<compile_context>
chip_gen: v7x
topology: tpu7x:2x2x1
jax: 0.10.0
libtpu: 0.0.40
codegen_flags: <defaults>
</compile_context>

<pallas_src>
import numpy as np
import jax
import jax.numpy as jnp
from jax.experimental import pallas as pl
from jax.experimental.pallas import tpu as pltpu

# ---------------------------------------------------------------------------
# Saturation-pressure table (temperature [C], pressure) -- same as the PyTorch code
# ---------------------------------------------------------------------------
_TEM_SAT_PRESS = np.array([
    [-62, 13.9], [-60, 15.9], [-58, 18.1], [-56, 20.5], [-54, 23.2], [-52, 26.2],
    [-50, 29.5], [-48, 33.1], [-46, 37.0], [-44, 41.3], [-42, 46.1], [-40, 51.2],
    [-38, 56.8], [-36, 62.9], [-34, 69.5], [-32, 76.7], [-30, 84.4], [-28, 92.7],
    [-26, 101.7], [-24, 111.3], [-22, 121.6], [-20, 132.7], [-18, 144.6],
    [-16, 157.3], [-14, 170.8], [-12, 185.2], [-10, 200.6], [-8, 216.9],
    [-6, 234.3], [-4, 252.7], [-2, 272.2], [0, 292.8], [2, 314.6], [4, 337.7],
    [6, 362.0], [8, 387.6], [10, 414.6], [12, 443.0], [14, 472.9], [16, 504.3],
    [18, 537.2], [20, 571.7], [22, 607.9], [24, 645.8], [26, 685.4], [28, 726.9],
    [30, 770.2], [32, 815.4], [34, 862.6], [36, 911.8], [38, 963.2], [40, 1016.6],
    [42, 1072.2], [44, 1130.1], [46, 1190.3], [48, 1252.9], [50, 1317.9],
    [52, 1385.4], [54, 1455.5], [56, 1528.2], [58, 1603.6], [60, 1681.8],
    [62, 1762.8], [64, 1846.7], [66, 1933.7], [68, 2023.7], [70, 2116.8],
    [72, 2213.2], [74, 2313.0], [76, 2416.1], [78, 2522.8], [80, 2633.2],
    [82, 2747.3], [84, 2865.3], [86, 2987.4], [88, 3113.6], [90, 3244.2],
    [92, 3379.3], [94, 3519.3], [96, 3664.5]], dtype=np.float64)

_T_ROWS = _TEM_SAT_PRESS.shape[0]                       # 79 entries, 78 intervals
_TEMP = _TEM_SAT_PRESS[:, 0]
_PRESS = _TEM_SAT_PRESS[:, 1]

# Per-interval slope/intercept precomputed host-side (f64, cast at use to f32):
#   temp_high(hp) = slope[idx] * hp + intercept[idx]
_SLOPES = ((_TEMP[1:] - _TEMP[:-1]) / (_PRESS[1:] - _PRESS[:-1]))          # (78,)
_ICEPTS = (_TEMP[:-1] - _SLOPES * _PRESS[:-1])                             # (78,)
_SLOPES = [float(v) for v in _SLOPES]
_ICEPTS = [float(v) for v in _ICEPTS]
# Comparison thresholds as exact float32 values (matches the torch f32 table).
_P_THRESH = [float(v) for v in _PRESS.astype(np.float32)]

LANES = 128
BLK_R = 128                       # sublane rows per grid step -> 16384 samples/step
SAMPLES_PER_STEP = BLK_R * LANES


# ---------------------------------------------------------------------------
# Pallas kernel (one (BLK_R, 128) lane-dense tile of samples per grid step)
# ---------------------------------------------------------------------------
def _com_out_temp_kernel(params_ref, air_ref, hp_ref, o_ref):
    # params_ref (SMEM, (4,) f32): [lamuda1, lamuda2, k_t, k_k]; k_t is dead code.
    lamuda1 = params_ref[0]
    lamuda2 = params_ref[1]
    k_k = params_ref[3]

    K0 = jnp.clip(lamuda1 / lamuda2, 0.0001, 1.0)
    K1 = jnp.clip(1.0 - k_k, 0.0001, 1.0)
    coef = (1.0 + K1) / (K0 + K1)            # scalar, hoisted out of the vector path

    hp = hp_ref[...]                         # (BLK_R, 128) f32
    air = air_ref[...] + 273.15              # (BLK_R, 128) f32

    # Piecewise-linear table lookup as an unrolled select chain:
    # interval idx = clip(#{k : press[k] < hp} - 1, 0, 77)  (== torch searchsorted left).
    slope = jnp.full(hp.shape, _SLOPES[0], dtype=jnp.float32)
    icept = jnp.full(hp.shape, _ICEPTS[0], dtype=jnp.float32)
    for k in range(1, _T_ROWS - 1):          # k = 1 .. 77
        m = hp > _P_THRESH[k]
        slope = jnp.where(m, _SLOPES[k], slope)
        icept = jnp.where(m, _ICEPTS[k], icept)

    temp_high = slope * hp + icept + 273.15  # saturation temperature [K]

    # out = C1 + C2 - 273.15 == air + (1 + K1) * (temp_high - air) / (K0 + K1) - 273.15
    o_ref[...] = air + coef * (temp_high - air) - 273.15


# ---------------------------------------------------------------------------
# Wrapper
# ---------------------------------------------------------------------------
def com_out_temp_forward(params_vec, x, hi_pressure, temp_p_h_5=None):
    """params_vec = [lamuda1, lamuda2, k_t, k_k] (float32, shape (4,))."""
    del temp_p_h_5  # unused by the reference forward
    n = x.shape[0]

    # Only column 0 is read by the model -> do not DMA the full feature matrix.
    air = x[:, 0].astype(jnp.float32).reshape(-1)
    hp = jnp.reshape(hi_pressure, (-1,)).astype(jnp.float32)

    # Pad batch to a whole number of lane-dense (BLK_R, 128) tiles.
    n_steps = max(1, pl.cdiv(n, SAMPLES_PER_STEP))
    n_pad = n_steps * SAMPLES_PER_STEP
    air_p = jnp.pad(air, (0, n_pad - n))
    hp_p = jnp.pad(hp, (0, n_pad - n))          # pad value 0 is safe (finite, discarded)
    rows = n_pad // LANES
    air2 = air_p.reshape(rows, LANES)
    hp2 = hp_p.reshape(rows, LANES)

    out = pl.pallas_call(
        _com_out_temp_kernel,
        out_shape=jax.ShapeDtypeStruct((rows, LANES), jnp.float32),
        grid=(n_steps,),
        in_specs=[
            pl.BlockSpec(memory_space=pltpu.MemorySpace.SMEM),       # params (whole, resident)
            pl.BlockSpec((BLK_R, LANES), lambda i: (i, 0)),          # air temp tile
            pl.BlockSpec((BLK_R, LANES), lambda i: (i, 0)),          # hi-pressure tile
        ],
        out_specs=pl.BlockSpec((BLK_R, LANES), lambda i: (i, 0)),
        compiler_params=pltpu.CompilerParams(
            dimension_semantics=("parallel",)),                      # 2-TC sharding on v7x
    )(params_vec.astype(jnp.float32), air2, hp2)

    # PyTorch result has shape (1, N) because K1 is a (1, 1) parameter.
    return out.reshape(-1)[:n].reshape(1, n)


# ---------------------------------------------------------------------------
# Pure-JAX reference (torch-faithful math, used for a sanity check)
# ---------------------------------------------------------------------------
def _reference(params_vec, x, hi_pressure):
    lamuda1, lamuda2, k_k = params_vec[0], params_vec[1], params_vec[3]
    table = jnp.asarray(_TEM_SAT_PRESS, dtype=jnp.float32)
    air = x[:, 0] + 273.15
    hp = jnp.reshape(hi_pressure, (-1,))
    idx = jnp.searchsorted(table[:, 1], hp, side="left") - 1
    idx = jnp.clip(idx, 0, _T_ROWS - 2)
    o1, o2 = table[idx, 0], table[idx + 1, 0]
    w1, w2 = table[idx, 1], table[idx + 1, 1]
    w = (hp - w1) / (w2 - w1)
    temp_high = w * (o2 - o1) + o1 + 273.15
    K0 = jnp.clip(lamuda1 / lamuda2, 0.0001, 1.0)
    K1 = jnp.clip(1.0 - k_k, 0.0001, 1.0)
    delta = temp_high - air
    C1 = delta / (K0 + K1)
    C2 = air + K1 * delta / (K0 + K1)
    out = C1 + C2 - 273.15
    return out[None, :]


if __name__ == "__main__":
    key = jax.random.PRNGKey(0)
    k1, k2, k3, k4 = jax.random.split(key, 4)

    # Deterministic "parameter init" (matches shapes in __init__)
    lamuda1 = jnp.float32(300.0)
    lamuda2 = jnp.float32(500.0)
    k_t = jax.random.normal(k1, (1, 1), jnp.float32)
    k_k = jax.random.normal(k2, (1, 1), jnp.float32)
    params_vec = jnp.array([lamuda1, lamuda2, k_t[0, 0], k_k[0, 0]],
                           dtype=jnp.float32)

    # Small synthetic inputs: batch=256, 10 features per sample (only col 0 used).
    N, F = 256, 10
    x = jax.random.uniform(k3, (N, F), jnp.float32, minval=-20.0, maxval=40.0)
    # Pressure range deliberately exceeds the table on both ends to exercise clipping.
    hi_pressure = jax.random.uniform(k4, (N,), jnp.float32,
                                     minval=5.0, maxval=4000.0)
    temp_p_h_5 = jnp.zeros((N,), jnp.float32)  # unused by forward

    out = com_out_temp_forward(params_vec, x, hi_pressure, temp_p_h_5)
    out = jax.block_until_ready(out)

    ref = _reference(params_vec, x, hi_pressure)
    np.testing.assert_allclose(np.asarray(out), np.asarray(ref),
                               rtol=1e-4, atol=2e-3)
    print("KERNEL_OK")
</pallas_src>

<mosaic_0001>
module attributes {stable_mosaic.version = 11 : i64} {
  func.func @_com_out_temp_kernel(%arg0: i32, %arg1: memref<4xf32, #tpu.memory_space<smem>>, %arg2: memref<128x128xf32, #tpu.memory_space<vmem>>, %arg3: memref<128x128xf32, #tpu.memory_space<vmem>>, %arg4: memref<128x128xf32, #tpu.memory_space<vmem>>) attributes {dimension_semantics = [#tpu.dimension_semantics<parallel>], iteration_bounds = array<i64: 1>, scalar_prefetch = 0 : i64, scratch_operands = 0 : i64, tpu.core_type = #tpu.core_type<tc>, window_params = [{transform_indices = @transform_0, window_bounds = array<i64: 4>}, {transform_indices = @transform_1, window_bounds = array<i64: 128, 128>}, {transform_indices = @transform_2, window_bounds = array<i64: 128, 128>}, {transform_indices = @transform_3, window_bounds = array<i64: 128, 128>}]} {
    %c0 = arith.constant 0 : index
    %0 = memref.load %arg1[%c0] : memref<4xf32, #tpu.memory_space<smem>>
    %c1 = arith.constant 1 : index
    %1 = memref.load %arg1[%c1] : memref<4xf32, #tpu.memory_space<smem>>
    %c3 = arith.constant 3 : index
    %2 = memref.load %arg1[%c3] : memref<4xf32, #tpu.memory_space<smem>>
    %3 = arith.divf %0, %1 : f32
    %cst = arith.constant 9.99999974E-5 : f32
    %cst_0 = arith.constant 1.000000e+00 : f32
    %4 = arith.maximumf %cst, %3 : f32
    %5 = arith.minimumf %cst_0, %4 : f32
    %cst_1 = arith.constant 1.000000e+00 : f32
    %6 = arith.subf %cst_1, %2 : f32
    %cst_2 = arith.constant 9.99999974E-5 : f32
    %cst_3 = arith.constant 1.000000e+00 : f32
    %7 = arith.maximumf %cst_2, %6 : f32
    %8 = arith.minimumf %cst_3, %7 : f32
    %cst_4 = arith.constant 1.000000e+00 : f32
    %9 = arith.addf %cst_4, %8 : f32
    %10 = arith.addf %5, %8 : f32
    %11 = arith.divf %9, %10 : f32
    %c0_5 = arith.constant 0 : index
    %c0_6 = arith.constant 0 : index
    %12 = vector.load %arg3[%c0_5, %c0_6] : memref<128x128xf32, #tpu.memory_space<vmem>>, vector<128x128xf32>
    %c0_7 = arith.constant 0 : index
    %c0_8 = arith.constant 0 : index
    %13 = vector.load %arg2[%c0_7, %c0_8] : memref<128x128xf32, #tpu.memory_space<vmem>>, vector<128x128xf32>
    %cst_9 = arith.constant 2.731500e+02 : f32
    %14 = vector.broadcast %cst_9 : f32 to vector<128x128xf32>
    %15 = arith.addf %13, %14 : vector<128x128xf32>
    %cst_10 = arith.constant 1.000000e+00 : f32
    %16 = vector.broadcast %cst_10 : f32 to vector<128x128xf32>
    %cst_11 = arith.constant -7.590000e+01 : f32
    %17 = vector.broadcast %cst_11 : f32 to vector<128x128xf32>
    %cst_12 = arith.constant 1.590000e+01 : f32
    %18 = vector.broadcast %cst_12 : f32 to vector<128x128xf32>
    %19 = arith.cmpf ogt, %12, %18 : vector<128x128xf32>
    %cst_13 = arith.constant 0.909090936 : f32
    %20 = vector.broadcast %cst_13 : f32 to vector<128x128xf32>
    %21 = arith.select %19, %20, %16 : vector<128x128xi1>, vector<128x128xf32>
    %cst_14 = arith.constant -74.454544 : f32
    %22 = vector.broadcast %cst_14 : f32 to vector<128x128xf32>
    %23 = arith.select %19, %22, %17 : vector<128x128xi1>, vector<128x128xf32>
    %cst_15 = arith.constant 1.810000e+01 : f32
    %24 = vector.broadcast %cst_15 : f32 to vector<128x128xf32>
    %25 = arith.cmpf ogt, %12, %24 : vector<128x128xf32>
    %cst_16 = arith.constant 0.833333313 : f32
    %26 = vector.broadcast %cst_16 : f32 to vector<128x128xf32>
    %27 = arith.select %25, %26, %21 : vector<128x128xi1>, vector<128x128xf32>
    %cst_17 = arith.constant -73.0833359 : f32
    %28 = vector.broadcast %cst_17 : f32 to vector<128x128xf32>
    %29 = arith.select %25, %28, %23 : vector<128x128xi1>, vector<128x128xf32>
    %cst_18 = arith.constant 2.050000e+01 : f32
    %30 = vector.broadcast %cst_18 : f32 to vector<128x128xf32>
    %31 = arith.cmpf ogt, %12, %30 : vector<128x128xf32>
    %cst_19 = arith.constant 0.740740716 : f32
    %32 = vector.broadcast %cst_19 : f32 to vector<128x128xf32>
    %33 = arith.select %31, %32, %27 : vector<128x128xi1>, vector<128x128xf32>
    %cst_20 = arith.constant -71.1851883 : f32
    %34 = vector.broadcast %cst_20 : f32 to vector<128x128xf32>
    %35 = arith.select %31, %34, %29 : vector<128x128xi1>, vector<128x128xf32>
    %cst_21 = arith.constant 2.320000e+01 : f32
    %36 = vector.broadcast %cst_21 : f32 to vector<128x128xf32>
    %37 = arith.cmpf ogt, %12, %36 : vector<128x128xf32>
    %cst_22 = arith.constant 0.666666686 : f32
    %38 = vector.broadcast %cst_22 : f32 to vector<128x128xf32>
    %39 = arith.select %37, %38, %33 : vector<128x128xi1>, vector<128x128xf32>
    %cst_23 = arith.constant -69.4666672 : f32
    %40 = vector.broadcast %cst_23 : f32 to vector<128x128xf32>
    %41 = arith.select %37, %40, %35 : vector<128x128xi1>, vector<128x128xf32>
    %cst_24 = arith.constant 2.620000e+01 : f32
    %42 = vector.broadcast %cst_24 : f32 to vector<128x128xf32>
    %43 = arith.cmpf ogt, %12, %42 : vector<128x128xf32>
    %cst_25 = arith.constant 0.606060624 : f32
    %44 = vector.broadcast %cst_25 : f32 to vector<128x128xf32>
    %45 = arith.select %43, %44, %39 : vector<128x128xi1>, vector<128x128xf32>
    %cst_26 = arith.constant -67.8787841 : f32
    %46 = vector.broadcast %cst_26 : f32 to vector<128x128xf32>
    %47 = arith.select %43, %46, %41 : vector<128x128xi1>, vector<128x128xf32>
    %cst_27 = arith.constant 2.950000e+01 : f32
    %48 = vector.broadcast %cst_27 : f32 to vector<128x128xf32>
    %49 = arith.cmpf ogt, %12, %48 : vector<128x128xf32>
    %cst_28 = arith.constant 0.555555582 : f32
    %50 = vector.broadcast %cst_28 : f32 to vector<128x128xf32>
    %51 = arith.select %49, %50, %45 : vector<128x128xi1>, vector<128x128xf32>
    %cst_29 = arith.constant -66.3888855 : f32
    %52 = vector.broadcast %cst_29 : f32 to vector<128x128xf32>
    %53 = arith.select %49, %52, %47 : vector<128x128xi1>, vector<128x128xf32>
    %cst_30 = arith.constant 3.310000e+01 : f32
    %54 = vector.broadcast %cst_30 : f32 to vector<128x128xf32>
    %55 = arith.cmpf ogt, %12, %54 : vector<128x128xf32>
    %cst_31 = arith.constant 0.512820542 : f32
    %56 = vector.broadcast %cst_31 : f32 to vector<128x128xf32>
    %57 = arith.select %55, %56, %51 : vector<128x128xi1>, vector<128x128xf32>
    %cst_32 = arith.constant -64.9743576 : f32
    %58 = vector.broadcast %cst_32 : f32 to vector<128x128xf32>
    %59 = arith.select %55, %58, %53 : vector<128x128xi1>, vector<128x128xf32>
    %cst_33 = arith.constant 3.700000e+01 : f32
    %60 = vector.broadcast %cst_33 : f32 to vector<128x128xf32>
    %61 = arith.cmpf ogt, %12, %60 : vector<128x128xf32>
    %cst_34 = arith.constant 0.465116292 : f32
    %62 = vector.broadcast %cst_34 : f32 to vector<128x128xf32>
    %63 = arith.select %61, %62, %57 : vector<128x128xi1>, vector<128x128xf32>
    %cst_35 = arith.constant -6.320930e+01 : f32
    %64 = vector.broadcast %cst_35 : f32 to vector<128x128xf32>
    %65 = arith.select %61, %64, %59 : vector<128x128xi1>, vector<128x128xf32>
    %cst_36 = arith.constant 4.130000e+01 : f32
    %66 = vector.broadcast %cst_36 : f32 to vector<128x128xf32>
    %67 = arith.cmpf ogt, %12, %66 : vector<128x128xf32>
    %cst_37 = arith.constant 0.416666657 : f32
    %68 = vector.broadcast %cst_37 : f32 to vector<128x128xf32>
    %69 = arith.select %67, %68, %63 : vector<128x128xi1>, vector<128x128xf32>
    %cst_38 = arith.constant -61.2083321 : f32
    %70 = vector.broadcast %cst_38 : f32 to vector<128x128xf32>
    %71 = arith.select %67, %70, %65 : vector<128x128xi1>, vector<128x128xf32>
    %cst_39 = arith.constant 4.610000e+01 : f32
    %72 = vector.broadcast %cst_39 : f32 to vector<128x128xf32>
    %73 = arith.cmpf ogt, %12, %72 : vector<128x128xf32>
    %cst_40 = arith.constant 0.392156869 : f32
    %74 = vector.broadcast %cst_40 : f32 to vector<128x128xf32>
    %75 = arith.select %73, %74, %69 : vector<128x128xi1>, vector<128x128xf32>
    %cst_41 = arith.constant -60.0784302 : f32
    %76 = vector.broadcast %cst_41 : f32 to vector<128x128xf32>
    %77 = arith.select %73, %76, %71 : vector<128x128xi1>, vector<128x128xf32>
    %cst_42 = arith.constant 5.120000e+01 : f32
    %78 = vector.broadcast %cst_42 : f32 to vector<128x128xf32>
    %79 = arith.cmpf ogt, %12, %78 : vector<128x128xf32>
    %cst_43 = arith.constant 0.357142866 : f32
    %80 = vector.broadcast %cst_43 : f32 to vector<128x128xf32>
    %81 = arith.select %79, %80, %75 : vector<128x128xi1>, vector<128x128xf32>
    %cst_44 = arith.constant -58.2857132 : f32
    %82 = vector.broadcast %cst_44 : f32 to vector<128x128xf32>
    %83 = arith.select %79, %82, %77 : vector<128x128xi1>, vector<128x128xf32>
    %cst_45 = arith.constant 5.680000e+01 : f32
    %84 = vector.broadcast %cst_45 : f32 to vector<128x128xf32>
    %85 = arith.cmpf ogt, %12, %84 : vector<128x128xf32>
    %cst_46 = arith.constant 0.327868849 : f32
    %86 = vector.broadcast %cst_46 : f32 to vector<128x128xf32>
    %87 = arith.select %85, %86, %81 : vector<128x128xi1>, vector<128x128xf32>
    %cst_47 = arith.constant -56.6229515 : f32
    %88 = vector.broadcast %cst_47 : f32 to vector<128x128xf32>
    %89 = arith.select %85, %88, %83 : vector<128x128xi1>, vector<128x128xf32>
    %cst_48 = arith.constant 6.290000e+01 : f32
    %90 = vector.broadcast %cst_48 : f32 to vector<128x128xf32>
    %91 = arith.cmpf ogt, %12, %90 : vector<128x128xf32>
    %cst_49 = arith.constant 0.303030312 : f32
    %92 = vector.broadcast %cst_49 : f32 to vector<128x128xf32>
    %93 = arith.select %91, %92, %87 : vector<128x128xi1>, vector<128x128xf32>
    %cst_50 = arith.constant -55.0606079 : f32
    %94 = vector.broadcast %cst_50 : f32 to vector<128x128xf32>
    %95 = arith.select %91, %94, %89 : vector<128x128xi1>, vector<128x128xf32>
    %cst_51 = arith.constant 6.950000e+01 : f32
    %96 = vector.broadcast %cst_51 : f32 to vector<128x128xf32>
    %97 = arith.cmpf ogt, %12, %96 : vector<128x128xf32>
    %cst_52 = arith.constant 0.277777791 : f32
    %98 = vector.broadcast %cst_52 : f32 to vector<128x128xf32>
    %99 = arith.select %97, %98, %93 : vector<128x128xi1>, vector<128x128xf32>
    %cst_53 = arith.constant -53.3055573 : f32
    %100 = vector.broadcast %cst_53 : f32 to vector<128x128xf32>
    %101 = arith.select %97, %100, %95 : vector<128x128xi1>, vector<128x128xf32>
    %cst_54 = arith.constant 76.6999969 : f32
    %102 = vector.broadcast %cst_54 : f32 to vector<128x128xf32>
    %103 = arith.cmpf ogt, %12, %102 : vector<128x128xf32>
    %cst_55 = arith.constant 0.259740263 : f32
    %104 = vector.broadcast %cst_55 : f32 to vector<128x128xf32>
    %105 = arith.select %103, %104, %99 : vector<128x128xi1>, vector<128x128xf32>
    %cst_56 = arith.constant -51.9220772 : f32
    %106 = vector.broadcast %cst_56 : f32 to vector<128x128xf32>
    %107 = arith.select %103, %106, %101 : vector<128x128xi1>, vector<128x128xf32>
    %cst_57 = arith.constant 8.440000e+01 : f32
    %108 = vector.broadcast %cst_57 : f32 to vector<128x128xf32>
    %109 = arith.cmpf ogt, %12, %108 : vector<128x128xf32>
    %cst_58 = arith.constant 0.240963861 : f32
    %110 = vector.broadcast %cst_58 : f32 to vector<128x128xf32>
    %111 = arith.select %109, %110, %105 : vector<128x128xi1>, vector<128x128xf32>
    %cst_59 = arith.constant -50.3373489 : f32
    %112 = vector.broadcast %cst_59 : f32 to vector<128x128xf32>
    %113 = arith.select %109, %112, %107 : vector<128x128xi1>, vector<128x128xf32>
    %cst_60 = arith.constant 92.6999969 : f32
    %114 = vector.broadcast %cst_60 : f32 to vector<128x128xf32>
    %115 = arith.cmpf ogt, %12, %114 : vector<128x128xf32>
    %cst_61 = arith.constant 0.222222224 : f32
    %116 = vector.broadcast %cst_61 : f32 to vector<128x128xf32>
    %117 = arith.select %115, %116, %111 : vector<128x128xi1>, vector<128x128xf32>
    %cst_62 = arith.constant -4.860000e+01 : f32
    %118 = vector.broadcast %cst_62 : f32 to vector<128x128xf32>
    %119 = arith.select %115, %118, %113 : vector<128x128xi1>, vector<128x128xf32>
    %cst_63 = arith.constant 1.017000e+02 : f32
    %120 = vector.broadcast %cst_63 : f32 to vector<128x128xf32>
    %121 = arith.cmpf ogt, %12, %120 : vector<128x128xf32>
    %cst_64 = arith.constant 0.208333328 : f32
    %122 = vector.broadcast %cst_64 : f32 to vector<128x128xf32>
    %123 = arith.select %121, %122, %117 : vector<128x128xi1>, vector<128x128xf32>
    %cst_65 = arith.constant -4.718750e+01 : f32
    %124 = vector.broadcast %cst_65 : f32 to vector<128x128xf32>
    %125 = arith.select %121, %124, %119 : vector<128x128xi1>, vector<128x128xf32>
    %cst_66 = arith.constant 1.113000e+02 : f32
    %126 = vector.broadcast %cst_66 : f32 to vector<128x128xf32>
    %127 = arith.cmpf ogt, %12, %126 : vector<128x128xf32>
    %cst_67 = arith.constant 0.194174752 : f32
    %128 = vector.broadcast %cst_67 : f32 to vector<128x128xf32>
    %129 = arith.select %127, %128, %123 : vector<128x128xi1>, vector<128x128xf32>
    %cst_68 = arith.constant -45.6116524 : f32
    %130 = vector.broadcast %cst_68 : f32 to vector<128x128xf32>
    %131 = arith.select %127, %130, %125 : vector<128x128xi1>, vector<128x128xf32>
    %cst_69 = arith.constant 1.216000e+02 : f32
    %132 = vector.broadcast %cst_69 : f32 to vector<128x128xf32>
    %133 = arith.cmpf ogt, %12, %132 : vector<128x128xf32>
    %cst_70 = arith.constant 0.180180177 : f32
    %134 = vector.broadcast %cst_70 : f32 to vector<128x128xf32>
    %135 = arith.select %133, %134, %129 : vector<128x128xi1>, vector<128x128xf32>
    %cst_71 = arith.constant -43.9099083 : f32
    %136 = vector.broadcast %cst_71 : f32 to vector<128x128xf32>
    %137 = arith.select %133, %136, %131 : vector<128x128xi1>, vector<128x128xf32>
    %cst_72 = arith.constant 1.327000e+02 : f32
    %138 = vector.broadcast %cst_72 : f32 to vector<128x128xf32>
    %139 = arith.cmpf ogt, %12, %138 : vector<128x128xf32>
    %cst_73 = arith.constant 0.168067232 : f32
    %140 = vector.broadcast %cst_73 : f32 to vector<128x128xf32>
    %141 = arith.select %139, %140, %135 : vector<128x128xi1>, vector<128x128xf32>
    %cst_74 = arith.constant -42.3025208 : f32
    %142 = vector.broadcast %cst_74 : f32 to vector<128x128xf32>
    %143 = arith.select %139, %142, %137 : vector<128x128xi1>, vector<128x128xf32>
    %cst_75 = arith.constant 1.446000e+02 : f32
    %144 = vector.broadcast %cst_75 : f32 to vector<128x128xf32>
    %145 = arith.cmpf ogt, %12, %144 : vector<128x128xf32>
    %cst_76 = arith.constant 0.157480314 : f32
    %146 = vector.broadcast %cst_76 : f32 to vector<128x128xf32>
    %147 = arith.select %145, %146, %141 : vector<128x128xi1>, vector<128x128xf32>
    %cst_77 = arith.constant -40.7716522 : f32
    %148 = vector.broadcast %cst_77 : f32 to vector<128x128xf32>
    %149 = arith.select %145, %148, %143 : vector<128x128xi1>, vector<128x128xf32>
    %cst_78 = arith.constant 1.573000e+02 : f32
    %150 = vector.broadcast %cst_78 : f32 to vector<128x128xf32>
    %151 = arith.cmpf ogt, %12, %150 : vector<128x128xf32>
    %cst_79 = arith.constant 0.148148149 : f32
    %152 = vector.broadcast %cst_79 : f32 to vector<128x128xf32>
    %153 = arith.select %151, %152, %147 : vector<128x128xi1>, vector<128x128xf32>
    %cst_80 = arith.constant -39.3037033 : f32
    %154 = vector.broadcast %cst_80 : f32 to vector<128x128xf32>
    %155 = arith.select %151, %154, %149 : vector<128x128xi1>, vector<128x128xf32>
    %cst_81 = arith.constant 1.708000e+02 : f32
    %156 = vector.broadcast %cst_81 : f32 to vector<128x128xf32>
    %157 = arith.cmpf ogt, %12, %156 : vector<128x128xf32>
    %cst_82 = arith.constant 0.138888896 : f32
    %158 = vector.broadcast %cst_82 : f32 to vector<128x128xf32>
    %159 = arith.select %157, %158, %153 : vector<128x128xi1>, vector<128x128xf32>
    %cst_83 = arith.constant -37.7222214 : f32
    %160 = vector.broadcast %cst_83 : f32 to vector<128x128xf32>
    %161 = arith.select %157, %160, %155 : vector<128x128xi1>, vector<128x128xf32>
    %cst_84 = arith.constant 1.852000e+02 : f32
    %162 = vector.broadcast %cst_84 : f32 to vector<128x128xf32>
    %163 = arith.cmpf ogt, %12, %162 : vector<128x128xf32>
    %cst_85 = arith.constant 0.129870132 : f32
    %164 = vector.broadcast %cst_85 : f32 to vector<128x128xf32>
    %165 = arith.select %163, %164, %159 : vector<128x128xi1>, vector<128x128xf32>
    %cst_86 = arith.constant -36.0519485 : f32
    %166 = vector.broadcast %cst_86 : f32 to vector<128x128xf32>
    %167 = arith.select %163, %166, %161 : vector<128x128xi1>, vector<128x128xf32>
    %cst_87 = arith.constant 2.006000e+02 : f32
    %168 = vector.broadcast %cst_87 : f32 to vector<128x128xf32>
    %169 = arith.cmpf ogt, %12, %168 : vector<128x128xf32>
    %cst_88 = arith.constant 0.122699387 : f32
    %170 = vector.broadcast %cst_88 : f32 to vector<128x128xf32>
    %171 = arith.select %169, %170, %165 : vector<128x128xi1>, vector<128x128xf32>
    %cst_89 = arith.constant -3.461350e+01 : f32
    %172 = vector.broadcast %cst_89 : f32 to vector<128x128xf32>
    %173 = arith.select %169, %172, %167 : vector<128x128xi1>, vector<128x128xf32>
    %cst_90 = arith.constant 2.169000e+02 : f32
    %174 = vector.broadcast %cst_90 : f32 to vector<128x128xf32>
    %175 = arith.cmpf ogt, %12, %174 : vector<128x128xf32>
    %cst_91 = arith.constant 0.114942528 : f32
    %176 = vector.broadcast %cst_91 : f32 to vector<128x128xf32>
    %177 = arith.select %175, %176, %171 : vector<128x128xi1>, vector<128x128xf32>
    %cst_92 = arith.constant -32.9310341 : f32
    %178 = vector.broadcast %cst_92 : f32 to vector<128x128xf32>
    %179 = arith.select %175, %178, %173 : vector<128x128xi1>, vector<128x128xf32>
    %cst_93 = arith.constant 2.343000e+02 : f32
    %180 = vector.broadcast %cst_93 : f32 to vector<128x128xf32>
    %181 = arith.cmpf ogt, %12, %180 : vector<128x128xf32>
    %cst_94 = arith.constant 0.108695649 : f32
    %182 = vector.broadcast %cst_94 : f32 to vector<128x128xf32>
    %183 = arith.select %181, %182, %177 : vector<128x128xi1>, vector<128x128xf32>
    %cst_95 = arith.constant -31.467392 : f32
    %184 = vector.broadcast %cst_95 : f32 to vector<128x128xf32>
    %185 = arith.select %181, %184, %179 : vector<128x128xi1>, vector<128x128xf32>
    %cst_96 = arith.constant 2.527000e+02 : f32
    %186 = vector.broadcast %cst_96 : f32 to vector<128x128xf32>
    %187 = arith.cmpf ogt, %12, %186 : vector<128x128xf32>
    %cst_97 = arith.constant 0.102564104 : f32
    %188 = vector.broadcast %cst_97 : f32 to vector<128x128xf32>
    %189 = arith.select %187, %188, %183 : vector<128x128xi1>, vector<128x128xf32>
    %cst_98 = arith.constant -29.9179478 : f32
    %190 = vector.broadcast %cst_98 : f32 to vector<128x128xf32>
    %191 = arith.select %187, %190, %185 : vector<128x128xi1>, vector<128x128xf32>
    %cst_99 = arith.constant 2.722000e+02 : f32
    %192 = vector.broadcast %cst_99 : f32 to vector<128x128xf32>
    %193 = arith.cmpf ogt, %12, %192 : vector<128x128xf32>
    %cst_100 = arith.constant 0.0970873758 : f32
    %194 = vector.broadcast %cst_100 : f32 to vector<128x128xf32>
    %195 = arith.select %193, %194, %189 : vector<128x128xi1>, vector<128x128xf32>
    %cst_101 = arith.constant -28.4271851 : f32
    %196 = vector.broadcast %cst_101 : f32 to vector<128x128xf32>
    %197 = arith.select %193, %196, %191 : vector<128x128xi1>, vector<128x128xf32>
    %cst_102 = arith.constant 2.928000e+02 : f32
    %198 = vector.broadcast %cst_102 : f32 to vector<128x128xf32>
    %199 = arith.cmpf ogt, %12, %198 : vector<128x128xf32>
    %cst_103 = arith.constant 0.091743119 : f32
    %200 = vector.broadcast %cst_103 : f32 to vector<128x128xf32>
    %201 = arith.select %199, %200, %195 : vector<128x128xi1>, vector<128x128xf32>
    %cst_104 = arith.constant -26.8623848 : f32
    %202 = vector.broadcast %cst_104 : f32 to vector<128x128xf32>
    %203 = arith.select %199, %202, %197 : vector<128x128xi1>, vector<128x128xf32>
    %cst_105 = arith.constant 3.146000e+02 : f32
    %204 = vector.broadcast %cst_105 : f32 to vector<128x128xf32>
    %205 = arith.cmpf ogt, %12, %204 : vector<128x128xf32>
    %cst_106 = arith.constant 0.0865800902 : f32
    %206 = vector.broadcast %cst_106 : f32 to vector<128x128xf32>
    %207 = arith.select %205, %206, %201 : vector<128x128xi1>, vector<128x128xf32>
    %cst_107 = arith.constant -25.2380943 : f32
    %208 = vector.broadcast %cst_107 : f32 to vector<128x128xf32>
    %209 = arith.select %205, %208, %203 : vector<128x128xi1>, vector<128x128xf32>
    %cst_108 = arith.constant 3.377000e+02 : f32
    %210 = vector.broadcast %cst_108 : f32 to vector<128x128xf32>
    %211 = arith.cmpf ogt, %12, %210 : vector<128x128xf32>
    %cst_109 = arith.constant 0.0823045298 : f32
    %212 = vector.broadcast %cst_109 : f32 to vector<128x128xf32>
    %213 = arith.select %211, %212, %207 : vector<128x128xi1>, vector<128x128xf32>
    %cst_110 = arith.constant -23.794239 : f32
    %214 = vector.broadcast %cst_110 : f32 to vector<128x128xf32>
    %215 = arith.select %211, %214, %209 : vector<128x128xi1>, vector<128x128xf32>
    %cst_111 = arith.constant 3.620000e+02 : f32
    %216 = vector.broadcast %cst_111 : f32 to vector<128x128xf32>
    %217 = arith.cmpf ogt, %12, %216 : vector<128x128xf32>
    %cst_112 = arith.constant 7.812500e-02 : f32
    %218 = vector.broadcast %cst_112 : f32 to vector<128x128xf32>
    %219 = arith.select %217, %218, %213 : vector<128x128xi1>, vector<128x128xf32>
    %cst_113 = arith.constant -22.28125 : f32
    %220 = vector.broadcast %cst_113 : f32 to vector<128x128xf32>
    %221 = arith.select %217, %220, %215 : vector<128x128xi1>, vector<128x128xf32>
    %cst_114 = arith.constant 3.876000e+02 : f32
    %222 = vector.broadcast %cst_114 : f32 to vector<128x128xf32>
    %223 = arith.cmpf ogt, %12, %222 : vector<128x128xf32>
    %cst_115 = arith.constant 0.0740740746 : f32
    %224 = vector.broadcast %cst_115 : f32 to vector<128x128xf32>
    %225 = arith.select %223, %224, %219 : vector<128x128xi1>, vector<128x128xf32>
    %cst_116 = arith.constant -20.7111111 : f32
    %226 = vector.broadcast %cst_116 : f32 to vector<128x128xf32>
    %227 = arith.select %223, %226, %221 : vector<128x128xi1>, vector<128x128xf32>
    %cst_117 = arith.constant 4.146000e+02 : f32
    %228 = vector.broadcast %cst_117 : f32 to vector<128x128xf32>
    %229 = arith.cmpf ogt, %12, %228 : vector<128x128xf32>
    %cst_118 = arith.constant 0.0704225376 : f32
    %230 = vector.broadcast %cst_118 : f32 to vector<128x128xf32>
    %231 = arith.select %229, %230, %225 : vector<128x128xi1>, vector<128x128xf32>
    %cst_119 = arith.constant -19.1971836 : f32
    %232 = vector.broadcast %cst_119 : f32 to vector<128x128xf32>
    %233 = arith.select %229, %232, %227 : vector<128x128xi1>, vector<128x128xf32>
    %cst_120 = arith.constant 4.430000e+02 : f32
    %234 = vector.broadcast %cst_120 : f32 to vector<128x128xf32>
    %235 = arith.cmpf ogt, %12, %234 : vector<128x128xf32>
    %cst_121 = arith.constant 0.0668896288 : f32
    %236 = vector.broadcast %cst_121 : f32 to vector<128x128xf32>
    %237 = arith.select %235, %236, %231 : vector<128x128xi1>, vector<128x128xf32>
    %cst_122 = arith.constant -17.6321068 : f32
    %238 = vector.broadcast %cst_122 : f32 to vector<128x128xf32>
    %239 = arith.select %235, %238, %233 : vector<128x128xi1>, vector<128x128xf32>
    %cst_123 = arith.constant 4.729000e+02 : f32
    %240 = vector.broadcast %cst_123 : f32 to vector<128x128xf32>
    %241 = arith.cmpf ogt, %12, %240 : vector<128x128xf32>
    %cst_124 = arith.constant 0.0636942684 : f32
    %242 = vector.broadcast %cst_124 : f32 to vector<128x128xf32>
    %243 = arith.select %241, %242, %237 : vector<128x128xi1>, vector<128x128xf32>
    %cst_125 = arith.constant -16.1210194 : f32
    %244 = vector.broadcast %cst_125 : f32 to vector<128x128xf32>
    %245 = arith.select %241, %244, %239 : vector<128x128xi1>, vector<128x128xf32>
    %cst_126 = arith.constant 5.043000e+02 : f32
    %246 = vector.broadcast %cst_126 : f32 to vector<128x128xf32>
    %247 = arith.cmpf ogt, %12, %246 : vector<128x128xf32>
    %cst_127 = arith.constant 0.0607902743 : f32
    %248 = vector.broadcast %cst_127 : f32 to vector<128x128xf32>
    %249 = arith.select %247, %248, %243 : vector<128x128xi1>, vector<128x128xf32>
    %cst_128 = arith.constant -14.6565351 : f32
    %250 = vector.broadcast %cst_128 : f32 to vector<128x128xf32>
    %251 = arith.select %247, %250, %245 : vector<128x128xi1>, vector<128x128xf32>
    %cst_129 = arith.constant 5.372000e+02 : f32
    %252 = vector.broadcast %cst_129 : f32 to vector<128x128xf32>
    %253 = arith.cmpf ogt, %12, %252 : vector<128x128xf32>
    %cst_130 = arith.constant 0.0579710156 : f32
    %254 = vector.broadcast %cst_130 : f32 to vector<128x128xf32>
    %255 = arith.select %253, %254, %249 : vector<128x128xi1>, vector<128x128xf32>
    %cst_131 = arith.constant -13.1420288 : f32
    %256 = vector.broadcast %cst_131 : f32 to vector<128x128xf32>
    %257 = arith.select %253, %256, %251 : vector<128x128xi1>, vector<128x128xf32>
    %cst_132 = arith.constant 5.717000e+02 : f32
    %258 = vector.broadcast %cst_132 : f32 to vector<128x128xf32>
    %259 = arith.cmpf ogt, %12, %258 : vector<128x128xf32>
    %cst_133 = arith.constant 0.0552486181 : f32
    %260 = vector.broadcast %cst_133 : f32 to vector<128x128xf32>
    %261 = arith.select %259, %260, %255 : vector<128x128xi1>, vector<128x128xf32>
    %cst_134 = arith.constant -11.5856352 : f32
    %262 = vector.broadcast %cst_134 : f32 to vector<128x128xf32>
    %263 = arith.select %259, %262, %257 : vector<128x128xi1>, vector<128x128xf32>
    %cst_135 = arith.constant 6.079000e+02 : f32
    %264 = vector.broadcast %cst_135 : f32 to vector<128x128xf32>
    %265 = arith.cmpf ogt, %12, %264 : vector<128x128xf32>
    %cst_136 = arith.constant 0.052770447 : f32
    %266 = vector.broadcast %cst_136 : f32 to vector<128x128xf32>
    %267 = arith.select %265, %266, %261 : vector<128x128xi1>, vector<128x128xf32>
    %cst_137 = arith.constant -10.0791559 : f32
    %268 = vector.broadcast %cst_137 : f32 to vector<128x128xf32>
    %269 = arith.select %265, %268, %263 : vector<128x128xi1>, vector<128x128xf32>
    %cst_138 = arith.constant 6.458000e+02 : f32
    %270 = vector.broadcast %cst_138 : f32 to vector<128x128xf32>
    %271 = arith.cmpf ogt, %12, %270 : vector<128x128xf32>
    %cst_139 = arith.constant 0.0505050495 : f32
    %272 = vector.broadcast %cst_139 : f32 to vector<128x128xf32>
    %273 = arith.select %271, %272, %267 : vector<128x128xi1>, vector<128x128xf32>
    %cst_140 = arith.constant -8.61616135 : f32
    %274 = vector.broadcast %cst_140 : f32 to vector<128x128xf32>
    %275 = arith.select %271, %274, %269 : vector<128x128xi1>, vector<128x128xf32>
    %cst_141 = arith.constant 6.854000e+02 : f32
    %276 = vector.broadcast %cst_141 : f32 to vector<128x128xf32>
    %277 = arith.cmpf ogt, %12, %276 : vector<128x128xf32>
    %cst_142 = arith.constant 0.0481927693 : f32
    %278 = vector.broadcast %cst_142 : f32 to vector<128x128xf32>
    %279 = arith.select %277, %278, %273 : vector<128x128xi1>, vector<128x128xf32>
    %cst_143 = arith.constant -7.03132534 : f32
    %280 = vector.broadcast %cst_143 : f32 to vector<128x128xf32>
    %281 = arith.select %277, %280, %275 : vector<128x128xi1>, vector<128x128xf32>
    %cst_144 = arith.constant 7.269000e+02 : f32
    %282 = vector.broadcast %cst_144 : f32 to vector<128x128xf32>
    %283 = arith.cmpf ogt, %12, %282 : vector<128x128xf32>
    %cst_145 = arith.constant 0.0461893752 : f32
    %284 = vector.broadcast %cst_145 : f32 to vector<128x128xf32>
    %285 = arith.select %283, %284, %279 : vector<128x128xi1>, vector<128x128xf32>
    %cst_146 = arith.constant -5.57505751 : f32
    %286 = vector.broadcast %cst_146 : f32 to vector<128x128xf32>
    %287 = arith.select %283, %286, %281 : vector<128x128xi1>, vector<128x128xf32>
    %cst_147 = arith.constant 7.702000e+02 : f32
    %288 = vector.broadcast %cst_147 : f32 to vector<128x128xf32>
    %289 = arith.cmpf ogt, %12, %288 : vector<128x128xf32>
    %cst_148 = arith.constant 0.0442477874 : f32
    %290 = vector.broadcast %cst_148 : f32 to vector<128x128xf32>
    %291 = arith.select %289, %290, %285 : vector<128x128xi1>, vector<128x128xf32>
    %cst_149 = arith.constant -4.07964611 : f32
    %292 = vector.broadcast %cst_149 : f32 to vector<128x128xf32>
    %293 = arith.select %289, %292, %287 : vector<128x128xi1>, vector<128x128xf32>
    %cst_150 = arith.constant 8.154000e+02 : f32
    %294 = vector.broadcast %cst_150 : f32 to vector<128x128xf32>
    %295 = arith.cmpf ogt, %12, %294 : vector<128x128xf32>
    %cst_151 = arith.constant 0.0423728824 : f32
    %296 = vector.broadcast %cst_151 : f32 to vector<128x128xf32>
    %297 = arith.select %295, %296, %291 : vector<128x128xi1>, vector<128x128xf32>
    %cst_152 = arith.constant -2.55084753 : f32
    %298 = vector.broadcast %cst_152 : f32 to vector<128x128xf32>
    %299 = arith.select %295, %298, %293 : vector<128x128xi1>, vector<128x128xf32>
    %cst_153 = arith.constant 8.626000e+02 : f32
    %300 = vector.broadcast %cst_153 : f32 to vector<128x128xf32>
    %301 = arith.cmpf ogt, %12, %300 : vector<128x128xf32>
    %cst_154 = arith.constant 0.040650405 : f32
    %302 = vector.broadcast %cst_154 : f32 to vector<128x128xf32>
    %303 = arith.select %301, %302, %297 : vector<128x128xi1>, vector<128x128xf32>
    %cst_155 = arith.constant -1.06504071 : f32
    %304 = vector.broadcast %cst_155 : f32 to vector<128x128xf32>
    %305 = arith.select %301, %304, %299 : vector<128x128xi1>, vector<128x128xf32>
    %cst_156 = arith.constant 911.799987 : f32
    %306 = vector.broadcast %cst_156 : f32 to vector<128x128xf32>
    %307 = arith.cmpf ogt, %12, %306 : vector<128x128xf32>
    %cst_157 = arith.constant 0.0389105044 : f32
    %308 = vector.broadcast %cst_157 : f32 to vector<128x128xf32>
    %309 = arith.select %307, %308, %303 : vector<128x128xi1>, vector<128x128xf32>
    %cst_158 = arith.constant 0.52140075 : f32
    %310 = vector.broadcast %cst_158 : f32 to vector<128x128xf32>
    %311 = arith.select %307, %310, %305 : vector<128x128xi1>, vector<128x128xf32>
    %cst_159 = arith.constant 9.632000e+02 : f32
    %312 = vector.broadcast %cst_159 : f32 to vector<128x128xf32>
    %313 = arith.cmpf ogt, %12, %312 : vector<128x128xf32>
    %cst_160 = arith.constant 0.037453182 : f32
    %314 = vector.broadcast %cst_160 : f32 to vector<128x128xf32>
    %315 = arith.select %313, %314, %309 : vector<128x128xi1>, vector<128x128xf32>
    %cst_161 = arith.constant 1.92509365 : f32
    %316 = vector.broadcast %cst_161 : f32 to vector<128x128xf32>
    %317 = arith.select %313, %316, %311 : vector<128x128xi1>, vector<128x128xf32>
    %cst_162 = arith.constant 1.016600e+03 : f32
    %318 = vector.broadcast %cst_162 : f32 to vector<128x128xf32>
    %319 = arith.cmpf ogt, %12, %318 : vector<128x128xf32>
    %cst_163 = arith.constant 0.0359712243 : f32
    %320 = vector.broadcast %cst_163 : f32 to vector<128x128xf32>
    %321 = arith.select %319, %320, %315 : vector<128x128xi1>, vector<128x128xf32>
    %cst_164 = arith.constant 3.43165469 : f32
    %322 = vector.broadcast %cst_164 : f32 to vector<128x128xf32>
    %323 = arith.select %319, %322, %317 : vector<128x128xi1>, vector<128x128xf32>
    %cst_165 = arith.constant 1.072200e+03 : f32
    %324 = vector.broadcast %cst_165 : f32 to vector<128x128xf32>
    %325 = arith.cmpf ogt, %12, %324 : vector<128x128xf32>
    %cst_166 = arith.constant 0.0345423147 : f32
    %326 = vector.broadcast %cst_166 : f32 to vector<128x128xf32>
    %327 = arith.select %325, %326, %321 : vector<128x128xi1>, vector<128x128xf32>
    %cst_167 = arith.constant 4.96373034 : f32
    %328 = vector.broadcast %cst_167 : f32 to vector<128x128xf32>
    %329 = arith.select %325, %328, %323 : vector<128x128xi1>, vector<128x128xf32>
    %cst_168 = arith.constant 1.130100e+03 : f32
    %330 = vector.broadcast %cst_168 : f32 to vector<128x128xf32>
    %331 = arith.cmpf ogt, %12, %330 : vector<128x128xf32>
    %cst_169 = arith.constant 0.0332225896 : f32
    %332 = vector.broadcast %cst_169 : f32 to vector<128x128xf32>
    %333 = arith.select %331, %332, %327 : vector<128x128xi1>, vector<128x128xf32>
    %cst_170 = arith.constant 6.45514965 : f32
    %334 = vector.broadcast %cst_170 : f32 to vector<128x128xf32>
    %335 = arith.select %331, %334, %329 : vector<128x128xi1>, vector<128x128xf32>
    %cst_171 = arith.constant 1.190300e+03 : f32
    %336 = vector.broadcast %cst_171 : f32 to vector<128x128xf32>
    %337 = arith.cmpf ogt, %12, %336 : vector<128x128xf32>
    %cst_172 = arith.constant 0.0319488831 : f32
    %338 = vector.broadcast %cst_172 : f32 to vector<128x128xf32>
    %339 = arith.select %337, %338, %333 : vector<128x128xi1>, vector<128x128xf32>
    %cst_173 = arith.constant 7.97124624 : f32
    %340 = vector.broadcast %cst_173 : f32 to vector<128x128xf32>
    %341 = arith.select %337, %340, %335 : vector<128x128xi1>, vector<128x128xf32>
    %cst_174 = arith.constant 1.252900e+03 : f32
    %342 = vector.broadcast %cst_174 : f32 to vector<128x128xf32>
    %343 = arith.cmpf ogt, %12, %342 : vector<128x128xf32>
    %cst_175 = arith.constant 0.0307692308 : f32
    %344 = vector.broadcast %cst_175 : f32 to vector<128x128xf32>
    %345 = arith.select %343, %344, %339 : vector<128x128xi1>, vector<128x128xf32>
    %cst_176 = arith.constant 9.44923114 : f32
    %346 = vector.broadcast %cst_176 : f32 to vector<128x128xf32>
    %347 = arith.select %343, %346, %341 : vector<128x128xi1>, vector<128x128xf32>
    %cst_177 = arith.constant 1.317900e+03 : f32
    %348 = vector.broadcast %cst_177 : f32 to vector<128x128xf32>
    %349 = arith.cmpf ogt, %12, %348 : vector<128x128xf32>
    %cst_178 = arith.constant 0.0296296291 : f32
    %350 = vector.broadcast %cst_178 : f32 to vector<128x128xf32>
    %351 = arith.select %349, %350, %345 : vector<128x128xi1>, vector<128x128xf32>
    %cst_179 = arith.constant 10.9511108 : f32
    %352 = vector.broadcast %cst_179 : f32 to vector<128x128xf32>
    %353 = arith.select %349, %352, %347 : vector<128x128xi1>, vector<128x128xf32>
    %cst_180 = arith.constant 1.385400e+03 : f32
    %354 = vector.broadcast %cst_180 : f32 to vector<128x128xf32>
    %355 = arith.cmpf ogt, %12, %354 : vector<128x128xf32>
    %cst_181 = arith.constant 0.0285306703 : f32
    %356 = vector.broadcast %cst_181 : f32 to vector<128x128xf32>
    %357 = arith.select %355, %356, %351 : vector<128x128xi1>, vector<128x128xf32>
    %cst_182 = arith.constant 12.473609 : f32
    %358 = vector.broadcast %cst_182 : f32 to vector<128x128xf32>
    %359 = arith.select %355, %358, %353 : vector<128x128xi1>, vector<128x128xf32>
    %cst_183 = arith.constant 1.455500e+03 : f32
    %360 = vector.broadcast %cst_183 : f32 to vector<128x128xf32>
    %361 = arith.cmpf ogt, %12, %360 : vector<128x128xf32>
    %cst_184 = arith.constant 0.027510317 : f32
    %362 = vector.broadcast %cst_184 : f32 to vector<128x128xf32>
    %363 = arith.select %361, %362, %357 : vector<128x128xi1>, vector<128x128xf32>
    %cst_185 = arith.constant 13.9587345 : f32
    %364 = vector.broadcast %cst_185 : f32 to vector<128x128xf32>
    %365 = arith.select %361, %364, %359 : vector<128x128xi1>, vector<128x128xf32>
    %cst_186 = arith.constant 1.528200e+03 : f32
    %366 = vector.broadcast %cst_186 : f32 to vector<128x128xf32>
    %367 = arith.cmpf ogt, %12, %366 : vector<128x128xf32>
    %cst_187 = arith.constant 2.652520e-02 : f32
    %368 = vector.broadcast %cst_187 : f32 to vector<128x128xf32>
    %369 = arith.select %367, %368, %363 : vector<128x128xi1>, vector<128x128xf32>
    %cst_188 = arith.constant 15.4641914 : f32
    %370 = vector.broadcast %cst_188 : f32 to vector<128x128xf32>
    %371 = arith.select %367, %370, %365 : vector<128x128xi1>, vector<128x128xf32>
    %cst_189 = arith.constant 1.603600e+03 : f32
    %372 = vector.broadcast %cst_189 : f32 to vector<128x128xf32>
    %373 = arith.cmpf ogt, %12, %372 : vector<128x128xf32>
    %cst_190 = arith.constant 0.0255754478 : f32
    %374 = vector.broadcast %cst_190 : f32 to vector<128x128xf32>
    %375 = arith.select %373, %374, %369 : vector<128x128xi1>, vector<128x128xf32>
    %cst_191 = arith.constant 16.9872131 : f32
    %376 = vector.broadcast %cst_191 : f32 to vector<128x128xf32>
    %377 = arith.select %373, %376, %371 : vector<128x128xi1>, vector<128x128xf32>
    %cst_192 = arith.constant 1.681800e+03 : f32
    %378 = vector.broadcast %cst_192 : f32 to vector<128x128xf32>
    %379 = arith.cmpf ogt, %12, %378 : vector<128x128xf32>
    %cst_193 = arith.constant 0.0246913582 : f32
    %380 = vector.broadcast %cst_193 : f32 to vector<128x128xf32>
    %381 = arith.select %379, %380, %375 : vector<128x128xi1>, vector<128x128xf32>
    %cst_194 = arith.constant 18.4740734 : f32
    %382 = vector.broadcast %cst_194 : f32 to vector<128x128xf32>
    %383 = arith.select %379, %382, %377 : vector<128x128xi1>, vector<128x128xf32>
    %cst_195 = arith.constant 1.762800e+03 : f32
    %384 = vector.broadcast %cst_195 : f32 to vector<128x128xf32>
    %385 = arith.cmpf ogt, %12, %384 : vector<128x128xf32>
    %cst_196 = arith.constant 0.0238379017 : f32
    %386 = vector.broadcast %cst_196 : f32 to vector<128x128xf32>
    %387 = arith.select %385, %386, %381 : vector<128x128xi1>, vector<128x128xf32>
    %cst_197 = arith.constant 19.9785461 : f32
    %388 = vector.broadcast %cst_197 : f32 to vector<128x128xf32>
    %389 = arith.select %385, %388, %383 : vector<128x128xi1>, vector<128x128xf32>
    %cst_198 = arith.constant 1.846700e+03 : f32
    %390 = vector.broadcast %cst_198 : f32 to vector<128x128xf32>
    %391 = arith.cmpf ogt, %12, %390 : vector<128x128xf32>
    %cst_199 = arith.constant 0.0229885057 : f32
    %392 = vector.broadcast %cst_199 : f32 to vector<128x128xf32>
    %393 = arith.select %391, %392, %387 : vector<128x128xi1>, vector<128x128xf32>
    %cst_200 = arith.constant 21.5471268 : f32
    %394 = vector.broadcast %cst_200 : f32 to vector<128x128xf32>
    %395 = arith.select %391, %394, %389 : vector<128x128xi1>, vector<128x128xf32>
    %cst_201 = arith.constant 1.933700e+03 : f32
    %396 = vector.broadcast %cst_201 : f32 to vector<128x128xf32>
    %397 = arith.cmpf ogt, %12, %396 : vector<128x128xf32>
    %cst_202 = arith.constant 0.0222222228 : f32
    %398 = vector.broadcast %cst_202 : f32 to vector<128x128xf32>
    %399 = arith.select %397, %398, %393 : vector<128x128xi1>, vector<128x128xf32>
    %cst_203 = arith.constant 23.0288887 : f32
    %400 = vector.broadcast %cst_203 : f32 to vector<128x128xf32>
    %401 = arith.select %397, %400, %395 : vector<128x128xi1>, vector<128x128xf32>
    %cst_204 = arith.constant 2.023700e+03 : f32
    %402 = vector.broadcast %cst_204 : f32 to vector<128x128xf32>
    %403 = arith.cmpf ogt, %12, %402 : vector<128x128xf32>
    %cst_205 = arith.constant 0.0214822777 : f32
    %404 = vector.broadcast %cst_205 : f32 to vector<128x128xf32>
    %405 = arith.select %403, %404, %399 : vector<128x128xi1>, vector<128x128xf32>
    %cst_206 = arith.constant 24.5263157 : f32
    %406 = vector.broadcast %cst_206 : f32 to vector<128x128xf32>
    %407 = arith.select %403, %406, %401 : vector<128x128xi1>, vector<128x128xf32>
    %cst_207 = arith.constant 2.116800e+03 : f32
    %408 = vector.broadcast %cst_207 : f32 to vector<128x128xf32>
    %409 = arith.cmpf ogt, %12, %408 : vector<128x128xf32>
    %cst_208 = arith.constant 0.0207468886 : f32
    %410 = vector.broadcast %cst_208 : f32 to vector<128x128xf32>
    %411 = arith.select %409, %410, %405 : vector<128x128xi1>, vector<128x128xf32>
    %cst_209 = arith.constant 26.0829868 : f32
    %412 = vector.broadcast %cst_209 : f32 to vector<128x128xf32>
    %413 = arith.select %409, %412, %407 : vector<128x128xi1>, vector<128x128xf32>
    %cst_210 = arith.constant 2.213200e+03 : f32
    %414 = vector.broadcast %cst_210 : f32 to vector<128x128xf32>
    %415 = arith.cmpf ogt, %12, %414 : vector<128x128xf32>
    %cst_211 = arith.constant 0.02004008 : f32
    %416 = vector.broadcast %cst_211 : f32 to vector<128x128xf32>
    %417 = arith.select %415, %416, %411 : vector<128x128xi1>, vector<128x128xf32>
    %cst_212 = arith.constant 27.647295 : f32
    %418 = vector.broadcast %cst_212 : f32 to vector<128x128xf32>
    %419 = arith.select %415, %418, %413 : vector<128x128xi1>, vector<128x128xf32>
    %cst_213 = arith.constant 2.313000e+03 : f32
    %420 = vector.broadcast %cst_213 : f32 to vector<128x128xf32>
    %421 = arith.cmpf ogt, %12, %420 : vector<128x128xf32>
    %cst_214 = arith.constant 0.0193986427 : f32
    %422 = vector.broadcast %cst_214 : f32 to vector<128x128xf32>
    %423 = arith.select %421, %422, %417 : vector<128x128xi1>, vector<128x128xf32>
    %cst_215 = arith.constant 29.1309414 : f32
    %424 = vector.broadcast %cst_215 : f32 to vector<128x128xf32>
    %425 = arith.select %421, %424, %419 : vector<128x128xi1>, vector<128x128xf32>
    %cst_216 = arith.constant 2.416100e+03 : f32
    %426 = vector.broadcast %cst_216 : f32 to vector<128x128xf32>
    %427 = arith.cmpf ogt, %12, %426 : vector<128x128xf32>
    %cst_217 = arith.constant 0.0187441427 : f32
    %428 = vector.broadcast %cst_217 : f32 to vector<128x128xf32>
    %429 = arith.select %427, %428, %423 : vector<128x128xi1>, vector<128x128xf32>
    %cst_218 = arith.constant 30.7122784 : f32
    %430 = vector.broadcast %cst_218 : f32 to vector<128x128xf32>
    %431 = arith.select %427, %430, %425 : vector<128x128xi1>, vector<128x128xf32>
    %cst_219 = arith.constant 2.522800e+03 : f32
    %432 = vector.broadcast %cst_219 : f32 to vector<128x128xf32>
    %433 = arith.cmpf ogt, %12, %432 : vector<128x128xf32>
    %cst_220 = arith.constant 0.0181159414 : f32
    %434 = vector.broadcast %cst_220 : f32 to vector<128x128xf32>
    %435 = arith.select %433, %434, %429 : vector<128x128xi1>, vector<128x128xf32>
    %cst_221 = arith.constant 3.229710e+01 : f32
    %436 = vector.broadcast %cst_221 : f32 to vector<128x128xf32>
    %437 = arith.select %433, %436, %431 : vector<128x128xi1>, vector<128x128xf32>
    %cst_222 = arith.constant 2.633200e+03 : f32
    %438 = vector.broadcast %cst_222 : f32 to vector<128x128xf32>
    %439 = arith.cmpf ogt, %12, %438 : vector<128x128xf32>
    %cst_223 = arith.constant 0.0175284836 : f32
    %440 = vector.broadcast %cst_223 : f32 to vector<128x128xf32>
    %441 = arith.select %439, %440, %435 : vector<128x128xi1>, vector<128x128xf32>
    %cst_224 = arith.constant 33.843998 : f32
    %442 = vector.broadcast %cst_224 : f32 to vector<128x128xf32>
    %443 = arith.select %439, %442, %437 : vector<128x128xi1>, vector<128x128xf32>
    %cst_225 = arith.constant 2.747300e+03 : f32
    %444 = vector.broadcast %cst_225 : f32 to vector<128x128xf32>
    %445 = arith.cmpf ogt, %12, %444 : vector<128x128xf32>
    %cst_226 = arith.constant 0.0169491526 : f32
    %446 = vector.broadcast %cst_226 : f32 to vector<128x128xf32>
    %447 = arith.select %445, %446, %441 : vector<128x128xi1>, vector<128x128xf32>
    %cst_227 = arith.constant 35.4355927 : f32
    %448 = vector.broadcast %cst_227 : f32 to vector<128x128xf32>
    %449 = arith.select %445, %448, %443 : vector<128x128xi1>, vector<128x128xf32>
    %cst_228 = arith.constant 2.865300e+03 : f32
    %450 = vector.broadcast %cst_228 : f32 to vector<128x128xf32>
    %451 = arith.cmpf ogt, %12, %450 : vector<128x128xf32>
    %cst_229 = arith.constant 0.0163800158 : f32
    %452 = vector.broadcast %cst_229 : f32 to vector<128x128xf32>
    %453 = arith.select %451, %452, %447 : vector<128x128xi1>, vector<128x128xf32>
    %cst_230 = arith.constant 37.0663376 : f32
    %454 = vector.broadcast %cst_230 : f32 to vector<128x128xf32>
    %455 = arith.select %451, %454, %449 : vector<128x128xi1>, vector<128x128xf32>
    %cst_231 = arith.constant 2.987400e+03 : f32
    %456 = vector.broadcast %cst_231 : f32 to vector<128x128xf32>
    %457 = arith.cmpf ogt, %12, %456 : vector<128x128xf32>
    %cst_232 = arith.constant 0.0158478599 : f32
    %458 = vector.broadcast %cst_232 : f32 to vector<128x128xf32>
    %459 = arith.select %457, %458, %453 : vector<128x128xi1>, vector<128x128xf32>
    %cst_233 = arith.constant 3.865610e+01 : f32
    %460 = vector.broadcast %cst_233 : f32 to vector<128x128xf32>
    %461 = arith.select %457, %460, %455 : vector<128x128xi1>, vector<128x128xf32>
    %cst_234 = arith.constant 3.113600e+03 : f32
    %462 = vector.broadcast %cst_234 : f32 to vector<128x128xf32>
    %463 = arith.cmpf ogt, %12, %462 : vector<128x128xf32>
    %cst_235 = arith.constant 0.0153139355 : f32
    %464 = vector.broadcast %cst_235 : f32 to vector<128x128xf32>
    %465 = arith.select %463, %464, %459 : vector<128x128xi1>, vector<128x128xf32>
    %cst_236 = arith.constant 40.318531 : f32
    %466 = vector.broadcast %cst_236 : f32 to vector<128x128xf32>
    %467 = arith.select %463, %466, %461 : vector<128x128xi1>, vector<128x128xf32>
    %cst_237 = arith.constant 3.244200e+03 : f32
    %468 = vector.broadcast %cst_237 : f32 to vector<128x128xf32>
    %469 = arith.cmpf ogt, %12, %468 : vector<128x128xf32>
    %cst_238 = arith.constant 0.0148038492 : f32
    %470 = vector.broadcast %cst_238 : f32 to vector<128x128xf32>
    %471 = arith.select %469, %470, %465 : vector<128x128xi1>, vector<128x128xf32>
    %cst_239 = arith.constant 41.9733543 : f32
    %472 = vector.broadcast %cst_239 : f32 to vector<128x128xf32>
    %473 = arith.select %469, %472, %467 : vector<128x128xi1>, vector<128x128xf32>
    %cst_240 = arith.constant 3.379300e+03 : f32
    %474 = vector.broadcast %cst_240 : f32 to vector<128x128xf32>
    %475 = arith.cmpf ogt, %12, %474 : vector<128x128xf32>
    %cst_241 = arith.constant 0.0142857144 : f32
    %476 = vector.broadcast %cst_241 : f32 to vector<128x128xf32>
    %477 = arith.select %475, %476, %471 : vector<128x128xi1>, vector<128x128xf32>
    %cst_242 = arith.constant 43.7242851 : f32
    %478 = vector.broadcast %cst_242 : f32 to vector<128x128xf32>
    %479 = arith.select %475, %478, %473 : vector<128x128xi1>, vector<128x128xf32>
    %cst_243 = arith.constant 3.519300e+03 : f32
    %480 = vector.broadcast %cst_243 : f32 to vector<128x128xf32>
    %481 = arith.cmpf ogt, %12, %480 : vector<128x128xf32>
    %cst_244 = arith.constant 0.0137741044 : f32
    %482 = vector.broadcast %cst_244 : f32 to vector<128x128xf32>
    %483 = arith.select %481, %482, %477 : vector<128x128xi1>, vector<128x128xf32>
    %cst_245 = arith.constant 45.5247917 : f32
    %484 = vector.broadcast %cst_245 : f32 to vector<128x128xf32>
    %485 = arith.select %481, %484, %479 : vector<128x128xi1>, vector<128x128xf32>
    %486 = arith.mulf %483, %12 : vector<128x128xf32>
    %487 = arith.addf %486, %485 : vector<128x128xf32>
    %cst_246 = arith.constant 2.731500e+02 : f32
    %488 = vector.broadcast %cst_246 : f32 to vector<128x128xf32>
    %489 = arith.addf %487, %488 : vector<128x128xf32>
    %490 = arith.subf %489, %15 : vector<128x128xf32>
    %491 = vector.broadcast %11 : f32 to vector<128x128xf32>
    %492 = arith.mulf %491, %490 : vector<128x128xf32>
    %493 = arith.addf %15, %492 : vector<128x128xf32>
    %cst_247 = arith.constant 2.731500e+02 : f32
    %494 = vector.broadcast %cst_247 : f32 to vector<128x128xf32>
    %495 = arith.subf %493, %494 : vector<128x128xf32>
    %c0_248 = arith.constant 0 : index
    %c0_249 = arith.constant 0 : index
    %496 = vector.load %arg4[%c0_248, %c0_249] : memref<128x128xf32, #tpu.memory_space<vmem>>, vector<128x128xf32>
    tpu.vector_store %arg4[%c0_248, %c0_249], %495 {strides = array<i32>} : memref<128x128xf32, #tpu.memory_space<vmem>>, vector<128x128xf32>,
    return
  }
  func.func @transform_0(%arg0: i32) -> i32 {
    %c0_i32 = arith.constant 0 : i32
    %c0_i32_0 = arith.constant 0 : i32
    return %c0_i32 : i32
  }
  func.func @transform_1(%arg0: i32) -> (i32, i32) {
    %c0_i32 = arith.constant 0 : i32
    %c0_i32_0 = arith.constant 0 : i32
    return %arg0, %c0_i32 : i32, i32
  }
  func.func @transform_2(%arg0: i32) -> (i32, i32) {
    %c0_i32 = arith.constant 0 : i32
    %c0_i32_0 = arith.constant 0 : i32
    return %arg0, %c0_i32 : i32, i32
  }
  func.func @transform_3(%arg0: i32) -> (i32, i32) {
    %c0_i32 = arith.constant 0 : i32
    %c0_i32_0 = arith.constant 0 : i32
    return %arg0, %c0_i32 : i32, i32
  }
}

</mosaic_0001>

<bundles_post_ra>
// kernel: tpu_custom_call.1
= control target key start
LH: loop header
LB: loop body
LE: loop exit
PB: predicated region body
PF: predicated region fallthrough
CT: control target
= control target key end

     0   :  { %8 = vsyncpa [#allocation5], 0  ;;  %s11591_s0 = inlined_call_operand.hbm [shape: f32[4], index: 0, kind: input, shape index: {}]   ;;  %s11592_s1 = inlined_call_operand.hbm [shape: f32[128,128], index: 1, kind: input, shape index: {}]   ;;  %s11593_s2 = inlined_call_operand.hbm [shape: f32[128,128], index: 2, kind: input, shape index: {}]   ;;  %s11594_s3 = inlined_call_operand.hbm [shape: f32[128,128], index: 3, kind: output, shape index: {}]  }
   0x1   :  { %9 = vsyncpa [#allocation3], 0 }
   0x2   :  { %10 = vsyncpa [#allocation8], 0 }
   0x3   :  { %11 = vsyncpa [#allocation4], 0  ;;  %s4160_s14 = scalar_lea.hbm %s11591_s0, 16 }
   0x4   :  { %p4161_p0 = scmp.ne.s32.totalorder %s11591_s0, %s4160_s14  ;;  %p4164_p1 = scmp.lt.u32.totalorder %s4160_s14, %s11591_s0 }
   0x6   :  { %p4166_p2 = pnand %p4164_p1, %p4161_p0 }
   0x8   :  { %4169 = shalt.err (!%p4166_p2)
}
   0x9   :  { %s4244_s19 = smov [#allocation2]   ;;  %s4245_s22 = smov [#allocation6]  }
   0xa   :  { %19 = dma.hbm_to_smem %s11591_s0, 16, %s4244_s19, [#allocation5]  }
   0xb   :  { %s25_s23 = sshll.u32 %s4245_s22, 4  ;;  %s4170_s26 = scalar_lea.hbm %s11592_s1, 2048  ;;  %s26_s23 = int_to_ptr.vmem [resolvable:$true] %s25_s23 }
   0xc   :  { %p4171_p3 = scmp.ne.s32.totalorder %s11592_s1, %s4170_s26  ;;  %p4174_p4 = scmp.lt.u32.totalorder %s4170_s26, %s11592_s1 }
   0xe   :  { %p4176_p5 = pnand %p4174_p4, %p4171_p3 }
  0x10   :  { %4179 = shalt.err (!%p4176_p5)
}
  0x11   :  { %s4180_s4 = scalar_lea.vmem %s26_s23, 2048  ;;  %p4185_p7 = scmp.lt.s32.totalorder %s26_s23, %s26_s23 }
  0x12   :  { %p4181_p6 = scmp.ne.s32.totalorder %s26_s23, %s4180_s4  ;;  %p4186_p8 = scmp.lt.s32.totalorder %s4180_s4, %s4180_s4 }
  0x14   :  { %p4187_p9 = por %p4186_p8, %p4185_p7 }
  0x16   :  { %p4188_p10 = pnand %p4187_p9, %p4181_p6 }
  0x18   :  { %4191 = shalt.err (!%p4188_p10)
}
  0x19   :  { %s4246_s0 = smov 128   ;;  %s4247_s5 = smov 8  }
  0x1a   :  { %31 = dma.hbm_to_vmem [thread:$0]  %s11592_s1, 2048, %s26_s23, [#allocation3], %s4246_s0, %s4246_s0, %s4247_s5  }
  0x1b   :  { %s4248_s8 = smov [#allocation7]   ;;  %s4192_s12 = scalar_lea.hbm %s11593_s2, 2048 }
  0x1c   :  { %s37_s9 = sshll.u32 %s4248_s8, 4  ;;  %p4193_p11 = scmp.ne.s32.totalorder %s11593_s2, %s4192_s12  ;;  %s38_s9 = int_to_ptr.vmem [resolvable:$true] %s37_s9 }
  0x1d   :  { %p4196_p12 = scmp.lt.u32.totalorder %s4192_s12, %s11593_s2 }
  0x1f   :  { %p4198_p13 = pnand %p4196_p12, %p4193_p11 }
  0x21   :  { %4201 = shalt.err (!%p4198_p13)
}
  0x22   :  { %s4202_s17 = scalar_lea.vmem %s38_s9, 2048  ;;  %p4207_p1 = scmp.lt.s32.totalorder %s38_s9, %s38_s9 }
  0x23   :  { %p4203_p0 = scmp.ne.s32.totalorder %s38_s9, %s4202_s17  ;;  %p4208_p2 = scmp.lt.s32.totalorder %s4202_s17, %s4202_s17 }
  0x25   :  { %p4209_p3 = por %p4208_p2, %p4207_p1 }
  0x27   :  { %p4210_p4 = pnand %p4209_p3, %p4203_p0 }
  0x29   :  { %4213 = shalt.err (!%p4210_p4)
}
  0x2a   :  { %43 = dma.hbm_to_vmem [thread:$0]  %s11593_s2, 2048, %s38_s9, [#allocation8], %s4246_s0, %s4246_s0, %s4247_s5  }
  0x2b   :  { %4236 = dma.done.wait [#allocation5], 16  }
  0x2c   :  { %4237 = vsyncadd [#allocation5], 4294967280 }
  0x2d   :  { %4238 = dma.done.wait [#allocation3], 2048  }
  0x2e   :  { %4239 = vsyncadd [#allocation3], 4294965248 }
  0x2f   :  { %4240 = dma.done.wait [#allocation8], 2048  }
  0x30   :  { %4241 = vsyncadd [#allocation8], 4294965248 }
  0x31   :  { %53 = sfence }
  0x32   :  { %s4012_s19 = sld [smem:[#allocation2 + $0x1]]  ;;  %v4316_v0 = vld [vmem:[#allocation7] sm:$0xff]  ;;  %v4318_v1 = vld [vmem:[#allocation7 + $0x8] sm:$0xff]  ;;  %v4320_v2 = vld [vmem:[#allocation7 + $0x10] sm:$0xff]  ;;  %s4322_s20 = sld [smem:[#allocation2]]  ;;  %v4249_v50 = vmov 1.0  }
  0x33   :  { %v4324_v4 = vld [vmem:[#allocation7 + $0x18] sm:$0xff]  ;;  %v88_v5 = vld [vmem:[#allocation6] sm:$0xff]  ;;  %v89_v6 = vld [vmem:[#allocation6 + $0x8] sm:$0xff]  ;;  %s4326_s2 = sld [smem:[#allocation2 + $0x3]]  ;;  %vm120_vm0 = vcmp.gt.f32.partialorder %v4316_v0, 15.9 }
  0x34   :  { %v4328_v7 = vld [vmem:[#allocation7 + $0x20] sm:$0xff]  ;;  %v90_v8 = vld [vmem:[#allocation6 + $0x10] sm:$0xff]  ;;  %v91_v9 = vld [vmem:[#allocation6 + $0x18] sm:$0xff]  ;;  %v4330_v13 = vadd.f32 273.15, %v88_v5  ;;  %s4252_s26 = smov 1.0  }
  0x35   :  { %v92_v10 = vld [vmem:[#allocation6 + $0x20] sm:$0xff]  ;;  %v93_v11 = vld [vmem:[#allocation6 + $0x28] sm:$0xff]  ;;  %v94_v12 = vld [vmem:[#allocation6 + $0x30] sm:$0xff]  ;;  %v4333_v17 = vadd.f32 273.15, %v89_v6  ;;  %s4253_s8 = smov [#allocation9]  }
  0x36   :  { %v95_v14 = vld [vmem:[#allocation6 + $0x38] sm:$0xff]  ;;  %v96_v15 = vld [vmem:[#allocation6 + $0x40] sm:$0xff]  ;;  %v97_v16 = vld [vmem:[#allocation6 + $0x48] sm:$0xff]  ;;  %vm121_vm1 = vcmp.gt.f32.partialorder %v4318_v1, 15.9  ;;  %s3998_s9 = sshll.u32 %s4253_s8, 4  ;;  %s3999_s9 = int_to_ptr.vmem [resolvable:$true] %s3998_s9 }
  0x37   :  { %vm122_vm2 = vcmp.gt.f32.partialorder %v4320_v2, 15.9  ;;  %vm123_vm3 = vcmp.gt.f32.partialorder %v4324_v4, 15.9  ;;  %v98_v18 = vld [vmem:[#allocation6 + $0x50] sm:$0xff]  ;;  %v99_v19 = vld [vmem:[#allocation6 + $0x58] sm:$0xff]  ;;  %p4219_p6 = scmp.lt.s32.totalorder %s3999_s9, %s3999_s9 }
  0x38   :  { %v57_v3 = vstv %s4012_s19  ;;  %v100_v20 = vld [vmem:[#allocation6 + $0x60] sm:$0xff]  ;;  %v4338_v21 = vadd.f32 273.15, %v90_v8  ;;  %vm124_vm4 = vcmp.gt.f32.partialorder %v4328_v7, 15.9  ;;  %v4341_v22 = vld [vmem:[#allocation7 + $0x28] sm:$0xff] }
  0x39   :  { %4044 = vrcp.f32 %v57_v3  ;;  %v4343_v23 = vld [vmem:[#allocation7 + $0x30] sm:$0xff]  ;;  %v4345_v24 = vld [vmem:[#allocation7 + $0x38] sm:$0xff]  ;;  %v101_v25 = vld [vmem:[#allocation6 + $0x68] sm:$0xff]  ;;  %v4347_v28 = vadd.f32 273.15, %v91_v9  ;;  %s63_s21 = ssub.f32 1.0, %s4326_s2 }
  0x3a   :  { %v102_v26 = vld [vmem:[#allocation6 + $0x70] sm:$0xff]  ;;  %v103_v27 = vld [vmem:[#allocation6 + $0x78] sm:$0xff]  ;;  %v4349_v29 = vld [vmem:[#allocation7 + $0x40] sm:$0xff]  ;;  %v4355_v32 = vadd.f32 273.15, %v92_v10  ;;  %s4214_s10 = scalar_lea.vmem %s3999_s9, 2048 }
  0x3b   :  { %v4351_v30 = vld [vmem:[#allocation7 + $0x48] sm:$0xff]  ;;  %v4353_v31 = vld [vmem:[#allocation7 + $0x50] sm:$0xff]  ;;  %v4357_v33 = vadd.f32 273.15, %v93_v11  ;;  %v4359_v34 = vadd.f32 273.15, %v94_v12  ;;  %p4215_p5 = scmp.ne.s32.totalorder %s3999_s9, %s4214_s10  ;;  %p4220_p7 = scmp.lt.s32.totalorder %s4214_s10, %s4214_s10 }
  0x3c   :  { %v4361_v35 = vld [vmem:[#allocation7 + $0x58] sm:$0xff]  ;;  %v4363_v36 = vld [vmem:[#allocation7 + $0x60] sm:$0xff]  ;;  %v4365_v37 = vld [vmem:[#allocation7 + $0x68] sm:$0xff]  ;;  %v4367_v38 = vadd.f32 273.15, %v95_v14 }
  0x3d   :  { %v4369_v39 = vadd.f32 273.15, %v96_v15  ;;  %v4371_v40 = vadd.f32 273.15, %v97_v16  ;;  %v4373_v41 = vld [vmem:[#allocation7 + $0x70] sm:$0xff]  ;;  %v4375_v42 = vld [vmem:[#allocation7 + $0x78] sm:$0xff]  ;;  %p4221_p8 = por %p4220_p7, %p4219_p6 }
  0x3e   :  { %v4377_v43 = vadd.f32 273.15, %v98_v18  ;;  %v4379_v44 = vadd.f32 273.15, %v99_v19  ;;  %v4381_v45 = vadd.f32 273.15, %v100_v20 }
  0x3f   :  { %11611 = vst [vmem:[#allocation14_spill] sm:$0xff] %v4369_v39  ;;  %11612 = vst [vmem:[#allocation15_spill] sm:$0xff] %v4371_v40  ;;  %v4383_v46 = vadd.f32 273.15, %v101_v25  ;;  %v4385_v47 = vadd.f32 273.15, %v102_v26  ;;  %p4222_p9 = pnand %p4221_p8, %p4215_p5 }
  0x40   :  { %11613 = vst [vmem:[#allocation16_spill] sm:$0xff] %v4377_v43  ;;  %11614 = vst [vmem:[#allocation17_spill] sm:$0xff] %v4379_v44  ;;  %v4387_v48 = vadd.f32 273.15, %v103_v27  ;;  %vm125_vm5 = vcmp.gt.f32.partialorder %v4341_v22, 15.9 }
  0x41   :  { %11615 = vst [vmem:[#allocation18_spill] sm:$0xff] %v4381_v45  ;;  %11616 = vst [vmem:[#allocation19_spill] sm:$0xff] %v4383_v46  ;;  %vm126_vm6 = vcmp.gt.f32.partialorder %v4343_v23, 15.9  ;;  %vm127_vm7 = vcmp.gt.f32.partialorder %v4345_v24, 15.9 }
  0x42   :  { %11617 = vst [vmem:[#allocation20_spill] sm:$0xff] %v4385_v47  ;;  %11618 = vst [vmem:[#allocation21_spill] sm:$0xff] %v4387_v48  ;;  %vm128_vm8 = vcmp.gt.f32.partialorder %v4349_v29, 15.9  ;;  %vm129_vm9 = vcmp.gt.f32.partialorder %v4351_v30, 15.9 }
  0x43   :  { %v4045_v49 = vpop.eup %4044  ;;  %vm11595_vm10 = vcmp.gt.f32.partialorder %v4353_v31, 15.9  ;;  %vm131_vm11 = vcmp.gt.f32.partialorder %v4361_v35, 15.9  ;;  %vm132_vm12 = vcmp.gt.f32.partialorder %v4363_v36, 15.9 }
  0x44   :  { %4030 = vpush %v4045_v49  ;;  %vm133_vm13 = vcmp.gt.f32.partialorder %v4365_v37, 15.9  ;;  %vm134_vm14 = vcmp.gt.f32.partialorder %v4373_v41, 15.9  ;;  %vm135_vm15 = vcmp.gt.f32.partialorder %v4375_v42, 15.9 }
  0x45   :  { %v136_v51 = vsel %vm120_vm0, 0.90909094, %v4249_v50  ;;  %v137_v52 = vsel %vm121_vm1, 0.90909094, %v4249_v50  ;;  %v138_v53 = vsel %vm122_vm2, 0.90909094, %v4249_v50 }
  0x46   :  { %v139_v54 = vsel %vm123_vm3, 0.90909094, %v4249_v50  ;;  %v140_v55 = vsel %vm124_vm4, 0.90909094, %v4249_v50  ;;  %v141_v56 = vsel %vm125_vm5, 0.90909094, %v4249_v50 }
  0x47   :  { %v142_v57 = vsel %vm126_vm6, 0.90909094, %v4249_v50  ;;  %v143_v58 = vsel %vm127_vm7, 0.90909094, %v4249_v50  ;;  %v144_v59 = vsel %vm128_vm8, 0.90909094, %v4249_v50 }
  0x48   :  { %v145_v60 = vsel %vm129_vm9, 0.90909094, %v4249_v50  ;;  %v146_v61 = vsel %vm11595_vm10, 0.90909094, %v4249_v50  ;;  %v147_v62 = vsel %vm131_vm11, 0.90909094, %v4249_v50 }
  0x49   :  { %v148_v63 = vsel %vm132_vm12, 0.90909094, %v4249_v50  ;;  %v149_v3 = vsel %vm133_vm13, 0.90909094, %v4249_v50  ;;  %v150_v5 = vsel %vm134_vm14, 0.90909094, %v4249_v50 }
  0x4a   :  { %v151_v6 = vsel %vm135_vm15, 0.90909094, %v4249_v50  ;;  %v4250_v8 = vmov -75.9   ;;  %vm168_vm10 = vcmp.gt.f32.partialorder %v4316_v0, 18.1 }
  0x4b   :  { %v152_v9 = vsel %vm120_vm0, -74.454544, %v4250_v8  ;;  %v153_v10 = vsel %vm121_vm1, -74.454544, %v4250_v8  ;;  %v154_v11 = vsel %vm122_vm2, -74.454544, %v4250_v8 }
  0x4c   :  { %v155_v12 = vsel %vm123_vm3, -74.454544, %v4250_v8  ;;  %v156_v14 = vsel %vm124_vm4, -74.454544, %v4250_v8  ;;  %v157_v15 = vsel %vm125_vm5, -74.454544, %v4250_v8 }
  0x4d   :  { %v158_v16 = vsel %vm126_vm6, -74.454544, %v4250_v8  ;;  %v159_v18 = vsel %vm127_vm7, -74.454544, %v4250_v8  ;;  %v160_v19 = vsel %vm128_vm8, -74.454544, %v4250_v8 }
  0x4e   :  { %v161_v20 = vsel %vm129_vm9, -74.454544, %v4250_v8  ;;  %vm11619_vm0 = vcmp.gt.f32.partialorder %v4353_v31, 15.9  ;;  %v163_v26 = vsel %vm131_vm11, -74.454544, %v4250_v8 }
  0x4f   :  { %v162_v25 = vsel %vm11619_vm0, -74.454544, %v4250_v8  ;;  %v164_v27 = vsel %vm132_vm12, -74.454544, %v4250_v8  ;;  %v165_v49 = vsel %vm133_vm13, -74.454544, %v4250_v8 }
  0x50   :  { %v166_v50 = vsel %vm134_vm14, -74.454544, %v4250_v8  ;;  %v167_v48 = vsel %vm135_vm15, -74.454544, %v4250_v8  ;;  %vm11604_vm1 = vcmp.gt.f32.partialorder %v4318_v1, 18.1 }
  0x51   :  { %vm11603_vm2 = vcmp.gt.f32.partialorder %v4320_v2, 18.1  ;;  %vm11605_vm3 = vcmp.gt.f32.partialorder %v4324_v4, 18.1  ;;  %vm172_vm4 = vcmp.gt.f32.partialorder %v4328_v7, 18.1 }
  0x52   :  { %vm173_vm5 = vcmp.gt.f32.partialorder %v4341_v22, 18.1  ;;  %vm11607_vm6 = vcmp.gt.f32.partialorder %v4343_v23, 18.1  ;;  %vm11606_vm7 = vcmp.gt.f32.partialorder %v4345_v24, 18.1 }
  0x53   :  { %vm11608_vm8 = vcmp.gt.f32.partialorder %v4349_v29, 18.1  ;;  %vm177_vm9 = vcmp.gt.f32.partialorder %v4351_v30, 18.1  ;;  %vm178_vm11 = vcmp.gt.f32.partialorder %v4353_v31, 18.1 }
  0x54   :  { %vm179_vm12 = vcmp.gt.f32.partialorder %v4361_v35, 18.1  ;;  %vm180_vm13 = vcmp.gt.f32.partialorder %v4363_v36, 18.1  ;;  %vm181_vm14 = vcmp.gt.f32.partialorder %v4365_v37, 18.1 }
  0x55   :  { %vm182_vm15 = vcmp.gt.f32.partialorder %v4373_v41, 18.1  ;;  %vm183_vm0 = vcmp.gt.f32.partialorder %v4375_v42, 18.1  ;;  %v184_v8 = vsel %vm168_vm10, 0.8333333, %v136_v51 }
  0x56   :  { %v185_v47 = vsel %vm11604_vm1, 0.8333333, %v137_v52  ;;  %v186_v46 = vsel %vm11603_vm2, 0.8333333, %v138_v53  ;;  %v187_v45 = vsel %vm11605_vm3, 0.8333333, %v139_v54 }
  0x57   :  { %v188_v44 = vsel %vm172_vm4, 0.8333333, %v140_v55  ;;  %v189_v43 = vsel %vm173_vm5, 0.8333333, %v141_v56  ;;  %v190_v40 = vsel %vm11607_vm6, 0.8333333, %v142_v57 }
  0x58   :  { %v191_v51 = vsel %vm11606_vm7, 0.8333333, %v143_v58  ;;  %v192_v52 = vsel %vm11608_vm8, 0.8333333, %v144_v59  ;;  %vm216_vm2 = vcmp.gt.f32.partialorder %v4316_v0, 20.5  ;;  %vm217_vm1 = vcmp.gt.f32.partialorder %v4318_v1, 20.5 }
  0x59   :  { %v193_v53 = vsel %vm177_vm9, 0.8333333, %v145_v60  ;;  %v194_v54 = vsel %vm178_vm11, 0.8333333, %v146_v61  ;;  %v195_v55 = vsel %vm179_vm12, 0.8333333, %v147_v62 }
  0x5a   :  { %v196_v56 = vsel %vm180_vm13, 0.8333333, %v148_v63  ;;  %v197_v57 = vsel %vm181_vm14, 0.8333333, %v149_v3  ;;  %v198_v58 = vsel %vm182_vm15, 0.8333333, %v150_v5 }
  0x5b   :  { %v199_v59 = vsel %vm183_vm0, 0.8333333, %v151_v6  ;;  %v200_v60 = vsel %vm168_vm10, -73.083336, %v152_v9  ;;  %vm11620_vm7 = vcmp.gt.f32.partialorder %v4318_v1, 18.1 }
  0x5c   :  { %v201_v61 = vsel %vm11620_vm7, -73.083336, %v153_v10  ;;  %vm11621_vm8 = vcmp.gt.f32.partialorder %v4320_v2, 18.1  ;;  %vm11622_vm6 = vcmp.gt.f32.partialorder %v4324_v4, 18.1 }
  0x5d   :  { %v202_v62 = vsel %vm11621_vm8, -73.083336, %v154_v11  ;;  %v203_v63 = vsel %vm11622_vm6, -73.083336, %v155_v12  ;;  %v204_v3 = vsel %vm172_vm4, -73.083336, %v156_v14 }
  0x5e   :  { %v205_v5 = vsel %vm173_vm5, -73.083336, %v157_v15  ;;  %vm11623_vm3 = vcmp.gt.f32.partialorder %v4343_v23, 18.1  ;;  %vm11624_vm10 = vcmp.gt.f32.partialorder %v4345_v24, 18.1 }
  0x5f   :  { %v206_v6 = vsel %vm11623_vm3, -73.083336, %v158_v16  ;;  %v207_v9 = vsel %vm11624_vm10, -73.083336, %v159_v18  ;;  %vm11625_vm7 = vcmp.gt.f32.partialorder %v4349_v29, 18.1 }
  0x60   :  { %v208_v10 = vsel %vm11625_vm7, -73.083336, %v160_v19  ;;  %v209_v11 = vsel %vm177_vm9, -73.083336, %v161_v20  ;;  %v210_v12 = vsel %vm178_vm11, -73.083336, %v162_v25 }
  0x61   :  { %v211_v14 = vsel %vm179_vm12, -73.083336, %v163_v26  ;;  %v212_v15 = vsel %vm180_vm13, -73.083336, %v164_v27  ;;  %v213_v16 = vsel %vm181_vm14, -73.083336, %v165_v49 }
  0x62   :  { %v214_v18 = vsel %vm182_vm15, -73.083336, %v166_v50  ;;  %v215_v19 = vsel %vm183_vm0, -73.083336, %v167_v48  ;;  %vm222_vm3 = vcmp.gt.f32.partialorder %v4343_v23, 20.5  ;;  %vm223_vm4 = vcmp.gt.f32.partialorder %v4345_v24, 20.5 }
  0x63   :  { %vm224_vm5 = vcmp.gt.f32.partialorder %v4349_v29, 20.5  ;;  %vm225_vm6 = vcmp.gt.f32.partialorder %v4351_v30, 20.5  ;;  %vm226_vm8 = vcmp.gt.f32.partialorder %v4353_v31, 20.5  ;;  %vm227_vm9 = vcmp.gt.f32.partialorder %v4361_v35, 20.5  ;;  %s4251_s22 = smov 0.0001  }
  0x64   :  { %vm228_vm11 = vcmp.gt.f32.partialorder %v4363_v36, 20.5  ;;  %vm229_vm12 = vcmp.gt.f32.partialorder %v4365_v37, 20.5  ;;  %vm230_vm13 = vcmp.gt.f32.partialorder %v4373_v41, 20.5  ;;  %vm231_vm14 = vcmp.gt.f32.partialorder %v4375_v42, 20.5  ;;  %s64_s23 = smax.f32 %s4251_s22, %s63_s21 }
  0x65   :  { %v232_v48 = vsel %vm216_vm2, 0.7407407, %v184_v8  ;;  %v233_v20 = vsel %vm217_vm1, 0.7407407, %v185_v47  ;;  %vm11626_vm15 = vcmp.gt.f32.partialorder %v4320_v2, 20.5  ;;  %vm11627_vm0 = vcmp.gt.f32.partialorder %v4324_v4, 20.5  ;;  %s4668_s27 = smin.f32 %s4252_s26, %s64_s23 }
  0x66   :  { %v234_v25 = vsel %vm11626_vm15, 0.7407407, %v186_v46  ;;  %v235_v26 = vsel %vm11627_vm0, 0.7407407, %v187_v45  ;;  %vm11628_vm10 = vcmp.gt.f32.partialorder %v4328_v7, 20.5  ;;  %vm11629_vm7 = vcmp.gt.f32.partialorder %v4341_v22, 20.5 }
  0x67   :  { %v236_v27 = vsel %vm11628_vm10, 0.7407407, %v188_v44  ;;  %v237_v49 = vsel %vm11629_vm7, 0.7407407, %v189_v43  ;;  %v238_v50 = vsel %vm222_vm3, 0.7407407, %v190_v40 }
  0x68   :  { %v239_v8 = vsel %vm223_vm4, 0.7407407, %v191_v51  ;;  %v240_v47 = vsel %vm224_vm5, 0.7407407, %v192_v52  ;;  %v241_v46 = vsel %vm225_vm6, 0.7407407, %v193_v53 }
  0x69   :  { %v242_v45 = vsel %vm226_vm8, 0.7407407, %v194_v54  ;;  %v243_v44 = vsel %vm227_vm9, 0.7407407, %v195_v55  ;;  %v244_v43 = vsel %vm228_vm11, 0.7407407, %v196_v56 }
  0x6a   :  { %v245_v40 = vsel %vm229_vm12, 0.7407407, %v197_v57  ;;  %v246_v51 = vsel %vm230_vm13, 0.7407407, %v198_v58  ;;  %v247_v52 = vsel %vm231_vm14, 0.7407407, %v199_v59 }
  0x6b   :  { %v248_v53 = vsel %vm216_vm2, -71.18519, %v200_v60  ;;  %v249_v54 = vsel %vm217_vm1, -71.18519, %v201_v61  ;;  %v250_v55 = vsel %vm11626_vm15, -71.18519, %v202_v62 }
  0x6c   :  { %v251_v56 = vsel %vm11627_vm0, -71.18519, %v203_v63  ;;  %v252_v57 = vsel %vm11628_vm10, -71.18519, %v204_v3  ;;  %v253_v58 = vsel %vm11629_vm7, -71.18519, %v205_v5 }
  0x6d   :  { %v254_v59 = vsel %vm222_vm3, -71.18519, %v206_v6  ;;  %v255_v60 = vsel %vm223_vm4, -71.18519, %v207_v9  ;;  %v256_v61 = vsel %vm224_vm5, -71.18519, %v208_v10 }
  0x6e   :  { %v257_v62 = vsel %vm225_vm6, -71.18519, %v209_v11  ;;  %v258_v63 = vsel %vm226_vm8, -71.18519, %v210_v12  ;;  %v259_v3 = vsel %vm227_vm9, -71.18519, %v211_v14 }
  0x6f   :  { %v260_v5 = vsel %vm228_vm11, -71.18519, %v212_v15  ;;  %v261_v6 = vsel %vm229_vm12, -71.18519, %v213_v16  ;;  %v262_v9 = vsel %vm230_vm13, -71.18519, %v214_v18 }
  0x70   :  { %v263_v10 = vsel %vm231_vm14, -71.18519, %v215_v19  ;;  %vm264_vm1 = vcmp.gt.f32.partialorder %v4316_v0, 23.2  ;;  %vm265_vm2 = vcmp.gt.f32.partialorder %v4318_v1, 23.2 }
  0x71   :  { %vm266_vm3 = vcmp.gt.f32.partialorder %v4320_v2, 23.2  ;;  %vm267_vm4 = vcmp.gt.f32.partialorder %v4324_v4, 23.2  ;;  %vm268_vm5 = vcmp.gt.f32.partialorder %v4328_v7, 23.2 }
  0x72   :  { %vm269_vm6 = vcmp.gt.f32.partialorder %v4341_v22, 23.2  ;;  %vm270_vm8 = vcmp.gt.f32.partialorder %v4343_v23, 23.2  ;;  %vm271_vm9 = vcmp.gt.f32.partialorder %v4345_v24, 23.2 }
  0x73   :  { %vm272_vm11 = vcmp.gt.f32.partialorder %v4349_v29, 23.2  ;;  %vm273_vm12 = vcmp.gt.f32.partialorder %v4351_v30, 23.2  ;;  %vm274_vm13 = vcmp.gt.f32.partialorder %v4353_v31, 23.2 }
  0x74   :  { %vm275_vm14 = vcmp.gt.f32.partialorder %v4361_v35, 23.2  ;;  %vm276_vm15 = vcmp.gt.f32.partialorder %v4363_v36, 23.2  ;;  %vm277_vm0 = vcmp.gt.f32.partialorder %v4365_v37, 23.2 }
  0x75   :  { %vm278_vm10 = vcmp.gt.f32.partialorder %v4373_v41, 23.2  ;;  %vm279_vm7 = vcmp.gt.f32.partialorder %v4375_v42, 23.2  ;;  %v280_v11 = vsel %vm264_vm1, 0.6666667, %v232_v48  ;;  %s4031_s24 = spop %4030 }
  0x76   :  { %v281_v12 = vsel %vm265_vm2, 0.6666667, %v233_v20  ;;  %v282_v14 = vsel %vm266_vm3, 0.6666667, %v234_v25  ;;  %v283_v15 = vsel %vm267_vm4, 0.6666667, %v235_v26  ;;  %s60_s25 = smul.f32 %s4031_s24, %s4322_s20 }
  0x77   :  { %v284_v16 = vsel %vm268_vm5, 0.6666667, %v236_v27  ;;  %v285_v18 = vsel %vm269_vm6, 0.6666667, %v237_v49  ;;  %v286_v19 = vsel %vm270_vm8, 0.6666667, %v238_v50 }
  0x78   :  { %v287_v48 = vsel %vm271_vm9, 0.6666667, %v239_v8  ;;  %v288_v20 = vsel %vm272_vm11, 0.6666667, %v240_v47  ;;  %v289_v25 = vsel %vm273_vm12, 0.6666667, %v241_v46  ;;  %s61_s28 = smax.f32 %s4251_s22, %s60_s25 }
  0x79   :  { %v290_v26 = vsel %vm274_vm13, 0.6666667, %v242_v45  ;;  %v291_v27 = vsel %vm275_vm14, 0.6666667, %v243_v44  ;;  %v292_v49 = vsel %vm276_vm15, 0.6666667, %v244_v43  ;;  %s62_s29 = smin.f32 %s4252_s26, %s61_s28 }
  0x7a   :  { %v293_v50 = vsel %vm277_vm0, 0.6666667, %v245_v40  ;;  %v294_v8 = vsel %vm278_vm10, 0.6666667, %v246_v51  ;;  %v295_v47 = vsel %vm279_vm7, 0.6666667, %v247_v52  ;;  %s67_s30 = sadd.f32 %s4668_s27, %s62_s29 }
  0x7b   :  { %v296_v46 = vsel %vm264_vm1, -69.46667, %v248_v53  ;;  %v297_v45 = vsel %vm265_vm2, -69.46667, %v249_v54  ;;  %v298_v44 = vsel %vm266_vm3, -69.46667, %v250_v55 }
  0x7c   :  { %v299_v43 = vsel %vm267_vm4, -69.46667, %v251_v56  ;;  %v300_v40 = vsel %vm268_vm5, -69.46667, %v252_v57  ;;  %v301_v51 = vsel %vm269_vm6, -69.46667, %v253_v58  ;;  %v68_v57 = vstv %s67_s30 }
  0x7d   :  { %v302_v52 = vsel %vm270_vm8, -69.46667, %v254_v59  ;;  %v303_v53 = vsel %vm271_vm9, -69.46667, %v255_v60  ;;  %v304_v54 = vsel %vm272_vm11, -69.46667, %v256_v61  ;;  %4046 = vrcp.f32 %v68_v57 }
  0x7e   :  { %v305_v55 = vsel %vm273_vm12, -69.46667, %v257_v62  ;;  %v306_v56 = vsel %vm274_vm13, -69.46667, %v258_v63  ;;  %v307_v39 = vsel %vm275_vm14, -69.46667, %v259_v3 }
  0x7f   :  { %v308_v58 = vsel %vm276_vm15, -69.46667, %v260_v5  ;;  %v309_v59 = vsel %vm277_vm0, -69.46667, %v261_v6  ;;  %v310_v60 = vsel %vm278_vm10, -69.46667, %v262_v9 }
  0x80   :  { %v311_v61 = vsel %vm279_vm7, -69.46667, %v263_v10  ;;  %vm312_vm1 = vcmp.gt.f32.partialorder %v4316_v0, 26.2  ;;  %vm313_vm2 = vcmp.gt.f32.partialorder %v4318_v1, 26.2 }
  0x81   :  { %vm314_vm3 = vcmp.gt.f32.partialorder %v4320_v2, 26.2  ;;  %vm315_vm4 = vcmp.gt.f32.partialorder %v4324_v4, 26.2  ;;  %vm316_vm5 = vcmp.gt.f32.partialorder %v4328_v7, 26.2 }
  0x82   :  { %vm317_vm6 = vcmp.gt.f32.partialorder %v4341_v22, 26.2  ;;  %vm318_vm8 = vcmp.gt.f32.partialorder %v4343_v23, 26.2  ;;  %vm319_vm9 = vcmp.gt.f32.partialorder %v4345_v24, 26.2 }
  0x83   :  { %vm320_vm11 = vcmp.gt.f32.partialorder %v4349_v29, 26.2  ;;  %vm321_vm12 = vcmp.gt.f32.partialorder %v4351_v30, 26.2  ;;  %vm322_vm13 = vcmp.gt.f32.partialorder %v4353_v31, 26.2 }
  0x84   :  { %vm323_vm14 = vcmp.gt.f32.partialorder %v4361_v35, 26.2  ;;  %vm324_vm15 = vcmp.gt.f32.partialorder %v4363_v36, 26.2  ;;  %vm325_vm0 = vcmp.gt.f32.partialorder %v4365_v37, 26.2 }
  0x85   :  { %vm326_vm10 = vcmp.gt.f32.partialorder %v4373_v41, 26.2  ;;  %vm327_vm7 = vcmp.gt.f32.partialorder %v4375_v42, 26.2  ;;  %v328_v62 = vsel %vm312_vm1, 0.6060606, %v280_v11 }
  0x86   :  { %v329_v63 = vsel %vm313_vm2, 0.6060606, %v281_v12  ;;  %v330_v3 = vsel %vm314_vm3, 0.6060606, %v282_v14  ;;  %v331_v5 = vsel %vm315_vm4, 0.6060606, %v283_v15 }
  0x87   :  { %v332_v6 = vsel %vm316_vm5, 0.6060606, %v284_v16  ;;  %v333_v9 = vsel %vm317_vm6, 0.6060606, %v285_v18  ;;  %v334_v10 = vsel %vm318_vm8, 0.6060606, %v286_v19  ;;  %v4047_v57 = vpop.eup %4046 }
  0x88   :  { %v335_v11 = vsel %vm319_vm9, 0.6060606, %v287_v48  ;;  %v336_v12 = vsel %vm320_vm11, 0.6060606, %v288_v20  ;;  %v337_v14 = vsel %vm321_vm12, 0.6060606, %v289_v25  ;;  %4032 = vpush %v4047_v57 }
  0x89   :  { %v338_v15 = vsel %vm322_vm13, 0.6060606, %v290_v26  ;;  %v339_v16 = vsel %vm323_vm14, 0.6060606, %v291_v27  ;;  %v340_v18 = vsel %vm324_vm15, 0.6060606, %v292_v49 }
  0x8a   :  { %v341_v19 = vsel %vm325_vm0, 0.6060606, %v293_v50  ;;  %v342_v48 = vsel %vm326_vm10, 0.6060606, %v294_v8  ;;  %v343_v20 = vsel %vm327_vm7, 0.6060606, %v295_v47 }
  0x8b   :  { %v344_v25 = vsel %vm312_vm1, -67.878784, %v296_v46  ;;  %v345_v26 = vsel %vm313_vm2, -67.878784, %v297_v45  ;;  %v346_v27 = vsel %vm314_vm3, -67.878784, %v298_v44 }
  0x8c   :  { %v347_v49 = vsel %vm315_vm4, -67.878784, %v299_v43  ;;  %v348_v50 = vsel %vm316_vm5, -67.878784, %v300_v40  ;;  %v349_v8 = vsel %vm317_vm6, -67.878784, %v301_v51 }
  0x8d   :  { %v350_v47 = vsel %vm318_vm8, -67.878784, %v302_v52  ;;  %v351_v46 = vsel %vm319_vm9, -67.878784, %v303_v53  ;;  %v352_v45 = vsel %vm320_vm11, -67.878784, %v304_v54 }
  0x8e   :  { %v353_v44 = vsel %vm321_vm12, -67.878784, %v305_v55  ;;  %v354_v43 = vsel %vm322_vm13, -67.878784, %v306_v56  ;;  %v355_v40 = vsel %vm323_vm14, -67.878784, %v307_v39 }
  0x8f   :  { %v356_v51 = vsel %vm324_vm15, -67.878784, %v308_v58  ;;  %v357_v52 = vsel %vm325_vm0, -67.878784, %v309_v59  ;;  %v358_v53 = vsel %vm326_vm10, -67.878784, %v310_v60 }
  0x90   :  { %v359_v54 = vsel %vm327_vm7, -67.878784, %v311_v61  ;;  %vm360_vm1 = vcmp.gt.f32.partialorder %v4316_v0, 29.5  ;;  %vm361_vm2 = vcmp.gt.f32.partialorder %v4318_v1, 29.5  ;;  %vm362_vm3 = vcmp.gt.f32.partialorder %v4320_v2, 29.5  ;;  %s66_s4 = sadd.f32 1.0, %s4668_s27 }
  0x91   :  { %vm363_vm4 = vcmp.gt.f32.partialorder %v4324_v4, 29.5  ;;  %vm364_vm5 = vcmp.gt.f32.partialorder %v4328_v7, 29.5  ;;  %vm365_vm6 = vcmp.gt.f32.partialorder %v4341_v22, 29.5  ;;  %vm366_vm8 = vcmp.gt.f32.partialorder %v4343_v23, 29.5 }
  0x92   :  { %vm367_vm9 = vcmp.gt.f32.partialorder %v4345_v24, 29.5  ;;  %vm368_vm11 = vcmp.gt.f32.partialorder %v4349_v29, 29.5  ;;  %vm369_vm12 = vcmp.gt.f32.partialorder %v4351_v30, 29.5  ;;  %vm370_vm13 = vcmp.gt.f32.partialorder %v4353_v31, 29.5 }
  0x93   :  { %vm371_vm14 = vcmp.gt.f32.partialorder %v4361_v35, 29.5  ;;  %vm372_vm15 = vcmp.gt.f32.partialorder %v4363_v36, 29.5  ;;  %vm373_vm0 = vcmp.gt.f32.partialorder %v4365_v37, 29.5  ;;  %vm374_vm10 = vcmp.gt.f32.partialorder %v4373_v41, 29.5 }
  0x94   :  { %vm375_vm7 = vcmp.gt.f32.partialorder %v4375_v42, 29.5  ;;  %v376_v39 = vsel %vm360_vm1, 0.5555556, %v328_v62  ;;  %v377_v55 = vsel %vm361_vm2, 0.5555556, %v329_v63 }
  0x95   :  { %v378_v56 = vsel %vm362_vm3, 0.5555556, %v330_v3  ;;  %v379_v58 = vsel %vm363_vm4, 0.5555556, %v331_v5  ;;  %v380_v59 = vsel %vm364_vm5, 0.5555556, %v332_v6 }
  0x96   :  { %v381_v60 = vsel %vm365_vm6, 0.5555556, %v333_v9  ;;  %v382_v61 = vsel %vm366_vm8, 0.5555556, %v334_v10  ;;  %v383_v62 = vsel %vm367_vm9, 0.5555556, %v335_v11 }
  0x97   :  { %v384_v63 = vsel %vm368_vm11, 0.5555556, %v336_v12  ;;  %v385_v3 = vsel %vm369_vm12, 0.5555556, %v337_v14  ;;  %v386_v5 = vsel %vm370_vm13, 0.5555556, %v338_v15 }
  0x98   :  { %v387_v6 = vsel %vm371_vm14, 0.5555556, %v339_v16  ;;  %v388_v9 = vsel %vm372_vm15, 0.5555556, %v340_v18  ;;  %v389_v10 = vsel %vm373_vm0, 0.5555556, %v341_v19 }
  0x99   :  { %v390_v11 = vsel %vm374_vm10, 0.5555556, %v342_v48  ;;  %v391_v12 = vsel %vm375_vm7, 0.5555556, %v343_v20  ;;  %v392_v14 = vsel %vm360_vm1, -66.388885, %v344_v25 }
  0x9a   :  { %v393_v15 = vsel %vm361_vm2, -66.388885, %v345_v26  ;;  %v394_v16 = vsel %vm362_vm3, -66.388885, %v346_v27  ;;  %v395_v57 = vsel %vm363_vm4, -66.388885, %v347_v49 }
  0x9b   :  { %v396_v18 = vsel %vm364_vm5, -66.388885, %v348_v50  ;;  %v397_v19 = vsel %vm365_vm6, -66.388885, %v349_v8  ;;  %v398_v48 = vsel %vm366_vm8, -66.388885, %v350_v47 }
  0x9c   :  { %v399_v20 = vsel %vm367_vm9, -66.388885, %v351_v46  ;;  %v400_v25 = vsel %vm368_vm11, -66.388885, %v352_v45  ;;  %v401_v26 = vsel %vm369_vm12, -66.388885, %v353_v44 }
  0x9d   :  { %v402_v27 = vsel %vm370_vm13, -66.388885, %v354_v43  ;;  %v403_v49 = vsel %vm371_vm14, -66.388885, %v355_v40  ;;  %v404_v50 = vsel %vm372_vm15, -66.388885, %v356_v51 }
  0x9e   :  { %v405_v8 = vsel %vm373_vm0, -66.388885, %v357_v52  ;;  %v406_v47 = vsel %vm374_vm10, -66.388885, %v358_v53  ;;  %v407_v46 = vsel %vm375_vm7, -66.388885, %v359_v54 }
  0x9f   :  { %vm408_vm1 = vcmp.gt.f32.partialorder %v4316_v0, 33.1  ;;  %vm409_vm2 = vcmp.gt.f32.partialorder %v4318_v1, 33.1  ;;  %vm410_vm3 = vcmp.gt.f32.partialorder %v4320_v2, 33.1 }
  0xa0   :  { %vm411_vm4 = vcmp.gt.f32.partialorder %v4324_v4, 33.1  ;;  %vm412_vm5 = vcmp.gt.f32.partialorder %v4328_v7, 33.1  ;;  %vm413_vm6 = vcmp.gt.f32.partialorder %v4341_v22, 33.1 }
  0xa1   :  { %vm414_vm8 = vcmp.gt.f32.partialorder %v4343_v23, 33.1  ;;  %vm415_vm9 = vcmp.gt.f32.partialorder %v4345_v24, 33.1  ;;  %vm416_vm11 = vcmp.gt.f32.partialorder %v4349_v29, 33.1 }
  0xa2   :  { %vm417_vm12 = vcmp.gt.f32.partialorder %v4351_v30, 33.1  ;;  %vm418_vm13 = vcmp.gt.f32.partialorder %v4353_v31, 33.1  ;;  %vm419_vm14 = vcmp.gt.f32.partialorder %v4361_v35, 33.1 }
  0xa3   :  { %vm420_vm15 = vcmp.gt.f32.partialorder %v4363_v36, 33.1  ;;  %vm421_vm0 = vcmp.gt.f32.partialorder %v4365_v37, 33.1  ;;  %vm422_vm10 = vcmp.gt.f32.partialorder %v4373_v41, 33.1 }
  0xa4   :  { %vm423_vm7 = vcmp.gt.f32.partialorder %v4375_v42, 33.1  ;;  %v424_v45 = vsel %vm408_vm1, 0.51282054, %v376_v39  ;;  %v425_v44 = vsel %vm409_vm2, 0.51282054, %v377_v55 }
  0xa5   :  { %v426_v43 = vsel %vm410_vm3, 0.51282054, %v378_v56  ;;  %v427_v40 = vsel %vm411_vm4, 0.51282054, %v379_v58  ;;  %v428_v51 = vsel %vm412_vm5, 0.51282054, %v380_v59 }
  0xa6   :  { %v429_v52 = vsel %vm413_vm6, 0.51282054, %v381_v60  ;;  %v430_v53 = vsel %vm414_vm8, 0.51282054, %v382_v61  ;;  %v431_v54 = vsel %vm415_vm9, 0.51282054, %v383_v62 }
  0xa7   :  { %v432_v39 = vsel %vm416_vm11, 0.51282054, %v384_v63  ;;  %v433_v55 = vsel %vm417_vm12, 0.51282054, %v385_v3  ;;  %v434_v56 = vsel %vm418_vm13, 0.51282054, %v386_v5 }
  0xa8   :  { %v435_v58 = vsel %vm419_vm14, 0.51282054, %v387_v6  ;;  %v436_v59 = vsel %vm420_vm15, 0.51282054, %v388_v9  ;;  %v437_v60 = vsel %vm421_vm0, 0.51282054, %v389_v10 }
  0xa9   :  { %v438_v61 = vsel %vm422_vm10, 0.51282054, %v390_v11  ;;  %v439_v62 = vsel %vm423_vm7, 0.51282054, %v391_v12  ;;  %v440_v63 = vsel %vm408_vm1, -64.97436, %v392_v14 }
  0xaa   :  { %v441_v3 = vsel %vm409_vm2, -64.97436, %v393_v15  ;;  %v442_v5 = vsel %vm410_vm3, -64.97436, %v394_v16  ;;  %v443_v6 = vsel %vm411_vm4, -64.97436, %v395_v57 }
  0xab   :  { %v444_v9 = vsel %vm412_vm5, -64.97436, %v396_v18  ;;  %v445_v10 = vsel %vm413_vm6, -64.97436, %v397_v19  ;;  %v446_v11 = vsel %vm414_vm8, -64.97436, %v398_v48 }
  0xac   :  { %v447_v12 = vsel %vm415_vm9, -64.97436, %v399_v20  ;;  %v448_v14 = vsel %vm416_vm11, -64.97436, %v400_v25  ;;  %v449_v15 = vsel %vm417_vm12, -64.97436, %v401_v26 }
  0xad   :  { %v450_v16 = vsel %vm418_vm13, -64.97436, %v402_v27  ;;  %v451_v57 = vsel %vm419_vm14, -64.97436, %v403_v49  ;;  %v452_v18 = vsel %vm420_vm15, -64.97436, %v404_v50 }
  0xae   :  { %v453_v19 = vsel %vm421_vm0, -64.97436, %v405_v8  ;;  %v454_v48 = vsel %vm422_vm10, -64.97436, %v406_v47  ;;  %v455_v20 = vsel %vm423_vm7, -64.97436, %v407_v46 }
  0xaf   :  { %vm456_vm1 = vcmp.gt.f32.partialorder %v4316_v0, 37.0  ;;  %vm457_vm2 = vcmp.gt.f32.partialorder %v4318_v1, 37.0  ;;  %vm458_vm3 = vcmp.gt.f32.partialorder %v4320_v2, 37.0  ;;  %vm459_vm4 = vcmp.gt.f32.partialorder %v4324_v4, 37.0 }
  0xb0   :  { %vm460_vm5 = vcmp.gt.f32.partialorder %v4328_v7, 37.0  ;;  %vm461_vm6 = vcmp.gt.f32.partialorder %v4341_v22, 37.0  ;;  %vm462_vm8 = vcmp.gt.f32.partialorder %v4343_v23, 37.0  ;;  %vm463_vm9 = vcmp.gt.f32.partialorder %v4345_v24, 37.0 }
  0xb1   :  { %vm464_vm11 = vcmp.gt.f32.partialorder %v4349_v29, 37.0  ;;  %vm465_vm12 = vcmp.gt.f32.partialorder %v4351_v30, 37.0  ;;  %vm466_vm13 = vcmp.gt.f32.partialorder %v4353_v31, 37.0  ;;  %vm467_vm14 = vcmp.gt.f32.partialorder %v4361_v35, 37.0 }
  0xb2   :  { %vm468_vm15 = vcmp.gt.f32.partialorder %v4363_v36, 37.0  ;;  %vm469_vm0 = vcmp.gt.f32.partialorder %v4365_v37, 37.0  ;;  %vm470_vm10 = vcmp.gt.f32.partialorder %v4373_v41, 37.0  ;;  %vm471_vm7 = vcmp.gt.f32.partialorder %v4375_v42, 37.0 }
  0xb3   :  { %v472_v25 = vsel %vm456_vm1, 0.4651163, %v424_v45  ;;  %v473_v26 = vsel %vm457_vm2, 0.4651163, %v425_v44  ;;  %v474_v27 = vsel %vm458_vm3, 0.4651163, %v426_v43 }
  0xb4   :  { %v475_v49 = vsel %vm459_vm4, 0.4651163, %v427_v40  ;;  %v476_v50 = vsel %vm460_vm5, 0.4651163, %v428_v51  ;;  %v477_v8 = vsel %vm461_vm6, 0.4651163, %v429_v52 }
  0xb5   :  { %v478_v47 = vsel %vm462_vm8, 0.4651163, %v430_v53  ;;  %v479_v46 = vsel %vm463_vm9, 0.4651163, %v431_v54  ;;  %v480_v45 = vsel %vm464_vm11, 0.4651163, %v432_v39 }
  0xb6   :  { %v481_v44 = vsel %vm465_vm12, 0.4651163, %v433_v55  ;;  %v482_v43 = vsel %vm466_vm13, 0.4651163, %v434_v56  ;;  %v483_v40 = vsel %vm467_vm14, 0.4651163, %v435_v58 }
  0xb7   :  { %v484_v51 = vsel %vm468_vm15, 0.4651163, %v436_v59  ;;  %v485_v52 = vsel %vm469_vm0, 0.4651163, %v437_v60  ;;  %v486_v53 = vsel %vm470_vm10, 0.4651163, %v438_v61 }
  0xb8   :  { %v487_v54 = vsel %vm471_vm7, 0.4651163, %v439_v62  ;;  %v488_v39 = vsel %vm456_vm1, -63.2093, %v440_v63  ;;  %v489_v55 = vsel %vm457_vm2, -63.2093, %v441_v3 }
  0xb9   :  { %v490_v56 = vsel %vm458_vm3, -63.2093, %v442_v5  ;;  %v491_v58 = vsel %vm459_vm4, -63.2093, %v443_v6  ;;  %v492_v59 = vsel %vm460_vm5, -63.2093, %v444_v9  ;;  %s4033_s6 = spop %4032 }
  0xba   :  { %v493_v60 = vsel %vm461_vm6, -63.2093, %v445_v10  ;;  %v494_v61 = vsel %vm462_vm8, -63.2093, %v446_v11  ;;  %v495_v62 = vsel %vm463_vm9, -63.2093, %v447_v12  ;;  %s71_s7 = smul.f32 %s4033_s6, %s66_s4 }
  0xbb   :  { %v496_v63 = vsel %vm464_vm11, -63.2093, %v448_v14  ;;  %v497_v3 = vsel %vm465_vm12, -63.2093, %v449_v15  ;;  %v498_v5 = vsel %vm466_vm13, -63.2093, %v450_v16 }
  0xbc   :  { %v499_v6 = vsel %vm467_vm14, -63.2093, %v451_v57  ;;  %v500_v9 = vsel %vm468_vm15, -63.2093, %v452_v18  ;;  %v501_v10 = vsel %vm469_vm0, -63.2093, %v453_v19 }
  0xbd   :  { %v502_v11 = vsel %vm470_vm10, -63.2093, %v454_v48  ;;  %v503_v12 = vsel %vm471_vm7, -63.2093, %v455_v20  ;;  %vm504_vm1 = vcmp.gt.f32.partialorder %v4316_v0, 41.3 }
  0xbe   :  { %vm505_vm2 = vcmp.gt.f32.partialorder %v4318_v1, 41.3  ;;  %vm506_vm3 = vcmp.gt.f32.partialorder %v4320_v2, 41.3  ;;  %vm507_vm4 = vcmp.gt.f32.partialorder %v4324_v4, 41.3 }
  0xbf   :  { %vm508_vm5 = vcmp.gt.f32.partialorder %v4328_v7, 41.3  ;;  %vm509_vm6 = vcmp.gt.f32.partialorder %v4341_v22, 41.3  ;;  %vm510_vm8 = vcmp.gt.f32.partialorder %v4343_v23, 41.3 }
  0xc0   :  { %vm511_vm9 = vcmp.gt.f32.partialorder %v4345_v24, 41.3  ;;  %vm512_vm11 = vcmp.gt.f32.partialorder %v4349_v29, 41.3  ;;  %vm513_vm12 = vcmp.gt.f32.partialorder %v4351_v30, 41.3 }
  0xc1   :  { %vm514_vm13 = vcmp.gt.f32.partialorder %v4353_v31, 41.3  ;;  %vm515_vm14 = vcmp.gt.f32.partialorder %v4361_v35, 41.3  ;;  %vm516_vm15 = vcmp.gt.f32.partialorder %v4363_v36, 41.3 }
  0xc2   :  { %vm517_vm0 = vcmp.gt.f32.partialorder %v4365_v37, 41.3  ;;  %vm518_vm10 = vcmp.gt.f32.partialorder %v4373_v41, 41.3  ;;  %vm519_vm7 = vcmp.gt.f32.partialorder %v4375_v42, 41.3 }
  0xc3   :  { %v520_v14 = vsel %vm504_vm1, 0.41666666, %v472_v25  ;;  %v521_v15 = vsel %vm505_vm2, 0.41666666, %v473_v26  ;;  %v522_v16 = vsel %vm506_vm3, 0.41666666, %v474_v27 }
  0xc4   :  { %v523_v57 = vsel %vm507_vm4, 0.41666666, %v475_v49  ;;  %v524_v18 = vsel %vm508_vm5, 0.41666666, %v476_v50  ;;  %v525_v19 = vsel %vm509_vm6, 0.41666666, %v477_v8 }
  0xc5   :  { %v526_v48 = vsel %vm510_vm8, 0.41666666, %v478_v47  ;;  %v527_v20 = vsel %vm511_vm9, 0.41666666, %v479_v46  ;;  %v528_v25 = vsel %vm512_vm11, 0.41666666, %v480_v45 }
  0xc6   :  { %v529_v26 = vsel %vm513_vm12, 0.41666666, %v481_v44  ;;  %v530_v27 = vsel %vm514_vm13, 0.41666666, %v482_v43  ;;  %v531_v49 = vsel %vm515_vm14, 0.41666666, %v483_v40 }
  0xc7   :  { %v532_v50 = vsel %vm516_vm15, 0.41666666, %v484_v51  ;;  %v533_v8 = vsel %vm517_vm0, 0.41666666, %v485_v52  ;;  %v534_v47 = vsel %vm518_vm10, 0.41666666, %v486_v53 }
  0xc8   :  { %v535_v46 = vsel %vm519_vm7, 0.41666666, %v487_v54  ;;  %v536_v45 = vsel %vm504_vm1, -61.208332, %v488_v39  ;;  %v537_v44 = vsel %vm505_vm2, -61.208332, %v489_v55 }
  0xc9   :  { %v538_v43 = vsel %vm506_vm3, -61.208332, %v490_v56  ;;  %v539_v40 = vsel %vm507_vm4, -61.208332, %v491_v58  ;;  %v540_v51 = vsel %vm508_vm5, -61.208332, %v492_v59 }
  0xca   :  { %v541_v52 = vsel %vm509_vm6, -61.208332, %v493_v60  ;;  %v542_v53 = vsel %vm510_vm8, -61.208332, %v494_v61  ;;  %v543_v54 = vsel %vm511_vm9, -61.208332, %v495_v62 }
  0xcb   :  { %v544_v39 = vsel %vm512_vm11, -61.208332, %v496_v63  ;;  %v545_v55 = vsel %vm513_vm12, -61.208332, %v497_v3  ;;  %v546_v56 = vsel %vm514_vm13, -61.208332, %v498_v5 }
  0xcc   :  { %v547_v58 = vsel %vm515_vm14, -61.208332, %v499_v6  ;;  %v548_v59 = vsel %vm516_vm15, -61.208332, %v500_v9  ;;  %v549_v60 = vsel %vm517_vm0, -61.208332, %v501_v10 }
  0xcd   :  { %v550_v61 = vsel %vm518_vm10, -61.208332, %v502_v11  ;;  %v551_v62 = vsel %vm519_vm7, -61.208332, %v503_v12  ;;  %vm552_vm1 = vcmp.gt.f32.partialorder %v4316_v0, 46.1 }
  0xce   :  { %vm553_vm2 = vcmp.gt.f32.partialorder %v4318_v1, 46.1  ;;  %vm554_vm3 = vcmp.gt.f32.partialorder %v4320_v2, 46.1  ;;  %vm555_vm4 = vcmp.gt.f32.partialorder %v4324_v4, 46.1 }
  0xcf   :  { %vm556_vm5 = vcmp.gt.f32.partialorder %v4328_v7, 46.1  ;;  %vm557_vm6 = vcmp.gt.f32.partialorder %v4341_v22, 46.1  ;;  %vm558_vm8 = vcmp.gt.f32.partialorder %v4343_v23, 46.1 }
  0xd0   :  { %vm559_vm9 = vcmp.gt.f32.partialorder %v4345_v24, 46.1  ;;  %vm560_vm11 = vcmp.gt.f32.partialorder %v4349_v29, 46.1  ;;  %vm561_vm12 = vcmp.gt.f32.partialorder %v4351_v30, 46.1 }
  0xd1   :  { %vm562_vm13 = vcmp.gt.f32.partialorder %v4353_v31, 46.1  ;;  %vm563_vm14 = vcmp.gt.f32.partialorder %v4361_v35, 46.1  ;;  %vm564_vm15 = vcmp.gt.f32.partialorder %v4363_v36, 46.1 }
  0xd2   :  { %vm565_vm0 = vcmp.gt.f32.partialorder %v4365_v37, 46.1  ;;  %vm566_vm10 = vcmp.gt.f32.partialorder %v4373_v41, 46.1  ;;  %vm567_vm7 = vcmp.gt.f32.partialorder %v4375_v42, 46.1 }
  0xd3   :  { %v5129_v63 = vsel %vm552_vm1, 0.39215687, %v520_v14  ;;  %v5133_v3 = vsel %vm553_vm2, 0.39215687, %v521_v15  ;;  %v5137_v5 = vsel %vm554_vm3, 0.39215687, %v522_v16 }
  0xd4   :  { %v5141_v6 = vsel %vm555_vm4, 0.39215687, %v523_v57  ;;  %v5145_v9 = vsel %vm556_vm5, 0.39215687, %v524_v18  ;;  %v5149_v10 = vsel %vm557_vm6, 0.39215687, %v525_v19 }
  0xd5   :  { %v5153_v11 = vsel %vm558_vm8, 0.39215687, %v526_v48  ;;  %v5157_v12 = vsel %vm559_vm9, 0.39215687, %v527_v20  ;;  %v5161_v14 = vsel %vm560_vm11, 0.39215687, %v528_v25 }
  0xd6   :  { %v5165_v15 = vsel %vm561_vm12, 0.39215687, %v529_v26  ;;  %v5169_v16 = vsel %vm562_vm13, 0.39215687, %v530_v27  ;;  %v5173_v57 = vsel %vm563_vm14, 0.39215687, %v531_v49 }
  0xd7   :  { %v5177_v18 = vsel %vm564_vm15, 0.39215687, %v532_v50  ;;  %v5181_v19 = vsel %vm565_vm0, 0.39215687, %v533_v8  ;;  %v5185_v48 = vsel %vm566_vm10, 0.39215687, %v534_v47 }
  0xd8   :  { %v5189_v20 = vsel %vm567_vm7, 0.39215687, %v535_v46  ;;  %v5193_v25 = vsel %vm552_vm1, -60.07843, %v536_v45  ;;  %v5197_v26 = vsel %vm553_vm2, -60.07843, %v537_v44 }
  0xd9   :  { %v5201_v27 = vsel %vm554_vm3, -60.07843, %v538_v43  ;;  %v5205_v49 = vsel %vm555_vm4, -60.07843, %v539_v40  ;;  %v5209_v50 = vsel %vm556_vm5, -60.07843, %v540_v51 }
  0xda   :  { %v5213_v0 = vsel %vm557_vm6, -60.07843, %v541_v52  ;;  %v5217_v1 = vsel %vm558_vm8, -60.07843, %v542_v53  ;;  %v5221_v2 = vsel %vm559_vm9, -60.07843, %v543_v54 }
  0xdb   :  { %v5225_v4 = vsel %vm560_vm11, -60.07843, %v544_v39  ;;  %v5229_v7 = vsel %vm561_vm12, -60.07843, %v545_v55  ;;  %v5233_v22 = vsel %vm562_vm13, -60.07843, %v546_v56 }
  0xdc   :  { %v5237_v23 = vsel %vm563_vm14, -60.07843, %v547_v58  ;;  %v5241_v24 = vsel %vm564_vm15, -60.07843, %v548_v59  ;;  %v5245_v29 = vsel %vm565_vm0, -60.07843, %v549_v60 }
  0xdd   :  { %v5249_v30 = vsel %vm566_vm10, -60.07843, %v550_v61  ;;  %v5253_v31 = vsel %vm567_vm7, -60.07843, %v551_v62  ;;  %v5255_v8 = vld [vmem:[#allocation7] sm:$0xff]  ;;  %v5258_v35 = vld [vmem:[#allocation7 + $0x8] sm:$0xff] }
  0xde   :  { %vm600_vm1 = vcmp.gt.f32.partialorder %v5255_v8, 51.2  ;;  %vm601_vm2 = vcmp.gt.f32.partialorder %v5258_v35, 51.2  ;;  %v5261_v36 = vld [vmem:[#allocation7 + $0x10] sm:$0xff]  ;;  %v5264_v37 = vld [vmem:[#allocation7 + $0x18] sm:$0xff] }
  0xdf   :  { %vm602_vm3 = vcmp.gt.f32.partialorder %v5261_v36, 51.2  ;;  %vm603_vm4 = vcmp.gt.f32.partialorder %v5264_v37, 51.2  ;;  %v5267_v41 = vld [vmem:[#allocation7 + $0x20] sm:$0xff]  ;;  %v5270_v42 = vld [vmem:[#allocation7 + $0x28] sm:$0xff] }
  0xe0   :  { %vm604_vm5 = vcmp.gt.f32.partialorder %v5267_v41, 51.2  ;;  %vm605_vm6 = vcmp.gt.f32.partialorder %v5270_v42, 51.2  ;;  %v5273_v47 = vld [vmem:[#allocation7 + $0x30] sm:$0xff]  ;;  %v5276_v46 = vld [vmem:[#allocation7 + $0x38] sm:$0xff] }
  0xe1   :  { %vm606_vm8 = vcmp.gt.f32.partialorder %v5273_v47, 51.2  ;;  %vm607_vm9 = vcmp.gt.f32.partialorder %v5276_v46, 51.2  ;;  %v5279_v45 = vld [vmem:[#allocation7 + $0x40] sm:$0xff]  ;;  %v5282_v44 = vld [vmem:[#allocation7 + $0x48] sm:$0xff] }
  0xe2   :  { %vm608_vm11 = vcmp.gt.f32.partialorder %v5279_v45, 51.2  ;;  %vm609_vm12 = vcmp.gt.f32.partialorder %v5282_v44, 51.2  ;;  %v5285_v43 = vld [vmem:[#allocation7 + $0x50] sm:$0xff]  ;;  %v5288_v40 = vld [vmem:[#allocation7 + $0x58] sm:$0xff] }
  0xe3   :  { %vm610_vm13 = vcmp.gt.f32.partialorder %v5285_v43, 51.2  ;;  %vm611_vm14 = vcmp.gt.f32.partialorder %v5288_v40, 51.2  ;;  %v5291_v51 = vld [vmem:[#allocation7 + $0x60] sm:$0xff]  ;;  %v5294_v52 = vld [vmem:[#allocation7 + $0x68] sm:$0xff] }
  0xe4   :  { %vm612_vm15 = vcmp.gt.f32.partialorder %v5291_v51, 51.2  ;;  %vm613_vm0 = vcmp.gt.f32.partialorder %v5294_v52, 51.2  ;;  %v5297_v53 = vld [vmem:[#allocation7 + $0x70] sm:$0xff]  ;;  %v5300_v54 = vld [vmem:[#allocation7 + $0x78] sm:$0xff] }
  0xe5   :  { %vm614_vm10 = vcmp.gt.f32.partialorder %v5297_v53, 51.2  ;;  %vm615_vm7 = vcmp.gt.f32.partialorder %v5300_v54, 51.2  ;;  %v616_v39 = vsel %vm600_vm1, 0.35714287, %v5129_v63 }
  0xe6   :  { %v617_v55 = vsel %vm601_vm2, 0.35714287, %v5133_v3  ;;  %v618_v56 = vsel %vm602_vm3, 0.35714287, %v5137_v5  ;;  %v619_v58 = vsel %vm603_vm4, 0.35714287, %v5141_v6 }
  0xe7   :  { %v620_v59 = vsel %vm604_vm5, 0.35714287, %v5145_v9  ;;  %v621_v60 = vsel %vm605_vm6, 0.35714287, %v5149_v10  ;;  %v622_v61 = vsel %vm606_vm8, 0.35714287, %v5153_v11 }
  0xe8   :  { %v623_v62 = vsel %vm607_vm9, 0.35714287, %v5157_v12  ;;  %v624_v63 = vsel %vm608_vm11, 0.35714287, %v5161_v14  ;;  %v625_v3 = vsel %vm609_vm12, 0.35714287, %v5165_v15 }
  0xe9   :  { %v626_v5 = vsel %vm610_vm13, 0.35714287, %v5169_v16  ;;  %v627_v6 = vsel %vm611_vm14, 0.35714287, %v5173_v57  ;;  %v628_v9 = vsel %vm612_vm15, 0.35714287, %v5177_v18 }
  0xea   :  { %v629_v10 = vsel %vm613_vm0, 0.35714287, %v5181_v19  ;;  %v630_v11 = vsel %vm614_vm10, 0.35714287, %v5185_v48  ;;  %v631_v12 = vsel %vm615_vm7, 0.35714287, %v5189_v20 }
  0xeb   :  { %v632_v14 = vsel %vm600_vm1, -58.285713, %v5193_v25  ;;  %v633_v15 = vsel %vm601_vm2, -58.285713, %v5197_v26  ;;  %v634_v16 = vsel %vm602_vm3, -58.285713, %v5201_v27 }
  0xec   :  { %v635_v57 = vsel %vm603_vm4, -58.285713, %v5205_v49  ;;  %v636_v18 = vsel %vm604_vm5, -58.285713, %v5209_v50  ;;  %v637_v19 = vsel %vm605_vm6, -58.285713, %v5213_v0 }
  0xed   :  { %v638_v48 = vsel %vm606_vm8, -58.285713, %v5217_v1  ;;  %v639_v20 = vsel %vm607_vm9, -58.285713, %v5221_v2  ;;  %v640_v25 = vsel %vm608_vm11, -58.285713, %v5225_v4 }
  0xee   :  { %v641_v26 = vsel %vm609_vm12, -58.285713, %v5229_v7  ;;  %v642_v27 = vsel %vm610_vm13, -58.285713, %v5233_v22  ;;  %v643_v49 = vsel %vm611_vm14, -58.285713, %v5237_v23 }
  0xef   :  { %v644_v50 = vsel %vm612_vm15, -58.285713, %v5241_v24  ;;  %v645_v0 = vsel %vm613_vm0, -58.285713, %v5245_v29  ;;  %v646_v1 = vsel %vm614_vm10, -58.285713, %v5249_v30 }
  0xf0   :  { %v647_v2 = vsel %vm615_vm7, -58.285713, %v5253_v31  ;;  %vm648_vm1 = vcmp.gt.f32.partialorder %v5255_v8, 56.8  ;;  %vm649_vm2 = vcmp.gt.f32.partialorder %v5258_v35, 56.8 }
  0xf1   :  { %vm650_vm3 = vcmp.gt.f32.partialorder %v5261_v36, 56.8  ;;  %vm651_vm4 = vcmp.gt.f32.partialorder %v5264_v37, 56.8  ;;  %vm652_vm5 = vcmp.gt.f32.partialorder %v5267_v41, 56.8 }
  0xf2   :  { %vm653_vm6 = vcmp.gt.f32.partialorder %v5270_v42, 56.8  ;;  %vm654_vm8 = vcmp.gt.f32.partialorder %v5273_v47, 56.8  ;;  %vm655_vm9 = vcmp.gt.f32.partialorder %v5276_v46, 56.8 }
  0xf3   :  { %vm656_vm11 = vcmp.gt.f32.partialorder %v5279_v45, 56.8  ;;  %vm657_vm12 = vcmp.gt.f32.partialorder %v5282_v44, 56.8  ;;  %vm658_vm13 = vcmp.gt.f32.partialorder %v5285_v43, 56.8 }
  0xf4   :  { %vm659_vm14 = vcmp.gt.f32.partialorder %v5288_v40, 56.8  ;;  %vm660_vm15 = vcmp.gt.f32.partialorder %v5291_v51, 56.8  ;;  %vm661_vm0 = vcmp.gt.f32.partialorder %v5294_v52, 56.8 }
  0xf5   :  { %vm662_vm10 = vcmp.gt.f32.partialorder %v5297_v53, 56.8  ;;  %vm663_vm7 = vcmp.gt.f32.partialorder %v5300_v54, 56.8  ;;  %v664_v4 = vsel %vm648_vm1, 0.32786885, %v616_v39 }
  0xf6   :  { %v665_v7 = vsel %vm649_vm2, 0.32786885, %v617_v55  ;;  %v666_v22 = vsel %vm650_vm3, 0.32786885, %v618_v56  ;;  %v667_v23 = vsel %vm651_vm4, 0.32786885, %v619_v58 }
  0xf7   :  { %v668_v24 = vsel %vm652_vm5, 0.32786885, %v620_v59  ;;  %v669_v29 = vsel %vm653_vm6, 0.32786885, %v621_v60  ;;  %v670_v30 = vsel %vm654_vm8, 0.32786885, %v622_v61 }
  0xf8   :  { %v671_v31 = vsel %vm655_vm9, 0.32786885, %v623_v62  ;;  %v672_v39 = vsel %vm656_vm11, 0.32786885, %v624_v63  ;;  %v673_v55 = vsel %vm657_vm12, 0.32786885, %v625_v3 }
  0xf9   :  { %v674_v56 = vsel %vm658_vm13, 0.32786885, %v626_v5  ;;  %v675_v58 = vsel %vm659_vm14, 0.32786885, %v627_v6  ;;  %v676_v59 = vsel %vm660_vm15, 0.32786885, %v628_v9 }
  0xfa   :  { %v677_v60 = vsel %vm661_vm0, 0.32786885, %v629_v10  ;;  %v678_v61 = vsel %vm662_vm10, 0.32786885, %v630_v11  ;;  %v679_v62 = vsel %vm663_vm7, 0.32786885, %v631_v12 }
  0xfb   :  { %v680_v63 = vsel %vm648_vm1, -56.62295, %v632_v14  ;;  %v681_v3 = vsel %vm649_vm2, -56.62295, %v633_v15  ;;  %v682_v5 = vsel %vm650_vm3, -56.62295, %v634_v16 }
  0xfc   :  { %v683_v6 = vsel %vm651_vm4, -56.62295, %v635_v57  ;;  %v684_v9 = vsel %vm652_vm5, -56.62295, %v636_v18  ;;  %v685_v10 = vsel %vm653_vm6, -56.62295, %v637_v19 }
  0xfd   :  { %v686_v11 = vsel %vm654_vm8, -56.62295, %v638_v48  ;;  %v687_v12 = vsel %vm655_vm9, -56.62295, %v639_v20  ;;  %v688_v14 = vsel %vm656_vm11, -56.62295, %v640_v25 }
  0xfe   :  { %v689_v15 = vsel %vm657_vm12, -56.62295, %v641_v26  ;;  %v690_v16 = vsel %vm658_vm13, -56.62295, %v642_v27  ;;  %v691_v57 = vsel %vm659_vm14, -56.62295, %v643_v49 }
  0xff   :  { %v692_v18 = vsel %vm660_vm15, -56.62295, %v644_v50  ;;  %v693_v19 = vsel %vm661_vm0, -56.62295, %v645_v0  ;;  %v694_v48 = vsel %vm662_vm10, -56.62295, %v646_v1 }
 0x100   :  { %v695_v20 = vsel %vm663_vm7, -56.62295, %v647_v2  ;;  %vm696_vm1 = vcmp.gt.f32.partialorder %v5255_v8, 62.9  ;;  %vm697_vm2 = vcmp.gt.f32.partialorder %v5258_v35, 62.9 }
 0x101   :  { %vm698_vm3 = vcmp.gt.f32.partialorder %v5261_v36, 62.9  ;;  %vm699_vm4 = vcmp.gt.f32.partialorder %v5264_v37, 62.9  ;;  %vm700_vm5 = vcmp.gt.f32.partialorder %v5267_v41, 62.9 }
 0x102   :  { %vm701_vm6 = vcmp.gt.f32.partialorder %v5270_v42, 62.9  ;;  %vm702_vm8 = vcmp.gt.f32.partialorder %v5273_v47, 62.9  ;;  %vm703_vm9 = vcmp.gt.f32.partialorder %v5276_v46, 62.9 }
 0x103   :  { %vm704_vm11 = vcmp.gt.f32.partialorder %v5279_v45, 62.9  ;;  %vm705_vm12 = vcmp.gt.f32.partialorder %v5282_v44, 62.9  ;;  %vm706_vm13 = vcmp.gt.f32.partialorder %v5285_v43, 62.9 }
 0x104   :  { %vm707_vm14 = vcmp.gt.f32.partialorder %v5288_v40, 62.9  ;;  %vm708_vm15 = vcmp.gt.f32.partialorder %v5291_v51, 62.9  ;;  %vm709_vm0 = vcmp.gt.f32.partialorder %v5294_v52, 62.9 }
 0x105   :  { %vm710_vm10 = vcmp.gt.f32.partialorder %v5297_v53, 62.9  ;;  %vm711_vm7 = vcmp.gt.f32.partialorder %v5300_v54, 62.9  ;;  %v712_v25 = vsel %vm696_vm1, 0.3030303, %v664_v4 }
 0x106   :  { %v713_v26 = vsel %vm697_vm2, 0.3030303, %v665_v7  ;;  %v714_v27 = vsel %vm698_vm3, 0.3030303, %v666_v22  ;;  %v715_v49 = vsel %vm699_vm4, 0.3030303, %v667_v23 }
 0x107   :  { %v716_v50 = vsel %vm700_vm5, 0.3030303, %v668_v24  ;;  %v717_v0 = vsel %vm701_vm6, 0.3030303, %v669_v29  ;;  %v718_v1 = vsel %vm702_vm8, 0.3030303, %v670_v30 }
 0x108   :  { %v719_v2 = vsel %vm703_vm9, 0.3030303, %v671_v31  ;;  %v720_v4 = vsel %vm704_vm11, 0.3030303, %v672_v39  ;;  %v721_v7 = vsel %vm705_vm12, 0.3030303, %v673_v55 }
 0x109   :  { %v722_v22 = vsel %vm706_vm13, 0.3030303, %v674_v56  ;;  %v723_v23 = vsel %vm707_vm14, 0.3030303, %v675_v58  ;;  %v724_v24 = vsel %vm708_vm15, 0.3030303, %v676_v59 }
 0x10a   :  { %v725_v29 = vsel %vm709_vm0, 0.3030303, %v677_v60  ;;  %v726_v30 = vsel %vm710_vm10, 0.3030303, %v678_v61  ;;  %v727_v31 = vsel %vm711_vm7, 0.3030303, %v679_v62 }
 0x10b   :  { %v728_v39 = vsel %vm696_vm1, -55.060608, %v680_v63  ;;  %v729_v55 = vsel %vm697_vm2, -55.060608, %v681_v3  ;;  %v730_v56 = vsel %vm698_vm3, -55.060608, %v682_v5 }
 0x10c   :  { %v731_v58 = vsel %vm699_vm4, -55.060608, %v683_v6  ;;  %v732_v59 = vsel %vm700_vm5, -55.060608, %v684_v9  ;;  %v733_v60 = vsel %vm701_vm6, -55.060608, %v685_v10 }
 0x10d   :  { %v734_v61 = vsel %vm702_vm8, -55.060608, %v686_v11  ;;  %v735_v62 = vsel %vm703_vm9, -55.060608, %v687_v12  ;;  %v736_v63 = vsel %vm704_vm11, -55.060608, %v688_v14 }
 0x10e   :  { %v737_v3 = vsel %vm705_vm12, -55.060608, %v689_v15  ;;  %v738_v5 = vsel %vm706_vm13, -55.060608, %v690_v16  ;;  %v739_v6 = vsel %vm707_vm14, -55.060608, %v691_v57 }
 0x10f   :  { %v740_v9 = vsel %vm708_vm15, -55.060608, %v692_v18  ;;  %v741_v10 = vsel %vm709_vm0, -55.060608, %v693_v19  ;;  %v742_v11 = vsel %vm710_vm10, -55.060608, %v694_v48 }
 0x110   :  { %v743_v12 = vsel %vm711_vm7, -55.060608, %v695_v20  ;;  %vm744_vm1 = vcmp.gt.f32.partialorder %v5255_v8, 69.5  ;;  %vm745_vm2 = vcmp.gt.f32.partialorder %v5258_v35, 69.5  ;;  %vm746_vm3 = vcmp.gt.f32.partialorder %v5261_v36, 69.5 }
 0x111   :  { %vm747_vm4 = vcmp.gt.f32.partialorder %v5264_v37, 69.5  ;;  %vm748_vm5 = vcmp.gt.f32.partialorder %v5267_v41, 69.5  ;;  %vm749_vm6 = vcmp.gt.f32.partialorder %v5270_v42, 69.5  ;;  %vm750_vm8 = vcmp.gt.f32.partialorder %v5273_v47, 69.5 }
 0x112   :  { %vm751_vm9 = vcmp.gt.f32.partialorder %v5276_v46, 69.5  ;;  %vm752_vm11 = vcmp.gt.f32.partialorder %v5279_v45, 69.5  ;;  %vm753_vm12 = vcmp.gt.f32.partialorder %v5282_v44, 69.5  ;;  %vm754_vm13 = vcmp.gt.f32.partialorder %v5285_v43, 69.5 }
 0x113   :  { %vm755_vm14 = vcmp.gt.f32.partialorder %v5288_v40, 69.5  ;;  %vm756_vm15 = vcmp.gt.f32.partialorder %v5291_v51, 69.5  ;;  %vm757_vm0 = vcmp.gt.f32.partialorder %v5294_v52, 69.5  ;;  %vm758_vm10 = vcmp.gt.f32.partialorder %v5297_v53, 69.5 }
 0x114   :  { %vm759_vm7 = vcmp.gt.f32.partialorder %v5300_v54, 69.5  ;;  %v760_v14 = vsel %vm744_vm1, 0.2777778, %v712_v25  ;;  %v761_v15 = vsel %vm745_vm2, 0.2777778, %v713_v26 }
 0x115   :  { %v762_v16 = vsel %vm746_vm3, 0.2777778, %v714_v27  ;;  %v763_v57 = vsel %vm747_vm4, 0.2777778, %v715_v49  ;;  %v764_v18 = vsel %vm748_vm5, 0.2777778, %v716_v50 }
 0x116   :  { %v765_v19 = vsel %vm749_vm6, 0.2777778, %v717_v0  ;;  %v766_v48 = vsel %vm750_vm8, 0.2777778, %v718_v1  ;;  %v767_v20 = vsel %vm751_vm9, 0.2777778, %v719_v2 }
 0x117   :  { %v768_v25 = vsel %vm752_vm11, 0.2777778, %v720_v4  ;;  %v769_v26 = vsel %vm753_vm12, 0.2777778, %v721_v7  ;;  %v770_v27 = vsel %vm754_vm13, 0.2777778, %v722_v22 }
 0x118   :  { %v771_v49 = vsel %vm755_vm14, 0.2777778, %v723_v23  ;;  %v772_v50 = vsel %vm756_vm15, 0.2777778, %v724_v24  ;;  %v773_v0 = vsel %vm757_vm0, 0.2777778, %v725_v29 }
 0x119   :  { %v774_v1 = vsel %vm758_vm10, 0.2777778, %v726_v30  ;;  %v775_v2 = vsel %vm759_vm7, 0.2777778, %v727_v31  ;;  %v776_v4 = vsel %vm744_vm1, -53.305557, %v728_v39 }
 0x11a   :  { %v777_v7 = vsel %vm745_vm2, -53.305557, %v729_v55  ;;  %v778_v22 = vsel %vm746_vm3, -53.305557, %v730_v56  ;;  %v779_v23 = vsel %vm747_vm4, -53.305557, %v731_v58 }
 0x11b   :  { %v780_v24 = vsel %vm748_vm5, -53.305557, %v732_v59  ;;  %v781_v29 = vsel %vm749_vm6, -53.305557, %v733_v60  ;;  %v782_v30 = vsel %vm750_vm8, -53.305557, %v734_v61 }
 0x11c   :  { %v783_v31 = vsel %vm751_vm9, -53.305557, %v735_v62  ;;  %v784_v39 = vsel %vm752_vm11, -53.305557, %v736_v63  ;;  %v785_v55 = vsel %vm753_vm12, -53.305557, %v737_v3 }
 0x11d   :  { %v786_v56 = vsel %vm754_vm13, -53.305557, %v738_v5  ;;  %v787_v58 = vsel %vm755_vm14, -53.305557, %v739_v6  ;;  %v788_v59 = vsel %vm756_vm15, -53.305557, %v740_v9 }
 0x11e   :  { %v789_v60 = vsel %vm757_vm0, -53.305557, %v741_v10  ;;  %v790_v61 = vsel %vm758_vm10, -53.305557, %v742_v11  ;;  %v791_v62 = vsel %vm759_vm7, -53.305557, %v743_v12 }
 0x11f   :  { %vm792_vm1 = vcmp.gt.f32.partialorder %v5255_v8, 76.7  ;;  %vm793_vm2 = vcmp.gt.f32.partialorder %v5258_v35, 76.7  ;;  %vm794_vm3 = vcmp.gt.f32.partialorder %v5261_v36, 76.7 }
 0x120   :  { %vm795_vm4 = vcmp.gt.f32.partialorder %v5264_v37, 76.7  ;;  %vm796_vm5 = vcmp.gt.f32.partialorder %v5267_v41, 76.7  ;;  %vm797_vm6 = vcmp.gt.f32.partialorder %v5270_v42, 76.7 }
 0x121   :  { %vm798_vm8 = vcmp.gt.f32.partialorder %v5273_v47, 76.7  ;;  %vm799_vm9 = vcmp.gt.f32.partialorder %v5276_v46, 76.7  ;;  %vm800_vm11 = vcmp.gt.f32.partialorder %v5279_v45, 76.7 }
 0x122   :  { %vm801_vm12 = vcmp.gt.f32.partialorder %v5282_v44, 76.7  ;;  %vm802_vm13 = vcmp.gt.f32.partialorder %v5285_v43, 76.7  ;;  %vm803_vm14 = vcmp.gt.f32.partialorder %v5288_v40, 76.7 }
 0x123   :  { %vm804_vm15 = vcmp.gt.f32.partialorder %v5291_v51, 76.7  ;;  %vm805_vm0 = vcmp.gt.f32.partialorder %v5294_v52, 76.7  ;;  %vm806_vm10 = vcmp.gt.f32.partialorder %v5297_v53, 76.7 }
 0x124   :  { %vm807_vm7 = vcmp.gt.f32.partialorder %v5300_v54, 76.7  ;;  %v808_v63 = vsel %vm792_vm1, 0.25974026, %v760_v14  ;;  %v809_v3 = vsel %vm793_vm2, 0.25974026, %v761_v15 }
 0x125   :  { %v810_v5 = vsel %vm794_vm3, 0.25974026, %v762_v16  ;;  %v811_v6 = vsel %vm795_vm4, 0.25974026, %v763_v57  ;;  %v812_v9 = vsel %vm796_vm5, 0.25974026, %v764_v18 }
 0x126   :  { %v813_v10 = vsel %vm797_vm6, 0.25974026, %v765_v19  ;;  %v814_v11 = vsel %vm798_vm8, 0.25974026, %v766_v48  ;;  %v815_v12 = vsel %vm799_vm9, 0.25974026, %v767_v20 }
 0x127   :  { %v816_v14 = vsel %vm800_vm11, 0.25974026, %v768_v25  ;;  %v817_v15 = vsel %vm801_vm12, 0.25974026, %v769_v26  ;;  %v818_v16 = vsel %vm802_vm13, 0.25974026, %v770_v27 }
 0x128   :  { %v819_v57 = vsel %vm803_vm14, 0.25974026, %v771_v49  ;;  %v820_v18 = vsel %vm804_vm15, 0.25974026, %v772_v50  ;;  %v821_v19 = vsel %vm805_vm0, 0.25974026, %v773_v0 }
 0x129   :  { %v822_v48 = vsel %vm806_vm10, 0.25974026, %v774_v1  ;;  %v823_v20 = vsel %vm807_vm7, 0.25974026, %v775_v2  ;;  %v824_v25 = vsel %vm792_vm1, -51.922077, %v776_v4 }
 0x12a   :  { %v825_v26 = vsel %vm793_vm2, -51.922077, %v777_v7  ;;  %v826_v27 = vsel %vm794_vm3, -51.922077, %v778_v22  ;;  %v827_v49 = vsel %vm795_vm4, -51.922077, %v779_v23 }
 0x12b   :  { %v828_v50 = vsel %vm796_vm5, -51.922077, %v780_v24  ;;  %v829_v0 = vsel %vm797_vm6, -51.922077, %v781_v29  ;;  %v830_v1 = vsel %vm798_vm8, -51.922077, %v782_v30 }
 0x12c   :  { %v831_v2 = vsel %vm799_vm9, -51.922077, %v783_v31  ;;  %v832_v4 = vsel %vm800_vm11, -51.922077, %v784_v39  ;;  %v833_v7 = vsel %vm801_vm12, -51.922077, %v785_v55 }
 0x12d   :  { %v834_v22 = vsel %vm802_vm13, -51.922077, %v786_v56  ;;  %v835_v23 = vsel %vm803_vm14, -51.922077, %v787_v58  ;;  %v836_v24 = vsel %vm804_vm15, -51.922077, %v788_v59 }
 0x12e   :  { %v837_v29 = vsel %vm805_vm0, -51.922077, %v789_v60  ;;  %v838_v30 = vsel %vm806_vm10, -51.922077, %v790_v61  ;;  %v839_v31 = vsel %vm807_vm7, -51.922077, %v791_v62 }
 0x12f   :  { %vm840_vm1 = vcmp.gt.f32.partialorder %v5255_v8, 84.4  ;;  %vm841_vm2 = vcmp.gt.f32.partialorder %v5258_v35, 84.4  ;;  %vm842_vm3 = vcmp.gt.f32.partialorder %v5261_v36, 84.4 }
 0x130   :  { %vm843_vm4 = vcmp.gt.f32.partialorder %v5264_v37, 84.4  ;;  %vm844_vm5 = vcmp.gt.f32.partialorder %v5267_v41, 84.4  ;;  %vm845_vm6 = vcmp.gt.f32.partialorder %v5270_v42, 84.4 }
 0x131   :  { %vm846_vm8 = vcmp.gt.f32.partialorder %v5273_v47, 84.4  ;;  %vm847_vm9 = vcmp.gt.f32.partialorder %v5276_v46, 84.4  ;;  %vm848_vm11 = vcmp.gt.f32.partialorder %v5279_v45, 84.4 }
 0x132   :  { %vm849_vm12 = vcmp.gt.f32.partialorder %v5282_v44, 84.4  ;;  %vm850_vm13 = vcmp.gt.f32.partialorder %v5285_v43, 84.4  ;;  %vm851_vm14 = vcmp.gt.f32.partialorder %v5288_v40, 84.4 }
 0x133   :  { %vm852_vm15 = vcmp.gt.f32.partialorder %v5291_v51, 84.4  ;;  %vm853_vm0 = vcmp.gt.f32.partialorder %v5294_v52, 84.4  ;;  %vm854_vm10 = vcmp.gt.f32.partialorder %v5297_v53, 84.4 }
 0x134   :  { %vm855_vm7 = vcmp.gt.f32.partialorder %v5300_v54, 84.4  ;;  %v856_v39 = vsel %vm840_vm1, 0.24096386, %v808_v63  ;;  %v857_v55 = vsel %vm841_vm2, 0.24096386, %v809_v3 }
 0x135   :  { %v858_v56 = vsel %vm842_vm3, 0.24096386, %v810_v5  ;;  %v859_v58 = vsel %vm843_vm4, 0.24096386, %v811_v6  ;;  %v860_v59 = vsel %vm844_vm5, 0.24096386, %v812_v9 }
 0x136   :  { %v861_v60 = vsel %vm845_vm6, 0.24096386, %v813_v10  ;;  %v862_v61 = vsel %vm846_vm8, 0.24096386, %v814_v11  ;;  %v863_v62 = vsel %vm847_vm9, 0.24096386, %v815_v12 }
 0x137   :  { %v864_v63 = vsel %vm848_vm11, 0.24096386, %v816_v14  ;;  %v865_v3 = vsel %vm849_vm12, 0.24096386, %v817_v15  ;;  %v866_v5 = vsel %vm850_vm13, 0.24096386, %v818_v16 }
 0x138   :  { %v867_v6 = vsel %vm851_vm14, 0.24096386, %v819_v57  ;;  %v868_v9 = vsel %vm852_vm15, 0.24096386, %v820_v18  ;;  %v869_v10 = vsel %vm853_vm0, 0.24096386, %v821_v19 }
 0x139   :  { %v870_v11 = vsel %vm854_vm10, 0.24096386, %v822_v48  ;;  %v871_v12 = vsel %vm855_vm7, 0.24096386, %v823_v20  ;;  %v872_v14 = vsel %vm840_vm1, -50.33735, %v824_v25 }
 0x13a   :  { %v873_v15 = vsel %vm841_vm2, -50.33735, %v825_v26  ;;  %v874_v16 = vsel %vm842_vm3, -50.33735, %v826_v27  ;;  %v875_v57 = vsel %vm843_vm4, -50.33735, %v827_v49 }
 0x13b   :  { %v876_v18 = vsel %vm844_vm5, -50.33735, %v828_v50  ;;  %v877_v19 = vsel %vm845_vm6, -50.33735, %v829_v0  ;;  %v878_v48 = vsel %vm846_vm8, -50.33735, %v830_v1 }
 0x13c   :  { %v879_v20 = vsel %vm847_vm9, -50.33735, %v831_v2  ;;  %v880_v25 = vsel %vm848_vm11, -50.33735, %v832_v4  ;;  %v881_v26 = vsel %vm849_vm12, -50.33735, %v833_v7 }
 0x13d   :  { %v882_v27 = vsel %vm850_vm13, -50.33735, %v834_v22  ;;  %v883_v49 = vsel %vm851_vm14, -50.33735, %v835_v23  ;;  %v884_v50 = vsel %vm852_vm15, -50.33735, %v836_v24 }
 0x13e   :  { %v885_v0 = vsel %vm853_vm0, -50.33735, %v837_v29  ;;  %v886_v1 = vsel %vm854_vm10, -50.33735, %v838_v30  ;;  %v887_v2 = vsel %vm855_vm7, -50.33735, %v839_v31 }
 0x13f   :  { %vm888_vm1 = vcmp.gt.f32.partialorder %v5255_v8, 92.7  ;;  %vm889_vm2 = vcmp.gt.f32.partialorder %v5258_v35, 92.7  ;;  %vm890_vm3 = vcmp.gt.f32.partialorder %v5261_v36, 92.7 }
 0x140   :  { %vm891_vm4 = vcmp.gt.f32.partialorder %v5264_v37, 92.7  ;;  %vm892_vm5 = vcmp.gt.f32.partialorder %v5267_v41, 92.7  ;;  %vm893_vm6 = vcmp.gt.f32.partialorder %v5270_v42, 92.7 }
 0x141   :  { %vm894_vm8 = vcmp.gt.f32.partialorder %v5273_v47, 92.7  ;;  %vm895_vm9 = vcmp.gt.f32.partialorder %v5276_v46, 92.7  ;;  %vm896_vm11 = vcmp.gt.f32.partialorder %v5279_v45, 92.7 }
 0x142   :  { %vm897_vm12 = vcmp.gt.f32.partialorder %v5282_v44, 92.7  ;;  %vm898_vm13 = vcmp.gt.f32.partialorder %v5285_v43, 92.7  ;;  %vm899_vm14 = vcmp.gt.f32.partialorder %v5288_v40, 92.7 }
 0x143   :  { %vm900_vm15 = vcmp.gt.f32.partialorder %v5291_v51, 92.7  ;;  %vm901_vm0 = vcmp.gt.f32.partialorder %v5294_v52, 92.7  ;;  %vm902_vm10 = vcmp.gt.f32.partialorder %v5297_v53, 92.7 }
 0x144   :  { %vm903_vm7 = vcmp.gt.f32.partialorder %v5300_v54, 92.7  ;;  %v904_v4 = vsel %vm888_vm1, 0.22222222, %v856_v39  ;;  %v905_v7 = vsel %vm889_vm2, 0.22222222, %v857_v55 }
 0x145   :  { %v906_v22 = vsel %vm890_vm3, 0.22222222, %v858_v56  ;;  %v907_v23 = vsel %vm891_vm4, 0.22222222, %v859_v58  ;;  %v908_v24 = vsel %vm892_vm5, 0.22222222, %v860_v59 }
 0x146   :  { %v909_v29 = vsel %vm893_vm6, 0.22222222, %v861_v60  ;;  %v910_v30 = vsel %vm894_vm8, 0.22222222, %v862_v61  ;;  %v911_v31 = vsel %vm895_vm9, 0.22222222, %v863_v62 }
 0x147   :  { %v912_v39 = vsel %vm896_vm11, 0.22222222, %v864_v63  ;;  %v913_v55 = vsel %vm897_vm12, 0.22222222, %v865_v3  ;;  %v914_v56 = vsel %vm898_vm13, 0.22222222, %v866_v5 }
 0x148   :  { %v915_v58 = vsel %vm899_vm14, 0.22222222, %v867_v6  ;;  %v916_v59 = vsel %vm900_vm15, 0.22222222, %v868_v9  ;;  %v917_v60 = vsel %vm901_vm0, 0.22222222, %v869_v10 }
 0x149   :  { %v918_v61 = vsel %vm902_vm10, 0.22222222, %v870_v11  ;;  %v919_v62 = vsel %vm903_vm7, 0.22222222, %v871_v12  ;;  %v920_v63 = vsel %vm888_vm1, -48.6, %v872_v14 }
 0x14a   :  { %v921_v3 = vsel %vm889_vm2, -48.6, %v873_v15  ;;  %v922_v5 = vsel %vm890_vm3, -48.6, %v874_v16  ;;  %v923_v6 = vsel %vm891_vm4, -48.6, %v875_v57 }
 0x14b   :  { %v924_v9 = vsel %vm892_vm5, -48.6, %v876_v18  ;;  %v925_v10 = vsel %vm893_vm6, -48.6, %v877_v19  ;;  %v926_v11 = vsel %vm894_vm8, -48.6, %v878_v48 }
 0x14c   :  { %v927_v12 = vsel %vm895_vm9, -48.6, %v879_v20  ;;  %v928_v14 = vsel %vm896_vm11, -48.6, %v880_v25  ;;  %v929_v15 = vsel %vm897_vm12, -48.6, %v881_v26 }
 0x14d   :  { %v930_v16 = vsel %vm898_vm13, -48.6, %v882_v27  ;;  %v931_v57 = vsel %vm899_vm14, -48.6, %v883_v49  ;;  %v932_v18 = vsel %vm900_vm15, -48.6, %v884_v50 }
 0x14e   :  { %v933_v19 = vsel %vm901_vm0, -48.6, %v885_v0  ;;  %v934_v48 = vsel %vm902_vm10, -48.6, %v886_v1  ;;  %v935_v20 = vsel %vm903_vm7, -48.6, %v887_v2 }
 0x14f   :  { %vm936_vm1 = vcmp.gt.f32.partialorder %v5255_v8, 101.7  ;;  %vm937_vm2 = vcmp.gt.f32.partialorder %v5258_v35, 101.7  ;;  %vm938_vm3 = vcmp.gt.f32.partialorder %v5261_v36, 101.7 }
 0x150   :  { %vm939_vm4 = vcmp.gt.f32.partialorder %v5264_v37, 101.7  ;;  %vm940_vm5 = vcmp.gt.f32.partialorder %v5267_v41, 101.7  ;;  %vm941_vm6 = vcmp.gt.f32.partialorder %v5270_v42, 101.7 }
 0x151   :  { %vm942_vm8 = vcmp.gt.f32.partialorder %v5273_v47, 101.7  ;;  %vm943_vm9 = vcmp.gt.f32.partialorder %v5276_v46, 101.7  ;;  %vm944_vm11 = vcmp.gt.f32.partialorder %v5279_v45, 101.7 }
 0x152   :  { %vm945_vm12 = vcmp.gt.f32.partialorder %v5282_v44, 101.7  ;;  %vm946_vm13 = vcmp.gt.f32.partialorder %v5285_v43, 101.7  ;;  %vm947_vm14 = vcmp.gt.f32.partialorder %v5288_v40, 101.7 }
 0x153   :  { %vm948_vm15 = vcmp.gt.f32.partialorder %v5291_v51, 101.7  ;;  %vm949_vm0 = vcmp.gt.f32.partialorder %v5294_v52, 101.7  ;;  %vm950_vm10 = vcmp.gt.f32.partialorder %v5297_v53, 101.7 }
 0x154   :  { %vm951_vm7 = vcmp.gt.f32.partialorder %v5300_v54, 101.7  ;;  %v952_v25 = vsel %vm936_vm1, 0.20833333, %v904_v4  ;;  %v953_v26 = vsel %vm937_vm2, 0.20833333, %v905_v7 }
 0x155   :  { %v954_v27 = vsel %vm938_vm3, 0.20833333, %v906_v22  ;;  %v955_v49 = vsel %vm939_vm4, 0.20833333, %v907_v23  ;;  %v956_v50 = vsel %vm940_vm5, 0.20833333, %v908_v24 }
 0x156   :  { %v957_v0 = vsel %vm941_vm6, 0.20833333, %v909_v29  ;;  %v958_v1 = vsel %vm942_vm8, 0.20833333, %v910_v30  ;;  %v959_v2 = vsel %vm943_vm9, 0.20833333, %v911_v31 }
 0x157   :  { %v960_v4 = vsel %vm944_vm11, 0.20833333, %v912_v39  ;;  %v961_v7 = vsel %vm945_vm12, 0.20833333, %v913_v55  ;;  %v962_v22 = vsel %vm946_vm13, 0.20833333, %v914_v56 }
 0x158   :  { %v963_v23 = vsel %vm947_vm14, 0.20833333, %v915_v58  ;;  %v964_v24 = vsel %vm948_vm15, 0.20833333, %v916_v59  ;;  %v965_v29 = vsel %vm949_vm0, 0.20833333, %v917_v60 }
 0x159   :  { %v966_v30 = vsel %vm950_vm10, 0.20833333, %v918_v61  ;;  %v967_v31 = vsel %vm951_vm7, 0.20833333, %v919_v62  ;;  %v968_v39 = vsel %vm936_vm1, -47.1875, %v920_v63  ;;  %v969_v55 = vsel %vm937_vm2, -47.1875, %v921_v3 }
 0x15a   :  { %v970_v56 = vsel %vm938_vm3, -47.1875, %v922_v5  ;;  %v971_v58 = vsel %vm939_vm4, -47.1875, %v923_v6  ;;  %v972_v59 = vsel %vm940_vm5, -47.1875, %v924_v9  ;;  %v973_v60 = vsel %vm941_vm6, -47.1875, %v925_v10 }
 0x15b   :  { %v974_v61 = vsel %vm942_vm8, -47.1875, %v926_v11  ;;  %v975_v62 = vsel %vm943_vm9, -47.1875, %v927_v12  ;;  %v976_v63 = vsel %vm944_vm11, -47.1875, %v928_v14  ;;  %v977_v3 = vsel %vm945_vm12, -47.1875, %v929_v15 }
 0x15c   :  { %v978_v5 = vsel %vm946_vm13, -47.1875, %v930_v16  ;;  %v979_v6 = vsel %vm947_vm14, -47.1875, %v931_v57  ;;  %v980_v9 = vsel %vm948_vm15, -47.1875, %v932_v18  ;;  %v981_v10 = vsel %vm949_vm0, -47.1875, %v933_v19 }
 0x15d   :  { %v982_v11 = vsel %vm950_vm10, -47.1875, %v934_v48  ;;  %v983_v12 = vsel %vm951_vm7, -47.1875, %v935_v20  ;;  %vm984_vm1 = vcmp.gt.f32.partialorder %v5255_v8, 111.3  ;;  %vm985_vm2 = vcmp.gt.f32.partialorder %v5258_v35, 111.3 }
 0x15e   :  { %vm986_vm3 = vcmp.gt.f32.partialorder %v5261_v36, 111.3  ;;  %vm987_vm4 = vcmp.gt.f32.partialorder %v5264_v37, 111.3  ;;  %vm988_vm5 = vcmp.gt.f32.partialorder %v5267_v41, 111.3 }
 0x15f   :  { %vm989_vm6 = vcmp.gt.f32.partialorder %v5270_v42, 111.3  ;;  %vm990_vm8 = vcmp.gt.f32.partialorder %v5273_v47, 111.3  ;;  %vm991_vm9 = vcmp.gt.f32.partialorder %v5276_v46, 111.3 }
 0x160   :  { %vm992_vm11 = vcmp.gt.f32.partialorder %v5279_v45, 111.3  ;;  %vm993_vm12 = vcmp.gt.f32.partialorder %v5282_v44, 111.3  ;;  %vm994_vm13 = vcmp.gt.f32.partialorder %v5285_v43, 111.3 }
 0x161   :  { %vm995_vm14 = vcmp.gt.f32.partialorder %v5288_v40, 111.3  ;;  %vm996_vm15 = vcmp.gt.f32.partialorder %v5291_v51, 111.3  ;;  %vm997_vm0 = vcmp.gt.f32.partialorder %v5294_v52, 111.3 }
 0x162   :  { %vm998_vm10 = vcmp.gt.f32.partialorder %v5297_v53, 111.3  ;;  %vm999_vm7 = vcmp.gt.f32.partialorder %v5300_v54, 111.3  ;;  %v1000_v14 = vsel %vm984_vm1, 0.19417475, %v952_v25 }
 0x163   :  { %v1001_v15 = vsel %vm985_vm2, 0.19417475, %v953_v26  ;;  %v1002_v16 = vsel %vm986_vm3, 0.19417475, %v954_v27  ;;  %v1003_v57 = vsel %vm987_vm4, 0.19417475, %v955_v49 }
 0x164   :  { %v1004_v18 = vsel %vm988_vm5, 0.19417475, %v956_v50  ;;  %v1005_v19 = vsel %vm989_vm6, 0.19417475, %v957_v0  ;;  %v1006_v48 = vsel %vm990_vm8, 0.19417475, %v958_v1 }
 0x165   :  { %v1007_v20 = vsel %vm991_vm9, 0.19417475, %v959_v2  ;;  %v1008_v25 = vsel %vm992_vm11, 0.19417475, %v960_v4  ;;  %v1009_v26 = vsel %vm993_vm12, 0.19417475, %v961_v7 }
 0x166   :  { %v1010_v27 = vsel %vm994_vm13, 0.19417475, %v962_v22  ;;  %v1011_v49 = vsel %vm995_vm14, 0.19417475, %v963_v23  ;;  %v1012_v50 = vsel %vm996_vm15, 0.19417475, %v964_v24 }
 0x167   :  { %v1013_v0 = vsel %vm997_vm0, 0.19417475, %v965_v29  ;;  %v1014_v1 = vsel %vm998_vm10, 0.19417475, %v966_v30  ;;  %v1015_v2 = vsel %vm999_vm7, 0.19417475, %v967_v31 }
 0x168   :  { %v1016_v4 = vsel %vm984_vm1, -45.611652, %v968_v39  ;;  %v1017_v7 = vsel %vm985_vm2, -45.611652, %v969_v55  ;;  %v1018_v22 = vsel %vm986_vm3, -45.611652, %v970_v56 }
 0x169   :  { %v1019_v23 = vsel %vm987_vm4, -45.611652, %v971_v58  ;;  %v1020_v24 = vsel %vm988_vm5, -45.611652, %v972_v59  ;;  %v1021_v29 = vsel %vm989_vm6, -45.611652, %v973_v60 }
 0x16a   :  { %v1022_v30 = vsel %vm990_vm8, -45.611652, %v974_v61  ;;  %v1023_v31 = vsel %vm991_vm9, -45.611652, %v975_v62  ;;  %v1024_v39 = vsel %vm992_vm11, -45.611652, %v976_v63 }
 0x16b   :  { %v1025_v55 = vsel %vm993_vm12, -45.611652, %v977_v3  ;;  %v1026_v56 = vsel %vm994_vm13, -45.611652, %v978_v5  ;;  %v1027_v58 = vsel %vm995_vm14, -45.611652, %v979_v6 }
 0x16c   :  { %v1028_v59 = vsel %vm996_vm15, -45.611652, %v980_v9  ;;  %v1029_v60 = vsel %vm997_vm0, -45.611652, %v981_v10  ;;  %v1030_v61 = vsel %vm998_vm10, -45.611652, %v982_v11 }
 0x16d   :  { %v1031_v62 = vsel %vm999_vm7, -45.611652, %v983_v12  ;;  %vm1032_vm1 = vcmp.gt.f32.partialorder %v5255_v8, 121.6  ;;  %vm1033_vm2 = vcmp.gt.f32.partialorder %v5258_v35, 121.6 }
 0x16e   :  { %vm1034_vm3 = vcmp.gt.f32.partialorder %v5261_v36, 121.6  ;;  %vm1035_vm4 = vcmp.gt.f32.partialorder %v5264_v37, 121.6  ;;  %vm1036_vm5 = vcmp.gt.f32.partialorder %v5267_v41, 121.6 }
 0x16f   :  { %vm1037_vm6 = vcmp.gt.f32.partialorder %v5270_v42, 121.6  ;;  %vm1038_vm8 = vcmp.gt.f32.partialorder %v5273_v47, 121.6  ;;  %vm1039_vm9 = vcmp.gt.f32.partialorder %v5276_v46, 121.6 }
 0x170   :  { %vm1040_vm11 = vcmp.gt.f32.partialorder %v5279_v45, 121.6  ;;  %vm1041_vm12 = vcmp.gt.f32.partialorder %v5282_v44, 121.6  ;;  %vm1042_vm13 = vcmp.gt.f32.partialorder %v5285_v43, 121.6 }
 0x171   :  { %vm1043_vm14 = vcmp.gt.f32.partialorder %v5288_v40, 121.6  ;;  %vm1044_vm15 = vcmp.gt.f32.partialorder %v5291_v51, 121.6  ;;  %vm1045_vm0 = vcmp.gt.f32.partialorder %v5294_v52, 121.6 }
 0x172   :  { %vm1046_vm10 = vcmp.gt.f32.partialorder %v5297_v53, 121.6  ;;  %vm1047_vm7 = vcmp.gt.f32.partialorder %v5300_v54, 121.6  ;;  %v1048_v63 = vsel %vm1032_vm1, 0.18018018, %v1000_v14 }
 0x173   :  { %v1049_v3 = vsel %vm1033_vm2, 0.18018018, %v1001_v15  ;;  %v1050_v5 = vsel %vm1034_vm3, 0.18018018, %v1002_v16  ;;  %v1051_v6 = vsel %vm1035_vm4, 0.18018018, %v1003_v57 }
 0x174   :  { %v1052_v9 = vsel %vm1036_vm5, 0.18018018, %v1004_v18  ;;  %v1053_v10 = vsel %vm1037_vm6, 0.18018018, %v1005_v19  ;;  %v1054_v11 = vsel %vm1038_vm8, 0.18018018, %v1006_v48 }
 0x175   :  { %v1055_v12 = vsel %vm1039_vm9, 0.18018018, %v1007_v20  ;;  %v1056_v14 = vsel %vm1040_vm11, 0.18018018, %v1008_v25  ;;  %v1057_v15 = vsel %vm1041_vm12, 0.18018018, %v1009_v26 }
 0x176   :  { %v1058_v16 = vsel %vm1042_vm13, 0.18018018, %v1010_v27  ;;  %v1059_v57 = vsel %vm1043_vm14, 0.18018018, %v1011_v49  ;;  %v1060_v18 = vsel %vm1044_vm15, 0.18018018, %v1012_v50 }
 0x177   :  { %v1061_v19 = vsel %vm1045_vm0, 0.18018018, %v1013_v0  ;;  %v1062_v48 = vsel %vm1046_vm10, 0.18018018, %v1014_v1  ;;  %v1063_v20 = vsel %vm1047_vm7, 0.18018018, %v1015_v2 }
 0x178   :  { %v1064_v25 = vsel %vm1032_vm1, -43.90991, %v1016_v4  ;;  %v1065_v26 = vsel %vm1033_vm2, -43.90991, %v1017_v7  ;;  %v1066_v27 = vsel %vm1034_vm3, -43.90991, %v1018_v22 }
 0x179   :  { %v1067_v49 = vsel %vm1035_vm4, -43.90991, %v1019_v23  ;;  %v1068_v50 = vsel %vm1036_vm5, -43.90991, %v1020_v24  ;;  %v1069_v0 = vsel %vm1037_vm6, -43.90991, %v1021_v29 }
 0x17a   :  { %v1070_v1 = vsel %vm1038_vm8, -43.90991, %v1022_v30  ;;  %v1071_v2 = vsel %vm1039_vm9, -43.90991, %v1023_v31  ;;  %v1072_v4 = vsel %vm1040_vm11, -43.90991, %v1024_v39 }
 0x17b   :  { %v1073_v7 = vsel %vm1041_vm12, -43.90991, %v1025_v55  ;;  %v1074_v22 = vsel %vm1042_vm13, -43.90991, %v1026_v56  ;;  %v1075_v23 = vsel %vm1043_vm14, -43.90991, %v1027_v58 }
 0x17c   :  { %v1076_v24 = vsel %vm1044_vm15, -43.90991, %v1028_v59  ;;  %v1077_v29 = vsel %vm1045_vm0, -43.90991, %v1029_v60  ;;  %v1078_v30 = vsel %vm1046_vm10, -43.90991, %v1030_v61 }
 0x17d   :  { %v1079_v31 = vsel %vm1047_vm7, -43.90991, %v1031_v62  ;;  %vm1080_vm1 = vcmp.gt.f32.partialorder %v5255_v8, 132.7  ;;  %vm1081_vm2 = vcmp.gt.f32.partialorder %v5258_v35, 132.7 }
 0x17e   :  { %vm1082_vm3 = vcmp.gt.f32.partialorder %v5261_v36, 132.7  ;;  %vm1083_vm4 = vcmp.gt.f32.partialorder %v5264_v37, 132.7  ;;  %vm1084_vm5 = vcmp.gt.f32.partialorder %v5267_v41, 132.7 }
 0x17f   :  { %vm1085_vm6 = vcmp.gt.f32.partialorder %v5270_v42, 132.7  ;;  %vm1086_vm8 = vcmp.gt.f32.partialorder %v5273_v47, 132.7  ;;  %vm1087_vm9 = vcmp.gt.f32.partialorder %v5276_v46, 132.7 }
 0x180   :  { %vm1088_vm11 = vcmp.gt.f32.partialorder %v5279_v45, 132.7  ;;  %vm1089_vm12 = vcmp.gt.f32.partialorder %v5282_v44, 132.7  ;;  %vm1090_vm13 = vcmp.gt.f32.partialorder %v5285_v43, 132.7 }
 0x181   :  { %vm1091_vm14 = vcmp.gt.f32.partialorder %v5288_v40, 132.7  ;;  %vm1092_vm15 = vcmp.gt.f32.partialorder %v5291_v51, 132.7  ;;  %vm1093_vm0 = vcmp.gt.f32.partialorder %v5294_v52, 132.7 }
 0x182   :  { %vm1094_vm10 = vcmp.gt.f32.partialorder %v5297_v53, 132.7  ;;  %vm1095_vm7 = vcmp.gt.f32.partialorder %v5300_v54, 132.7  ;;  %v6137_v39 = vsel %vm1080_vm1, 0.16806723, %v1048_v63 }
 0x183   :  { %v6141_v55 = vsel %vm1081_vm2, 0.16806723, %v1049_v3  ;;  %v6145_v56 = vsel %vm1082_vm3, 0.16806723, %v1050_v5  ;;  %v6149_v58 = vsel %vm1083_vm4, 0.16806723, %v1051_v6 }
 0x184   :  { %v6153_v59 = vsel %vm1084_vm5, 0.16806723, %v1052_v9  ;;  %v6157_v60 = vsel %vm1085_vm6, 0.16806723, %v1053_v10  ;;  %v6161_v61 = vsel %vm1086_vm8, 0.16806723, %v1054_v11 }
 0x185   :  { %v6165_v62 = vsel %vm1087_vm9, 0.16806723, %v1055_v12  ;;  %v6169_v63 = vsel %vm1088_vm11, 0.16806723, %v1056_v14  ;;  %v6173_v3 = vsel %vm1089_vm12, 0.16806723, %v1057_v15 }
 0x186   :  { %v6177_v5 = vsel %vm1090_vm13, 0.16806723, %v1058_v16  ;;  %v6181_v6 = vsel %vm1091_vm14, 0.16806723, %v1059_v57  ;;  %v6185_v9 = vsel %vm1092_vm15, 0.16806723, %v1060_v18 }
 0x187   :  { %v6189_v10 = vsel %vm1093_vm0, 0.16806723, %v1061_v19  ;;  %v6193_v11 = vsel %vm1094_vm10, 0.16806723, %v1062_v48  ;;  %v6197_v12 = vsel %vm1095_vm7, 0.16806723, %v1063_v20 }
 0x188   :  { %v6201_v14 = vsel %vm1080_vm1, -42.30252, %v1064_v25  ;;  %v6205_v15 = vsel %vm1081_vm2, -42.30252, %v1065_v26  ;;  %v6209_v16 = vsel %vm1082_vm3, -42.30252, %v1066_v27 }
 0x189   :  { %v6213_v57 = vsel %vm1083_vm4, -42.30252, %v1067_v49  ;;  %v6217_v18 = vsel %vm1084_vm5, -42.30252, %v1068_v50  ;;  %v6221_v8 = vsel %vm1085_vm6, -42.30252, %v1069_v0 }
 0x18a   :  { %v6225_v35 = vsel %vm1086_vm8, -42.30252, %v1070_v1  ;;  %v6229_v36 = vsel %vm1087_vm9, -42.30252, %v1071_v2  ;;  %v6233_v37 = vsel %vm1088_vm11, -42.30252, %v1072_v4 }
 0x18b   :  { %v6237_v41 = vsel %vm1089_vm12, -42.30252, %v1073_v7  ;;  %v6241_v42 = vsel %vm1090_vm13, -42.30252, %v1074_v22  ;;  %v6245_v47 = vsel %vm1091_vm14, -42.30252, %v1075_v23 }
 0x18c   :  { %v6249_v46 = vsel %vm1092_vm15, -42.30252, %v1076_v24  ;;  %v6253_v45 = vsel %vm1093_vm0, -42.30252, %v1077_v29  ;;  %v6257_v44 = vsel %vm1094_vm10, -42.30252, %v1078_v30 }
 0x18d   :  { %v6261_v43 = vsel %vm1095_vm7, -42.30252, %v1079_v31  ;;  %v6263_v19 = vld [vmem:[#allocation7] sm:$0xff]  ;;  %v6266_v40 = vld [vmem:[#allocation7 + $0x8] sm:$0xff]  ;;  %v6269_v51 = vld [vmem:[#allocation7 + $0x10] sm:$0xff] }
 0x18e   :  { %vm1128_vm1 = vcmp.gt.f32.partialorder %v6263_v19, 144.6  ;;  %vm1129_vm2 = vcmp.gt.f32.partialorder %v6266_v40, 144.6  ;;  %vm1130_vm3 = vcmp.gt.f32.partialorder %v6269_v51, 144.6 }
 0x18f   :  { %v6272_v52 = vld [vmem:[#allocation7 + $0x18] sm:$0xff]  ;;  %v6275_v53 = vld [vmem:[#allocation7 + $0x20] sm:$0xff]  ;;  %v6278_v54 = vld [vmem:[#allocation7 + $0x28] sm:$0xff]  ;;  %v1144_v4 = vsel %vm1128_vm1, 0.15748031, %v6137_v39 }
 0x190   :  { %vm1131_vm4 = vcmp.gt.f32.partialorder %v6272_v52, 144.6  ;;  %vm1132_vm5 = vcmp.gt.f32.partialorder %v6275_v53, 144.6  ;;  %vm1133_vm6 = vcmp.gt.f32.partialorder %v6278_v54, 144.6 }
 0x191   :  { %v6281_v48 = vld [vmem:[#allocation7 + $0x30] sm:$0xff]  ;;  %v6284_v20 = vld [vmem:[#allocation7 + $0x38] sm:$0xff]  ;;  %v6287_v25 = vld [vmem:[#allocation7 + $0x40] sm:$0xff]  ;;  %v1145_v7 = vsel %vm1129_vm2, 0.15748031, %v6141_v55 }
 0x192   :  { %vm1134_vm8 = vcmp.gt.f32.partialorder %v6281_v48, 144.6  ;;  %vm1135_vm9 = vcmp.gt.f32.partialorder %v6284_v20, 144.6  ;;  %vm1136_vm11 = vcmp.gt.f32.partialorder %v6287_v25, 144.6 }
 0x193   :  { %v6290_v26 = vld [vmem:[#allocation7 + $0x48] sm:$0xff]  ;;  %v6293_v27 = vld [vmem:[#allocation7 + $0x50] sm:$0xff]  ;;  %v6296_v49 = vld [vmem:[#allocation7 + $0x58] sm:$0xff]  ;;  %v1146_v22 = vsel %vm1130_vm3, 0.15748031, %v6145_v56 }
 0x194   :  { %vm1137_vm12 = vcmp.gt.f32.partialorder %v6290_v26, 144.6  ;;  %vm1138_vm13 = vcmp.gt.f32.partialorder %v6293_v27, 144.6  ;;  %vm1139_vm14 = vcmp.gt.f32.partialorder %v6296_v49, 144.6 }
 0x195   :  { %v6299_v50 = vld [vmem:[#allocation7 + $0x60] sm:$0xff]  ;;  %v6302_v0 = vld [vmem:[#allocation7 + $0x68] sm:$0xff]  ;;  %v6305_v1 = vld [vmem:[#allocation7 + $0x70] sm:$0xff]  ;;  %v1147_v23 = vsel %vm1131_vm4, 0.15748031, %v6149_v58 }
 0x196   :  { %vm1140_vm15 = vcmp.gt.f32.partialorder %v6299_v50, 144.6  ;;  %vm1141_vm0 = vcmp.gt.f32.partialorder %v6302_v0, 144.6  ;;  %vm1142_vm10 = vcmp.gt.f32.partialorder %v6305_v1, 144.6 }
 0x197   :  { %v6308_v2 = vld [vmem:[#allocation7 + $0x78] sm:$0xff]  ;;  %v1148_v24 = vsel %vm1132_vm5, 0.15748031, %v6153_v59  ;;  %v1149_v29 = vsel %vm1133_vm6, 0.15748031, %v6157_v60 }
 0x198   :  { %vm1143_vm7 = vcmp.gt.f32.partialorder %v6308_v2, 144.6  ;;  %v1150_v30 = vsel %vm1134_vm8, 0.15748031, %v6161_v61  ;;  %v1151_v31 = vsel %vm1135_vm9, 0.15748031, %v6165_v62 }
 0x199   :  { %v1152_v39 = vsel %vm1136_vm11, 0.15748031, %v6169_v63  ;;  %v1153_v55 = vsel %vm1137_vm12, 0.15748031, %v6173_v3  ;;  %v1154_v56 = vsel %vm1138_vm13, 0.15748031, %v6177_v5 }
 0x19a   :  { %v1155_v58 = vsel %vm1139_vm14, 0.15748031, %v6181_v6  ;;  %v1156_v59 = vsel %vm1140_vm15, 0.15748031, %v6185_v9  ;;  %v1157_v60 = vsel %vm1141_vm0, 0.15748031, %v6189_v10 }
 0x19b   :  { %v1158_v61 = vsel %vm1142_vm10, 0.15748031, %v6193_v11  ;;  %v1159_v62 = vsel %vm1143_vm7, 0.15748031, %v6197_v12  ;;  %v1160_v63 = vsel %vm1128_vm1, -40.771652, %v6201_v14 }
 0x19c   :  { %v1161_v3 = vsel %vm1129_vm2, -40.771652, %v6205_v15  ;;  %v1162_v5 = vsel %vm1130_vm3, -40.771652, %v6209_v16  ;;  %v1163_v6 = vsel %vm1131_vm4, -40.771652, %v6213_v57 }
 0x19d   :  { %v1164_v9 = vsel %vm1132_vm5, -40.771652, %v6217_v18  ;;  %v1165_v10 = vsel %vm1133_vm6, -40.771652, %v6221_v8  ;;  %v1166_v11 = vsel %vm1134_vm8, -40.771652, %v6225_v35 }
 0x19e   :  { %v1167_v12 = vsel %vm1135_vm9, -40.771652, %v6229_v36  ;;  %v1168_v14 = vsel %vm1136_vm11, -40.771652, %v6233_v37  ;;  %v1169_v15 = vsel %vm1137_vm12, -40.771652, %v6237_v41 }
 0x19f   :  { %v1170_v16 = vsel %vm1138_vm13, -40.771652, %v6241_v42  ;;  %v1171_v57 = vsel %vm1139_vm14, -40.771652, %v6245_v47  ;;  %v1172_v18 = vsel %vm1140_vm15, -40.771652, %v6249_v46 }
 0x1a0   :  { %v1173_v8 = vsel %vm1141_vm0, -40.771652, %v6253_v45  ;;  %v1174_v35 = vsel %vm1142_vm10, -40.771652, %v6257_v44  ;;  %v1175_v36 = vsel %vm1143_vm7, -40.771652, %v6261_v43 }
 0x1a1   :  { %vm1176_vm1 = vcmp.gt.f32.partialorder %v6263_v19, 157.3  ;;  %vm1177_vm2 = vcmp.gt.f32.partialorder %v6266_v40, 157.3  ;;  %vm1178_vm3 = vcmp.gt.f32.partialorder %v6269_v51, 157.3 }
 0x1a2   :  { %vm1179_vm4 = vcmp.gt.f32.partialorder %v6272_v52, 157.3  ;;  %vm1180_vm5 = vcmp.gt.f32.partialorder %v6275_v53, 157.3  ;;  %vm1181_vm6 = vcmp.gt.f32.partialorder %v6278_v54, 157.3 }
 0x1a3   :  { %vm1182_vm8 = vcmp.gt.f32.partialorder %v6281_v48, 157.3  ;;  %vm1183_vm9 = vcmp.gt.f32.partialorder %v6284_v20, 157.3  ;;  %vm1184_vm11 = vcmp.gt.f32.partialorder %v6287_v25, 157.3 }
 0x1a4   :  { %vm1185_vm12 = vcmp.gt.f32.partialorder %v6290_v26, 157.3  ;;  %vm1186_vm13 = vcmp.gt.f32.partialorder %v6293_v27, 157.3  ;;  %vm1187_vm14 = vcmp.gt.f32.partialorder %v6296_v49, 157.3 }
 0x1a5   :  { %vm1188_vm15 = vcmp.gt.f32.partialorder %v6299_v50, 157.3  ;;  %vm1189_vm0 = vcmp.gt.f32.partialorder %v6302_v0, 157.3  ;;  %vm1190_vm10 = vcmp.gt.f32.partialorder %v6305_v1, 157.3 }
 0x1a6   :  { %vm1191_vm7 = vcmp.gt.f32.partialorder %v6308_v2, 157.3  ;;  %v1192_v37 = vsel %vm1176_vm1, 0.14814815, %v1144_v4  ;;  %v1193_v41 = vsel %vm1177_vm2, 0.14814815, %v1145_v7 }
 0x1a7   :  { %v1194_v42 = vsel %vm1178_vm3, 0.14814815, %v1146_v22  ;;  %v1195_v47 = vsel %vm1179_vm4, 0.14814815, %v1147_v23  ;;  %v1196_v46 = vsel %vm1180_vm5, 0.14814815, %v1148_v24 }
 0x1a8   :  { %v1197_v45 = vsel %vm1181_vm6, 0.14814815, %v1149_v29  ;;  %v1198_v44 = vsel %vm1182_vm8, 0.14814815, %v1150_v30  ;;  %v1199_v43 = vsel %vm1183_vm9, 0.14814815, %v1151_v31 }
 0x1a9   :  { %v1200_v4 = vsel %vm1184_vm11, 0.14814815, %v1152_v39  ;;  %v1201_v7 = vsel %vm1185_vm12, 0.14814815, %v1153_v55  ;;  %v1202_v22 = vsel %vm1186_vm13, 0.14814815, %v1154_v56 }
 0x1aa   :  { %v1203_v23 = vsel %vm1187_vm14, 0.14814815, %v1155_v58  ;;  %v1204_v24 = vsel %vm1188_vm15, 0.14814815, %v1156_v59  ;;  %v1205_v29 = vsel %vm1189_vm0, 0.14814815, %v1157_v60 }
 0x1ab   :  { %v1206_v30 = vsel %vm1190_vm10, 0.14814815, %v1158_v61  ;;  %v1207_v31 = vsel %vm1191_vm7, 0.14814815, %v1159_v62  ;;  %v1208_v39 = vsel %vm1176_vm1, -39.303703, %v1160_v63 }
 0x1ac   :  { %v1209_v55 = vsel %vm1177_vm2, -39.303703, %v1161_v3  ;;  %v1210_v56 = vsel %vm1178_vm3, -39.303703, %v1162_v5  ;;  %v1211_v58 = vsel %vm1179_vm4, -39.303703, %v1163_v6 }
 0x1ad   :  { %v1212_v59 = vsel %vm1180_vm5, -39.303703, %v1164_v9  ;;  %v1213_v60 = vsel %vm1181_vm6, -39.303703, %v1165_v10  ;;  %v1214_v61 = vsel %vm1182_vm8, -39.303703, %v1166_v11 }
 0x1ae   :  { %v1215_v62 = vsel %vm1183_vm9, -39.303703, %v1167_v12  ;;  %v1216_v63 = vsel %vm1184_vm11, -39.303703, %v1168_v14  ;;  %v1217_v3 = vsel %vm1185_vm12, -39.303703, %v1169_v15 }
 0x1af   :  { %v1218_v5 = vsel %vm1186_vm13, -39.303703, %v1170_v16  ;;  %v1219_v6 = vsel %vm1187_vm14, -39.303703, %v1171_v57  ;;  %v1220_v9 = vsel %vm1188_vm15, -39.303703, %v1172_v18 }
 0x1b0   :  { %v1221_v10 = vsel %vm1189_vm0, -39.303703, %v1173_v8  ;;  %v1222_v11 = vsel %vm1190_vm10, -39.303703, %v1174_v35  ;;  %v1223_v12 = vsel %vm1191_vm7, -39.303703, %v1175_v36 }
 0x1b1   :  { %vm1224_vm1 = vcmp.gt.f32.partialorder %v6263_v19, 170.8  ;;  %vm1225_vm2 = vcmp.gt.f32.partialorder %v6266_v40, 170.8  ;;  %vm1226_vm3 = vcmp.gt.f32.partialorder %v6269_v51, 170.8 }
 0x1b2   :  { %vm1227_vm4 = vcmp.gt.f32.partialorder %v6272_v52, 170.8  ;;  %vm1228_vm5 = vcmp.gt.f32.partialorder %v6275_v53, 170.8  ;;  %vm1229_vm6 = vcmp.gt.f32.partialorder %v6278_v54, 170.8 }
 0x1b3   :  { %vm1230_vm8 = vcmp.gt.f32.partialorder %v6281_v48, 170.8  ;;  %vm1231_vm9 = vcmp.gt.f32.partialorder %v6284_v20, 170.8  ;;  %vm1232_vm11 = vcmp.gt.f32.partialorder %v6287_v25, 170.8 }
 0x1b4   :  { %vm1233_vm12 = vcmp.gt.f32.partialorder %v6290_v26, 170.8  ;;  %vm1234_vm13 = vcmp.gt.f32.partialorder %v6293_v27, 170.8  ;;  %vm1235_vm14 = vcmp.gt.f32.partialorder %v6296_v49, 170.8 }
 0x1b5   :  { %vm1236_vm15 = vcmp.gt.f32.partialorder %v6299_v50, 170.8  ;;  %vm1237_vm0 = vcmp.gt.f32.partialorder %v6302_v0, 170.8  ;;  %vm1238_vm10 = vcmp.gt.f32.partialorder %v6305_v1, 170.8 }
 0x1b6   :  { %vm1239_vm7 = vcmp.gt.f32.partialorder %v6308_v2, 170.8  ;;  %v1240_v14 = vsel %vm1224_vm1, 0.1388889, %v1192_v37  ;;  %v1241_v15 = vsel %vm1225_vm2, 0.1388889, %v1193_v41 }
 0x1b7   :  { %v1242_v16 = vsel %vm1226_vm3, 0.1388889, %v1194_v42  ;;  %v1243_v57 = vsel %vm1227_vm4, 0.1388889, %v1195_v47  ;;  %v1244_v18 = vsel %vm1228_vm5, 0.1388889, %v1196_v46 }
 0x1b8   :  { %v1245_v8 = vsel %vm1229_vm6, 0.1388889, %v1197_v45  ;;  %v1246_v35 = vsel %vm1230_vm8, 0.1388889, %v1198_v44  ;;  %v1247_v36 = vsel %vm1231_vm9, 0.1388889, %v1199_v43 }
 0x1b9   :  { %v1248_v37 = vsel %vm1232_vm11, 0.1388889, %v1200_v4  ;;  %v1249_v41 = vsel %vm1233_vm12, 0.1388889, %v1201_v7  ;;  %v1250_v42 = vsel %vm1234_vm13, 0.1388889, %v1202_v22 }
 0x1ba   :  { %v1251_v47 = vsel %vm1235_vm14, 0.1388889, %v1203_v23  ;;  %v1252_v46 = vsel %vm1236_vm15, 0.1388889, %v1204_v24  ;;  %v1253_v45 = vsel %vm1237_vm0, 0.1388889, %v1205_v29 }
 0x1bb   :  { %v1254_v44 = vsel %vm1238_vm10, 0.1388889, %v1206_v30  ;;  %v1255_v43 = vsel %vm1239_vm7, 0.1388889, %v1207_v31  ;;  %v1256_v4 = vsel %vm1224_vm1, -37.72222, %v1208_v39 }
 0x1bc   :  { %v1257_v7 = vsel %vm1225_vm2, -37.72222, %v1209_v55  ;;  %v1258_v22 = vsel %vm1226_vm3, -37.72222, %v1210_v56  ;;  %v1259_v23 = vsel %vm1227_vm4, -37.72222, %v1211_v58 }
 0x1bd   :  { %v1260_v24 = vsel %vm1228_vm5, -37.72222, %v1212_v59  ;;  %v1261_v29 = vsel %vm1229_vm6, -37.72222, %v1213_v60  ;;  %v1262_v30 = vsel %vm1230_vm8, -37.72222, %v1214_v61 }
 0x1be   :  { %v1263_v31 = vsel %vm1231_vm9, -37.72222, %v1215_v62  ;;  %v1264_v39 = vsel %vm1232_vm11, -37.72222, %v1216_v63  ;;  %v1265_v55 = vsel %vm1233_vm12, -37.72222, %v1217_v3 }
 0x1bf   :  { %v1266_v56 = vsel %vm1234_vm13, -37.72222, %v1218_v5  ;;  %v1267_v58 = vsel %vm1235_vm14, -37.72222, %v1219_v6  ;;  %v1268_v59 = vsel %vm1236_vm15, -37.72222, %v1220_v9 }
 0x1c0   :  { %v1269_v60 = vsel %vm1237_vm0, -37.72222, %v1221_v10  ;;  %v1270_v61 = vsel %vm1238_vm10, -37.72222, %v1222_v11  ;;  %v1271_v62 = vsel %vm1239_vm7, -37.72222, %v1223_v12 }
 0x1c1   :  { %vm1272_vm1 = vcmp.gt.f32.partialorder %v6263_v19, 185.2  ;;  %vm1273_vm2 = vcmp.gt.f32.partialorder %v6266_v40, 185.2  ;;  %vm1274_vm3 = vcmp.gt.f32.partialorder %v6269_v51, 185.2 }
 0x1c2   :  { %vm1275_vm4 = vcmp.gt.f32.partialorder %v6272_v52, 185.2  ;;  %vm1276_vm5 = vcmp.gt.f32.partialorder %v6275_v53, 185.2  ;;  %vm1277_vm6 = vcmp.gt.f32.partialorder %v6278_v54, 185.2 }
 0x1c3   :  { %vm1278_vm8 = vcmp.gt.f32.partialorder %v6281_v48, 185.2  ;;  %vm1279_vm9 = vcmp.gt.f32.partialorder %v6284_v20, 185.2  ;;  %vm1280_vm11 = vcmp.gt.f32.partialorder %v6287_v25, 185.2 }
 0x1c4   :  { %vm1281_vm12 = vcmp.gt.f32.partialorder %v6290_v26, 185.2  ;;  %vm1282_vm13 = vcmp.gt.f32.partialorder %v6293_v27, 185.2  ;;  %vm1283_vm14 = vcmp.gt.f32.partialorder %v6296_v49, 185.2 }
 0x1c5   :  { %vm1284_vm15 = vcmp.gt.f32.partialorder %v6299_v50, 185.2  ;;  %vm1285_vm0 = vcmp.gt.f32.partialorder %v6302_v0, 185.2  ;;  %vm1286_vm10 = vcmp.gt.f32.partialorder %v6305_v1, 185.2 }
 0x1c6   :  { %vm1287_vm7 = vcmp.gt.f32.partialorder %v6308_v2, 185.2  ;;  %v1288_v63 = vsel %vm1272_vm1, 0.12987013, %v1240_v14  ;;  %v1289_v3 = vsel %vm1273_vm2, 0.12987013, %v1241_v15 }
 0x1c7   :  { %v1290_v5 = vsel %vm1274_vm3, 0.12987013, %v1242_v16  ;;  %v1291_v6 = vsel %vm1275_vm4, 0.12987013, %v1243_v57  ;;  %v1292_v9 = vsel %vm1276_vm5, 0.12987013, %v1244_v18 }
 0x1c8   :  { %v1293_v10 = vsel %vm1277_vm6, 0.12987013, %v1245_v8  ;;  %v1294_v11 = vsel %vm1278_vm8, 0.12987013, %v1246_v35  ;;  %v1295_v12 = vsel %vm1279_vm9, 0.12987013, %v1247_v36 }
 0x1c9   :  { %v1296_v14 = vsel %vm1280_vm11, 0.12987013, %v1248_v37  ;;  %v1297_v15 = vsel %vm1281_vm12, 0.12987013, %v1249_v41  ;;  %v1298_v16 = vsel %vm1282_vm13, 0.12987013, %v1250_v42 }
 0x1ca   :  { %v1299_v57 = vsel %vm1283_vm14, 0.12987013, %v1251_v47  ;;  %v1300_v18 = vsel %vm1284_vm15, 0.12987013, %v1252_v46  ;;  %v1301_v8 = vsel %vm1285_vm0, 0.12987013, %v1253_v45 }
 0x1cb   :  { %v1302_v35 = vsel %vm1286_vm10, 0.12987013, %v1254_v44  ;;  %v1303_v36 = vsel %vm1287_vm7, 0.12987013, %v1255_v43  ;;  %v1304_v37 = vsel %vm1272_vm1, -36.05195, %v1256_v4 }
 0x1cc   :  { %v1305_v41 = vsel %vm1273_vm2, -36.05195, %v1257_v7  ;;  %v1306_v42 = vsel %vm1274_vm3, -36.05195, %v1258_v22  ;;  %v1307_v47 = vsel %vm1275_vm4, -36.05195, %v1259_v23 }
 0x1cd   :  { %v1308_v46 = vsel %vm1276_vm5, -36.05195, %v1260_v24  ;;  %v1309_v45 = vsel %vm1277_vm6, -36.05195, %v1261_v29  ;;  %v1310_v44 = vsel %vm1278_vm8, -36.05195, %v1262_v30 }
 0x1ce   :  { %v1311_v43 = vsel %vm1279_vm9, -36.05195, %v1263_v31  ;;  %v1312_v4 = vsel %vm1280_vm11, -36.05195, %v1264_v39  ;;  %v1313_v7 = vsel %vm1281_vm12, -36.05195, %v1265_v55 }
 0x1cf   :  { %v1314_v22 = vsel %vm1282_vm13, -36.05195, %v1266_v56  ;;  %v1315_v23 = vsel %vm1283_vm14, -36.05195, %v1267_v58  ;;  %v1316_v24 = vsel %vm1284_vm15, -36.05195, %v1268_v59 }
 0x1d0   :  { %v1317_v29 = vsel %vm1285_vm0, -36.05195, %v1269_v60  ;;  %v1318_v30 = vsel %vm1286_vm10, -36.05195, %v1270_v61  ;;  %v1319_v31 = vsel %vm1287_vm7, -36.05195, %v1271_v62 }
 0x1d1   :  { %vm1320_vm1 = vcmp.gt.f32.partialorder %v6263_v19, 200.6  ;;  %vm1321_vm2 = vcmp.gt.f32.partialorder %v6266_v40, 200.6  ;;  %vm1322_vm3 = vcmp.gt.f32.partialorder %v6269_v51, 200.6 }
 0x1d2   :  { %vm1323_vm4 = vcmp.gt.f32.partialorder %v6272_v52, 200.6  ;;  %vm1324_vm5 = vcmp.gt.f32.partialorder %v6275_v53, 200.6  ;;  %vm1325_vm6 = vcmp.gt.f32.partialorder %v6278_v54, 200.6 }
 0x1d3   :  { %vm1326_vm8 = vcmp.gt.f32.partialorder %v6281_v48, 200.6  ;;  %vm1327_vm9 = vcmp.gt.f32.partialorder %v6284_v20, 200.6  ;;  %vm1328_vm11 = vcmp.gt.f32.partialorder %v6287_v25, 200.6 }
 0x1d4   :  { %vm1329_vm12 = vcmp.gt.f32.partialorder %v6290_v26, 200.6  ;;  %vm1330_vm13 = vcmp.gt.f32.partialorder %v6293_v27, 200.6  ;;  %vm1331_vm14 = vcmp.gt.f32.partialorder %v6296_v49, 200.6 }
 0x1d5   :  { %vm1332_vm15 = vcmp.gt.f32.partialorder %v6299_v50, 200.6  ;;  %vm1333_vm0 = vcmp.gt.f32.partialorder %v6302_v0, 200.6  ;;  %vm1334_vm10 = vcmp.gt.f32.partialorder %v6305_v1, 200.6 }
 0x1d6   :  { %vm1335_vm7 = vcmp.gt.f32.partialorder %v6308_v2, 200.6  ;;  %v1336_v39 = vsel %vm1320_vm1, 0.12269939, %v1288_v63  ;;  %v1337_v55 = vsel %vm1321_vm2, 0.12269939, %v1289_v3 }
 0x1d7   :  { %v1338_v56 = vsel %vm1322_vm3, 0.12269939, %v1290_v5  ;;  %v1339_v58 = vsel %vm1323_vm4, 0.12269939, %v1291_v6  ;;  %v1340_v59 = vsel %vm1324_vm5, 0.12269939, %v1292_v9 }
 0x1d8   :  { %v1341_v60 = vsel %vm1325_vm6, 0.12269939, %v1293_v10  ;;  %v1342_v61 = vsel %vm1326_vm8, 0.12269939, %v1294_v11  ;;  %v1343_v62 = vsel %vm1327_vm9, 0.12269939, %v1295_v12 }
 0x1d9   :  { %v1344_v63 = vsel %vm1328_vm11, 0.12269939, %v1296_v14  ;;  %v1345_v3 = vsel %vm1329_vm12, 0.12269939, %v1297_v15  ;;  %v1346_v5 = vsel %vm1330_vm13, 0.12269939, %v1298_v16 }
 0x1da   :  { %v1347_v6 = vsel %vm1331_vm14, 0.12269939, %v1299_v57  ;;  %v1348_v9 = vsel %vm1332_vm15, 0.12269939, %v1300_v18  ;;  %v1349_v10 = vsel %vm1333_vm0, 0.12269939, %v1301_v8 }
 0x1db   :  { %v1350_v11 = vsel %vm1334_vm10, 0.12269939, %v1302_v35  ;;  %v1351_v12 = vsel %vm1335_vm7, 0.12269939, %v1303_v36  ;;  %v1352_v14 = vsel %vm1320_vm1, -34.6135, %v1304_v37 }
 0x1dc   :  { %v1353_v15 = vsel %vm1321_vm2, -34.6135, %v1305_v41  ;;  %v1354_v16 = vsel %vm1322_vm3, -34.6135, %v1306_v42  ;;  %v1355_v57 = vsel %vm1323_vm4, -34.6135, %v1307_v47 }
 0x1dd   :  { %v1356_v18 = vsel %vm1324_vm5, -34.6135, %v1308_v46  ;;  %v1357_v8 = vsel %vm1325_vm6, -34.6135, %v1309_v45  ;;  %v1358_v35 = vsel %vm1326_vm8, -34.6135, %v1310_v44 }
 0x1de   :  { %v1359_v36 = vsel %vm1327_vm9, -34.6135, %v1311_v43  ;;  %v1360_v37 = vsel %vm1328_vm11, -34.6135, %v1312_v4  ;;  %v1361_v41 = vsel %vm1329_vm12, -34.6135, %v1313_v7 }
 0x1df   :  { %v1362_v42 = vsel %vm1330_vm13, -34.6135, %v1314_v22  ;;  %v1363_v47 = vsel %vm1331_vm14, -34.6135, %v1315_v23  ;;  %v1364_v46 = vsel %vm1332_vm15, -34.6135, %v1316_v24 }
 0x1e0   :  { %v1365_v45 = vsel %vm1333_vm0, -34.6135, %v1317_v29  ;;  %v1366_v44 = vsel %vm1334_vm10, -34.6135, %v1318_v30  ;;  %v1367_v43 = vsel %vm1335_vm7, -34.6135, %v1319_v31 }
 0x1e1   :  { %vm1368_vm1 = vcmp.gt.f32.partialorder %v6263_v19, 216.9  ;;  %vm1369_vm2 = vcmp.gt.f32.partialorder %v6266_v40, 216.9  ;;  %vm1370_vm3 = vcmp.gt.f32.partialorder %v6269_v51, 216.9 }
 0x1e2   :  { %vm1371_vm4 = vcmp.gt.f32.partialorder %v6272_v52, 216.9  ;;  %vm1372_vm5 = vcmp.gt.f32.partialorder %v6275_v53, 216.9  ;;  %vm1373_vm6 = vcmp.gt.f32.partialorder %v6278_v54, 216.9 }
 0x1e3   :  { %vm1374_vm8 = vcmp.gt.f32.partialorder %v6281_v48, 216.9  ;;  %vm1375_vm9 = vcmp.gt.f32.partialorder %v6284_v20, 216.9  ;;  %vm1376_vm11 = vcmp.gt.f32.partialorder %v6287_v25, 216.9 }
 0x1e4   :  { %vm1377_vm12 = vcmp.gt.f32.partialorder %v6290_v26, 216.9  ;;  %vm1378_vm13 = vcmp.gt.f32.partialorder %v6293_v27, 216.9  ;;  %vm1379_vm14 = vcmp.gt.f32.partialorder %v6296_v49, 216.9 }
 0x1e5   :  { %vm1380_vm15 = vcmp.gt.f32.partialorder %v6299_v50, 216.9  ;;  %vm1381_vm0 = vcmp.gt.f32.partialorder %v6302_v0, 216.9  ;;  %vm1382_vm10 = vcmp.gt.f32.partialorder %v6305_v1, 216.9 }
 0x1e6   :  { %vm1383_vm7 = vcmp.gt.f32.partialorder %v6308_v2, 216.9  ;;  %v1384_v4 = vsel %vm1368_vm1, 0.11494253, %v1336_v39  ;;  %v1385_v7 = vsel %vm1369_vm2, 0.11494253, %v1337_v55 }
 0x1e7   :  { %v1386_v22 = vsel %vm1370_vm3, 0.11494253, %v1338_v56  ;;  %v1387_v23 = vsel %vm1371_vm4, 0.11494253, %v1339_v58  ;;  %v1388_v24 = vsel %vm1372_vm5, 0.11494253, %v1340_v59 }
 0x1e8   :  { %v1389_v29 = vsel %vm1373_vm6, 0.11494253, %v1341_v60  ;;  %v1390_v30 = vsel %vm1374_vm8, 0.11494253, %v1342_v61  ;;  %v1391_v31 = vsel %vm1375_vm9, 0.11494253, %v1343_v62 }
 0x1e9   :  { %v1392_v39 = vsel %vm1376_vm11, 0.11494253, %v1344_v63  ;;  %v1393_v55 = vsel %vm1377_vm12, 0.11494253, %v1345_v3  ;;  %v1394_v56 = vsel %vm1378_vm13, 0.11494253, %v1346_v5 }
 0x1ea   :  { %v1395_v58 = vsel %vm1379_vm14, 0.11494253, %v1347_v6  ;;  %v1396_v59 = vsel %vm1380_vm15, 0.11494253, %v1348_v9  ;;  %v1397_v60 = vsel %vm1381_vm0, 0.11494253, %v1349_v10 }
 0x1eb   :  { %v1398_v61 = vsel %vm1382_vm10, 0.11494253, %v1350_v11  ;;  %v1399_v62 = vsel %vm1383_vm7, 0.11494253, %v1351_v12  ;;  %v1400_v63 = vsel %vm1368_vm1, -32.931034, %v1352_v14 }
 0x1ec   :  { %v1401_v3 = vsel %vm1369_vm2, -32.931034, %v1353_v15  ;;  %v1402_v5 = vsel %vm1370_vm3, -32.931034, %v1354_v16  ;;  %v1403_v6 = vsel %vm1371_vm4, -32.931034, %v1355_v57 }
 0x1ed   :  { %v1404_v9 = vsel %vm1372_vm5, -32.931034, %v1356_v18  ;;  %v1405_v10 = vsel %vm1373_vm6, -32.931034, %v1357_v8  ;;  %v1406_v11 = vsel %vm1374_vm8, -32.931034, %v1358_v35 }
 0x1ee   :  { %v1407_v12 = vsel %vm1375_vm9, -32.931034, %v1359_v36  ;;  %v1408_v14 = vsel %vm1376_vm11, -32.931034, %v1360_v37  ;;  %v1409_v15 = vsel %vm1377_vm12, -32.931034, %v1361_v41 }
 0x1ef   :  { %v1410_v16 = vsel %vm1378_vm13, -32.931034, %v1362_v42  ;;  %v1411_v57 = vsel %vm1379_vm14, -32.931034, %v1363_v47  ;;  %v1412_v18 = vsel %vm1380_vm15, -32.931034, %v1364_v46 }
 0x1f0   :  { %v1413_v8 = vsel %vm1381_vm0, -32.931034, %v1365_v45  ;;  %v1414_v35 = vsel %vm1382_vm10, -32.931034, %v1366_v44  ;;  %v1415_v36 = vsel %vm1383_vm7, -32.931034, %v1367_v43 }
 0x1f1   :  { %vm1416_vm1 = vcmp.gt.f32.partialorder %v6263_v19, 234.3  ;;  %vm1417_vm2 = vcmp.gt.f32.partialorder %v6266_v40, 234.3  ;;  %vm1418_vm3 = vcmp.gt.f32.partialorder %v6269_v51, 234.3 }
 0x1f2   :  { %vm1419_vm4 = vcmp.gt.f32.partialorder %v6272_v52, 234.3  ;;  %vm1420_vm5 = vcmp.gt.f32.partialorder %v6275_v53, 234.3  ;;  %vm1421_vm6 = vcmp.gt.f32.partialorder %v6278_v54, 234.3 }
 0x1f3   :  { %vm1422_vm8 = vcmp.gt.f32.partialorder %v6281_v48, 234.3  ;;  %vm1423_vm9 = vcmp.gt.f32.partialorder %v6284_v20, 234.3  ;;  %vm1424_vm11 = vcmp.gt.f32.partialorder %v6287_v25, 234.3 }
 0x1f4   :  { %vm1425_vm12 = vcmp.gt.f32.partialorder %v6290_v26, 234.3  ;;  %vm1426_vm13 = vcmp.gt.f32.partialorder %v6293_v27, 234.3  ;;  %vm1427_vm14 = vcmp.gt.f32.partialorder %v6296_v49, 234.3 }
 0x1f5   :  { %vm1428_vm15 = vcmp.gt.f32.partialorder %v6299_v50, 234.3  ;;  %vm1429_vm0 = vcmp.gt.f32.partialorder %v6302_v0, 234.3  ;;  %vm1430_vm10 = vcmp.gt.f32.partialorder %v6305_v1, 234.3 }
 0x1f6   :  { %vm1431_vm7 = vcmp.gt.f32.partialorder %v6308_v2, 234.3  ;;  %v1432_v37 = vsel %vm1416_vm1, 0.10869565, %v1384_v4  ;;  %v1433_v41 = vsel %vm1417_vm2, 0.10869565, %v1385_v7 }
 0x1f7   :  { %v1434_v42 = vsel %vm1418_vm3, 0.10869565, %v1386_v22  ;;  %v1435_v47 = vsel %vm1419_vm4, 0.10869565, %v1387_v23  ;;  %v1436_v46 = vsel %vm1420_vm5, 0.10869565, %v1388_v24 }
 0x1f8   :  { %v1437_v45 = vsel %vm1421_vm6, 0.10869565, %v1389_v29  ;;  %v1438_v44 = vsel %vm1422_vm8, 0.10869565, %v1390_v30  ;;  %v1439_v43 = vsel %vm1423_vm9, 0.10869565, %v1391_v31 }
 0x1f9   :  { %v1440_v4 = vsel %vm1424_vm11, 0.10869565, %v1392_v39  ;;  %v1441_v7 = vsel %vm1425_vm12, 0.10869565, %v1393_v55  ;;  %v1442_v22 = vsel %vm1426_vm13, 0.10869565, %v1394_v56 }
 0x1fa   :  { %v1443_v23 = vsel %vm1427_vm14, 0.10869565, %v1395_v58  ;;  %v1444_v24 = vsel %vm1428_vm15, 0.10869565, %v1396_v59  ;;  %v1445_v29 = vsel %vm1429_vm0, 0.10869565, %v1397_v60 }
 0x1fb   :  { %v1446_v30 = vsel %vm1430_vm10, 0.10869565, %v1398_v61  ;;  %v1447_v31 = vsel %vm1431_vm7, 0.10869565, %v1399_v62  ;;  %v1448_v39 = vsel %vm1416_vm1, -31.467392, %v1400_v63 }
 0x1fc   :  { %v1449_v55 = vsel %vm1417_vm2, -31.467392, %v1401_v3  ;;  %v1450_v56 = vsel %vm1418_vm3, -31.467392, %v1402_v5  ;;  %v1451_v58 = vsel %vm1419_vm4, -31.467392, %v1403_v6 }
 0x1fd   :  { %v1452_v59 = vsel %vm1420_vm5, -31.467392, %v1404_v9  ;;  %v1453_v60 = vsel %vm1421_vm6, -31.467392, %v1405_v10  ;;  %v1454_v61 = vsel %vm1422_vm8, -31.467392, %v1406_v11 }
 0x1fe   :  { %v1455_v62 = vsel %vm1423_vm9, -31.467392, %v1407_v12  ;;  %v1456_v63 = vsel %vm1424_vm11, -31.467392, %v1408_v14  ;;  %v1457_v3 = vsel %vm1425_vm12, -31.467392, %v1409_v15 }
 0x1ff   :  { %v1458_v5 = vsel %vm1426_vm13, -31.467392, %v1410_v16  ;;  %v1459_v6 = vsel %vm1427_vm14, -31.467392, %v1411_v57  ;;  %v1460_v9 = vsel %vm1428_vm15, -31.467392, %v1412_v18 }
 0x200   :  { %v1461_v10 = vsel %vm1429_vm0, -31.467392, %v1413_v8  ;;  %v1462_v11 = vsel %vm1430_vm10, -31.467392, %v1414_v35  ;;  %v1463_v12 = vsel %vm1431_vm7, -31.467392, %v1415_v36 }
 0x201   :  { %vm1464_vm1 = vcmp.gt.f32.partialorder %v6263_v19, 252.7  ;;  %vm1465_vm2 = vcmp.gt.f32.partialorder %v6266_v40, 252.7  ;;  %vm1466_vm3 = vcmp.gt.f32.partialorder %v6269_v51, 252.7 }
 0x202   :  { %vm1467_vm4 = vcmp.gt.f32.partialorder %v6272_v52, 252.7  ;;  %vm1468_vm5 = vcmp.gt.f32.partialorder %v6275_v53, 252.7  ;;  %vm1469_vm6 = vcmp.gt.f32.partialorder %v6278_v54, 252.7 }
 0x203   :  { %vm1470_vm8 = vcmp.gt.f32.partialorder %v6281_v48, 252.7  ;;  %vm1471_vm9 = vcmp.gt.f32.partialorder %v6284_v20, 252.7  ;;  %vm1472_vm11 = vcmp.gt.f32.partialorder %v6287_v25, 252.7 }
 0x204   :  { %vm1473_vm12 = vcmp.gt.f32.partialorder %v6290_v26, 252.7  ;;  %vm1474_vm13 = vcmp.gt.f32.partialorder %v6293_v27, 252.7  ;;  %vm1475_vm14 = vcmp.gt.f32.partialorder %v6296_v49, 252.7 }
 0x205   :  { %vm1476_vm15 = vcmp.gt.f32.partialorder %v6299_v50, 252.7  ;;  %vm1477_vm0 = vcmp.gt.f32.partialorder %v6302_v0, 252.7  ;;  %vm1478_vm10 = vcmp.gt.f32.partialorder %v6305_v1, 252.7 }
 0x206   :  { %vm1479_vm7 = vcmp.gt.f32.partialorder %v6308_v2, 252.7  ;;  %v1480_v14 = vsel %vm1464_vm1, 0.102564104, %v1432_v37  ;;  %v1481_v15 = vsel %vm1465_vm2, 0.102564104, %v1433_v41 }
 0x207   :  { %v1482_v16 = vsel %vm1466_vm3, 0.102564104, %v1434_v42  ;;  %v1483_v57 = vsel %vm1467_vm4, 0.102564104, %v1435_v47  ;;  %v1484_v18 = vsel %vm1468_vm5, 0.102564104, %v1436_v46 }
 0x208   :  { %v1485_v8 = vsel %vm1469_vm6, 0.102564104, %v1437_v45  ;;  %v1486_v35 = vsel %vm1470_vm8, 0.102564104, %v1438_v44  ;;  %v1487_v36 = vsel %vm1471_vm9, 0.102564104, %v1439_v43 }
 0x209   :  { %v1488_v37 = vsel %vm1472_vm11, 0.102564104, %v1440_v4  ;;  %v1489_v41 = vsel %vm1473_vm12, 0.102564104, %v1441_v7  ;;  %v1490_v42 = vsel %vm1474_vm13, 0.102564104, %v1442_v22 }
 0x20a   :  { %v1491_v47 = vsel %vm1475_vm14, 0.102564104, %v1443_v23  ;;  %v1492_v46 = vsel %vm1476_vm15, 0.102564104, %v1444_v24  ;;  %v1493_v45 = vsel %vm1477_vm0, 0.102564104, %v1445_v29 }
 0x20b   :  { %v1494_v44 = vsel %vm1478_vm10, 0.102564104, %v1446_v30  ;;  %v1495_v43 = vsel %vm1479_vm7, 0.102564104, %v1447_v31  ;;  %v1496_v4 = vsel %vm1464_vm1, -29.917948, %v1448_v39 }
 0x20c   :  { %v1497_v7 = vsel %vm1465_vm2, -29.917948, %v1449_v55  ;;  %v1498_v22 = vsel %vm1466_vm3, -29.917948, %v1450_v56  ;;  %v1499_v23 = vsel %vm1467_vm4, -29.917948, %v1451_v58 }
 0x20d   :  { %v1500_v24 = vsel %vm1468_vm5, -29.917948, %v1452_v59  ;;  %v1501_v29 = vsel %vm1469_vm6, -29.917948, %v1453_v60  ;;  %v1502_v30 = vsel %vm1470_vm8, -29.917948, %v1454_v61 }
 0x20e   :  { %v1503_v31 = vsel %vm1471_vm9, -29.917948, %v1455_v62  ;;  %v1504_v39 = vsel %vm1472_vm11, -29.917948, %v1456_v63  ;;  %v1505_v55 = vsel %vm1473_vm12, -29.917948, %v1457_v3 }
 0x20f   :  { %v1506_v56 = vsel %vm1474_vm13, -29.917948, %v1458_v5  ;;  %v1507_v58 = vsel %vm1475_vm14, -29.917948, %v1459_v6  ;;  %v1508_v59 = vsel %vm1476_vm15, -29.917948, %v1460_v9 }
 0x210   :  { %v1509_v60 = vsel %vm1477_vm0, -29.917948, %v1461_v10  ;;  %v1510_v61 = vsel %vm1478_vm10, -29.917948, %v1462_v11  ;;  %v1511_v62 = vsel %vm1479_vm7, -29.917948, %v1463_v12 }
 0x211   :  { %vm1512_vm1 = vcmp.gt.f32.partialorder %v6263_v19, 272.2  ;;  %vm1513_vm2 = vcmp.gt.f32.partialorder %v6266_v40, 272.2  ;;  %vm1514_vm3 = vcmp.gt.f32.partialorder %v6269_v51, 272.2 }
 0x212   :  { %vm1515_vm4 = vcmp.gt.f32.partialorder %v6272_v52, 272.2  ;;  %vm1516_vm5 = vcmp.gt.f32.partialorder %v6275_v53, 272.2  ;;  %vm1517_vm6 = vcmp.gt.f32.partialorder %v6278_v54, 272.2 }
 0x213   :  { %vm1518_vm8 = vcmp.gt.f32.partialorder %v6281_v48, 272.2  ;;  %vm1519_vm9 = vcmp.gt.f32.partialorder %v6284_v20, 272.2  ;;  %vm1520_vm11 = vcmp.gt.f32.partialorder %v6287_v25, 272.2 }
 0x214   :  { %vm1521_vm12 = vcmp.gt.f32.partialorder %v6290_v26, 272.2  ;;  %vm1522_vm13 = vcmp.gt.f32.partialorder %v6293_v27, 272.2  ;;  %vm1523_vm14 = vcmp.gt.f32.partialorder %v6296_v49, 272.2 }
 0x215   :  { %vm1524_vm15 = vcmp.gt.f32.partialorder %v6299_v50, 272.2  ;;  %vm1525_vm0 = vcmp.gt.f32.partialorder %v6302_v0, 272.2  ;;  %vm1526_vm10 = vcmp.gt.f32.partialorder %v6305_v1, 272.2 }
 0x216   :  { %vm1527_vm7 = vcmp.gt.f32.partialorder %v6308_v2, 272.2  ;;  %v1528_v63 = vsel %vm1512_vm1, 0.097087376, %v1480_v14  ;;  %v1529_v3 = vsel %vm1513_vm2, 0.097087376, %v1481_v15 }
 0x217   :  { %v1530_v5 = vsel %vm1514_vm3, 0.097087376, %v1482_v16  ;;  %v1531_v6 = vsel %vm1515_vm4, 0.097087376, %v1483_v57  ;;  %v1532_v9 = vsel %vm1516_vm5, 0.097087376, %v1484_v18 }
 0x218   :  { %v1533_v10 = vsel %vm1517_vm6, 0.097087376, %v1485_v8  ;;  %v1534_v11 = vsel %vm1518_vm8, 0.097087376, %v1486_v35  ;;  %v1535_v12 = vsel %vm1519_vm9, 0.097087376, %v1487_v36 }
 0x219   :  { %v1536_v14 = vsel %vm1520_vm11, 0.097087376, %v1488_v37  ;;  %v1537_v15 = vsel %vm1521_vm12, 0.097087376, %v1489_v41  ;;  %v1538_v16 = vsel %vm1522_vm13, 0.097087376, %v1490_v42 }
 0x21a   :  { %v1539_v57 = vsel %vm1523_vm14, 0.097087376, %v1491_v47  ;;  %v1540_v18 = vsel %vm1524_vm15, 0.097087376, %v1492_v46  ;;  %v1541_v8 = vsel %vm1525_vm0, 0.097087376, %v1493_v45 }
 0x21b   :  { %v1542_v35 = vsel %vm1526_vm10, 0.097087376, %v1494_v44  ;;  %v1543_v36 = vsel %vm1527_vm7, 0.097087376, %v1495_v43  ;;  %v1544_v37 = vsel %vm1512_vm1, -28.427185, %v1496_v4 }
 0x21c   :  { %v1545_v41 = vsel %vm1513_vm2, -28.427185, %v1497_v7  ;;  %v1546_v42 = vsel %vm1514_vm3, -28.427185, %v1498_v22  ;;  %v1547_v47 = vsel %vm1515_vm4, -28.427185, %v1499_v23 }
 0x21d   :  { %v1548_v46 = vsel %vm1516_vm5, -28.427185, %v1500_v24  ;;  %v1549_v45 = vsel %vm1517_vm6, -28.427185, %v1501_v29  ;;  %v1550_v44 = vsel %vm1518_vm8, -28.427185, %v1502_v30 }
 0x21e   :  { %v1551_v43 = vsel %vm1519_vm9, -28.427185, %v1503_v31  ;;  %v1552_v4 = vsel %vm1520_vm11, -28.427185, %v1504_v39  ;;  %v1553_v7 = vsel %vm1521_vm12, -28.427185, %v1505_v55 }
 0x21f   :  { %v1554_v22 = vsel %vm1522_vm13, -28.427185, %v1506_v56  ;;  %v1555_v23 = vsel %vm1523_vm14, -28.427185, %v1507_v58  ;;  %v1556_v24 = vsel %vm1524_vm15, -28.427185, %v1508_v59 }
 0x220   :  { %v1557_v29 = vsel %vm1525_vm0, -28.427185, %v1509_v60  ;;  %v1558_v30 = vsel %vm1526_vm10, -28.427185, %v1510_v61  ;;  %v1559_v31 = vsel %vm1527_vm7, -28.427185, %v1511_v62 }
 0x221   :  { %vm1560_vm1 = vcmp.gt.f32.partialorder %v6263_v19, 292.8  ;;  %vm1561_vm2 = vcmp.gt.f32.partialorder %v6266_v40, 292.8  ;;  %vm1562_vm3 = vcmp.gt.f32.partialorder %v6269_v51, 292.8 }
 0x222   :  { %vm1563_vm4 = vcmp.gt.f32.partialorder %v6272_v52, 292.8  ;;  %vm1564_vm5 = vcmp.gt.f32.partialorder %v6275_v53, 292.8  ;;  %vm1565_vm6 = vcmp.gt.f32.partialorder %v6278_v54, 292.8 }
 0x223   :  { %vm1566_vm8 = vcmp.gt.f32.partialorder %v6281_v48, 292.8  ;;  %vm1567_vm9 = vcmp.gt.f32.partialorder %v6284_v20, 292.8  ;;  %vm1568_vm11 = vcmp.gt.f32.partialorder %v6287_v25, 292.8 }
 0x224   :  { %vm1569_vm12 = vcmp.gt.f32.partialorder %v6290_v26, 292.8  ;;  %vm1570_vm13 = vcmp.gt.f32.partialorder %v6293_v27, 292.8  ;;  %vm1571_vm14 = vcmp.gt.f32.partialorder %v6296_v49, 292.8 }
 0x225   :  { %vm1572_vm15 = vcmp.gt.f32.partialorder %v6299_v50, 292.8  ;;  %vm1573_vm0 = vcmp.gt.f32.partialorder %v6302_v0, 292.8  ;;  %vm1574_vm10 = vcmp.gt.f32.partialorder %v6305_v1, 292.8 }
 0x226   :  { %vm1575_vm7 = vcmp.gt.f32.partialorder %v6308_v2, 292.8  ;;  %v1576_v39 = vsel %vm1560_vm1, 0.09174312, %v1528_v63  ;;  %v1577_v55 = vsel %vm1561_vm2, 0.09174312, %v1529_v3 }
 0x227   :  { %v1578_v56 = vsel %vm1562_vm3, 0.09174312, %v1530_v5  ;;  %v1579_v58 = vsel %vm1563_vm4, 0.09174312, %v1531_v6  ;;  %v1580_v59 = vsel %vm1564_vm5, 0.09174312, %v1532_v9 }
 0x228   :  { %v1581_v60 = vsel %vm1565_vm6, 0.09174312, %v1533_v10  ;;  %v1582_v61 = vsel %vm1566_vm8, 0.09174312, %v1534_v11  ;;  %v1583_v62 = vsel %vm1567_vm9, 0.09174312, %v1535_v12 }
 0x229   :  { %v1584_v63 = vsel %vm1568_vm11, 0.09174312, %v1536_v14  ;;  %v1585_v3 = vsel %vm1569_vm12, 0.09174312, %v1537_v15  ;;  %v1586_v5 = vsel %vm1570_vm13, 0.09174312, %v1538_v16 }
 0x22a   :  { %v1587_v6 = vsel %vm1571_vm14, 0.09174312, %v1539_v57  ;;  %v1588_v9 = vsel %vm1572_vm15, 0.09174312, %v1540_v18  ;;  %v1589_v10 = vsel %vm1573_vm0, 0.09174312, %v1541_v8 }
 0x22b   :  { %v1590_v11 = vsel %vm1574_vm10, 0.09174312, %v1542_v35  ;;  %v1591_v12 = vsel %vm1575_vm7, 0.09174312, %v1543_v36  ;;  %v1592_v14 = vsel %vm1560_vm1, -26.862385, %v1544_v37 }
 0x22c   :  { %v1593_v15 = vsel %vm1561_vm2, -26.862385, %v1545_v41  ;;  %v1594_v16 = vsel %vm1562_vm3, -26.862385, %v1546_v42  ;;  %v1595_v57 = vsel %vm1563_vm4, -26.862385, %v1547_v47 }
 0x22d   :  { %v1596_v18 = vsel %vm1564_vm5, -26.862385, %v1548_v46  ;;  %v1597_v8 = vsel %vm1565_vm6, -26.862385, %v1549_v45  ;;  %v1598_v35 = vsel %vm1566_vm8, -26.862385, %v1550_v44 }
 0x22e   :  { %v1599_v36 = vsel %vm1567_vm9, -26.862385, %v1551_v43  ;;  %v1600_v37 = vsel %vm1568_vm11, -26.862385, %v1552_v4  ;;  %v1601_v41 = vsel %vm1569_vm12, -26.862385, %v1553_v7 }
 0x22f   :  { %v1602_v42 = vsel %vm1570_vm13, -26.862385, %v1554_v22  ;;  %v1603_v47 = vsel %vm1571_vm14, -26.862385, %v1555_v23  ;;  %v1604_v46 = vsel %vm1572_vm15, -26.862385, %v1556_v24 }
 0x230   :  { %v1605_v45 = vsel %vm1573_vm0, -26.862385, %v1557_v29  ;;  %v1606_v44 = vsel %vm1574_vm10, -26.862385, %v1558_v30  ;;  %v1607_v43 = vsel %vm1575_vm7, -26.862385, %v1559_v31 }
 0x231   :  { %vm1608_vm1 = vcmp.gt.f32.partialorder %v6263_v19, 314.6  ;;  %vm1609_vm2 = vcmp.gt.f32.partialorder %v6266_v40, 314.6  ;;  %vm1610_vm3 = vcmp.gt.f32.partialorder %v6269_v51, 314.6 }
 0x232   :  { %vm1611_vm4 = vcmp.gt.f32.partialorder %v6272_v52, 314.6  ;;  %vm1612_vm5 = vcmp.gt.f32.partialorder %v6275_v53, 314.6  ;;  %vm1613_vm6 = vcmp.gt.f32.partialorder %v6278_v54, 314.6 }
 0x233   :  { %vm1614_vm8 = vcmp.gt.f32.partialorder %v6281_v48, 314.6  ;;  %vm1615_vm9 = vcmp.gt.f32.partialorder %v6284_v20, 314.6  ;;  %vm1616_vm11 = vcmp.gt.f32.partialorder %v6287_v25, 314.6 }
 0x234   :  { %vm1617_vm12 = vcmp.gt.f32.partialorder %v6290_v26, 314.6  ;;  %vm1618_vm13 = vcmp.gt.f32.partialorder %v6293_v27, 314.6  ;;  %vm1619_vm14 = vcmp.gt.f32.partialorder %v6296_v49, 314.6 }
 0x235   :  { %vm1620_vm15 = vcmp.gt.f32.partialorder %v6299_v50, 314.6  ;;  %vm1621_vm0 = vcmp.gt.f32.partialorder %v6302_v0, 314.6  ;;  %vm1622_vm10 = vcmp.gt.f32.partialorder %v6305_v1, 314.6 }
 0x236   :  { %vm1623_vm7 = vcmp.gt.f32.partialorder %v6308_v2, 314.6  ;;  %v7145_v4 = vsel %vm1608_vm1, 0.08658009, %v1576_v39  ;;  %v7149_v7 = vsel %vm1609_vm2, 0.08658009, %v1577_v55 }
 0x237   :  { %v7153_v22 = vsel %vm1610_vm3, 0.08658009, %v1578_v56  ;;  %v7157_v23 = vsel %vm1611_vm4, 0.08658009, %v1579_v58  ;;  %v7161_v24 = vsel %vm1612_vm5, 0.08658009, %v1580_v59 }
 0x238   :  { %v7165_v29 = vsel %vm1613_vm6, 0.08658009, %v1581_v60  ;;  %v7169_v30 = vsel %vm1614_vm8, 0.08658009, %v1582_v61  ;;  %v7173_v31 = vsel %vm1615_vm9, 0.08658009, %v1583_v62 }
 0x239   :  { %v7177_v39 = vsel %vm1616_vm11, 0.08658009, %v1584_v63  ;;  %v7181_v55 = vsel %vm1617_vm12, 0.08658009, %v1585_v3  ;;  %v7185_v56 = vsel %vm1618_vm13, 0.08658009, %v1586_v5 }
 0x23a   :  { %v7189_v58 = vsel %vm1619_vm14, 0.08658009, %v1587_v6  ;;  %v7193_v59 = vsel %vm1620_vm15, 0.08658009, %v1588_v9  ;;  %v7197_v60 = vsel %vm1621_vm0, 0.08658009, %v1589_v10 }
 0x23b   :  { %v7201_v61 = vsel %vm1622_vm10, 0.08658009, %v1590_v11  ;;  %v7205_v62 = vsel %vm1623_vm7, 0.08658009, %v1591_v12  ;;  %v7209_v63 = vsel %vm1608_vm1, -25.238094, %v1592_v14 }
 0x23c   :  { %v7213_v3 = vsel %vm1609_vm2, -25.238094, %v1593_v15  ;;  %v7217_v5 = vsel %vm1610_vm3, -25.238094, %v1594_v16  ;;  %v7221_v6 = vsel %vm1611_vm4, -25.238094, %v1595_v57 }
 0x23d   :  { %v7225_v9 = vsel %vm1612_vm5, -25.238094, %v1596_v18  ;;  %v7229_v19 = vsel %vm1613_vm6, -25.238094, %v1597_v8  ;;  %v7233_v40 = vsel %vm1614_vm8, -25.238094, %v1598_v35 }
 0x23e   :  { %v7237_v51 = vsel %vm1615_vm9, -25.238094, %v1599_v36  ;;  %v7241_v52 = vsel %vm1616_vm11, -25.238094, %v1600_v37  ;;  %v7245_v53 = vsel %vm1617_vm12, -25.238094, %v1601_v41 }
 0x23f   :  { %v7249_v54 = vsel %vm1618_vm13, -25.238094, %v1602_v42  ;;  %v7253_v48 = vsel %vm1619_vm14, -25.238094, %v1603_v47  ;;  %v7257_v20 = vsel %vm1620_vm15, -25.238094, %v1604_v46 }
 0x240   :  { %v7261_v25 = vsel %vm1621_vm0, -25.238094, %v1605_v45  ;;  %v7265_v26 = vsel %vm1622_vm10, -25.238094, %v1606_v44  ;;  %v7269_v27 = vsel %vm1623_vm7, -25.238094, %v1607_v43 }
 0x241   :  { %v7271_v10 = vld [vmem:[#allocation7] sm:$0xff]  ;;  %v7274_v49 = vld [vmem:[#allocation7 + $0x8] sm:$0xff]  ;;  %v7277_v50 = vld [vmem:[#allocation7 + $0x10] sm:$0xff] }
 0x242   :  { %vm1656_vm1 = vcmp.gt.f32.partialorder %v7271_v10, 337.7  ;;  %vm1657_vm2 = vcmp.gt.f32.partialorder %v7274_v49, 337.7  ;;  %vm1658_vm3 = vcmp.gt.f32.partialorder %v7277_v50, 337.7 }
 0x243   :  { %v7280_v0 = vld [vmem:[#allocation7 + $0x18] sm:$0xff]  ;;  %v7283_v1 = vld [vmem:[#allocation7 + $0x20] sm:$0xff]  ;;  %v7286_v2 = vld [vmem:[#allocation7 + $0x28] sm:$0xff]  ;;  %v1672_v37 = vsel %vm1656_vm1, 0.08230453, %v7145_v4 }
 0x244   :  { %vm1659_vm4 = vcmp.gt.f32.partialorder %v7280_v0, 337.7  ;;  %vm1660_vm5 = vcmp.gt.f32.partialorder %v7283_v1, 337.7  ;;  %vm1661_vm6 = vcmp.gt.f32.partialorder %v7286_v2, 337.7 }
 0x245   :  { %v7289_v11 = vld [vmem:[#allocation7 + $0x30] sm:$0xff]  ;;  %v7292_v12 = vld [vmem:[#allocation7 + $0x38] sm:$0xff]  ;;  %v7295_v14 = vld [vmem:[#allocation7 + $0x40] sm:$0xff]  ;;  %v1673_v41 = vsel %vm1657_vm2, 0.08230453, %v7149_v7 }
 0x246   :  { %vm1662_vm8 = vcmp.gt.f32.partialorder %v7289_v11, 337.7  ;;  %vm1663_vm9 = vcmp.gt.f32.partialorder %v7292_v12, 337.7  ;;  %vm1664_vm11 = vcmp.gt.f32.partialorder %v7295_v14, 337.7 }
 0x247   :  { %v7298_v15 = vld [vmem:[#allocation7 + $0x48] sm:$0xff]  ;;  %v7301_v16 = vld [vmem:[#allocation7 + $0x50] sm:$0xff]  ;;  %v7304_v57 = vld [vmem:[#allocation7 + $0x58] sm:$0xff]  ;;  %v1674_v42 = vsel %vm1658_vm3, 0.08230453, %v7153_v22 }
 0x248   :  { %vm1665_vm12 = vcmp.gt.f32.partialorder %v7298_v15, 337.7  ;;  %vm1666_vm13 = vcmp.gt.f32.partialorder %v7301_v16, 337.7  ;;  %vm1667_vm14 = vcmp.gt.f32.partialorder %v7304_v57, 337.7 }
 0x249   :  { %v7307_v18 = vld [vmem:[#allocation7 + $0x60] sm:$0xff]  ;;  %v7310_v8 = vld [vmem:[#allocation7 + $0x68] sm:$0xff]  ;;  %v7313_v35 = vld [vmem:[#allocation7 + $0x70] sm:$0xff]  ;;  %v1675_v47 = vsel %vm1659_vm4, 0.08230453, %v7157_v23 }
 0x24a   :  { %vm1668_vm15 = vcmp.gt.f32.partialorder %v7307_v18, 337.7  ;;  %vm1669_vm0 = vcmp.gt.f32.partialorder %v7310_v8, 337.7  ;;  %vm1670_vm10 = vcmp.gt.f32.partialorder %v7313_v35, 337.7 }
 0x24b   :  { %v7316_v36 = vld [vmem:[#allocation7 + $0x78] sm:$0xff]  ;;  %v1676_v46 = vsel %vm1660_vm5, 0.08230453, %v7161_v24  ;;  %v1677_v45 = vsel %vm1661_vm6, 0.08230453, %v7165_v29 }
 0x24c   :  { %vm1671_vm7 = vcmp.gt.f32.partialorder %v7316_v36, 337.7  ;;  %v1678_v44 = vsel %vm1662_vm8, 0.08230453, %v7169_v30  ;;  %v1679_v43 = vsel %vm1663_vm9, 0.08230453, %v7173_v31 }
 0x24d   :  { %v1680_v4 = vsel %vm1664_vm11, 0.08230453, %v7177_v39  ;;  %v1681_v7 = vsel %vm1665_vm12, 0.08230453, %v7181_v55  ;;  %v1682_v22 = vsel %vm1666_vm13, 0.08230453, %v7185_v56 }
 0x24e   :  { %v1683_v23 = vsel %vm1667_vm14, 0.08230453, %v7189_v58  ;;  %v1684_v24 = vsel %vm1668_vm15, 0.08230453, %v7193_v59  ;;  %v1685_v29 = vsel %vm1669_vm0, 0.08230453, %v7197_v60 }
 0x24f   :  { %v1686_v30 = vsel %vm1670_vm10, 0.08230453, %v7201_v61  ;;  %v1687_v31 = vsel %vm1671_vm7, 0.08230453, %v7205_v62  ;;  %v1688_v39 = vsel %vm1656_vm1, -23.794239, %v7209_v63 }
 0x250   :  { %v1689_v55 = vsel %vm1657_vm2, -23.794239, %v7213_v3  ;;  %v1690_v56 = vsel %vm1658_vm3, -23.794239, %v7217_v5  ;;  %v1691_v58 = vsel %vm1659_vm4, -23.794239, %v7221_v6 }
 0x251   :  { %v1692_v59 = vsel %vm1660_vm5, -23.794239, %v7225_v9  ;;  %v1693_v60 = vsel %vm1661_vm6, -23.794239, %v7229_v19  ;;  %v1694_v61 = vsel %vm1662_vm8, -23.794239, %v7233_v40 }
 0x252   :  { %v1695_v62 = vsel %vm1663_vm9, -23.794239, %v7237_v51  ;;  %v1696_v63 = vsel %vm1664_vm11, -23.794239, %v7241_v52  ;;  %v1697_v3 = vsel %vm1665_vm12, -23.794239, %v7245_v53 }
 0x253   :  { %v1698_v5 = vsel %vm1666_vm13, -23.794239, %v7249_v54  ;;  %v1699_v6 = vsel %vm1667_vm14, -23.794239, %v7253_v48  ;;  %v1700_v9 = vsel %vm1668_vm15, -23.794239, %v7257_v20 }
 0x254   :  { %v1701_v19 = vsel %vm1669_vm0, -23.794239, %v7261_v25  ;;  %v1702_v40 = vsel %vm1670_vm10, -23.794239, %v7265_v26  ;;  %v1703_v51 = vsel %vm1671_vm7, -23.794239, %v7269_v27 }
 0x255   :  { %vm1704_vm1 = vcmp.gt.f32.partialorder %v7271_v10, 362.0  ;;  %vm1705_vm2 = vcmp.gt.f32.partialorder %v7274_v49, 362.0  ;;  %vm1706_vm3 = vcmp.gt.f32.partialorder %v7277_v50, 362.0  ;;  %vm1707_vm4 = vcmp.gt.f32.partialorder %v7280_v0, 362.0 }
 0x256   :  { %vm1708_vm5 = vcmp.gt.f32.partialorder %v7283_v1, 362.0  ;;  %vm1709_vm6 = vcmp.gt.f32.partialorder %v7286_v2, 362.0  ;;  %vm1710_vm8 = vcmp.gt.f32.partialorder %v7289_v11, 362.0  ;;  %vm1711_vm9 = vcmp.gt.f32.partialorder %v7292_v12, 362.0 }
 0x257   :  { %vm1712_vm11 = vcmp.gt.f32.partialorder %v7295_v14, 362.0  ;;  %vm1713_vm12 = vcmp.gt.f32.partialorder %v7298_v15, 362.0  ;;  %vm1714_vm13 = vcmp.gt.f32.partialorder %v7301_v16, 362.0  ;;  %vm1715_vm14 = vcmp.gt.f32.partialorder %v7304_v57, 362.0 }
 0x258   :  { %vm1716_vm15 = vcmp.gt.f32.partialorder %v7307_v18, 362.0  ;;  %vm1717_vm0 = vcmp.gt.f32.partialorder %v7310_v8, 362.0  ;;  %vm1718_vm10 = vcmp.gt.f32.partialorder %v7313_v35, 362.0  ;;  %vm1719_vm7 = vcmp.gt.f32.partialorder %v7316_v36, 362.0 }
 0x259   :  { %v1720_v52 = vsel %vm1704_vm1, 0.078125, %v1672_v37  ;;  %v1721_v53 = vsel %vm1705_vm2, 0.078125, %v1673_v41  ;;  %v1722_v54 = vsel %vm1706_vm3, 0.078125, %v1674_v42  ;;  %v1723_v48 = vsel %vm1707_vm4, 0.078125, %v1675_v47 }
 0x25a   :  { %v1724_v20 = vsel %vm1708_vm5, 0.078125, %v1676_v46  ;;  %v1725_v25 = vsel %vm1709_vm6, 0.078125, %v1677_v45  ;;  %v1726_v26 = vsel %vm1710_vm8, 0.078125, %v1678_v44  ;;  %v1727_v27 = vsel %vm1711_vm9, 0.078125, %v1679_v43 }
 0x25b   :  { %v1728_v37 = vsel %vm1712_vm11, 0.078125, %v1680_v4  ;;  %v1729_v41 = vsel %vm1713_vm12, 0.078125, %v1681_v7  ;;  %v1730_v42 = vsel %vm1714_vm13, 0.078125, %v1682_v22  ;;  %v1731_v47 = vsel %vm1715_vm14, 0.078125, %v1683_v23 }
 0x25c   :  { %v1732_v46 = vsel %vm1716_vm15, 0.078125, %v1684_v24  ;;  %v1733_v45 = vsel %vm1717_vm0, 0.078125, %v1685_v29  ;;  %v1734_v44 = vsel %vm1718_vm10, 0.078125, %v1686_v30  ;;  %v1735_v43 = vsel %vm1719_vm7, 0.078125, %v1687_v31 }
 0x25d   :  { %v1736_v4 = vsel %vm1704_vm1, -22.28125, %v1688_v39  ;;  %v1737_v7 = vsel %vm1705_vm2, -22.28125, %v1689_v55  ;;  %v1738_v22 = vsel %vm1706_vm3, -22.28125, %v1690_v56  ;;  %v1739_v23 = vsel %vm1707_vm4, -22.28125, %v1691_v58 }
 0x25e   :  { %v1740_v24 = vsel %vm1708_vm5, -22.28125, %v1692_v59  ;;  %v1741_v29 = vsel %vm1709_vm6, -22.28125, %v1693_v60  ;;  %v1742_v30 = vsel %vm1710_vm8, -22.28125, %v1694_v61  ;;  %v1743_v31 = vsel %vm1711_vm9, -22.28125, %v1695_v62 }
 0x25f   :  { %v1744_v39 = vsel %vm1712_vm11, -22.28125, %v1696_v63  ;;  %v1745_v55 = vsel %vm1713_vm12, -22.28125, %v1697_v3  ;;  %v1746_v56 = vsel %vm1714_vm13, -22.28125, %v1698_v5  ;;  %v1747_v58 = vsel %vm1715_vm14, -22.28125, %v1699_v6 }
 0x260   :  { %v1748_v59 = vsel %vm1716_vm15, -22.28125, %v1700_v9  ;;  %v1749_v60 = vsel %vm1717_vm0, -22.28125, %v1701_v19  ;;  %v1750_v61 = vsel %vm1718_vm10, -22.28125, %v1702_v40  ;;  %v1751_v62 = vsel %vm1719_vm7, -22.28125, %v1703_v51 }
 0x261   :  { %vm1752_vm1 = vcmp.gt.f32.partialorder %v7271_v10, 387.6  ;;  %vm1753_vm2 = vcmp.gt.f32.partialorder %v7274_v49, 387.6  ;;  %vm1754_vm3 = vcmp.gt.f32.partialorder %v7277_v50, 387.6 }
 0x262   :  { %vm1755_vm4 = vcmp.gt.f32.partialorder %v7280_v0, 387.6  ;;  %vm1756_vm5 = vcmp.gt.f32.partialorder %v7283_v1, 387.6  ;;  %vm1757_vm6 = vcmp.gt.f32.partialorder %v7286_v2, 387.6 }
 0x263   :  { %vm1758_vm8 = vcmp.gt.f32.partialorder %v7289_v11, 387.6  ;;  %vm1759_vm9 = vcmp.gt.f32.partialorder %v7292_v12, 387.6  ;;  %vm1760_vm11 = vcmp.gt.f32.partialorder %v7295_v14, 387.6 }
 0x264   :  { %vm1761_vm12 = vcmp.gt.f32.partialorder %v7298_v15, 387.6  ;;  %vm1762_vm13 = vcmp.gt.f32.partialorder %v7301_v16, 387.6  ;;  %vm1763_vm14 = vcmp.gt.f32.partialorder %v7304_v57, 387.6 }
 0x265   :  { %vm1764_vm15 = vcmp.gt.f32.partialorder %v7307_v18, 387.6  ;;  %vm1765_vm0 = vcmp.gt.f32.partialorder %v7310_v8, 387.6  ;;  %vm1766_vm10 = vcmp.gt.f32.partialorder %v7313_v35, 387.6 }
 0x266   :  { %vm1767_vm7 = vcmp.gt.f32.partialorder %v7316_v36, 387.6  ;;  %v1768_v63 = vsel %vm1752_vm1, 0.074074075, %v1720_v52  ;;  %v1769_v3 = vsel %vm1753_vm2, 0.074074075, %v1721_v53 }
 0x267   :  { %v1770_v5 = vsel %vm1754_vm3, 0.074074075, %v1722_v54  ;;  %v1771_v6 = vsel %vm1755_vm4, 0.074074075, %v1723_v48  ;;  %v1772_v9 = vsel %vm1756_vm5, 0.074074075, %v1724_v20 }
 0x268   :  { %v1773_v19 = vsel %vm1757_vm6, 0.074074075, %v1725_v25  ;;  %v1774_v40 = vsel %vm1758_vm8, 0.074074075, %v1726_v26  ;;  %v1775_v51 = vsel %vm1759_vm9, 0.074074075, %v1727_v27 }
 0x269   :  { %v1776_v52 = vsel %vm1760_vm11, 0.074074075, %v1728_v37  ;;  %v1777_v53 = vsel %vm1761_vm12, 0.074074075, %v1729_v41  ;;  %v1778_v54 = vsel %vm1762_vm13, 0.074074075, %v1730_v42 }
 0x26a   :  { %v1779_v48 = vsel %vm1763_vm14, 0.074074075, %v1731_v47  ;;  %v1780_v20 = vsel %vm1764_vm15, 0.074074075, %v1732_v46  ;;  %v1781_v25 = vsel %vm1765_vm0, 0.074074075, %v1733_v45 }
 0x26b   :  { %v1782_v26 = vsel %vm1766_vm10, 0.074074075, %v1734_v44  ;;  %v1783_v27 = vsel %vm1767_vm7, 0.074074075, %v1735_v43  ;;  %v1784_v37 = vsel %vm1752_vm1, -20.711111, %v1736_v4 }
 0x26c   :  { %v1785_v41 = vsel %vm1753_vm2, -20.711111, %v1737_v7  ;;  %v1786_v42 = vsel %vm1754_vm3, -20.711111, %v1738_v22  ;;  %v1787_v47 = vsel %vm1755_vm4, -20.711111, %v1739_v23 }
 0x26d   :  { %v1788_v46 = vsel %vm1756_vm5, -20.711111, %v1740_v24  ;;  %v1789_v45 = vsel %vm1757_vm6, -20.711111, %v1741_v29  ;;  %v1790_v44 = vsel %vm1758_vm8, -20.711111, %v1742_v30 }
 0x26e   :  { %v1791_v43 = vsel %vm1759_vm9, -20.711111, %v1743_v31  ;;  %v1792_v4 = vsel %vm1760_vm11, -20.711111, %v1744_v39  ;;  %v1793_v7 = vsel %vm1761_vm12, -20.711111, %v1745_v55 }
 0x26f   :  { %v1794_v22 = vsel %vm1762_vm13, -20.711111, %v1746_v56  ;;  %v1795_v23 = vsel %vm1763_vm14, -20.711111, %v1747_v58  ;;  %v1796_v24 = vsel %vm1764_vm15, -20.711111, %v1748_v59 }
 0x270   :  { %v1797_v29 = vsel %vm1765_vm0, -20.711111, %v1749_v60  ;;  %v1798_v30 = vsel %vm1766_vm10, -20.711111, %v1750_v61  ;;  %v1799_v31 = vsel %vm1767_vm7, -20.711111, %v1751_v62 }
 0x271   :  { %vm1800_vm1 = vcmp.gt.f32.partialorder %v7271_v10, 414.6  ;;  %vm1801_vm2 = vcmp.gt.f32.partialorder %v7274_v49, 414.6  ;;  %vm1802_vm3 = vcmp.gt.f32.partialorder %v7277_v50, 414.6 }
 0x272   :  { %vm1803_vm4 = vcmp.gt.f32.partialorder %v7280_v0, 414.6  ;;  %vm1804_vm5 = vcmp.gt.f32.partialorder %v7283_v1, 414.6  ;;  %vm1805_vm6 = vcmp.gt.f32.partialorder %v7286_v2, 414.6 }
 0x273   :  { %vm11610_vm8 = vcmp.gt.f32.partialorder %v7289_v11, 414.6  ;;  %vm1807_vm9 = vcmp.gt.f32.partialorder %v7292_v12, 414.6  ;;  %vm1808_vm11 = vcmp.gt.f32.partialorder %v7295_v14, 414.6 }
 0x274   :  { %vm1809_vm12 = vcmp.gt.f32.partialorder %v7298_v15, 414.6  ;;  %vm1810_vm13 = vcmp.gt.f32.partialorder %v7301_v16, 414.6  ;;  %vm1811_vm14 = vcmp.gt.f32.partialorder %v7304_v57, 414.6 }
 0x275   :  { %vm1812_vm15 = vcmp.gt.f32.partialorder %v7307_v18, 414.6  ;;  %vm1813_vm0 = vcmp.gt.f32.partialorder %v7310_v8, 414.6  ;;  %vm1814_vm10 = vcmp.gt.f32.partialorder %v7313_v35, 414.6 }
 0x276   :  { %vm1815_vm7 = vcmp.gt.f32.partialorder %v7316_v36, 414.6  ;;  %v1816_v39 = vsel %vm1800_vm1, 0.07042254, %v1768_v63  ;;  %v1817_v55 = vsel %vm1801_vm2, 0.07042254, %v1769_v3 }
 0x277   :  { %v1818_v56 = vsel %vm1802_vm3, 0.07042254, %v1770_v5  ;;  %v1819_v58 = vsel %vm1803_vm4, 0.07042254, %v1771_v6  ;;  %v1820_v59 = vsel %vm1804_vm5, 0.07042254, %v1772_v9 }
 0x278   :  { %v1821_v60 = vsel %vm1805_vm6, 0.07042254, %v1773_v19  ;;  %v1822_v61 = vsel %vm11610_vm8, 0.07042254, %v1774_v40  ;;  %v1823_v62 = vsel %vm1807_vm9, 0.07042254, %v1775_v51 }
 0x279   :  { %v1824_v63 = vsel %vm1808_vm11, 0.07042254, %v1776_v52  ;;  %v1825_v3 = vsel %vm1809_vm12, 0.07042254, %v1777_v53  ;;  %v1826_v5 = vsel %vm1810_vm13, 0.07042254, %v1778_v54 }
 0x27a   :  { %v1827_v6 = vsel %vm1811_vm14, 0.07042254, %v1779_v48  ;;  %v1828_v9 = vsel %vm1812_vm15, 0.07042254, %v1780_v20  ;;  %v1829_v19 = vsel %vm1813_vm0, 0.07042254, %v1781_v25 }
 0x27b   :  { %v1830_v40 = vsel %vm1814_vm10, 0.07042254, %v1782_v26  ;;  %v1831_v51 = vsel %vm1815_vm7, 0.07042254, %v1783_v27  ;;  %v1832_v52 = vsel %vm1800_vm1, -19.197184, %v1784_v37 }
 0x27c   :  { %v1833_v53 = vsel %vm1801_vm2, -19.197184, %v1785_v41  ;;  %v1834_v54 = vsel %vm1802_vm3, -19.197184, %v1786_v42  ;;  %v1835_v48 = vsel %vm1803_vm4, -19.197184, %v1787_v47 }
 0x27d   :  { %v1836_v20 = vsel %vm1804_vm5, -19.197184, %v1788_v46  ;;  %v1837_v25 = vsel %vm1805_vm6, -19.197184, %v1789_v45  ;;  %vm11630_vm8 = vcmp.gt.f32.partialorder %v7289_v11, 414.6 }
 0x27e   :  { %v1838_v26 = vsel %vm11630_vm8, -19.197184, %v1790_v44  ;;  %v1839_v27 = vsel %vm1807_vm9, -19.197184, %v1791_v43  ;;  %v1840_v37 = vsel %vm1808_vm11, -19.197184, %v1792_v4 }
 0x27f   :  { %v1841_v41 = vsel %vm1809_vm12, -19.197184, %v1793_v7  ;;  %v1842_v42 = vsel %vm1810_vm13, -19.197184, %v1794_v22  ;;  %v1843_v47 = vsel %vm1811_vm14, -19.197184, %v1795_v23 }
 0x280   :  { %v1844_v46 = vsel %vm1812_vm15, -19.197184, %v1796_v24  ;;  %v1845_v45 = vsel %vm1813_vm0, -19.197184, %v1797_v29  ;;  %v1846_v44 = vsel %vm1814_vm10, -19.197184, %v1798_v30 }
 0x281   :  { %v1847_v43 = vsel %vm1815_vm7, -19.197184, %v1799_v31  ;;  %vm1849_vm1 = vcmp.gt.f32.partialorder %v7274_v49, 443.0  ;;  %vm1850_vm2 = vcmp.gt.f32.partialorder %v7277_v50, 443.0  ;;  %vm1851_vm3 = vcmp.gt.f32.partialorder %v7280_v0, 443.0 }
 0x282   :  { %vm1852_vm4 = vcmp.gt.f32.partialorder %v7283_v1, 443.0  ;;  %vm1853_vm5 = vcmp.gt.f32.partialorder %v7286_v2, 443.0  ;;  %vm1854_vm6 = vcmp.gt.f32.partialorder %v7289_v11, 443.0  ;;  %vm1855_vm8 = vcmp.gt.f32.partialorder %v7292_v12, 443.0 }
 0x283   :  { %vm1856_vm9 = vcmp.gt.f32.partialorder %v7295_v14, 443.0  ;;  %vm1857_vm11 = vcmp.gt.f32.partialorder %v7298_v15, 443.0  ;;  %vm1858_vm12 = vcmp.gt.f32.partialorder %v7301_v16, 443.0  ;;  %vm1859_vm13 = vcmp.gt.f32.partialorder %v7304_v57, 443.0 }
 0x284   :  { %vm1860_vm14 = vcmp.gt.f32.partialorder %v7307_v18, 443.0  ;;  %vm1861_vm15 = vcmp.gt.f32.partialorder %v7310_v8, 443.0  ;;  %vm1862_vm0 = vcmp.gt.f32.partialorder %v7313_v35, 443.0  ;;  %vm1863_vm10 = vcmp.gt.f32.partialorder %v7316_v36, 443.0 }
 0x285   :  { %vm11631_vm7 = vcmp.gt.f32.partialorder %v7271_v10, 443.0  ;;  %v1865_v7 = vsel %vm1849_vm1, 0.06688963, %v1817_v55  ;;  %v1866_v22 = vsel %vm1850_vm2, 0.06688963, %v1818_v56 }
 0x286   :  { %v1864_v4 = vsel %vm11631_vm7, 0.06688963, %v1816_v39  ;;  %v1867_v23 = vsel %vm1851_vm3, 0.06688963, %v1819_v58  ;;  %v1868_v24 = vsel %vm1852_vm4, 0.06688963, %v1820_v59 }
 0x287   :  { %v1869_v29 = vsel %vm1853_vm5, 0.06688963, %v1821_v60  ;;  %v1870_v30 = vsel %vm1854_vm6, 0.06688963, %v1822_v61  ;;  %v1871_v31 = vsel %vm1855_vm8, 0.06688963, %v1823_v62 }
 0x288   :  { %v1872_v39 = vsel %vm1856_vm9, 0.06688963, %v1824_v63  ;;  %v1873_v55 = vsel %vm1857_vm11, 0.06688963, %v1825_v3  ;;  %v1874_v56 = vsel %vm1858_vm12, 0.06688963, %v1826_v5 }
 0x289   :  { %v1875_v58 = vsel %vm1859_vm13, 0.06688963, %v1827_v6  ;;  %v1876_v59 = vsel %vm1860_vm14, 0.06688963, %v1828_v9  ;;  %v1877_v60 = vsel %vm1861_vm15, 0.06688963, %v1829_v19 }
 0x28a   :  { %v1878_v61 = vsel %vm1862_vm0, 0.06688963, %v1830_v40  ;;  %v1879_v62 = vsel %vm1863_vm10, 0.06688963, %v1831_v51  ;;  %v1880_v63 = vsel %vm11631_vm7, -17.632107, %v1832_v52 }
 0x28b   :  { %v1881_v3 = vsel %vm1849_vm1, -17.632107, %v1833_v53  ;;  %v1882_v5 = vsel %vm1850_vm2, -17.632107, %v1834_v54  ;;  %v1883_v6 = vsel %vm1851_vm3, -17.632107, %v1835_v48 }
 0x28c   :  { %v1884_v9 = vsel %vm1852_vm4, -17.632107, %v1836_v20  ;;  %v1885_v19 = vsel %vm1853_vm5, -17.632107, %v1837_v25  ;;  %v1886_v40 = vsel %vm1854_vm6, -17.632107, %v1838_v26 }
 0x28d   :  { %v1887_v51 = vsel %vm1855_vm8, -17.632107, %v1839_v27  ;;  %v1888_v52 = vsel %vm1856_vm9, -17.632107, %v1840_v37  ;;  %v1889_v53 = vsel %vm1857_vm11, -17.632107, %v1841_v41 }
 0x28e   :  { %v1890_v54 = vsel %vm1858_vm12, -17.632107, %v1842_v42  ;;  %v1891_v48 = vsel %vm1859_vm13, -17.632107, %v1843_v47  ;;  %v1892_v20 = vsel %vm1860_vm14, -17.632107, %v1844_v46 }
 0x28f   :  { %v1893_v25 = vsel %vm1861_vm15, -17.632107, %v1845_v45  ;;  %v1894_v26 = vsel %vm1862_vm0, -17.632107, %v1846_v44  ;;  %v1895_v27 = vsel %vm1863_vm10, -17.632107, %v1847_v43 }
 0x290   :  { %vm1896_vm1 = vcmp.gt.f32.partialorder %v7271_v10, 472.9  ;;  %vm1897_vm2 = vcmp.gt.f32.partialorder %v7274_v49, 472.9  ;;  %vm1898_vm3 = vcmp.gt.f32.partialorder %v7277_v50, 472.9 }
 0x291   :  { %vm1899_vm4 = vcmp.gt.f32.partialorder %v7280_v0, 472.9  ;;  %vm1900_vm5 = vcmp.gt.f32.partialorder %v7283_v1, 472.9  ;;  %vm1901_vm6 = vcmp.gt.f32.partialorder %v7286_v2, 472.9 }
 0x292   :  { %vm1902_vm8 = vcmp.gt.f32.partialorder %v7289_v11, 472.9  ;;  %vm1903_vm9 = vcmp.gt.f32.partialorder %v7292_v12, 472.9  ;;  %vm1904_vm11 = vcmp.gt.f32.partialorder %v7295_v14, 472.9 }
 0x293   :  { %vm1905_vm12 = vcmp.gt.f32.partialorder %v7298_v15, 472.9  ;;  %vm1906_vm13 = vcmp.gt.f32.partialorder %v7301_v16, 472.9  ;;  %vm1907_vm14 = vcmp.gt.f32.partialorder %v7304_v57, 472.9 }
 0x294   :  { %vm1908_vm15 = vcmp.gt.f32.partialorder %v7307_v18, 472.9  ;;  %vm1909_vm0 = vcmp.gt.f32.partialorder %v7310_v8, 472.9  ;;  %vm1910_vm10 = vcmp.gt.f32.partialorder %v7313_v35, 472.9 }
 0x295   :  { %vm1911_vm7 = vcmp.gt.f32.partialorder %v7316_v36, 472.9  ;;  %v1912_v37 = vsel %vm1896_vm1, 0.06369427, %v1864_v4  ;;  %v1913_v41 = vsel %vm1897_vm2, 0.06369427, %v1865_v7 }
 0x296   :  { %v1914_v42 = vsel %vm1898_vm3, 0.06369427, %v1866_v22  ;;  %v1915_v47 = vsel %vm1899_vm4, 0.06369427, %v1867_v23  ;;  %v1916_v46 = vsel %vm1900_vm5, 0.06369427, %v1868_v24 }
 0x297   :  { %v1917_v45 = vsel %vm1901_vm6, 0.06369427, %v1869_v29  ;;  %v1918_v44 = vsel %vm1902_vm8, 0.06369427, %v1870_v30  ;;  %v1919_v43 = vsel %vm1903_vm9, 0.06369427, %v1871_v31 }
 0x298   :  { %v1920_v4 = vsel %vm1904_vm11, 0.06369427, %v1872_v39  ;;  %v1921_v7 = vsel %vm1905_vm12, 0.06369427, %v1873_v55  ;;  %v1922_v22 = vsel %vm1906_vm13, 0.06369427, %v1874_v56 }
 0x299   :  { %v1923_v23 = vsel %vm1907_vm14, 0.06369427, %v1875_v58  ;;  %v1924_v24 = vsel %vm1908_vm15, 0.06369427, %v1876_v59  ;;  %v1925_v29 = vsel %vm1909_vm0, 0.06369427, %v1877_v60 }
 0x29a   :  { %v1926_v30 = vsel %vm1910_vm10, 0.06369427, %v1878_v61  ;;  %v1927_v31 = vsel %vm1911_vm7, 0.06369427, %v1879_v62  ;;  %v1928_v39 = vsel %vm1896_vm1, -16.12102, %v1880_v63 }
 0x29b   :  { %v1929_v55 = vsel %vm1897_vm2, -16.12102, %v1881_v3  ;;  %v1930_v56 = vsel %vm1898_vm3, -16.12102, %v1882_v5  ;;  %v1931_v58 = vsel %vm1899_vm4, -16.12102, %v1883_v6 }
 0x29c   :  { %v1932_v59 = vsel %vm1900_vm5, -16.12102, %v1884_v9  ;;  %v1933_v60 = vsel %vm1901_vm6, -16.12102, %v1885_v19  ;;  %v1934_v61 = vsel %vm1902_vm8, -16.12102, %v1886_v40 }
 0x29d   :  { %v1935_v62 = vsel %vm1903_vm9, -16.12102, %v1887_v51  ;;  %v1936_v63 = vsel %vm1904_vm11, -16.12102, %v1888_v52  ;;  %v1937_v3 = vsel %vm1905_vm12, -16.12102, %v1889_v53 }
 0x29e   :  { %v1938_v5 = vsel %vm1906_vm13, -16.12102, %v1890_v54  ;;  %v1939_v6 = vsel %vm1907_vm14, -16.12102, %v1891_v48  ;;  %v1940_v9 = vsel %vm1908_vm15, -16.12102, %v1892_v20 }
 0x29f   :  { %v1941_v19 = vsel %vm1909_vm0, -16.12102, %v1893_v25  ;;  %v1942_v40 = vsel %vm1910_vm10, -16.12102, %v1894_v26  ;;  %v1943_v51 = vsel %vm1911_vm7, -16.12102, %v1895_v27 }
 0x2a0   :  { %vm1944_vm1 = vcmp.gt.f32.partialorder %v7271_v10, 504.3  ;;  %vm1945_vm2 = vcmp.gt.f32.partialorder %v7274_v49, 504.3  ;;  %vm1946_vm3 = vcmp.gt.f32.partialorder %v7277_v50, 504.3 }
 0x2a1   :  { %vm1947_vm4 = vcmp.gt.f32.partialorder %v7280_v0, 504.3  ;;  %vm1948_vm5 = vcmp.gt.f32.partialorder %v7283_v1, 504.3  ;;  %vm1949_vm6 = vcmp.gt.f32.partialorder %v7286_v2, 504.3 }
 0x2a2   :  { %vm1950_vm8 = vcmp.gt.f32.partialorder %v7289_v11, 504.3  ;;  %vm1951_vm9 = vcmp.gt.f32.partialorder %v7292_v12, 504.3  ;;  %vm1952_vm11 = vcmp.gt.f32.partialorder %v7295_v14, 504.3 }
 0x2a3   :  { %vm1953_vm12 = vcmp.gt.f32.partialorder %v7298_v15, 504.3  ;;  %vm1954_vm13 = vcmp.gt.f32.partialorder %v7301_v16, 504.3  ;;  %vm1955_vm14 = vcmp.gt.f32.partialorder %v7304_v57, 504.3 }
 0x2a4   :  { %vm1956_vm15 = vcmp.gt.f32.partialorder %v7307_v18, 504.3  ;;  %vm1957_vm0 = vcmp.gt.f32.partialorder %v7310_v8, 504.3  ;;  %vm1958_vm10 = vcmp.gt.f32.partialorder %v7313_v35, 504.3 }
 0x2a5   :  { %vm1959_vm7 = vcmp.gt.f32.partialorder %v7316_v36, 504.3  ;;  %v1960_v52 = vsel %vm1944_vm1, 0.060790274, %v1912_v37  ;;  %v1961_v53 = vsel %vm1945_vm2, 0.060790274, %v1913_v41 }
 0x2a6   :  { %v1962_v54 = vsel %vm1946_vm3, 0.060790274, %v1914_v42  ;;  %v1963_v48 = vsel %vm1947_vm4, 0.060790274, %v1915_v47  ;;  %v1964_v20 = vsel %vm1948_vm5, 0.060790274, %v1916_v46 }
 0x2a7   :  { %v1965_v25 = vsel %vm1949_vm6, 0.060790274, %v1917_v45  ;;  %v1966_v26 = vsel %vm1950_vm8, 0.060790274, %v1918_v44  ;;  %v1967_v27 = vsel %vm1951_vm9, 0.060790274, %v1919_v43 }
 0x2a8   :  { %v1968_v37 = vsel %vm1952_vm11, 0.060790274, %v1920_v4  ;;  %v1969_v41 = vsel %vm1953_vm12, 0.060790274, %v1921_v7  ;;  %v1970_v42 = vsel %vm1954_vm13, 0.060790274, %v1922_v22 }
 0x2a9   :  { %v1971_v47 = vsel %vm1955_vm14, 0.060790274, %v1923_v23  ;;  %v1972_v46 = vsel %vm1956_vm15, 0.060790274, %v1924_v24  ;;  %v1973_v45 = vsel %vm1957_vm0, 0.060790274, %v1925_v29 }
 0x2aa   :  { %v1974_v44 = vsel %vm1958_vm10, 0.060790274, %v1926_v30  ;;  %v1975_v43 = vsel %vm1959_vm7, 0.060790274, %v1927_v31  ;;  %v1976_v4 = vsel %vm1944_vm1, -14.656535, %v1928_v39 }
 0x2ab   :  { %v1977_v7 = vsel %vm1945_vm2, -14.656535, %v1929_v55  ;;  %v1978_v22 = vsel %vm1946_vm3, -14.656535, %v1930_v56  ;;  %v1979_v23 = vsel %vm1947_vm4, -14.656535, %v1931_v58 }
 0x2ac   :  { %v1980_v24 = vsel %vm1948_vm5, -14.656535, %v1932_v59  ;;  %v1981_v29 = vsel %vm1949_vm6, -14.656535, %v1933_v60  ;;  %v1982_v30 = vsel %vm1950_vm8, -14.656535, %v1934_v61 }
 0x2ad   :  { %v1983_v31 = vsel %vm1951_vm9, -14.656535, %v1935_v62  ;;  %v1984_v39 = vsel %vm1952_vm11, -14.656535, %v1936_v63  ;;  %v1985_v55 = vsel %vm1953_vm12, -14.656535, %v1937_v3 }
 0x2ae   :  { %v1986_v56 = vsel %vm1954_vm13, -14.656535, %v1938_v5  ;;  %v1987_v58 = vsel %vm1955_vm14, -14.656535, %v1939_v6  ;;  %v1988_v59 = vsel %vm1956_vm15, -14.656535, %v1940_v9 }
 0x2af   :  { %v1989_v60 = vsel %vm1957_vm0, -14.656535, %v1941_v19  ;;  %v1990_v61 = vsel %vm1958_vm10, -14.656535, %v1942_v40  ;;  %v1991_v62 = vsel %vm1959_vm7, -14.656535, %v1943_v51 }
 0x2b0   :  { %vm1992_vm1 = vcmp.gt.f32.partialorder %v7271_v10, 537.2  ;;  %vm1993_vm2 = vcmp.gt.f32.partialorder %v7274_v49, 537.2  ;;  %vm1994_vm3 = vcmp.gt.f32.partialorder %v7277_v50, 537.2 }
 0x2b1   :  { %vm1995_vm4 = vcmp.gt.f32.partialorder %v7280_v0, 537.2  ;;  %vm1996_vm5 = vcmp.gt.f32.partialorder %v7283_v1, 537.2  ;;  %vm1997_vm6 = vcmp.gt.f32.partialorder %v7286_v2, 537.2 }
 0x2b2   :  { %vm1998_vm8 = vcmp.gt.f32.partialorder %v7289_v11, 537.2  ;;  %vm1999_vm9 = vcmp.gt.f32.partialorder %v7292_v12, 537.2  ;;  %vm2000_vm11 = vcmp.gt.f32.partialorder %v7295_v14, 537.2 }
 0x2b3   :  { %vm2001_vm12 = vcmp.gt.f32.partialorder %v7298_v15, 537.2  ;;  %vm2002_vm13 = vcmp.gt.f32.partialorder %v7301_v16, 537.2  ;;  %vm2003_vm14 = vcmp.gt.f32.partialorder %v7304_v57, 537.2 }
 0x2b4   :  { %vm2004_vm15 = vcmp.gt.f32.partialorder %v7307_v18, 537.2  ;;  %vm2005_vm0 = vcmp.gt.f32.partialorder %v7310_v8, 537.2  ;;  %vm2006_vm10 = vcmp.gt.f32.partialorder %v7313_v35, 537.2 }
 0x2b5   :  { %vm2007_vm7 = vcmp.gt.f32.partialorder %v7316_v36, 537.2  ;;  %v2008_v63 = vsel %vm1992_vm1, 0.057971016, %v1960_v52  ;;  %v2009_v3 = vsel %vm1993_vm2, 0.057971016, %v1961_v53 }
 0x2b6   :  { %v2010_v5 = vsel %vm1994_vm3, 0.057971016, %v1962_v54  ;;  %v2011_v6 = vsel %vm1995_vm4, 0.057971016, %v1963_v48  ;;  %v2012_v9 = vsel %vm1996_vm5, 0.057971016, %v1964_v20 }
 0x2b7   :  { %v2013_v19 = vsel %vm1997_vm6, 0.057971016, %v1965_v25  ;;  %v2014_v40 = vsel %vm1998_vm8, 0.057971016, %v1966_v26  ;;  %v2015_v51 = vsel %vm1999_vm9, 0.057971016, %v1967_v27 }
 0x2b8   :  { %v2016_v52 = vsel %vm2000_vm11, 0.057971016, %v1968_v37  ;;  %v2017_v53 = vsel %vm2001_vm12, 0.057971016, %v1969_v41  ;;  %v2018_v54 = vsel %vm2002_vm13, 0.057971016, %v1970_v42 }
 0x2b9   :  { %v2019_v48 = vsel %vm2003_vm14, 0.057971016, %v1971_v47  ;;  %v2020_v20 = vsel %vm2004_vm15, 0.057971016, %v1972_v46  ;;  %v2021_v25 = vsel %vm2005_vm0, 0.057971016, %v1973_v45 }
 0x2ba   :  { %v2022_v26 = vsel %vm2006_vm10, 0.057971016, %v1974_v44  ;;  %v2023_v27 = vsel %vm2007_vm7, 0.057971016, %v1975_v43  ;;  %v2024_v37 = vsel %vm1992_vm1, -13.142029, %v1976_v4 }
 0x2bb   :  { %v2025_v41 = vsel %vm1993_vm2, -13.142029, %v1977_v7  ;;  %v2026_v42 = vsel %vm1994_vm3, -13.142029, %v1978_v22  ;;  %v2027_v47 = vsel %vm1995_vm4, -13.142029, %v1979_v23 }
 0x2bc   :  { %v2028_v46 = vsel %vm1996_vm5, -13.142029, %v1980_v24  ;;  %v2029_v45 = vsel %vm1997_vm6, -13.142029, %v1981_v29  ;;  %v2030_v44 = vsel %vm1998_vm8, -13.142029, %v1982_v30 }
 0x2bd   :  { %v2031_v43 = vsel %vm1999_vm9, -13.142029, %v1983_v31  ;;  %v2032_v4 = vsel %vm2000_vm11, -13.142029, %v1984_v39  ;;  %v2033_v7 = vsel %vm2001_vm12, -13.142029, %v1985_v55 }
 0x2be   :  { %v2034_v22 = vsel %vm2002_vm13, -13.142029, %v1986_v56  ;;  %v2035_v23 = vsel %vm2003_vm14, -13.142029, %v1987_v58  ;;  %v2036_v24 = vsel %vm2004_vm15, -13.142029, %v1988_v59 }
 0x2bf   :  { %v2037_v29 = vsel %vm2005_vm0, -13.142029, %v1989_v60  ;;  %v2038_v30 = vsel %vm2006_vm10, -13.142029, %v1990_v61  ;;  %v2039_v31 = vsel %vm2007_vm7, -13.142029, %v1991_v62 }
 0x2c0   :  { %vm2040_vm1 = vcmp.gt.f32.partialorder %v7271_v10, 571.7  ;;  %vm2041_vm2 = vcmp.gt.f32.partialorder %v7274_v49, 571.7  ;;  %vm2042_vm3 = vcmp.gt.f32.partialorder %v7277_v50, 571.7 }
 0x2c1   :  { %vm2043_vm4 = vcmp.gt.f32.partialorder %v7280_v0, 571.7  ;;  %vm2044_vm5 = vcmp.gt.f32.partialorder %v7283_v1, 571.7  ;;  %vm2045_vm6 = vcmp.gt.f32.partialorder %v7286_v2, 571.7 }
 0x2c2   :  { %vm2046_vm8 = vcmp.gt.f32.partialorder %v7289_v11, 571.7  ;;  %vm2047_vm9 = vcmp.gt.f32.partialorder %v7292_v12, 571.7  ;;  %vm2048_vm11 = vcmp.gt.f32.partialorder %v7295_v14, 571.7 }
 0x2c3   :  { %vm2049_vm12 = vcmp.gt.f32.partialorder %v7298_v15, 571.7  ;;  %vm2050_vm13 = vcmp.gt.f32.partialorder %v7301_v16, 571.7  ;;  %vm2051_vm14 = vcmp.gt.f32.partialorder %v7304_v57, 571.7 }
 0x2c4   :  { %vm2052_vm15 = vcmp.gt.f32.partialorder %v7307_v18, 571.7  ;;  %vm2053_vm0 = vcmp.gt.f32.partialorder %v7310_v8, 571.7  ;;  %vm2054_vm10 = vcmp.gt.f32.partialorder %v7313_v35, 571.7 }
 0x2c5   :  { %vm2055_vm7 = vcmp.gt.f32.partialorder %v7316_v36, 571.7  ;;  %v2056_v39 = vsel %vm2040_vm1, 0.055248618, %v2008_v63  ;;  %v2057_v55 = vsel %vm2041_vm2, 0.055248618, %v2009_v3 }
 0x2c6   :  { %v2058_v56 = vsel %vm2042_vm3, 0.055248618, %v2010_v5  ;;  %v2059_v58 = vsel %vm2043_vm4, 0.055248618, %v2011_v6  ;;  %v2060_v59 = vsel %vm2044_vm5, 0.055248618, %v2012_v9 }
 0x2c7   :  { %v2061_v60 = vsel %vm2045_vm6, 0.055248618, %v2013_v19  ;;  %v2062_v61 = vsel %vm2046_vm8, 0.055248618, %v2014_v40  ;;  %v2063_v62 = vsel %vm2047_vm9, 0.055248618, %v2015_v51 }
 0x2c8   :  { %v2064_v63 = vsel %vm2048_vm11, 0.055248618, %v2016_v52  ;;  %v2065_v3 = vsel %vm2049_vm12, 0.055248618, %v2017_v53  ;;  %v2066_v5 = vsel %vm2050_vm13, 0.055248618, %v2018_v54 }
 0x2c9   :  { %v2067_v6 = vsel %vm2051_vm14, 0.055248618, %v2019_v48  ;;  %v2068_v9 = vsel %vm2052_vm15, 0.055248618, %v2020_v20  ;;  %v2069_v19 = vsel %vm2053_vm0, 0.055248618, %v2021_v25 }
 0x2ca   :  { %v2070_v40 = vsel %vm2054_vm10, 0.055248618, %v2022_v26  ;;  %v2071_v51 = vsel %vm2055_vm7, 0.055248618, %v2023_v27  ;;  %v2072_v52 = vsel %vm2040_vm1, -11.585635, %v2024_v37 }
 0x2cb   :  { %v2073_v53 = vsel %vm2041_vm2, -11.585635, %v2025_v41  ;;  %v2074_v54 = vsel %vm2042_vm3, -11.585635, %v2026_v42  ;;  %v2075_v48 = vsel %vm2043_vm4, -11.585635, %v2027_v47 }
 0x2cc   :  { %v2076_v20 = vsel %vm2044_vm5, -11.585635, %v2028_v46  ;;  %v2077_v25 = vsel %vm2045_vm6, -11.585635, %v2029_v45  ;;  %v2078_v26 = vsel %vm2046_vm8, -11.585635, %v2030_v44 }
 0x2cd   :  { %v2079_v27 = vsel %vm2047_vm9, -11.585635, %v2031_v43  ;;  %v2080_v37 = vsel %vm2048_vm11, -11.585635, %v2032_v4  ;;  %v2081_v41 = vsel %vm2049_vm12, -11.585635, %v2033_v7 }
 0x2ce   :  { %v2082_v42 = vsel %vm2050_vm13, -11.585635, %v2034_v22  ;;  %v2083_v47 = vsel %vm2051_vm14, -11.585635, %v2035_v23  ;;  %v2084_v46 = vsel %vm2052_vm15, -11.585635, %v2036_v24 }
 0x2cf   :  { %v2085_v45 = vsel %vm2053_vm0, -11.585635, %v2037_v29  ;;  %v2086_v44 = vsel %vm2054_vm10, -11.585635, %v2038_v30  ;;  %v2087_v43 = vsel %vm2055_vm7, -11.585635, %v2039_v31 }
 0x2d0   :  { %vm2088_vm1 = vcmp.gt.f32.partialorder %v7271_v10, 607.9  ;;  %vm2089_vm2 = vcmp.gt.f32.partialorder %v7274_v49, 607.9  ;;  %vm2090_vm3 = vcmp.gt.f32.partialorder %v7277_v50, 607.9 }
 0x2d1   :  { %vm2091_vm4 = vcmp.gt.f32.partialorder %v7280_v0, 607.9  ;;  %vm2092_vm5 = vcmp.gt.f32.partialorder %v7283_v1, 607.9  ;;  %vm2093_vm6 = vcmp.gt.f32.partialorder %v7286_v2, 607.9 }
 0x2d2   :  { %vm2094_vm8 = vcmp.gt.f32.partialorder %v7289_v11, 607.9  ;;  %vm2095_vm9 = vcmp.gt.f32.partialorder %v7292_v12, 607.9  ;;  %vm2096_vm11 = vcmp.gt.f32.partialorder %v7295_v14, 607.9 }
 0x2d3   :  { %vm2097_vm12 = vcmp.gt.f32.partialorder %v7298_v15, 607.9  ;;  %vm2098_vm13 = vcmp.gt.f32.partialorder %v7301_v16, 607.9  ;;  %vm2099_vm14 = vcmp.gt.f32.partialorder %v7304_v57, 607.9 }
 0x2d4   :  { %vm2100_vm15 = vcmp.gt.f32.partialorder %v7307_v18, 607.9  ;;  %vm2101_vm0 = vcmp.gt.f32.partialorder %v7310_v8, 607.9  ;;  %vm2102_vm10 = vcmp.gt.f32.partialorder %v7313_v35, 607.9 }
 0x2d5   :  { %vm2103_vm7 = vcmp.gt.f32.partialorder %v7316_v36, 607.9  ;;  %v2104_v4 = vsel %vm2088_vm1, 0.052770447, %v2056_v39  ;;  %v2105_v7 = vsel %vm2089_vm2, 0.052770447, %v2057_v55 }
 0x2d6   :  { %v2106_v22 = vsel %vm2090_vm3, 0.052770447, %v2058_v56  ;;  %v2107_v23 = vsel %vm2091_vm4, 0.052770447, %v2059_v58  ;;  %v2108_v24 = vsel %vm2092_vm5, 0.052770447, %v2060_v59 }
 0x2d7   :  { %v2109_v29 = vsel %vm2093_vm6, 0.052770447, %v2061_v60  ;;  %v2110_v30 = vsel %vm2094_vm8, 0.052770447, %v2062_v61  ;;  %v2111_v31 = vsel %vm2095_vm9, 0.052770447, %v2063_v62 }
 0x2d8   :  { %v2112_v39 = vsel %vm2096_vm11, 0.052770447, %v2064_v63  ;;  %v2113_v55 = vsel %vm2097_vm12, 0.052770447, %v2065_v3  ;;  %v2114_v56 = vsel %vm2098_vm13, 0.052770447, %v2066_v5 }
 0x2d9   :  { %v2115_v58 = vsel %vm2099_vm14, 0.052770447, %v2067_v6  ;;  %v2116_v59 = vsel %vm2100_vm15, 0.052770447, %v2068_v9  ;;  %v2117_v60 = vsel %vm2101_vm0, 0.052770447, %v2069_v19 }
 0x2da   :  { %v2118_v61 = vsel %vm2102_vm10, 0.052770447, %v2070_v40  ;;  %v2119_v62 = vsel %vm2103_vm7, 0.052770447, %v2071_v51  ;;  %v2120_v63 = vsel %vm2088_vm1, -10.079156, %v2072_v52 }
 0x2db   :  { %v2121_v3 = vsel %vm2089_vm2, -10.079156, %v2073_v53  ;;  %v2122_v5 = vsel %vm2090_vm3, -10.079156, %v2074_v54  ;;  %v2123_v6 = vsel %vm2091_vm4, -10.079156, %v2075_v48 }
 0x2dc   :  { %v2124_v9 = vsel %vm2092_vm5, -10.079156, %v2076_v20  ;;  %v2125_v19 = vsel %vm2093_vm6, -10.079156, %v2077_v25  ;;  %v2126_v40 = vsel %vm2094_vm8, -10.079156, %v2078_v26 }
 0x2dd   :  { %v2127_v51 = vsel %vm2095_vm9, -10.079156, %v2079_v27  ;;  %v2128_v52 = vsel %vm2096_vm11, -10.079156, %v2080_v37  ;;  %v2129_v53 = vsel %vm2097_vm12, -10.079156, %v2081_v41 }
 0x2de   :  { %v2130_v54 = vsel %vm2098_vm13, -10.079156, %v2082_v42  ;;  %v2131_v48 = vsel %vm2099_vm14, -10.079156, %v2083_v47  ;;  %v2132_v20 = vsel %vm2100_vm15, -10.079156, %v2084_v46 }
 0x2df   :  { %v2133_v25 = vsel %vm2101_vm0, -10.079156, %v2085_v45  ;;  %v2134_v26 = vsel %vm2102_vm10, -10.079156, %v2086_v44  ;;  %v2135_v27 = vsel %vm2103_vm7, -10.079156, %v2087_v43 }
 0x2e0   :  { %vm2136_vm1 = vcmp.gt.f32.partialorder %v7271_v10, 645.8  ;;  %vm2137_vm2 = vcmp.gt.f32.partialorder %v7274_v49, 645.8  ;;  %vm2138_vm3 = vcmp.gt.f32.partialorder %v7277_v50, 645.8 }
 0x2e1   :  { %vm2139_vm4 = vcmp.gt.f32.partialorder %v7280_v0, 645.8  ;;  %vm2140_vm5 = vcmp.gt.f32.partialorder %v7283_v1, 645.8  ;;  %vm2141_vm6 = vcmp.gt.f32.partialorder %v7286_v2, 645.8 }
 0x2e2   :  { %vm2142_vm8 = vcmp.gt.f32.partialorder %v7289_v11, 645.8  ;;  %vm2143_vm9 = vcmp.gt.f32.partialorder %v7292_v12, 645.8  ;;  %vm2144_vm11 = vcmp.gt.f32.partialorder %v7295_v14, 645.8 }
 0x2e3   :  { %vm2145_vm12 = vcmp.gt.f32.partialorder %v7298_v15, 645.8  ;;  %vm2146_vm13 = vcmp.gt.f32.partialorder %v7301_v16, 645.8  ;;  %vm2147_vm14 = vcmp.gt.f32.partialorder %v7304_v57, 645.8 }
 0x2e4   :  { %vm2148_vm15 = vcmp.gt.f32.partialorder %v7307_v18, 645.8  ;;  %vm2149_vm0 = vcmp.gt.f32.partialorder %v7310_v8, 645.8  ;;  %vm2150_vm10 = vcmp.gt.f32.partialorder %v7313_v35, 645.8 }
 0x2e5   :  { %vm2151_vm7 = vcmp.gt.f32.partialorder %v7316_v36, 645.8  ;;  %v8153_v37 = vsel %vm2136_vm1, 0.05050505, %v2104_v4  ;;  %v8157_v41 = vsel %vm2137_vm2, 0.05050505, %v2105_v7 }
 0x2e6   :  { %v8161_v42 = vsel %vm2138_vm3, 0.05050505, %v2106_v22  ;;  %v8165_v47 = vsel %vm2139_vm4, 0.05050505, %v2107_v23  ;;  %v8169_v46 = vsel %vm2140_vm5, 0.05050505, %v2108_v24 }
 0x2e7   :  { %v8173_v45 = vsel %vm2141_vm6, 0.05050505, %v2109_v29  ;;  %v8177_v44 = vsel %vm2142_vm8, 0.05050505, %v2110_v30  ;;  %v8181_v43 = vsel %vm2143_vm9, 0.05050505, %v2111_v31 }
 0x2e8   :  { %v8185_v4 = vsel %vm2144_vm11, 0.05050505, %v2112_v39  ;;  %v8189_v7 = vsel %vm2145_vm12, 0.05050505, %v2113_v55  ;;  %v8193_v22 = vsel %vm2146_vm13, 0.05050505, %v2114_v56 }
 0x2e9   :  { %v8197_v23 = vsel %vm2147_vm14, 0.05050505, %v2115_v58  ;;  %v8201_v24 = vsel %vm2148_vm15, 0.05050505, %v2116_v59  ;;  %v8205_v29 = vsel %vm2149_vm0, 0.05050505, %v2117_v60 }
 0x2ea   :  { %v8209_v30 = vsel %vm2150_vm10, 0.05050505, %v2118_v61  ;;  %v8213_v31 = vsel %vm2151_vm7, 0.05050505, %v2119_v62  ;;  %v8217_v39 = vsel %vm2136_vm1, -8.616161, %v2120_v63 }
 0x2eb   :  { %v8221_v55 = vsel %vm2137_vm2, -8.616161, %v2121_v3  ;;  %v8225_v56 = vsel %vm2138_vm3, -8.616161, %v2122_v5  ;;  %v8229_v58 = vsel %vm2139_vm4, -8.616161, %v2123_v6 }
 0x2ec   :  { %v8233_v59 = vsel %vm2140_vm5, -8.616161, %v2124_v9  ;;  %v8237_v10 = vsel %vm2141_vm6, -8.616161, %v2125_v19  ;;  %v8241_v49 = vsel %vm2142_vm8, -8.616161, %v2126_v40 }
 0x2ed   :  { %v8245_v50 = vsel %vm2143_vm9, -8.616161, %v2127_v51  ;;  %v8249_v0 = vsel %vm2144_vm11, -8.616161, %v2128_v52  ;;  %v8253_v1 = vsel %vm2145_vm12, -8.616161, %v2129_v53 }
 0x2ee   :  { %v8257_v2 = vsel %vm2146_vm13, -8.616161, %v2130_v54  ;;  %v8261_v11 = vsel %vm2147_vm14, -8.616161, %v2131_v48  ;;  %v8265_v12 = vsel %vm2148_vm15, -8.616161, %v2132_v20 }
 0x2ef   :  { %v8269_v14 = vsel %vm2149_vm0, -8.616161, %v2133_v25  ;;  %v8273_v15 = vsel %vm2150_vm10, -8.616161, %v2134_v26  ;;  %v8277_v16 = vsel %vm2151_vm7, -8.616161, %v2135_v27 }
 0x2f0   :  { %v8279_v60 = vld [vmem:[#allocation7] sm:$0xff]  ;;  %v8282_v57 = vld [vmem:[#allocation7 + $0x8] sm:$0xff]  ;;  %v8285_v18 = vld [vmem:[#allocation7 + $0x10] sm:$0xff] }
 0x2f1   :  { %vm2184_vm1 = vcmp.gt.f32.partialorder %v8279_v60, 685.4  ;;  %vm2185_vm2 = vcmp.gt.f32.partialorder %v8282_v57, 685.4  ;;  %vm2186_vm3 = vcmp.gt.f32.partialorder %v8285_v18, 685.4 }
 0x2f2   :  { %v8288_v8 = vld [vmem:[#allocation7 + $0x18] sm:$0xff]  ;;  %v8291_v35 = vld [vmem:[#allocation7 + $0x20] sm:$0xff]  ;;  %v8294_v36 = vld [vmem:[#allocation7 + $0x28] sm:$0xff]  ;;  %v2200_v52 = vsel %vm2184_vm1, 0.04819277, %v8153_v37 }
 0x2f3   :  { %vm2187_vm4 = vcmp.gt.f32.partialorder %v8288_v8, 685.4  ;;  %vm2188_vm5 = vcmp.gt.f32.partialorder %v8291_v35, 685.4  ;;  %vm2189_vm6 = vcmp.gt.f32.partialorder %v8294_v36, 685.4 }
 0x2f4   :  { %v8297_v61 = vld [vmem:[#allocation7 + $0x30] sm:$0xff]  ;;  %v8300_v62 = vld [vmem:[#allocation7 + $0x38] sm:$0xff]  ;;  %v8303_v63 = vld [vmem:[#allocation7 + $0x40] sm:$0xff]  ;;  %v2201_v53 = vsel %vm2185_vm2, 0.04819277, %v8157_v41 }
 0x2f5   :  { %vm2190_vm8 = vcmp.gt.f32.partialorder %v8297_v61, 685.4  ;;  %vm2191_vm9 = vcmp.gt.f32.partialorder %v8300_v62, 685.4  ;;  %vm2192_vm11 = vcmp.gt.f32.partialorder %v8303_v63, 685.4 }
 0x2f6   :  { %v8306_v3 = vld [vmem:[#allocation7 + $0x48] sm:$0xff]  ;;  %v8309_v5 = vld [vmem:[#allocation7 + $0x50] sm:$0xff]  ;;  %v8312_v6 = vld [vmem:[#allocation7 + $0x58] sm:$0xff]  ;;  %v2202_v54 = vsel %vm2186_vm3, 0.04819277, %v8161_v42 }
 0x2f7   :  { %vm2193_vm12 = vcmp.gt.f32.partialorder %v8306_v3, 685.4  ;;  %vm2194_vm13 = vcmp.gt.f32.partialorder %v8309_v5, 685.4  ;;  %vm2195_vm14 = vcmp.gt.f32.partialorder %v8312_v6, 685.4 }
 0x2f8   :  { %v8315_v9 = vld [vmem:[#allocation7 + $0x60] sm:$0xff]  ;;  %v8318_v19 = vld [vmem:[#allocation7 + $0x68] sm:$0xff]  ;;  %v8321_v40 = vld [vmem:[#allocation7 + $0x70] sm:$0xff]  ;;  %v2203_v48 = vsel %vm2187_vm4, 0.04819277, %v8165_v47 }
 0x2f9   :  { %vm2196_vm15 = vcmp.gt.f32.partialorder %v8315_v9, 685.4  ;;  %vm2197_vm0 = vcmp.gt.f32.partialorder %v8318_v19, 685.4  ;;  %vm2198_vm10 = vcmp.gt.f32.partialorder %v8321_v40, 685.4 }
 0x2fa   :  { %v8324_v51 = vld [vmem:[#allocation7 + $0x78] sm:$0xff]  ;;  %v2204_v20 = vsel %vm2188_vm5, 0.04819277, %v8169_v46  ;;  %v2205_v25 = vsel %vm2189_vm6, 0.04819277, %v8173_v45 }
 0x2fb   :  { %vm2199_vm7 = vcmp.gt.f32.partialorder %v8324_v51, 685.4  ;;  %v2206_v26 = vsel %vm2190_vm8, 0.04819277, %v8177_v44  ;;  %v2207_v27 = vsel %vm2191_vm9, 0.04819277, %v8181_v43 }
 0x2fc   :  { %v2208_v37 = vsel %vm2192_vm11, 0.04819277, %v8185_v4  ;;  %v2209_v41 = vsel %vm2193_vm12, 0.04819277, %v8189_v7  ;;  %v2210_v42 = vsel %vm2194_vm13, 0.04819277, %v8193_v22 }
 0x2fd   :  { %v2211_v47 = vsel %vm2195_vm14, 0.04819277, %v8197_v23  ;;  %v2212_v46 = vsel %vm2196_vm15, 0.04819277, %v8201_v24  ;;  %v2213_v45 = vsel %vm2197_vm0, 0.04819277, %v8205_v29 }
 0x2fe   :  { %v2214_v44 = vsel %vm2198_vm10, 0.04819277, %v8209_v30  ;;  %v2215_v43 = vsel %vm2199_vm7, 0.04819277, %v8213_v31  ;;  %v2216_v4 = vsel %vm2184_vm1, -7.0313253, %v8217_v39 }
 0x2ff   :  { %v2217_v7 = vsel %vm2185_vm2, -7.0313253, %v8221_v55  ;;  %v2218_v22 = vsel %vm2186_vm3, -7.0313253, %v8225_v56  ;;  %v2219_v23 = vsel %vm2187_vm4, -7.0313253, %v8229_v58 }
 0x300   :  { %v2220_v24 = vsel %vm2188_vm5, -7.0313253, %v8233_v59  ;;  %v2221_v29 = vsel %vm2189_vm6, -7.0313253, %v8237_v10  ;;  %v2222_v30 = vsel %vm2190_vm8, -7.0313253, %v8241_v49 }
 0x301   :  { %v2223_v31 = vsel %vm2191_vm9, -7.0313253, %v8245_v50  ;;  %v2224_v39 = vsel %vm2192_vm11, -7.0313253, %v8249_v0  ;;  %v2225_v55 = vsel %vm2193_vm12, -7.0313253, %v8253_v1 }
 0x302   :  { %v2226_v56 = vsel %vm2194_vm13, -7.0313253, %v8257_v2  ;;  %v2227_v58 = vsel %vm2195_vm14, -7.0313253, %v8261_v11  ;;  %v2228_v59 = vsel %vm2196_vm15, -7.0313253, %v8265_v12 }
 0x303   :  { %v2229_v10 = vsel %vm2197_vm0, -7.0313253, %v8269_v14  ;;  %v2230_v49 = vsel %vm2198_vm10, -7.0313253, %v8273_v15  ;;  %v2231_v50 = vsel %vm2199_vm7, -7.0313253, %v8277_v16 }
 0x304   :  { %vm2232_vm1 = vcmp.gt.f32.partialorder %v8279_v60, 726.9  ;;  %vm2233_vm2 = vcmp.gt.f32.partialorder %v8282_v57, 726.9  ;;  %vm2234_vm3 = vcmp.gt.f32.partialorder %v8285_v18, 726.9 }
 0x305   :  { %vm2235_vm4 = vcmp.gt.f32.partialorder %v8288_v8, 726.9  ;;  %vm2236_vm5 = vcmp.gt.f32.partialorder %v8291_v35, 726.9  ;;  %vm2237_vm6 = vcmp.gt.f32.partialorder %v8294_v36, 726.9 }
 0x306   :  { %vm2238_vm8 = vcmp.gt.f32.partialorder %v8297_v61, 726.9  ;;  %vm2239_vm9 = vcmp.gt.f32.partialorder %v8300_v62, 726.9  ;;  %vm2240_vm11 = vcmp.gt.f32.partialorder %v8303_v63, 726.9 }
 0x307   :  { %vm2241_vm12 = vcmp.gt.f32.partialorder %v8306_v3, 726.9  ;;  %vm2242_vm13 = vcmp.gt.f32.partialorder %v8309_v5, 726.9  ;;  %vm2243_vm14 = vcmp.gt.f32.partialorder %v8312_v6, 726.9 }
 0x308   :  { %vm2244_vm15 = vcmp.gt.f32.partialorder %v8315_v9, 726.9  ;;  %vm2245_vm0 = vcmp.gt.f32.partialorder %v8318_v19, 726.9  ;;  %vm2246_vm10 = vcmp.gt.f32.partialorder %v8321_v40, 726.9 }
 0x309   :  { %vm2247_vm7 = vcmp.gt.f32.partialorder %v8324_v51, 726.9  ;;  %v2248_v0 = vsel %vm2232_vm1, 0.046189375, %v2200_v52  ;;  %v2249_v1 = vsel %vm2233_vm2, 0.046189375, %v2201_v53 }
 0x30a   :  { %v2250_v2 = vsel %vm2234_vm3, 0.046189375, %v2202_v54  ;;  %v2251_v11 = vsel %vm2235_vm4, 0.046189375, %v2203_v48  ;;  %v2252_v12 = vsel %vm2236_vm5, 0.046189375, %v2204_v20 }
 0x30b   :  { %v2253_v14 = vsel %vm2237_vm6, 0.046189375, %v2205_v25  ;;  %v2254_v15 = vsel %vm2238_vm8, 0.046189375, %v2206_v26  ;;  %v2255_v16 = vsel %vm2239_vm9, 0.046189375, %v2207_v27 }
 0x30c   :  { %v2256_v52 = vsel %vm2240_vm11, 0.046189375, %v2208_v37  ;;  %v2257_v53 = vsel %vm2241_vm12, 0.046189375, %v2209_v41  ;;  %v2258_v54 = vsel %vm2242_vm13, 0.046189375, %v2210_v42 }
 0x30d   :  { %v2259_v48 = vsel %vm2243_vm14, 0.046189375, %v2211_v47  ;;  %v2260_v20 = vsel %vm2244_vm15, 0.046189375, %v2212_v46  ;;  %v2261_v25 = vsel %vm2245_vm0, 0.046189375, %v2213_v45 }
 0x30e   :  { %v2262_v26 = vsel %vm2246_vm10, 0.046189375, %v2214_v44  ;;  %v2263_v27 = vsel %vm2247_vm7, 0.046189375, %v2215_v43  ;;  %v2264_v37 = vsel %vm2232_vm1, -5.5750575, %v2216_v4 }
 0x30f   :  { %v2265_v41 = vsel %vm2233_vm2, -5.5750575, %v2217_v7  ;;  %v2266_v42 = vsel %vm2234_vm3, -5.5750575, %v2218_v22  ;;  %v2267_v47 = vsel %vm2235_vm4, -5.5750575, %v2219_v23 }
 0x310   :  { %v2268_v46 = vsel %vm2236_vm5, -5.5750575, %v2220_v24  ;;  %v2269_v45 = vsel %vm2237_vm6, -5.5750575, %v2221_v29  ;;  %v2270_v44 = vsel %vm2238_vm8, -5.5750575, %v2222_v30 }
 0x311   :  { %v2271_v43 = vsel %vm2239_vm9, -5.5750575, %v2223_v31  ;;  %v2272_v4 = vsel %vm2240_vm11, -5.5750575, %v2224_v39  ;;  %v2273_v7 = vsel %vm2241_vm12, -5.5750575, %v2225_v55 }
 0x312   :  { %v2274_v22 = vsel %vm2242_vm13, -5.5750575, %v2226_v56  ;;  %v2275_v23 = vsel %vm2243_vm14, -5.5750575, %v2227_v58  ;;  %v2276_v24 = vsel %vm2244_vm15, -5.5750575, %v2228_v59 }
 0x313   :  { %v2277_v29 = vsel %vm2245_vm0, -5.5750575, %v2229_v10  ;;  %v2278_v30 = vsel %vm2246_vm10, -5.5750575, %v2230_v49  ;;  %v2279_v31 = vsel %vm2247_vm7, -5.5750575, %v2231_v50 }
 0x314   :  { %vm2280_vm1 = vcmp.gt.f32.partialorder %v8279_v60, 770.2  ;;  %vm2281_vm2 = vcmp.gt.f32.partialorder %v8282_v57, 770.2  ;;  %vm2282_vm3 = vcmp.gt.f32.partialorder %v8285_v18, 770.2 }
 0x315   :  { %vm2283_vm4 = vcmp.gt.f32.partialorder %v8288_v8, 770.2  ;;  %vm2284_vm5 = vcmp.gt.f32.partialorder %v8291_v35, 770.2  ;;  %vm2285_vm6 = vcmp.gt.f32.partialorder %v8294_v36, 770.2 }
 0x316   :  { %vm2286_vm8 = vcmp.gt.f32.partialorder %v8297_v61, 770.2  ;;  %vm2287_vm9 = vcmp.gt.f32.partialorder %v8300_v62, 770.2  ;;  %vm2288_vm11 = vcmp.gt.f32.partialorder %v8303_v63, 770.2 }
 0x317   :  { %vm2289_vm12 = vcmp.gt.f32.partialorder %v8306_v3, 770.2  ;;  %vm2290_vm13 = vcmp.gt.f32.partialorder %v8309_v5, 770.2  ;;  %vm2291_vm14 = vcmp.gt.f32.partialorder %v8312_v6, 770.2 }
 0x318   :  { %vm2292_vm15 = vcmp.gt.f32.partialorder %v8315_v9, 770.2  ;;  %vm2293_vm0 = vcmp.gt.f32.partialorder %v8318_v19, 770.2  ;;  %vm2294_vm10 = vcmp.gt.f32.partialorder %v8321_v40, 770.2 }
 0x319   :  { %vm2295_vm7 = vcmp.gt.f32.partialorder %v8324_v51, 770.2  ;;  %v2296_v39 = vsel %vm2280_vm1, 0.044247787, %v2248_v0  ;;  %v2297_v55 = vsel %vm2281_vm2, 0.044247787, %v2249_v1 }
 0x31a   :  { %v2298_v56 = vsel %vm2282_vm3, 0.044247787, %v2250_v2  ;;  %v2299_v58 = vsel %vm2283_vm4, 0.044247787, %v2251_v11  ;;  %v2300_v59 = vsel %vm2284_vm5, 0.044247787, %v2252_v12 }
 0x31b   :  { %v2301_v10 = vsel %vm2285_vm6, 0.044247787, %v2253_v14  ;;  %v2302_v49 = vsel %vm2286_vm8, 0.044247787, %v2254_v15  ;;  %v2303_v50 = vsel %vm2287_vm9, 0.044247787, %v2255_v16 }
 0x31c   :  { %v2304_v0 = vsel %vm2288_vm11, 0.044247787, %v2256_v52  ;;  %v2305_v1 = vsel %vm2289_vm12, 0.044247787, %v2257_v53  ;;  %v2306_v2 = vsel %vm2290_vm13, 0.044247787, %v2258_v54 }
 0x31d   :  { %v2307_v11 = vsel %vm2291_vm14, 0.044247787, %v2259_v48  ;;  %v2308_v12 = vsel %vm2292_vm15, 0.044247787, %v2260_v20  ;;  %v2309_v14 = vsel %vm2293_vm0, 0.044247787, %v2261_v25 }
 0x31e   :  { %v2310_v15 = vsel %vm2294_vm10, 0.044247787, %v2262_v26  ;;  %v2311_v16 = vsel %vm2295_vm7, 0.044247787, %v2263_v27  ;;  %v2312_v52 = vsel %vm2280_vm1, -4.079646, %v2264_v37 }
 0x31f   :  { %v2313_v53 = vsel %vm2281_vm2, -4.079646, %v2265_v41  ;;  %v2314_v54 = vsel %vm2282_vm3, -4.079646, %v2266_v42  ;;  %v2315_v48 = vsel %vm2283_vm4, -4.079646, %v2267_v47 }
 0x320   :  { %v2316_v20 = vsel %vm2284_vm5, -4.079646, %v2268_v46  ;;  %v2317_v25 = vsel %vm2285_vm6, -4.079646, %v2269_v45  ;;  %v2318_v26 = vsel %vm2286_vm8, -4.079646, %v2270_v44 }
 0x321   :  { %v2319_v27 = vsel %vm2287_vm9, -4.079646, %v2271_v43  ;;  %v2320_v37 = vsel %vm2288_vm11, -4.079646, %v2272_v4  ;;  %v2321_v41 = vsel %vm2289_vm12, -4.079646, %v2273_v7 }
 0x322   :  { %v2322_v42 = vsel %vm2290_vm13, -4.079646, %v2274_v22  ;;  %v2323_v47 = vsel %vm2291_vm14, -4.079646, %v2275_v23  ;;  %v2324_v46 = vsel %vm2292_vm15, -4.079646, %v2276_v24 }
 0x323   :  { %v2325_v45 = vsel %vm2293_vm0, -4.079646, %v2277_v29  ;;  %v2326_v44 = vsel %vm2294_vm10, -4.079646, %v2278_v30  ;;  %v2327_v43 = vsel %vm2295_vm7, -4.079646, %v2279_v31 }
 0x324   :  { %vm2328_vm1 = vcmp.gt.f32.partialorder %v8279_v60, 815.4  ;;  %vm2329_vm2 = vcmp.gt.f32.partialorder %v8282_v57, 815.4  ;;  %vm2330_vm3 = vcmp.gt.f32.partialorder %v8285_v18, 815.4 }
 0x325   :  { %vm2331_vm4 = vcmp.gt.f32.partialorder %v8288_v8, 815.4  ;;  %vm2332_vm5 = vcmp.gt.f32.partialorder %v8291_v35, 815.4  ;;  %vm2333_vm6 = vcmp.gt.f32.partialorder %v8294_v36, 815.4 }
 0x326   :  { %vm2334_vm8 = vcmp.gt.f32.partialorder %v8297_v61, 815.4  ;;  %vm2335_vm9 = vcmp.gt.f32.partialorder %v8300_v62, 815.4  ;;  %vm2336_vm11 = vcmp.gt.f32.partialorder %v8303_v63, 815.4 }
 0x327   :  { %vm2337_vm12 = vcmp.gt.f32.partialorder %v8306_v3, 815.4  ;;  %vm2338_vm13 = vcmp.gt.f32.partialorder %v8309_v5, 815.4  ;;  %vm2339_vm14 = vcmp.gt.f32.partialorder %v8312_v6, 815.4 }
 0x328   :  { %vm2340_vm15 = vcmp.gt.f32.partialorder %v8315_v9, 815.4  ;;  %vm2341_vm0 = vcmp.gt.f32.partialorder %v8318_v19, 815.4  ;;  %vm2342_vm10 = vcmp.gt.f32.partialorder %v8321_v40, 815.4 }
 0x329   :  { %vm2343_vm7 = vcmp.gt.f32.partialorder %v8324_v51, 815.4  ;;  %v2344_v4 = vsel %vm2328_vm1, 0.042372882, %v2296_v39  ;;  %v2345_v7 = vsel %vm2329_vm2, 0.042372882, %v2297_v55 }
 0x32a   :  { %v2346_v22 = vsel %vm2330_vm3, 0.042372882, %v2298_v56  ;;  %v2347_v23 = vsel %vm2331_vm4, 0.042372882, %v2299_v58  ;;  %v2348_v24 = vsel %vm2332_vm5, 0.042372882, %v2300_v59 }
 0x32b   :  { %v2349_v29 = vsel %vm2333_vm6, 0.042372882, %v2301_v10  ;;  %v2350_v30 = vsel %vm2334_vm8, 0.042372882, %v2302_v49  ;;  %v2351_v31 = vsel %vm2335_vm9, 0.042372882, %v2303_v50 }
 0x32c   :  { %v2352_v39 = vsel %vm2336_vm11, 0.042372882, %v2304_v0  ;;  %v2353_v55 = vsel %vm2337_vm12, 0.042372882, %v2305_v1  ;;  %v2354_v56 = vsel %vm2338_vm13, 0.042372882, %v2306_v2 }
 0x32d   :  { %v2355_v58 = vsel %vm2339_vm14, 0.042372882, %v2307_v11  ;;  %v2356_v59 = vsel %vm2340_vm15, 0.042372882, %v2308_v12  ;;  %v2357_v10 = vsel %vm2341_vm0, 0.042372882, %v2309_v14 }
 0x32e   :  { %v2358_v49 = vsel %vm2342_vm10, 0.042372882, %v2310_v15  ;;  %v2359_v50 = vsel %vm2343_vm7, 0.042372882, %v2311_v16  ;;  %v2360_v0 = vsel %vm2328_vm1, -2.5508475, %v2312_v52 }
 0x32f   :  { %v2361_v1 = vsel %vm2329_vm2, -2.5508475, %v2313_v53  ;;  %v2362_v2 = vsel %vm2330_vm3, -2.5508475, %v2314_v54  ;;  %v2363_v11 = vsel %vm2331_vm4, -2.5508475, %v2315_v48 }
 0x330   :  { %v2364_v12 = vsel %vm2332_vm5, -2.5508475, %v2316_v20  ;;  %v2365_v14 = vsel %vm2333_vm6, -2.5508475, %v2317_v25  ;;  %v2366_v15 = vsel %vm2334_vm8, -2.5508475, %v2318_v26 }
 0x331   :  { %v2367_v16 = vsel %vm2335_vm9, -2.5508475, %v2319_v27  ;;  %v2368_v52 = vsel %vm2336_vm11, -2.5508475, %v2320_v37  ;;  %v2369_v53 = vsel %vm2337_vm12, -2.5508475, %v2321_v41 }
 0x332   :  { %v2370_v54 = vsel %vm2338_vm13, -2.5508475, %v2322_v42  ;;  %v2371_v48 = vsel %vm2339_vm14, -2.5508475, %v2323_v47  ;;  %v2372_v20 = vsel %vm2340_vm15, -2.5508475, %v2324_v46 }
 0x333   :  { %v2373_v25 = vsel %vm2341_vm0, -2.5508475, %v2325_v45  ;;  %v2374_v26 = vsel %vm2342_vm10, -2.5508475, %v2326_v44  ;;  %v2375_v27 = vsel %vm2343_vm7, -2.5508475, %v2327_v43 }
 0x334   :  { %vm2376_vm1 = vcmp.gt.f32.partialorder %v8279_v60, 862.6  ;;  %vm2377_vm2 = vcmp.gt.f32.partialorder %v8282_v57, 862.6  ;;  %vm2378_vm3 = vcmp.gt.f32.partialorder %v8285_v18, 862.6 }
 0x335   :  { %vm2379_vm4 = vcmp.gt.f32.partialorder %v8288_v8, 862.6  ;;  %vm2380_vm5 = vcmp.gt.f32.partialorder %v8291_v35, 862.6  ;;  %vm2381_vm6 = vcmp.gt.f32.partialorder %v8294_v36, 862.6 }
 0x336   :  { %vm2382_vm8 = vcmp.gt.f32.partialorder %v8297_v61, 862.6  ;;  %vm2383_vm9 = vcmp.gt.f32.partialorder %v8300_v62, 862.6  ;;  %vm2384_vm11 = vcmp.gt.f32.partialorder %v8303_v63, 862.6 }
 0x337   :  { %vm2385_vm12 = vcmp.gt.f32.partialorder %v8306_v3, 862.6  ;;  %vm2386_vm13 = vcmp.gt.f32.partialorder %v8309_v5, 862.6  ;;  %vm2387_vm14 = vcmp.gt.f32.partialorder %v8312_v6, 862.6 }
 0x338   :  { %vm2388_vm15 = vcmp.gt.f32.partialorder %v8315_v9, 862.6  ;;  %vm2389_vm0 = vcmp.gt.f32.partialorder %v8318_v19, 862.6  ;;  %vm2390_vm10 = vcmp.gt.f32.partialorder %v8321_v40, 862.6 }
 0x339   :  { %vm2391_vm7 = vcmp.gt.f32.partialorder %v8324_v51, 862.6  ;;  %v2392_v37 = vsel %vm2376_vm1, 0.040650405, %v2344_v4  ;;  %v2393_v41 = vsel %vm2377_vm2, 0.040650405, %v2345_v7 }
 0x33a   :  { %v2394_v42 = vsel %vm2378_vm3, 0.040650405, %v2346_v22  ;;  %v2395_v47 = vsel %vm2379_vm4, 0.040650405, %v2347_v23  ;;  %v2396_v46 = vsel %vm2380_vm5, 0.040650405, %v2348_v24 }
 0x33b   :  { %v2397_v45 = vsel %vm2381_vm6, 0.040650405, %v2349_v29  ;;  %v2398_v44 = vsel %vm2382_vm8, 0.040650405, %v2350_v30  ;;  %v2399_v43 = vsel %vm2383_vm9, 0.040650405, %v2351_v31 }
 0x33c   :  { %v2400_v4 = vsel %vm2384_vm11, 0.040650405, %v2352_v39  ;;  %v2401_v7 = vsel %vm2385_vm12, 0.040650405, %v2353_v55  ;;  %v2402_v22 = vsel %vm2386_vm13, 0.040650405, %v2354_v56 }
 0x33d   :  { %v2403_v23 = vsel %vm2387_vm14, 0.040650405, %v2355_v58  ;;  %v2404_v24 = vsel %vm2388_vm15, 0.040650405, %v2356_v59  ;;  %v2405_v29 = vsel %vm2389_vm0, 0.040650405, %v2357_v10 }
 0x33e   :  { %v2406_v30 = vsel %vm2390_vm10, 0.040650405, %v2358_v49  ;;  %v2407_v31 = vsel %vm2391_vm7, 0.040650405, %v2359_v50  ;;  %v2408_v39 = vsel %vm2376_vm1, -1.0650407, %v2360_v0 }
 0x33f   :  { %v2409_v55 = vsel %vm2377_vm2, -1.0650407, %v2361_v1  ;;  %v2410_v56 = vsel %vm2378_vm3, -1.0650407, %v2362_v2  ;;  %v2411_v58 = vsel %vm2379_vm4, -1.0650407, %v2363_v11 }
 0x340   :  { %v2412_v59 = vsel %vm2380_vm5, -1.0650407, %v2364_v12  ;;  %v2413_v10 = vsel %vm2381_vm6, -1.0650407, %v2365_v14  ;;  %v2414_v49 = vsel %vm2382_vm8, -1.0650407, %v2366_v15 }
 0x341   :  { %v2415_v50 = vsel %vm2383_vm9, -1.0650407, %v2367_v16  ;;  %v2416_v0 = vsel %vm2384_vm11, -1.0650407, %v2368_v52  ;;  %v2417_v1 = vsel %vm2385_vm12, -1.0650407, %v2369_v53 }
 0x342   :  { %v2418_v2 = vsel %vm2386_vm13, -1.0650407, %v2370_v54  ;;  %v2419_v11 = vsel %vm2387_vm14, -1.0650407, %v2371_v48  ;;  %v2420_v12 = vsel %vm2388_vm15, -1.0650407, %v2372_v20 }
 0x343   :  { %v2421_v14 = vsel %vm2389_vm0, -1.0650407, %v2373_v25  ;;  %v2422_v15 = vsel %vm2390_vm10, -1.0650407, %v2374_v26  ;;  %v2423_v16 = vsel %vm2391_vm7, -1.0650407, %v2375_v27 }
 0x344   :  { %vm2424_vm1 = vcmp.gt.f32.partialorder %v8279_v60, 911.8  ;;  %vm2425_vm2 = vcmp.gt.f32.partialorder %v8282_v57, 911.8  ;;  %vm2426_vm3 = vcmp.gt.f32.partialorder %v8285_v18, 911.8 }
 0x345   :  { %vm2427_vm4 = vcmp.gt.f32.partialorder %v8288_v8, 911.8  ;;  %vm2428_vm5 = vcmp.gt.f32.partialorder %v8291_v35, 911.8  ;;  %vm2429_vm6 = vcmp.gt.f32.partialorder %v8294_v36, 911.8 }
 0x346   :  { %vm2430_vm8 = vcmp.gt.f32.partialorder %v8297_v61, 911.8  ;;  %vm2431_vm9 = vcmp.gt.f32.partialorder %v8300_v62, 911.8  ;;  %vm2432_vm11 = vcmp.gt.f32.partialorder %v8303_v63, 911.8 }
 0x347   :  { %vm2433_vm12 = vcmp.gt.f32.partialorder %v8306_v3, 911.8  ;;  %vm2434_vm13 = vcmp.gt.f32.partialorder %v8309_v5, 911.8  ;;  %vm2435_vm14 = vcmp.gt.f32.partialorder %v8312_v6, 911.8 }
 0x348   :  { %vm2436_vm15 = vcmp.gt.f32.partialorder %v8315_v9, 911.8  ;;  %vm2437_vm0 = vcmp.gt.f32.partialorder %v8318_v19, 911.8  ;;  %vm2438_vm10 = vcmp.gt.f32.partialorder %v8321_v40, 911.8 }
 0x349   :  { %vm2439_vm7 = vcmp.gt.f32.partialorder %v8324_v51, 911.8  ;;  %v2440_v52 = vsel %vm2424_vm1, 0.038910504, %v2392_v37  ;;  %v2441_v53 = vsel %vm2425_vm2, 0.038910504, %v2393_v41 }
 0x34a   :  { %v2442_v54 = vsel %vm2426_vm3, 0.038910504, %v2394_v42  ;;  %v2443_v48 = vsel %vm2427_vm4, 0.038910504, %v2395_v47  ;;  %v2444_v20 = vsel %vm2428_vm5, 0.038910504, %v2396_v46 }
 0x34b   :  { %v2445_v25 = vsel %vm2429_vm6, 0.038910504, %v2397_v45  ;;  %v2446_v26 = vsel %vm2430_vm8, 0.038910504, %v2398_v44  ;;  %v2447_v27 = vsel %vm2431_vm9, 0.038910504, %v2399_v43 }
 0x34c   :  { %v2448_v37 = vsel %vm2432_vm11, 0.038910504, %v2400_v4  ;;  %v2449_v41 = vsel %vm2433_vm12, 0.038910504, %v2401_v7  ;;  %v2450_v42 = vsel %vm2434_vm13, 0.038910504, %v2402_v22 }
 0x34d   :  { %v2451_v47 = vsel %vm2435_vm14, 0.038910504, %v2403_v23  ;;  %v2452_v46 = vsel %vm2436_vm15, 0.038910504, %v2404_v24  ;;  %v2453_v45 = vsel %vm2437_vm0, 0.038910504, %v2405_v29 }
 0x34e   :  { %v2454_v44 = vsel %vm2438_vm10, 0.038910504, %v2406_v30  ;;  %v2455_v43 = vsel %vm2439_vm7, 0.038910504, %v2407_v31  ;;  %v2456_v4 = vsel %vm2424_vm1, 0.52140075, %v2408_v39 }
 0x34f   :  { %v2457_v7 = vsel %vm2425_vm2, 0.52140075, %v2409_v55  ;;  %v2458_v22 = vsel %vm2426_vm3, 0.52140075, %v2410_v56  ;;  %v2459_v23 = vsel %vm2427_vm4, 0.52140075, %v2411_v58 }
 0x350   :  { %v2460_v24 = vsel %vm2428_vm5, 0.52140075, %v2412_v59  ;;  %v2461_v29 = vsel %vm2429_vm6, 0.52140075, %v2413_v10  ;;  %v2462_v30 = vsel %vm2430_vm8, 0.52140075, %v2414_v49 }
 0x351   :  { %v2463_v31 = vsel %vm2431_vm9, 0.52140075, %v2415_v50  ;;  %v2464_v39 = vsel %vm2432_vm11, 0.52140075, %v2416_v0  ;;  %v2465_v55 = vsel %vm2433_vm12, 0.52140075, %v2417_v1 }
 0x352   :  { %v2466_v56 = vsel %vm2434_vm13, 0.52140075, %v2418_v2  ;;  %v2467_v58 = vsel %vm2435_vm14, 0.52140075, %v2419_v11  ;;  %v2468_v59 = vsel %vm2436_vm15, 0.52140075, %v2420_v12 }
 0x353   :  { %v2469_v10 = vsel %vm2437_vm0, 0.52140075, %v2421_v14  ;;  %v2470_v49 = vsel %vm2438_vm10, 0.52140075, %v2422_v15  ;;  %v2471_v50 = vsel %vm2439_vm7, 0.52140075, %v2423_v16 }
 0x354   :  { %vm2472_vm1 = vcmp.gt.f32.partialorder %v8279_v60, 963.2  ;;  %vm2473_vm2 = vcmp.gt.f32.partialorder %v8282_v57, 963.2  ;;  %vm2474_vm3 = vcmp.gt.f32.partialorder %v8285_v18, 963.2 }
 0x355   :  { %vm2475_vm4 = vcmp.gt.f32.partialorder %v8288_v8, 963.2  ;;  %vm2476_vm5 = vcmp.gt.f32.partialorder %v8291_v35, 963.2  ;;  %vm2477_vm6 = vcmp.gt.f32.partialorder %v8294_v36, 963.2 }
 0x356   :  { %vm2478_vm8 = vcmp.gt.f32.partialorder %v8297_v61, 963.2  ;;  %vm2479_vm9 = vcmp.gt.f32.partialorder %v8300_v62, 963.2  ;;  %vm2480_vm11 = vcmp.gt.f32.partialorder %v8303_v63, 963.2 }
 0x357   :  { %vm2481_vm12 = vcmp.gt.f32.partialorder %v8306_v3, 963.2  ;;  %vm2482_vm13 = vcmp.gt.f32.partialorder %v8309_v5, 963.2  ;;  %vm2483_vm14 = vcmp.gt.f32.partialorder %v8312_v6, 963.2 }
 0x358   :  { %vm2484_vm15 = vcmp.gt.f32.partialorder %v8315_v9, 963.2  ;;  %vm2485_vm0 = vcmp.gt.f32.partialorder %v8318_v19, 963.2  ;;  %vm2486_vm10 = vcmp.gt.f32.partialorder %v8321_v40, 963.2 }
 0x359   :  { %vm2487_vm7 = vcmp.gt.f32.partialorder %v8324_v51, 963.2  ;;  %v2488_v0 = vsel %vm2472_vm1, 0.037453182, %v2440_v52  ;;  %v2489_v1 = vsel %vm2473_vm2, 0.037453182, %v2441_v53 }
 0x35a   :  { %v2490_v2 = vsel %vm2474_vm3, 0.037453182, %v2442_v54  ;;  %v2491_v11 = vsel %vm2475_vm4, 0.037453182, %v2443_v48  ;;  %v2492_v12 = vsel %vm2476_vm5, 0.037453182, %v2444_v20 }
 0x35b   :  { %v2493_v14 = vsel %vm2477_vm6, 0.037453182, %v2445_v25  ;;  %v2494_v15 = vsel %vm2478_vm8, 0.037453182, %v2446_v26  ;;  %v2495_v16 = vsel %vm2479_vm9, 0.037453182, %v2447_v27 }
 0x35c   :  { %v2496_v52 = vsel %vm2480_vm11, 0.037453182, %v2448_v37  ;;  %v2497_v53 = vsel %vm2481_vm12, 0.037453182, %v2449_v41  ;;  %v2498_v54 = vsel %vm2482_vm13, 0.037453182, %v2450_v42 }
 0x35d   :  { %v2499_v48 = vsel %vm2483_vm14, 0.037453182, %v2451_v47  ;;  %v2500_v20 = vsel %vm2484_vm15, 0.037453182, %v2452_v46  ;;  %v2501_v25 = vsel %vm2485_vm0, 0.037453182, %v2453_v45 }
 0x35e   :  { %v2502_v26 = vsel %vm2486_vm10, 0.037453182, %v2454_v44  ;;  %v2503_v27 = vsel %vm2487_vm7, 0.037453182, %v2455_v43  ;;  %v2504_v37 = vsel %vm2472_vm1, 1.9250937, %v2456_v4 }
 0x35f   :  { %v2505_v41 = vsel %vm2473_vm2, 1.9250937, %v2457_v7  ;;  %v2506_v42 = vsel %vm2474_vm3, 1.9250937, %v2458_v22  ;;  %v2507_v47 = vsel %vm2475_vm4, 1.9250937, %v2459_v23 }
 0x360   :  { %v2508_v46 = vsel %vm2476_vm5, 1.9250937, %v2460_v24  ;;  %v2509_v45 = vsel %vm2477_vm6, 1.9250937, %v2461_v29  ;;  %v2510_v44 = vsel %vm2478_vm8, 1.9250937, %v2462_v30 }
 0x361   :  { %v2511_v43 = vsel %vm2479_vm9, 1.9250937, %v2463_v31  ;;  %v2512_v4 = vsel %vm2480_vm11, 1.9250937, %v2464_v39  ;;  %v2513_v7 = vsel %vm2481_vm12, 1.9250937, %v2465_v55 }
 0x362   :  { %v2514_v22 = vsel %vm2482_vm13, 1.9250937, %v2466_v56  ;;  %v2515_v23 = vsel %vm2483_vm14, 1.9250937, %v2467_v58  ;;  %v2516_v24 = vsel %vm2484_vm15, 1.9250937, %v2468_v59 }
 0x363   :  { %v2517_v29 = vsel %vm2485_vm0, 1.9250937, %v2469_v10  ;;  %v2518_v30 = vsel %vm2486_vm10, 1.9250937, %v2470_v49  ;;  %v2519_v31 = vsel %vm2487_vm7, 1.9250937, %v2471_v50 }
 0x364   :  { %vm2520_vm1 = vcmp.gt.f32.partialorder %v8279_v60, 1016.6  ;;  %vm2521_vm2 = vcmp.gt.f32.partialorder %v8282_v57, 1016.6  ;;  %vm2522_vm3 = vcmp.gt.f32.partialorder %v8285_v18, 1016.6 }
 0x365   :  { %vm2523_vm4 = vcmp.gt.f32.partialorder %v8288_v8, 1016.6  ;;  %vm2524_vm5 = vcmp.gt.f32.partialorder %v8291_v35, 1016.6  ;;  %vm2525_vm6 = vcmp.gt.f32.partialorder %v8294_v36, 1016.6 }
 0x366   :  { %vm2526_vm8 = vcmp.gt.f32.partialorder %v8297_v61, 1016.6  ;;  %vm2527_vm9 = vcmp.gt.f32.partialorder %v8300_v62, 1016.6  ;;  %vm2528_vm11 = vcmp.gt.f32.partialorder %v8303_v63, 1016.6 }
 0x367   :  { %vm2529_vm12 = vcmp.gt.f32.partialorder %v8306_v3, 1016.6  ;;  %vm2530_vm13 = vcmp.gt.f32.partialorder %v8309_v5, 1016.6  ;;  %vm2531_vm14 = vcmp.gt.f32.partialorder %v8312_v6, 1016.6 }
 0x368   :  { %vm2532_vm15 = vcmp.gt.f32.partialorder %v8315_v9, 1016.6  ;;  %vm2533_vm0 = vcmp.gt.f32.partialorder %v8318_v19, 1016.6  ;;  %vm2534_vm10 = vcmp.gt.f32.partialorder %v8321_v40, 1016.6 }
 0x369   :  { %vm2535_vm7 = vcmp.gt.f32.partialorder %v8324_v51, 1016.6  ;;  %v2536_v39 = vsel %vm2520_vm1, 0.035971224, %v2488_v0  ;;  %v2537_v55 = vsel %vm2521_vm2, 0.035971224, %v2489_v1 }
 0x36a   :  { %v2538_v56 = vsel %vm2522_vm3, 0.035971224, %v2490_v2  ;;  %v2539_v58 = vsel %vm2523_vm4, 0.035971224, %v2491_v11  ;;  %v2540_v59 = vsel %vm2524_vm5, 0.035971224, %v2492_v12 }
 0x36b   :  { %v2541_v10 = vsel %vm2525_vm6, 0.035971224, %v2493_v14  ;;  %v2542_v49 = vsel %vm2526_vm8, 0.035971224, %v2494_v15  ;;  %v2543_v50 = vsel %vm2527_vm9, 0.035971224, %v2495_v16 }
 0x36c   :  { %v2544_v0 = vsel %vm2528_vm11, 0.035971224, %v2496_v52  ;;  %v2545_v1 = vsel %vm2529_vm12, 0.035971224, %v2497_v53  ;;  %v2546_v2 = vsel %vm2530_vm13, 0.035971224, %v2498_v54 }
 0x36d   :  { %v2547_v11 = vsel %vm2531_vm14, 0.035971224, %v2499_v48  ;;  %v2548_v12 = vsel %vm2532_vm15, 0.035971224, %v2500_v20  ;;  %v2549_v14 = vsel %vm2533_vm0, 0.035971224, %v2501_v25 }
 0x36e   :  { %v2550_v15 = vsel %vm2534_vm10, 0.035971224, %v2502_v26  ;;  %v2551_v16 = vsel %vm2535_vm7, 0.035971224, %v2503_v27  ;;  %v2552_v52 = vsel %vm2520_vm1, 3.4316547, %v2504_v37 }
 0x36f   :  { %v2553_v53 = vsel %vm2521_vm2, 3.4316547, %v2505_v41  ;;  %v2554_v54 = vsel %vm2522_vm3, 3.4316547, %v2506_v42  ;;  %v2555_v48 = vsel %vm2523_vm4, 3.4316547, %v2507_v47 }
 0x370   :  { %v2556_v20 = vsel %vm2524_vm5, 3.4316547, %v2508_v46  ;;  %v2557_v25 = vsel %vm2525_vm6, 3.4316547, %v2509_v45  ;;  %v2558_v26 = vsel %vm2526_vm8, 3.4316547, %v2510_v44 }
 0x371   :  { %v2559_v27 = vsel %vm2527_vm9, 3.4316547, %v2511_v43  ;;  %v2560_v37 = vsel %vm2528_vm11, 3.4316547, %v2512_v4  ;;  %v2561_v41 = vsel %vm2529_vm12, 3.4316547, %v2513_v7 }
 0x372   :  { %v2562_v42 = vsel %vm2530_vm13, 3.4316547, %v2514_v22  ;;  %v2563_v47 = vsel %vm2531_vm14, 3.4316547, %v2515_v23  ;;  %v2564_v46 = vsel %vm2532_vm15, 3.4316547, %v2516_v24 }
 0x373   :  { %v2565_v45 = vsel %vm2533_vm0, 3.4316547, %v2517_v29  ;;  %v2566_v44 = vsel %vm2534_vm10, 3.4316547, %v2518_v30  ;;  %v2567_v43 = vsel %vm2535_vm7, 3.4316547, %v2519_v31 }
 0x374   :  { %vm2568_vm1 = vcmp.gt.f32.partialorder %v8279_v60, 1072.2  ;;  %vm2569_vm2 = vcmp.gt.f32.partialorder %v8282_v57, 1072.2  ;;  %vm2570_vm3 = vcmp.gt.f32.partialorder %v8285_v18, 1072.2 }
 0x375   :  { %vm2571_vm4 = vcmp.gt.f32.partialorder %v8288_v8, 1072.2  ;;  %vm2572_vm5 = vcmp.gt.f32.partialorder %v8291_v35, 1072.2  ;;  %vm2573_vm6 = vcmp.gt.f32.partialorder %v8294_v36, 1072.2 }
 0x376   :  { %vm2574_vm8 = vcmp.gt.f32.partialorder %v8297_v61, 1072.2  ;;  %vm2575_vm9 = vcmp.gt.f32.partialorder %v8300_v62, 1072.2  ;;  %vm2576_vm11 = vcmp.gt.f32.partialorder %v8303_v63, 1072.2 }
 0x377   :  { %vm2577_vm12 = vcmp.gt.f32.partialorder %v8306_v3, 1072.2  ;;  %vm2578_vm13 = vcmp.gt.f32.partialorder %v8309_v5, 1072.2  ;;  %vm2579_vm14 = vcmp.gt.f32.partialorder %v8312_v6, 1072.2 }
 0x378   :  { %vm2580_vm15 = vcmp.gt.f32.partialorder %v8315_v9, 1072.2  ;;  %vm2581_vm0 = vcmp.gt.f32.partialorder %v8318_v19, 1072.2  ;;  %vm2582_vm10 = vcmp.gt.f32.partialorder %v8321_v40, 1072.2 }
 0x379   :  { %vm2583_vm7 = vcmp.gt.f32.partialorder %v8324_v51, 1072.2  ;;  %v2584_v4 = vsel %vm2568_vm1, 0.034542315, %v2536_v39  ;;  %v2585_v7 = vsel %vm2569_vm2, 0.034542315, %v2537_v55 }
 0x37a   :  { %v2586_v22 = vsel %vm2570_vm3, 0.034542315, %v2538_v56  ;;  %v2587_v23 = vsel %vm2571_vm4, 0.034542315, %v2539_v58  ;;  %v2588_v24 = vsel %vm2572_vm5, 0.034542315, %v2540_v59 }
 0x37b   :  { %v2589_v29 = vsel %vm2573_vm6, 0.034542315, %v2541_v10  ;;  %v2590_v30 = vsel %vm2574_vm8, 0.034542315, %v2542_v49  ;;  %v2591_v31 = vsel %vm2575_vm9, 0.034542315, %v2543_v50 }
 0x37c   :  { %v2592_v39 = vsel %vm2576_vm11, 0.034542315, %v2544_v0  ;;  %v2593_v55 = vsel %vm2577_vm12, 0.034542315, %v2545_v1  ;;  %v2594_v56 = vsel %vm2578_vm13, 0.034542315, %v2546_v2 }
 0x37d   :  { %v2595_v58 = vsel %vm2579_vm14, 0.034542315, %v2547_v11  ;;  %v2596_v59 = vsel %vm2580_vm15, 0.034542315, %v2548_v12  ;;  %v2597_v10 = vsel %vm2581_vm0, 0.034542315, %v2549_v14 }
 0x37e   :  { %v2598_v49 = vsel %vm2582_vm10, 0.034542315, %v2550_v15  ;;  %v2599_v50 = vsel %vm2583_vm7, 0.034542315, %v2551_v16  ;;  %v2600_v0 = vsel %vm2568_vm1, 4.9637303, %v2552_v52 }
 0x37f   :  { %v2601_v1 = vsel %vm2569_vm2, 4.9637303, %v2553_v53  ;;  %v2602_v2 = vsel %vm2570_vm3, 4.9637303, %v2554_v54  ;;  %v2603_v11 = vsel %vm2571_vm4, 4.9637303, %v2555_v48 }
 0x380   :  { %v2604_v12 = vsel %vm2572_vm5, 4.9637303, %v2556_v20  ;;  %v2605_v14 = vsel %vm2573_vm6, 4.9637303, %v2557_v25  ;;  %v2606_v15 = vsel %vm2574_vm8, 4.9637303, %v2558_v26 }
 0x381   :  { %v2607_v16 = vsel %vm2575_vm9, 4.9637303, %v2559_v27  ;;  %v2608_v52 = vsel %vm2576_vm11, 4.9637303, %v2560_v37  ;;  %v2609_v53 = vsel %vm2577_vm12, 4.9637303, %v2561_v41 }
 0x382   :  { %v2610_v54 = vsel %vm2578_vm13, 4.9637303, %v2562_v42  ;;  %v2611_v48 = vsel %vm2579_vm14, 4.9637303, %v2563_v47  ;;  %v2612_v20 = vsel %vm2580_vm15, 4.9637303, %v2564_v46 }
 0x383   :  { %v2613_v25 = vsel %vm2581_vm0, 4.9637303, %v2565_v45  ;;  %v2614_v26 = vsel %vm2582_vm10, 4.9637303, %v2566_v44  ;;  %v2615_v27 = vsel %vm2583_vm7, 4.9637303, %v2567_v43 }
 0x384   :  { %vm2616_vm1 = vcmp.gt.f32.partialorder %v8279_v60, 1130.1  ;;  %vm2617_vm2 = vcmp.gt.f32.partialorder %v8282_v57, 1130.1  ;;  %vm2618_vm3 = vcmp.gt.f32.partialorder %v8285_v18, 1130.1 }
 0x385   :  { %vm2619_vm4 = vcmp.gt.f32.partialorder %v8288_v8, 1130.1  ;;  %vm2620_vm5 = vcmp.gt.f32.partialorder %v8291_v35, 1130.1  ;;  %vm2621_vm6 = vcmp.gt.f32.partialorder %v8294_v36, 1130.1 }
 0x386   :  { %vm2622_vm8 = vcmp.gt.f32.partialorder %v8297_v61, 1130.1  ;;  %vm2623_vm9 = vcmp.gt.f32.partialorder %v8300_v62, 1130.1  ;;  %vm2624_vm11 = vcmp.gt.f32.partialorder %v8303_v63, 1130.1 }
 0x387   :  { %vm2625_vm12 = vcmp.gt.f32.partialorder %v8306_v3, 1130.1  ;;  %vm2626_vm13 = vcmp.gt.f32.partialorder %v8309_v5, 1130.1  ;;  %vm2627_vm14 = vcmp.gt.f32.partialorder %v8312_v6, 1130.1 }
 0x388   :  { %vm2628_vm15 = vcmp.gt.f32.partialorder %v8315_v9, 1130.1  ;;  %vm2629_vm0 = vcmp.gt.f32.partialorder %v8318_v19, 1130.1  ;;  %vm2630_vm10 = vcmp.gt.f32.partialorder %v8321_v40, 1130.1 }
 0x389   :  { %vm2631_vm7 = vcmp.gt.f32.partialorder %v8324_v51, 1130.1  ;;  %v2632_v37 = vsel %vm2616_vm1, 0.03322259, %v2584_v4  ;;  %v2633_v41 = vsel %vm2617_vm2, 0.03322259, %v2585_v7 }
 0x38a   :  { %v2634_v42 = vsel %vm2618_vm3, 0.03322259, %v2586_v22  ;;  %v2635_v47 = vsel %vm2619_vm4, 0.03322259, %v2587_v23  ;;  %v2636_v46 = vsel %vm2620_vm5, 0.03322259, %v2588_v24 }
 0x38b   :  { %v2637_v45 = vsel %vm2621_vm6, 0.03322259, %v2589_v29  ;;  %v2638_v44 = vsel %vm2622_vm8, 0.03322259, %v2590_v30  ;;  %v2639_v43 = vsel %vm2623_vm9, 0.03322259, %v2591_v31 }
 0x38c   :  { %v2640_v4 = vsel %vm2624_vm11, 0.03322259, %v2592_v39  ;;  %v2641_v7 = vsel %vm2625_vm12, 0.03322259, %v2593_v55  ;;  %v2642_v22 = vsel %vm2626_vm13, 0.03322259, %v2594_v56 }
 0x38d   :  { %v2643_v23 = vsel %vm2627_vm14, 0.03322259, %v2595_v58  ;;  %v2644_v24 = vsel %vm2628_vm15, 0.03322259, %v2596_v59  ;;  %v2645_v29 = vsel %vm2629_vm0, 0.03322259, %v2597_v10 }
 0x38e   :  { %v2646_v30 = vsel %vm2630_vm10, 0.03322259, %v2598_v49  ;;  %v2647_v31 = vsel %vm2631_vm7, 0.03322259, %v2599_v50  ;;  %v2648_v39 = vsel %vm2616_vm1, 6.4551497, %v2600_v0 }
 0x38f   :  { %v2649_v55 = vsel %vm2617_vm2, 6.4551497, %v2601_v1  ;;  %v2650_v56 = vsel %vm2618_vm3, 6.4551497, %v2602_v2  ;;  %v2651_v58 = vsel %vm2619_vm4, 6.4551497, %v2603_v11 }
 0x390   :  { %v2652_v59 = vsel %vm2620_vm5, 6.4551497, %v2604_v12  ;;  %v2653_v10 = vsel %vm2621_vm6, 6.4551497, %v2605_v14  ;;  %v2654_v49 = vsel %vm2622_vm8, 6.4551497, %v2606_v15 }
 0x391   :  { %v2655_v50 = vsel %vm2623_vm9, 6.4551497, %v2607_v16  ;;  %v2656_v0 = vsel %vm2624_vm11, 6.4551497, %v2608_v52  ;;  %v2657_v1 = vsel %vm2625_vm12, 6.4551497, %v2609_v53 }
 0x392   :  { %v2658_v2 = vsel %vm2626_vm13, 6.4551497, %v2610_v54  ;;  %v2659_v11 = vsel %vm2627_vm14, 6.4551497, %v2611_v48  ;;  %v2660_v12 = vsel %vm2628_vm15, 6.4551497, %v2612_v20 }
 0x393   :  { %v2661_v14 = vsel %vm2629_vm0, 6.4551497, %v2613_v25  ;;  %v2662_v15 = vsel %vm2630_vm10, 6.4551497, %v2614_v26  ;;  %v2663_v16 = vsel %vm2631_vm7, 6.4551497, %v2615_v27 }
 0x394   :  { %vm2664_vm1 = vcmp.gt.f32.partialorder %v8279_v60, 1190.3  ;;  %vm2665_vm2 = vcmp.gt.f32.partialorder %v8282_v57, 1190.3  ;;  %vm2666_vm3 = vcmp.gt.f32.partialorder %v8285_v18, 1190.3 }
 0x395   :  { %vm2667_vm4 = vcmp.gt.f32.partialorder %v8288_v8, 1190.3  ;;  %vm2668_vm5 = vcmp.gt.f32.partialorder %v8291_v35, 1190.3  ;;  %vm2669_vm6 = vcmp.gt.f32.partialorder %v8294_v36, 1190.3 }
 0x396   :  { %vm2670_vm8 = vcmp.gt.f32.partialorder %v8297_v61, 1190.3  ;;  %vm2671_vm9 = vcmp.gt.f32.partialorder %v8300_v62, 1190.3  ;;  %vm2672_vm11 = vcmp.gt.f32.partialorder %v8303_v63, 1190.3 }
 0x397   :  { %vm2673_vm12 = vcmp.gt.f32.partialorder %v8306_v3, 1190.3  ;;  %vm2674_vm13 = vcmp.gt.f32.partialorder %v8309_v5, 1190.3  ;;  %vm2675_vm14 = vcmp.gt.f32.partialorder %v8312_v6, 1190.3 }
 0x398   :  { %vm2676_vm15 = vcmp.gt.f32.partialorder %v8315_v9, 1190.3  ;;  %vm2677_vm0 = vcmp.gt.f32.partialorder %v8318_v19, 1190.3  ;;  %vm2678_vm10 = vcmp.gt.f32.partialorder %v8321_v40, 1190.3 }
 0x399   :  { %vm2679_vm7 = vcmp.gt.f32.partialorder %v8324_v51, 1190.3  ;;  %v9161_v52 = vsel %vm2664_vm1, 0.031948883, %v2632_v37  ;;  %v9165_v53 = vsel %vm2665_vm2, 0.031948883, %v2633_v41 }
 0x39a   :  { %v9169_v54 = vsel %vm2666_vm3, 0.031948883, %v2634_v42  ;;  %v9173_v48 = vsel %vm2667_vm4, 0.031948883, %v2635_v47  ;;  %v9177_v20 = vsel %vm2668_vm5, 0.031948883, %v2636_v46 }
 0x39b   :  { %v9181_v25 = vsel %vm2669_vm6, 0.031948883, %v2637_v45  ;;  %v9185_v26 = vsel %vm2670_vm8, 0.031948883, %v2638_v44  ;;  %v9189_v27 = vsel %vm2671_vm9, 0.031948883, %v2639_v43 }
 0x39c   :  { %v9193_v37 = vsel %vm2672_vm11, 0.031948883, %v2640_v4  ;;  %v9197_v41 = vsel %vm2673_vm12, 0.031948883, %v2641_v7  ;;  %v9201_v42 = vsel %vm2674_vm13, 0.031948883, %v2642_v22 }
 0x39d   :  { %v9205_v47 = vsel %vm2675_vm14, 0.031948883, %v2643_v23  ;;  %v9209_v46 = vsel %vm2676_vm15, 0.031948883, %v2644_v24  ;;  %v9213_v45 = vsel %vm2677_vm0, 0.031948883, %v2645_v29 }
 0x39e   :  { %v9217_v44 = vsel %vm2678_vm10, 0.031948883, %v2646_v30  ;;  %v9221_v43 = vsel %vm2679_vm7, 0.031948883, %v2647_v31  ;;  %v9225_v4 = vsel %vm2664_vm1, 7.9712462, %v2648_v39 }
 0x39f   :  { %v9229_v7 = vsel %vm2665_vm2, 7.9712462, %v2649_v55  ;;  %v9233_v22 = vsel %vm2666_vm3, 7.9712462, %v2650_v56  ;;  %v9237_v23 = vsel %vm2667_vm4, 7.9712462, %v2651_v58 }
 0x3a0   :  { %v9241_v24 = vsel %vm2668_vm5, 7.9712462, %v2652_v59  ;;  %v9245_v60 = vsel %vm2669_vm6, 7.9712462, %v2653_v10  ;;  %v9249_v57 = vsel %vm2670_vm8, 7.9712462, %v2654_v49 }
 0x3a1   :  { %v9253_v18 = vsel %vm2671_vm9, 7.9712462, %v2655_v50  ;;  %v9257_v8 = vsel %vm2672_vm11, 7.9712462, %v2656_v0  ;;  %v9261_v35 = vsel %vm2673_vm12, 7.9712462, %v2657_v1 }
 0x3a2   :  { %v9265_v36 = vsel %vm2674_vm13, 7.9712462, %v2658_v2  ;;  %v9269_v61 = vsel %vm2675_vm14, 7.9712462, %v2659_v11  ;;  %v9273_v62 = vsel %vm2676_vm15, 7.9712462, %v2660_v12 }
 0x3a3   :  { %v9277_v63 = vsel %vm2677_vm0, 7.9712462, %v2661_v14  ;;  %v9281_v3 = vsel %vm2678_vm10, 7.9712462, %v2662_v15  ;;  %v9285_v5 = vsel %vm2679_vm7, 7.9712462, %v2663_v16 }
 0x3a4   :  { %v9287_v29 = vld [vmem:[#allocation7] sm:$0xff]  ;;  %v9290_v6 = vld [vmem:[#allocation7 + $0x8] sm:$0xff]  ;;  %v9293_v9 = vld [vmem:[#allocation7 + $0x10] sm:$0xff] }
 0x3a5   :  { %vm2712_vm1 = vcmp.gt.f32.partialorder %v9287_v29, 1252.9  ;;  %vm2713_vm2 = vcmp.gt.f32.partialorder %v9290_v6, 1252.9  ;;  %vm2714_vm3 = vcmp.gt.f32.partialorder %v9293_v9, 1252.9 }
 0x3a6   :  { %v9296_v19 = vld [vmem:[#allocation7 + $0x18] sm:$0xff]  ;;  %v9299_v40 = vld [vmem:[#allocation7 + $0x20] sm:$0xff]  ;;  %v9302_v51 = vld [vmem:[#allocation7 + $0x28] sm:$0xff]  ;;  %v2728_v0 = vsel %vm2712_vm1, 0.03076923, %v9161_v52 }
 0x3a7   :  { %vm2715_vm4 = vcmp.gt.f32.partialorder %v9296_v19, 1252.9  ;;  %vm2716_vm5 = vcmp.gt.f32.partialorder %v9299_v40, 1252.9  ;;  %vm2717_vm6 = vcmp.gt.f32.partialorder %v9302_v51, 1252.9 }
 0x3a8   :  { %v9305_v30 = vld [vmem:[#allocation7 + $0x30] sm:$0xff]  ;;  %v9308_v31 = vld [vmem:[#allocation7 + $0x38] sm:$0xff]  ;;  %v9311_v39 = vld [vmem:[#allocation7 + $0x40] sm:$0xff]  ;;  %v2729_v1 = vsel %vm2713_vm2, 0.03076923, %v9165_v53 }
 0x3a9   :  { %vm2718_vm8 = vcmp.gt.f32.partialorder %v9305_v30, 1252.9  ;;  %vm2719_vm9 = vcmp.gt.f32.partialorder %v9308_v31, 1252.9  ;;  %vm2720_vm11 = vcmp.gt.f32.partialorder %v9311_v39, 1252.9 }
 0x3aa   :  { %v9314_v55 = vld [vmem:[#allocation7 + $0x48] sm:$0xff]  ;;  %v9317_v56 = vld [vmem:[#allocation7 + $0x50] sm:$0xff]  ;;  %v9320_v58 = vld [vmem:[#allocation7 + $0x58] sm:$0xff]  ;;  %v2730_v2 = vsel %vm2714_vm3, 0.03076923, %v9169_v54 }
 0x3ab   :  { %vm2721_vm12 = vcmp.gt.f32.partialorder %v9314_v55, 1252.9  ;;  %vm2722_vm13 = vcmp.gt.f32.partialorder %v9317_v56, 1252.9  ;;  %vm2723_vm14 = vcmp.gt.f32.partialorder %v9320_v58, 1252.9 }
 0x3ac   :  { %v9323_v59 = vld [vmem:[#allocation7 + $0x60] sm:$0xff]  ;;  %v9326_v10 = vld [vmem:[#allocation7 + $0x68] sm:$0xff]  ;;  %v9329_v49 = vld [vmem:[#allocation7 + $0x70] sm:$0xff]  ;;  %v2731_v11 = vsel %vm2715_vm4, 0.03076923, %v9173_v48 }
 0x3ad   :  { %vm2724_vm15 = vcmp.gt.f32.partialorder %v9323_v59, 1252.9  ;;  %vm2725_vm0 = vcmp.gt.f32.partialorder %v9326_v10, 1252.9  ;;  %vm2726_vm10 = vcmp.gt.f32.partialorder %v9329_v49, 1252.9 }
 0x3ae   :  { %v9332_v50 = vld [vmem:[#allocation7 + $0x78] sm:$0xff]  ;;  %v2732_v12 = vsel %vm2716_vm5, 0.03076923, %v9177_v20  ;;  %v2733_v14 = vsel %vm2717_vm6, 0.03076923, %v9181_v25 }
 0x3af   :  { %vm2727_vm7 = vcmp.gt.f32.partialorder %v9332_v50, 1252.9  ;;  %v2734_v15 = vsel %vm2718_vm8, 0.03076923, %v9185_v26  ;;  %v2735_v16 = vsel %vm2719_vm9, 0.03076923, %v9189_v27 }
 0x3b0   :  { %v2736_v52 = vsel %vm2720_vm11, 0.03076923, %v9193_v37  ;;  %v2737_v53 = vsel %vm2721_vm12, 0.03076923, %v9197_v41  ;;  %v2738_v54 = vsel %vm2722_vm13, 0.03076923, %v9201_v42 }
 0x3b1   :  { %v2739_v48 = vsel %vm2723_vm14, 0.03076923, %v9205_v47  ;;  %v2740_v20 = vsel %vm2724_vm15, 0.03076923, %v9209_v46  ;;  %v2741_v25 = vsel %vm2725_vm0, 0.03076923, %v9213_v45 }
 0x3b2   :  { %v2742_v26 = vsel %vm2726_vm10, 0.03076923, %v9217_v44  ;;  %v2743_v27 = vsel %vm2727_vm7, 0.03076923, %v9221_v43  ;;  %v2744_v37 = vsel %vm2712_vm1, 9.449231, %v9225_v4 }
 0x3b3   :  { %v2745_v41 = vsel %vm2713_vm2, 9.449231, %v9229_v7  ;;  %v2746_v42 = vsel %vm2714_vm3, 9.449231, %v9233_v22  ;;  %v2747_v47 = vsel %vm2715_vm4, 9.449231, %v9237_v23 }
 0x3b4   :  { %v2748_v46 = vsel %vm2716_vm5, 9.449231, %v9241_v24  ;;  %v2749_v45 = vsel %vm2717_vm6, 9.449231, %v9245_v60  ;;  %v2750_v44 = vsel %vm2718_vm8, 9.449231, %v9249_v57 }
 0x3b5   :  { %v2751_v43 = vsel %vm2719_vm9, 9.449231, %v9253_v18  ;;  %v2752_v4 = vsel %vm2720_vm11, 9.449231, %v9257_v8  ;;  %v2753_v7 = vsel %vm2721_vm12, 9.449231, %v9261_v35 }
 0x3b6   :  { %v2754_v22 = vsel %vm2722_vm13, 9.449231, %v9265_v36  ;;  %v2755_v23 = vsel %vm2723_vm14, 9.449231, %v9269_v61  ;;  %v2756_v24 = vsel %vm2724_vm15, 9.449231, %v9273_v62 }
 0x3b7   :  { %v2757_v60 = vsel %vm2725_vm0, 9.449231, %v9277_v63  ;;  %v2758_v57 = vsel %vm2726_vm10, 9.449231, %v9281_v3  ;;  %v2759_v18 = vsel %vm2727_vm7, 9.449231, %v9285_v5 }
 0x3b8   :  { %vm2760_vm1 = vcmp.gt.f32.partialorder %v9287_v29, 1317.9  ;;  %vm2761_vm2 = vcmp.gt.f32.partialorder %v9290_v6, 1317.9  ;;  %vm2762_vm3 = vcmp.gt.f32.partialorder %v9293_v9, 1317.9 }
 0x3b9   :  { %vm2763_vm4 = vcmp.gt.f32.partialorder %v9296_v19, 1317.9  ;;  %vm2764_vm5 = vcmp.gt.f32.partialorder %v9299_v40, 1317.9  ;;  %vm2765_vm6 = vcmp.gt.f32.partialorder %v9302_v51, 1317.9 }
 0x3ba   :  { %vm2766_vm8 = vcmp.gt.f32.partialorder %v9305_v30, 1317.9  ;;  %vm2767_vm9 = vcmp.gt.f32.partialorder %v9308_v31, 1317.9  ;;  %vm2768_vm11 = vcmp.gt.f32.partialorder %v9311_v39, 1317.9 }
 0x3bb   :  { %vm2769_vm12 = vcmp.gt.f32.partialorder %v9314_v55, 1317.9  ;;  %vm2770_vm13 = vcmp.gt.f32.partialorder %v9317_v56, 1317.9  ;;  %vm2771_vm14 = vcmp.gt.f32.partialorder %v9320_v58, 1317.9 }
 0x3bc   :  { %vm2772_vm15 = vcmp.gt.f32.partialorder %v9323_v59, 1317.9  ;;  %vm2773_vm0 = vcmp.gt.f32.partialorder %v9326_v10, 1317.9  ;;  %vm2774_vm10 = vcmp.gt.f32.partialorder %v9329_v49, 1317.9 }
 0x3bd   :  { %vm2775_vm7 = vcmp.gt.f32.partialorder %v9332_v50, 1317.9  ;;  %v2776_v8 = vsel %vm2760_vm1, 0.02962963, %v2728_v0  ;;  %v2777_v35 = vsel %vm2761_vm2, 0.02962963, %v2729_v1 }
 0x3be   :  { %v2778_v36 = vsel %vm2762_vm3, 0.02962963, %v2730_v2  ;;  %v2779_v61 = vsel %vm2763_vm4, 0.02962963, %v2731_v11  ;;  %v2780_v62 = vsel %vm2764_vm5, 0.02962963, %v2732_v12 }
 0x3bf   :  { %v2781_v63 = vsel %vm2765_vm6, 0.02962963, %v2733_v14  ;;  %v2782_v3 = vsel %vm2766_vm8, 0.02962963, %v2734_v15  ;;  %v2783_v5 = vsel %vm2767_vm9, 0.02962963, %v2735_v16 }
 0x3c0   :  { %v2784_v0 = vsel %vm2768_vm11, 0.02962963, %v2736_v52  ;;  %v2785_v1 = vsel %vm2769_vm12, 0.02962963, %v2737_v53  ;;  %v2786_v2 = vsel %vm2770_vm13, 0.02962963, %v2738_v54 }
 0x3c1   :  { %v2787_v11 = vsel %vm2771_vm14, 0.02962963, %v2739_v48  ;;  %v2788_v12 = vsel %vm2772_vm15, 0.02962963, %v2740_v20  ;;  %v2789_v14 = vsel %vm2773_vm0, 0.02962963, %v2741_v25 }
 0x3c2   :  { %v2790_v15 = vsel %vm2774_vm10, 0.02962963, %v2742_v26  ;;  %v2791_v16 = vsel %vm2775_vm7, 0.02962963, %v2743_v27  ;;  %v2792_v52 = vsel %vm2760_vm1, 10.951111, %v2744_v37 }
 0x3c3   :  { %v2793_v53 = vsel %vm2761_vm2, 10.951111, %v2745_v41  ;;  %v2794_v54 = vsel %vm2762_vm3, 10.951111, %v2746_v42  ;;  %v2795_v48 = vsel %vm2763_vm4, 10.951111, %v2747_v47 }
 0x3c4   :  { %v2796_v20 = vsel %vm2764_vm5, 10.951111, %v2748_v46  ;;  %v2797_v25 = vsel %vm2765_vm6, 10.951111, %v2749_v45  ;;  %v2798_v26 = vsel %vm2766_vm8, 10.951111, %v2750_v44 }
 0x3c5   :  { %v2799_v27 = vsel %vm2767_vm9, 10.951111, %v2751_v43  ;;  %v2800_v37 = vsel %vm2768_vm11, 10.951111, %v2752_v4  ;;  %v2801_v41 = vsel %vm2769_vm12, 10.951111, %v2753_v7 }
 0x3c6   :  { %v2802_v42 = vsel %vm2770_vm13, 10.951111, %v2754_v22  ;;  %v2803_v47 = vsel %vm2771_vm14, 10.951111, %v2755_v23  ;;  %v2804_v46 = vsel %vm2772_vm15, 10.951111, %v2756_v24 }
 0x3c7   :  { %v2805_v45 = vsel %vm2773_vm0, 10.951111, %v2757_v60  ;;  %v2806_v44 = vsel %vm2774_vm10, 10.951111, %v2758_v57  ;;  %v2807_v43 = vsel %vm2775_vm7, 10.951111, %v2759_v18 }
 0x3c8   :  { %vm2808_vm1 = vcmp.gt.f32.partialorder %v9287_v29, 1385.4  ;;  %vm2809_vm2 = vcmp.gt.f32.partialorder %v9290_v6, 1385.4  ;;  %vm2810_vm3 = vcmp.gt.f32.partialorder %v9293_v9, 1385.4 }
 0x3c9   :  { %vm2811_vm4 = vcmp.gt.f32.partialorder %v9296_v19, 1385.4  ;;  %vm2812_vm5 = vcmp.gt.f32.partialorder %v9299_v40, 1385.4  ;;  %vm2813_vm6 = vcmp.gt.f32.partialorder %v9302_v51, 1385.4 }
 0x3ca   :  { %vm2814_vm8 = vcmp.gt.f32.partialorder %v9305_v30, 1385.4  ;;  %vm2815_vm9 = vcmp.gt.f32.partialorder %v9308_v31, 1385.4  ;;  %vm2816_vm11 = vcmp.gt.f32.partialorder %v9311_v39, 1385.4 }
 0x3cb   :  { %vm2817_vm12 = vcmp.gt.f32.partialorder %v9314_v55, 1385.4  ;;  %vm2818_vm13 = vcmp.gt.f32.partialorder %v9317_v56, 1385.4  ;;  %vm2819_vm14 = vcmp.gt.f32.partialorder %v9320_v58, 1385.4 }
 0x3cc   :  { %vm2820_vm15 = vcmp.gt.f32.partialorder %v9323_v59, 1385.4  ;;  %vm2821_vm0 = vcmp.gt.f32.partialorder %v9326_v10, 1385.4  ;;  %vm2822_vm10 = vcmp.gt.f32.partialorder %v9329_v49, 1385.4 }
 0x3cd   :  { %vm2823_vm7 = vcmp.gt.f32.partialorder %v9332_v50, 1385.4  ;;  %v2824_v4 = vsel %vm2808_vm1, 0.02853067, %v2776_v8  ;;  %v2825_v7 = vsel %vm2809_vm2, 0.02853067, %v2777_v35 }
 0x3ce   :  { %v2826_v22 = vsel %vm2810_vm3, 0.02853067, %v2778_v36  ;;  %v2827_v23 = vsel %vm2811_vm4, 0.02853067, %v2779_v61  ;;  %v2828_v24 = vsel %vm2812_vm5, 0.02853067, %v2780_v62 }
 0x3cf   :  { %v2829_v60 = vsel %vm2813_vm6, 0.02853067, %v2781_v63  ;;  %v2830_v57 = vsel %vm2814_vm8, 0.02853067, %v2782_v3  ;;  %v2831_v18 = vsel %vm2815_vm9, 0.02853067, %v2783_v5 }
 0x3d0   :  { %v2832_v8 = vsel %vm2816_vm11, 0.02853067, %v2784_v0  ;;  %v2833_v35 = vsel %vm2817_vm12, 0.02853067, %v2785_v1  ;;  %v2834_v36 = vsel %vm2818_vm13, 0.02853067, %v2786_v2 }
 0x3d1   :  { %v2835_v61 = vsel %vm2819_vm14, 0.02853067, %v2787_v11  ;;  %v2836_v62 = vsel %vm2820_vm15, 0.02853067, %v2788_v12  ;;  %v2837_v63 = vsel %vm2821_vm0, 0.02853067, %v2789_v14 }
 0x3d2   :  { %v2838_v3 = vsel %vm2822_vm10, 0.02853067, %v2790_v15  ;;  %v2839_v5 = vsel %vm2823_vm7, 0.02853067, %v2791_v16  ;;  %v2840_v0 = vsel %vm2808_vm1, 12.473609, %v2792_v52 }
 0x3d3   :  { %v2841_v1 = vsel %vm2809_vm2, 12.473609, %v2793_v53  ;;  %v2842_v2 = vsel %vm2810_vm3, 12.473609, %v2794_v54  ;;  %v2843_v11 = vsel %vm2811_vm4, 12.473609, %v2795_v48 }
 0x3d4   :  { %v2844_v12 = vsel %vm2812_vm5, 12.473609, %v2796_v20  ;;  %v2845_v14 = vsel %vm2813_vm6, 12.473609, %v2797_v25  ;;  %v2846_v15 = vsel %vm2814_vm8, 12.473609, %v2798_v26 }
 0x3d5   :  { %v2847_v16 = vsel %vm2815_vm9, 12.473609, %v2799_v27  ;;  %v2848_v52 = vsel %vm2816_vm11, 12.473609, %v2800_v37  ;;  %v2849_v53 = vsel %vm2817_vm12, 12.473609, %v2801_v41 }
 0x3d6   :  { %v2850_v54 = vsel %vm2818_vm13, 12.473609, %v2802_v42  ;;  %v2851_v48 = vsel %vm2819_vm14, 12.473609, %v2803_v47  ;;  %v2852_v20 = vsel %vm2820_vm15, 12.473609, %v2804_v46 }
 0x3d7   :  { %v2853_v25 = vsel %vm2821_vm0, 12.473609, %v2805_v45  ;;  %v2854_v26 = vsel %vm2822_vm10, 12.473609, %v2806_v44  ;;  %v2855_v27 = vsel %vm2823_vm7, 12.473609, %v2807_v43 }
 0x3d8   :  { %vm2856_vm1 = vcmp.gt.f32.partialorder %v9287_v29, 1455.5  ;;  %vm2857_vm2 = vcmp.gt.f32.partialorder %v9290_v6, 1455.5  ;;  %vm2858_vm3 = vcmp.gt.f32.partialorder %v9293_v9, 1455.5  ;;  %vm2859_vm4 = vcmp.gt.f32.partialorder %v9296_v19, 1455.5 }
 0x3d9   :  { %vm2860_vm5 = vcmp.gt.f32.partialorder %v9299_v40, 1455.5  ;;  %vm2861_vm6 = vcmp.gt.f32.partialorder %v9302_v51, 1455.5  ;;  %vm2862_vm8 = vcmp.gt.f32.partialorder %v9305_v30, 1455.5  ;;  %vm2863_vm9 = vcmp.gt.f32.partialorder %v9308_v31, 1455.5 }
 0x3da   :  { %vm2864_vm11 = vcmp.gt.f32.partialorder %v9311_v39, 1455.5  ;;  %vm2865_vm12 = vcmp.gt.f32.partialorder %v9314_v55, 1455.5  ;;  %vm2866_vm13 = vcmp.gt.f32.partialorder %v9317_v56, 1455.5  ;;  %vm2867_vm14 = vcmp.gt.f32.partialorder %v9320_v58, 1455.5 }
 0x3db   :  { %vm2868_vm15 = vcmp.gt.f32.partialorder %v9323_v59, 1455.5  ;;  %vm2869_vm0 = vcmp.gt.f32.partialorder %v9326_v10, 1455.5  ;;  %vm2870_vm10 = vcmp.gt.f32.partialorder %v9329_v49, 1455.5  ;;  %vm2871_vm7 = vcmp.gt.f32.partialorder %v9332_v50, 1455.5 }
 0x3dc   :  { %v2872_v37 = vsel %vm2856_vm1, 0.027510317, %v2824_v4  ;;  %v2873_v41 = vsel %vm2857_vm2, 0.027510317, %v2825_v7  ;;  %v2874_v42 = vsel %vm2858_vm3, 0.027510317, %v2826_v22 }
 0x3dd   :  { %v2875_v47 = vsel %vm2859_vm4, 0.027510317, %v2827_v23  ;;  %v2876_v46 = vsel %vm2860_vm5, 0.027510317, %v2828_v24  ;;  %v2877_v45 = vsel %vm2861_vm6, 0.027510317, %v2829_v60 }
 0x3de   :  { %v2878_v44 = vsel %vm2862_vm8, 0.027510317, %v2830_v57  ;;  %v2879_v43 = vsel %vm2863_vm9, 0.027510317, %v2831_v18  ;;  %v2880_v4 = vsel %vm2864_vm11, 0.027510317, %v2832_v8 }
 0x3df   :  { %v2881_v7 = vsel %vm2865_vm12, 0.027510317, %v2833_v35  ;;  %v2882_v22 = vsel %vm2866_vm13, 0.027510317, %v2834_v36  ;;  %v2883_v23 = vsel %vm2867_vm14, 0.027510317, %v2835_v61 }
 0x3e0   :  { %v2884_v24 = vsel %vm2868_vm15, 0.027510317, %v2836_v62  ;;  %v2885_v60 = vsel %vm2869_vm0, 0.027510317, %v2837_v63  ;;  %v2886_v57 = vsel %vm2870_vm10, 0.027510317, %v2838_v3 }
 0x3e1   :  { %v2887_v18 = vsel %vm2871_vm7, 0.027510317, %v2839_v5  ;;  %v2888_v8 = vsel %vm2856_vm1, 13.9587345, %v2840_v0  ;;  %v2889_v35 = vsel %vm2857_vm2, 13.9587345, %v2841_v1 }
 0x3e2   :  { %v2890_v36 = vsel %vm2858_vm3, 13.9587345, %v2842_v2  ;;  %v2891_v61 = vsel %vm2859_vm4, 13.9587345, %v2843_v11  ;;  %v2892_v62 = vsel %vm2860_vm5, 13.9587345, %v2844_v12 }
 0x3e3   :  { %v2893_v63 = vsel %vm2861_vm6, 13.9587345, %v2845_v14  ;;  %v2894_v3 = vsel %vm2862_vm8, 13.9587345, %v2846_v15  ;;  %v2895_v5 = vsel %vm2863_vm9, 13.9587345, %v2847_v16 }
 0x3e4   :  { %v2896_v0 = vsel %vm2864_vm11, 13.9587345, %v2848_v52  ;;  %v2897_v1 = vsel %vm2865_vm12, 13.9587345, %v2849_v53  ;;  %v2898_v2 = vsel %vm2866_vm13, 13.9587345, %v2850_v54 }
 0x3e5   :  { %v2899_v11 = vsel %vm2867_vm14, 13.9587345, %v2851_v48  ;;  %v2900_v12 = vsel %vm2868_vm15, 13.9587345, %v2852_v20  ;;  %v2901_v14 = vsel %vm2869_vm0, 13.9587345, %v2853_v25 }
 0x3e6   :  { %v2902_v15 = vsel %vm2870_vm10, 13.9587345, %v2854_v26  ;;  %v2903_v16 = vsel %vm2871_vm7, 13.9587345, %v2855_v27  ;;  %vm2904_vm1 = vcmp.gt.f32.partialorder %v9287_v29, 1528.2 }
 0x3e7   :  { %vm2905_vm2 = vcmp.gt.f32.partialorder %v9290_v6, 1528.2  ;;  %vm2906_vm3 = vcmp.gt.f32.partialorder %v9293_v9, 1528.2  ;;  %vm2907_vm4 = vcmp.gt.f32.partialorder %v9296_v19, 1528.2 }
 0x3e8   :  { %vm2908_vm5 = vcmp.gt.f32.partialorder %v9299_v40, 1528.2  ;;  %vm2909_vm6 = vcmp.gt.f32.partialorder %v9302_v51, 1528.2  ;;  %vm2910_vm8 = vcmp.gt.f32.partialorder %v9305_v30, 1528.2 }
 0x3e9   :  { %vm2911_vm9 = vcmp.gt.f32.partialorder %v9308_v31, 1528.2  ;;  %vm2912_vm11 = vcmp.gt.f32.partialorder %v9311_v39, 1528.2  ;;  %vm2913_vm12 = vcmp.gt.f32.partialorder %v9314_v55, 1528.2 }
 0x3ea   :  { %vm2914_vm13 = vcmp.gt.f32.partialorder %v9317_v56, 1528.2  ;;  %vm2915_vm14 = vcmp.gt.f32.partialorder %v9320_v58, 1528.2  ;;  %vm2916_vm15 = vcmp.gt.f32.partialorder %v9323_v59, 1528.2 }
 0x3eb   :  { %vm2917_vm0 = vcmp.gt.f32.partialorder %v9326_v10, 1528.2  ;;  %vm2918_vm10 = vcmp.gt.f32.partialorder %v9329_v49, 1528.2  ;;  %vm2919_vm7 = vcmp.gt.f32.partialorder %v9332_v50, 1528.2 }
 0x3ec   :  { %v2920_v52 = vsel %vm2904_vm1, 0.0265252, %v2872_v37  ;;  %v2921_v53 = vsel %vm2905_vm2, 0.0265252, %v2873_v41  ;;  %v2922_v54 = vsel %vm2906_vm3, 0.0265252, %v2874_v42 }
 0x3ed   :  { %v2923_v48 = vsel %vm2907_vm4, 0.0265252, %v2875_v47  ;;  %v2924_v20 = vsel %vm2908_vm5, 0.0265252, %v2876_v46  ;;  %v2925_v25 = vsel %vm2909_vm6, 0.0265252, %v2877_v45 }
 0x3ee   :  { %v2926_v26 = vsel %vm2910_vm8, 0.0265252, %v2878_v44  ;;  %v2927_v27 = vsel %vm2911_vm9, 0.0265252, %v2879_v43  ;;  %v2928_v37 = vsel %vm2912_vm11, 0.0265252, %v2880_v4 }
 0x3ef   :  { %v2929_v41 = vsel %vm2913_vm12, 0.0265252, %v2881_v7  ;;  %v2930_v42 = vsel %vm2914_vm13, 0.0265252, %v2882_v22  ;;  %v2931_v47 = vsel %vm2915_vm14, 0.0265252, %v2883_v23 }
 0x3f0   :  { %v2932_v46 = vsel %vm2916_vm15, 0.0265252, %v2884_v24  ;;  %v2933_v45 = vsel %vm2917_vm0, 0.0265252, %v2885_v60  ;;  %v2934_v44 = vsel %vm2918_vm10, 0.0265252, %v2886_v57 }
 0x3f1   :  { %v2935_v43 = vsel %vm2919_vm7, 0.0265252, %v2887_v18  ;;  %v2936_v4 = vsel %vm2904_vm1, 15.464191, %v2888_v8  ;;  %v2937_v7 = vsel %vm2905_vm2, 15.464191, %v2889_v35 }
 0x3f2   :  { %v2938_v22 = vsel %vm2906_vm3, 15.464191, %v2890_v36  ;;  %v2939_v23 = vsel %vm2907_vm4, 15.464191, %v2891_v61  ;;  %v2940_v24 = vsel %vm2908_vm5, 15.464191, %v2892_v62 }
 0x3f3   :  { %v2941_v60 = vsel %vm2909_vm6, 15.464191, %v2893_v63  ;;  %v2942_v57 = vsel %vm2910_vm8, 15.464191, %v2894_v3  ;;  %v2943_v18 = vsel %vm2911_vm9, 15.464191, %v2895_v5 }
 0x3f4   :  { %v2944_v8 = vsel %vm2912_vm11, 15.464191, %v2896_v0  ;;  %v2945_v35 = vsel %vm2913_vm12, 15.464191, %v2897_v1  ;;  %v2946_v36 = vsel %vm2914_vm13, 15.464191, %v2898_v2 }
 0x3f5   :  { %v2947_v61 = vsel %vm2915_vm14, 15.464191, %v2899_v11  ;;  %v2948_v62 = vsel %vm2916_vm15, 15.464191, %v2900_v12  ;;  %v2949_v63 = vsel %vm2917_vm0, 15.464191, %v2901_v14 }
 0x3f6   :  { %v2950_v3 = vsel %vm2918_vm10, 15.464191, %v2902_v15  ;;  %v2951_v5 = vsel %vm2919_vm7, 15.464191, %v2903_v16  ;;  %vm2952_vm1 = vcmp.gt.f32.partialorder %v9287_v29, 1603.6 }
 0x3f7   :  { %vm2953_vm2 = vcmp.gt.f32.partialorder %v9290_v6, 1603.6  ;;  %vm2954_vm3 = vcmp.gt.f32.partialorder %v9293_v9, 1603.6  ;;  %vm2955_vm4 = vcmp.gt.f32.partialorder %v9296_v19, 1603.6 }
 0x3f8   :  { %vm2956_vm5 = vcmp.gt.f32.partialorder %v9299_v40, 1603.6  ;;  %vm2957_vm6 = vcmp.gt.f32.partialorder %v9302_v51, 1603.6  ;;  %vm2958_vm8 = vcmp.gt.f32.partialorder %v9305_v30, 1603.6 }
 0x3f9   :  { %vm2959_vm9 = vcmp.gt.f32.partialorder %v9308_v31, 1603.6  ;;  %vm2960_vm11 = vcmp.gt.f32.partialorder %v9311_v39, 1603.6  ;;  %vm2961_vm12 = vcmp.gt.f32.partialorder %v9314_v55, 1603.6 }
 0x3fa   :  { %vm2962_vm13 = vcmp.gt.f32.partialorder %v9317_v56, 1603.6  ;;  %vm2963_vm14 = vcmp.gt.f32.partialorder %v9320_v58, 1603.6  ;;  %vm2964_vm15 = vcmp.gt.f32.partialorder %v9323_v59, 1603.6 }
 0x3fb   :  { %vm2965_vm0 = vcmp.gt.f32.partialorder %v9326_v10, 1603.6  ;;  %vm2966_vm10 = vcmp.gt.f32.partialorder %v9329_v49, 1603.6  ;;  %vm2967_vm7 = vcmp.gt.f32.partialorder %v9332_v50, 1603.6 }
 0x3fc   :  { %v2968_v0 = vsel %vm2952_vm1, 0.025575448, %v2920_v52  ;;  %v2969_v1 = vsel %vm2953_vm2, 0.025575448, %v2921_v53  ;;  %v2970_v2 = vsel %vm2954_vm3, 0.025575448, %v2922_v54 }
 0x3fd   :  { %v2971_v11 = vsel %vm2955_vm4, 0.025575448, %v2923_v48  ;;  %v2972_v12 = vsel %vm2956_vm5, 0.025575448, %v2924_v20  ;;  %v2973_v14 = vsel %vm2957_vm6, 0.025575448, %v2925_v25 }
 0x3fe   :  { %v2974_v15 = vsel %vm2958_vm8, 0.025575448, %v2926_v26  ;;  %v2975_v16 = vsel %vm2959_vm9, 0.025575448, %v2927_v27  ;;  %v2976_v52 = vsel %vm2960_vm11, 0.025575448, %v2928_v37 }
 0x3ff   :  { %v2977_v53 = vsel %vm2961_vm12, 0.025575448, %v2929_v41  ;;  %v2978_v54 = vsel %vm2962_vm13, 0.025575448, %v2930_v42  ;;  %v2979_v48 = vsel %vm2963_vm14, 0.025575448, %v2931_v47 }
 0x400   :  { %v2980_v20 = vsel %vm2964_vm15, 0.025575448, %v2932_v46  ;;  %v2981_v25 = vsel %vm2965_vm0, 0.025575448, %v2933_v45  ;;  %v2982_v26 = vsel %vm2966_vm10, 0.025575448, %v2934_v44 }
 0x401   :  { %v2983_v27 = vsel %vm2967_vm7, 0.025575448, %v2935_v43  ;;  %v2984_v37 = vsel %vm2952_vm1, 16.987213, %v2936_v4  ;;  %v2985_v41 = vsel %vm2953_vm2, 16.987213, %v2937_v7 }
 0x402   :  { %v2986_v42 = vsel %vm2954_vm3, 16.987213, %v2938_v22  ;;  %v2987_v47 = vsel %vm2955_vm4, 16.987213, %v2939_v23  ;;  %v2988_v46 = vsel %vm2956_vm5, 16.987213, %v2940_v24 }
 0x403   :  { %v2989_v45 = vsel %vm2957_vm6, 16.987213, %v2941_v60  ;;  %v2990_v44 = vsel %vm2958_vm8, 16.987213, %v2942_v57  ;;  %v2991_v43 = vsel %vm2959_vm9, 16.987213, %v2943_v18 }
 0x404   :  { %v2992_v4 = vsel %vm2960_vm11, 16.987213, %v2944_v8  ;;  %v2993_v7 = vsel %vm2961_vm12, 16.987213, %v2945_v35  ;;  %v2994_v22 = vsel %vm2962_vm13, 16.987213, %v2946_v36 }
 0x405   :  { %v2995_v23 = vsel %vm2963_vm14, 16.987213, %v2947_v61  ;;  %v2996_v24 = vsel %vm2964_vm15, 16.987213, %v2948_v62  ;;  %v2997_v60 = vsel %vm2965_vm0, 16.987213, %v2949_v63 }
 0x406   :  { %v2998_v57 = vsel %vm2966_vm10, 16.987213, %v2950_v3  ;;  %v2999_v18 = vsel %vm2967_vm7, 16.987213, %v2951_v5  ;;  %vm3000_vm1 = vcmp.gt.f32.partialorder %v9287_v29, 1681.8 }
 0x407   :  { %vm3001_vm2 = vcmp.gt.f32.partialorder %v9290_v6, 1681.8  ;;  %vm3002_vm3 = vcmp.gt.f32.partialorder %v9293_v9, 1681.8  ;;  %vm3003_vm4 = vcmp.gt.f32.partialorder %v9296_v19, 1681.8 }
 0x408   :  { %vm3004_vm5 = vcmp.gt.f32.partialorder %v9299_v40, 1681.8  ;;  %vm3005_vm6 = vcmp.gt.f32.partialorder %v9302_v51, 1681.8  ;;  %vm3006_vm8 = vcmp.gt.f32.partialorder %v9305_v30, 1681.8 }
 0x409   :  { %vm3007_vm9 = vcmp.gt.f32.partialorder %v9308_v31, 1681.8  ;;  %vm3008_vm11 = vcmp.gt.f32.partialorder %v9311_v39, 1681.8  ;;  %vm3009_vm12 = vcmp.gt.f32.partialorder %v9314_v55, 1681.8 }
 0x40a   :  { %vm3010_vm13 = vcmp.gt.f32.partialorder %v9317_v56, 1681.8  ;;  %vm3011_vm14 = vcmp.gt.f32.partialorder %v9320_v58, 1681.8  ;;  %vm3012_vm15 = vcmp.gt.f32.partialorder %v9323_v59, 1681.8 }
 0x40b   :  { %vm3013_vm0 = vcmp.gt.f32.partialorder %v9326_v10, 1681.8  ;;  %vm3014_vm10 = vcmp.gt.f32.partialorder %v9329_v49, 1681.8  ;;  %vm3015_vm7 = vcmp.gt.f32.partialorder %v9332_v50, 1681.8 }
 0x40c   :  { %v3016_v8 = vsel %vm3000_vm1, 0.024691358, %v2968_v0  ;;  %v3017_v35 = vsel %vm3001_vm2, 0.024691358, %v2969_v1  ;;  %v3018_v36 = vsel %vm3002_vm3, 0.024691358, %v2970_v2 }
 0x40d   :  { %v3019_v61 = vsel %vm3003_vm4, 0.024691358, %v2971_v11  ;;  %v3020_v62 = vsel %vm3004_vm5, 0.024691358, %v2972_v12  ;;  %v3021_v63 = vsel %vm3005_vm6, 0.024691358, %v2973_v14 }
 0x40e   :  { %v3022_v3 = vsel %vm3006_vm8, 0.024691358, %v2974_v15  ;;  %v3023_v5 = vsel %vm3007_vm9, 0.024691358, %v2975_v16  ;;  %v3024_v0 = vsel %vm3008_vm11, 0.024691358, %v2976_v52 }
 0x40f   :  { %v3025_v1 = vsel %vm3009_vm12, 0.024691358, %v2977_v53  ;;  %v3026_v2 = vsel %vm3010_vm13, 0.024691358, %v2978_v54  ;;  %v3027_v11 = vsel %vm3011_vm14, 0.024691358, %v2979_v48 }
 0x410   :  { %v3028_v12 = vsel %vm3012_vm15, 0.024691358, %v2980_v20  ;;  %v3029_v14 = vsel %vm3013_vm0, 0.024691358, %v2981_v25  ;;  %v3030_v15 = vsel %vm3014_vm10, 0.024691358, %v2982_v26 }
 0x411   :  { %v3031_v16 = vsel %vm3015_vm7, 0.024691358, %v2983_v27  ;;  %v3032_v52 = vsel %vm3000_vm1, 18.474073, %v2984_v37  ;;  %v3033_v53 = vsel %vm3001_vm2, 18.474073, %v2985_v41 }
 0x412   :  { %v3034_v54 = vsel %vm3002_vm3, 18.474073, %v2986_v42  ;;  %v3035_v48 = vsel %vm3003_vm4, 18.474073, %v2987_v47  ;;  %v3036_v20 = vsel %vm3004_vm5, 18.474073, %v2988_v46 }
 0x413   :  { %v3037_v25 = vsel %vm3005_vm6, 18.474073, %v2989_v45  ;;  %v3038_v26 = vsel %vm3006_vm8, 18.474073, %v2990_v44  ;;  %v3039_v27 = vsel %vm3007_vm9, 18.474073, %v2991_v43 }
 0x414   :  { %v3040_v37 = vsel %vm3008_vm11, 18.474073, %v2992_v4  ;;  %v3041_v41 = vsel %vm3009_vm12, 18.474073, %v2993_v7  ;;  %v3042_v42 = vsel %vm3010_vm13, 18.474073, %v2994_v22 }
 0x415   :  { %v3043_v47 = vsel %vm3011_vm14, 18.474073, %v2995_v23  ;;  %v3044_v46 = vsel %vm3012_vm15, 18.474073, %v2996_v24  ;;  %v3045_v45 = vsel %vm3013_vm0, 18.474073, %v2997_v60 }
 0x416   :  { %v3046_v44 = vsel %vm3014_vm10, 18.474073, %v2998_v57  ;;  %v3047_v43 = vsel %vm3015_vm7, 18.474073, %v2999_v18  ;;  %vm3048_vm1 = vcmp.gt.f32.partialorder %v9287_v29, 1762.8 }
 0x417   :  { %vm3049_vm2 = vcmp.gt.f32.partialorder %v9290_v6, 1762.8  ;;  %vm3050_vm3 = vcmp.gt.f32.partialorder %v9293_v9, 1762.8  ;;  %vm3051_vm4 = vcmp.gt.f32.partialorder %v9296_v19, 1762.8 }
 0x418   :  { %vm3052_vm5 = vcmp.gt.f32.partialorder %v9299_v40, 1762.8  ;;  %vm3053_vm6 = vcmp.gt.f32.partialorder %v9302_v51, 1762.8  ;;  %vm3054_vm8 = vcmp.gt.f32.partialorder %v9305_v30, 1762.8 }
 0x419   :  { %vm3055_vm9 = vcmp.gt.f32.partialorder %v9308_v31, 1762.8  ;;  %vm3056_vm11 = vcmp.gt.f32.partialorder %v9311_v39, 1762.8  ;;  %vm3057_vm12 = vcmp.gt.f32.partialorder %v9314_v55, 1762.8 }
 0x41a   :  { %vm3058_vm13 = vcmp.gt.f32.partialorder %v9317_v56, 1762.8  ;;  %vm3059_vm14 = vcmp.gt.f32.partialorder %v9320_v58, 1762.8  ;;  %vm3060_vm15 = vcmp.gt.f32.partialorder %v9323_v59, 1762.8 }
 0x41b   :  { %vm3061_vm0 = vcmp.gt.f32.partialorder %v9326_v10, 1762.8  ;;  %vm3062_vm10 = vcmp.gt.f32.partialorder %v9329_v49, 1762.8  ;;  %vm3063_vm7 = vcmp.gt.f32.partialorder %v9332_v50, 1762.8 }
 0x41c   :  { %v3064_v4 = vsel %vm3048_vm1, 0.023837902, %v3016_v8  ;;  %v3065_v7 = vsel %vm3049_vm2, 0.023837902, %v3017_v35  ;;  %v3066_v22 = vsel %vm3050_vm3, 0.023837902, %v3018_v36 }
 0x41d   :  { %v3067_v23 = vsel %vm3051_vm4, 0.023837902, %v3019_v61  ;;  %v3068_v24 = vsel %vm3052_vm5, 0.023837902, %v3020_v62  ;;  %v3069_v60 = vsel %vm3053_vm6, 0.023837902, %v3021_v63 }
 0x41e   :  { %v3070_v57 = vsel %vm3054_vm8, 0.023837902, %v3022_v3  ;;  %v3071_v18 = vsel %vm3055_vm9, 0.023837902, %v3023_v5  ;;  %v3072_v8 = vsel %vm3056_vm11, 0.023837902, %v3024_v0 }
 0x41f   :  { %v3073_v35 = vsel %vm3057_vm12, 0.023837902, %v3025_v1  ;;  %v3074_v36 = vsel %vm3058_vm13, 0.023837902, %v3026_v2  ;;  %v3075_v61 = vsel %vm3059_vm14, 0.023837902, %v3027_v11 }
 0x420   :  { %v3076_v62 = vsel %vm3060_vm15, 0.023837902, %v3028_v12  ;;  %v3077_v63 = vsel %vm3061_vm0, 0.023837902, %v3029_v14  ;;  %v3078_v3 = vsel %vm3062_vm10, 0.023837902, %v3030_v15 }
 0x421   :  { %v3079_v5 = vsel %vm3063_vm7, 0.023837902, %v3031_v16  ;;  %v3080_v0 = vsel %vm3048_vm1, 19.978546, %v3032_v52  ;;  %v3081_v1 = vsel %vm3049_vm2, 19.978546, %v3033_v53 }
 0x422   :  { %v3082_v2 = vsel %vm3050_vm3, 19.978546, %v3034_v54  ;;  %v3083_v11 = vsel %vm3051_vm4, 19.978546, %v3035_v48  ;;  %v3084_v12 = vsel %vm3052_vm5, 19.978546, %v3036_v20 }
 0x423   :  { %v3085_v14 = vsel %vm3053_vm6, 19.978546, %v3037_v25  ;;  %v3086_v15 = vsel %vm3054_vm8, 19.978546, %v3038_v26  ;;  %v3087_v16 = vsel %vm3055_vm9, 19.978546, %v3039_v27 }
 0x424   :  { %v3088_v52 = vsel %vm3056_vm11, 19.978546, %v3040_v37  ;;  %v3089_v53 = vsel %vm3057_vm12, 19.978546, %v3041_v41  ;;  %v3090_v54 = vsel %vm3058_vm13, 19.978546, %v3042_v42 }
 0x425   :  { %v3091_v48 = vsel %vm3059_vm14, 19.978546, %v3043_v47  ;;  %v3092_v20 = vsel %vm3060_vm15, 19.978546, %v3044_v46  ;;  %v3093_v25 = vsel %vm3061_vm0, 19.978546, %v3045_v45 }
 0x426   :  { %v3094_v26 = vsel %vm3062_vm10, 19.978546, %v3046_v44  ;;  %v3095_v27 = vsel %vm3063_vm7, 19.978546, %v3047_v43  ;;  %vm3096_vm1 = vcmp.gt.f32.partialorder %v9287_v29, 1846.7 }
 0x427   :  { %vm3097_vm2 = vcmp.gt.f32.partialorder %v9290_v6, 1846.7  ;;  %vm3098_vm3 = vcmp.gt.f32.partialorder %v9293_v9, 1846.7  ;;  %vm3099_vm4 = vcmp.gt.f32.partialorder %v9296_v19, 1846.7 }
 0x428   :  { %vm3100_vm5 = vcmp.gt.f32.partialorder %v9299_v40, 1846.7  ;;  %vm3101_vm6 = vcmp.gt.f32.partialorder %v9302_v51, 1846.7  ;;  %vm3102_vm8 = vcmp.gt.f32.partialorder %v9305_v30, 1846.7 }
 0x429   :  { %vm3103_vm9 = vcmp.gt.f32.partialorder %v9308_v31, 1846.7  ;;  %vm3104_vm11 = vcmp.gt.f32.partialorder %v9311_v39, 1846.7  ;;  %vm3105_vm12 = vcmp.gt.f32.partialorder %v9314_v55, 1846.7 }
 0x42a   :  { %vm3106_vm13 = vcmp.gt.f32.partialorder %v9317_v56, 1846.7  ;;  %vm3107_vm14 = vcmp.gt.f32.partialorder %v9320_v58, 1846.7  ;;  %vm3108_vm15 = vcmp.gt.f32.partialorder %v9323_v59, 1846.7 }
 0x42b   :  { %vm3109_vm0 = vcmp.gt.f32.partialorder %v9326_v10, 1846.7  ;;  %vm3110_vm10 = vcmp.gt.f32.partialorder %v9329_v49, 1846.7  ;;  %vm3111_vm7 = vcmp.gt.f32.partialorder %v9332_v50, 1846.7 }
 0x42c   :  { %v3112_v37 = vsel %vm3096_vm1, 0.022988506, %v3064_v4  ;;  %v3113_v41 = vsel %vm3097_vm2, 0.022988506, %v3065_v7  ;;  %v3114_v42 = vsel %vm3098_vm3, 0.022988506, %v3066_v22 }
 0x42d   :  { %v3115_v47 = vsel %vm3099_vm4, 0.022988506, %v3067_v23  ;;  %v3116_v46 = vsel %vm3100_vm5, 0.022988506, %v3068_v24  ;;  %v3117_v45 = vsel %vm3101_vm6, 0.022988506, %v3069_v60 }
 0x42e   :  { %v3118_v44 = vsel %vm3102_vm8, 0.022988506, %v3070_v57  ;;  %v3119_v43 = vsel %vm3103_vm9, 0.022988506, %v3071_v18  ;;  %v3120_v4 = vsel %vm3104_vm11, 0.022988506, %v3072_v8 }
 0x42f   :  { %v3121_v7 = vsel %vm3105_vm12, 0.022988506, %v3073_v35  ;;  %v3122_v22 = vsel %vm3106_vm13, 0.022988506, %v3074_v36  ;;  %v3123_v23 = vsel %vm3107_vm14, 0.022988506, %v3075_v61 }
 0x430   :  { %v3124_v24 = vsel %vm3108_vm15, 0.022988506, %v3076_v62  ;;  %v3125_v60 = vsel %vm3109_vm0, 0.022988506, %v3077_v63  ;;  %v3126_v57 = vsel %vm3110_vm10, 0.022988506, %v3078_v3 }
 0x431   :  { %v3127_v18 = vsel %vm3111_vm7, 0.022988506, %v3079_v5  ;;  %v3128_v8 = vsel %vm3096_vm1, 21.547127, %v3080_v0  ;;  %v3129_v35 = vsel %vm3097_vm2, 21.547127, %v3081_v1 }
 0x432   :  { %v3130_v36 = vsel %vm3098_vm3, 21.547127, %v3082_v2  ;;  %v3131_v61 = vsel %vm3099_vm4, 21.547127, %v3083_v11  ;;  %v3132_v62 = vsel %vm3100_vm5, 21.547127, %v3084_v12 }
 0x433   :  { %v3133_v63 = vsel %vm3101_vm6, 21.547127, %v3085_v14  ;;  %v3134_v3 = vsel %vm3102_vm8, 21.547127, %v3086_v15  ;;  %v3135_v5 = vsel %vm3103_vm9, 21.547127, %v3087_v16 }
 0x434   :  { %v3136_v0 = vsel %vm3104_vm11, 21.547127, %v3088_v52  ;;  %v3137_v1 = vsel %vm3105_vm12, 21.547127, %v3089_v53  ;;  %v3138_v2 = vsel %vm3106_vm13, 21.547127, %v3090_v54 }
 0x435   :  { %v3139_v11 = vsel %vm3107_vm14, 21.547127, %v3091_v48  ;;  %v3140_v12 = vsel %vm3108_vm15, 21.547127, %v3092_v20  ;;  %v3141_v14 = vsel %vm3109_vm0, 21.547127, %v3093_v25 }
 0x436   :  { %v3142_v15 = vsel %vm3110_vm10, 21.547127, %v3094_v26  ;;  %v3143_v16 = vsel %vm3111_vm7, 21.547127, %v3095_v27  ;;  %vm3144_vm1 = vcmp.gt.f32.partialorder %v9287_v29, 1933.7 }
 0x437   :  { %vm3145_vm2 = vcmp.gt.f32.partialorder %v9290_v6, 1933.7  ;;  %vm3146_vm3 = vcmp.gt.f32.partialorder %v9293_v9, 1933.7  ;;  %vm3147_vm4 = vcmp.gt.f32.partialorder %v9296_v19, 1933.7 }
 0x438   :  { %vm3148_vm5 = vcmp.gt.f32.partialorder %v9299_v40, 1933.7  ;;  %vm3149_vm6 = vcmp.gt.f32.partialorder %v9302_v51, 1933.7  ;;  %vm3150_vm8 = vcmp.gt.f32.partialorder %v9305_v30, 1933.7 }
 0x439   :  { %vm3151_vm9 = vcmp.gt.f32.partialorder %v9308_v31, 1933.7  ;;  %vm3152_vm11 = vcmp.gt.f32.partialorder %v9311_v39, 1933.7  ;;  %vm3153_vm12 = vcmp.gt.f32.partialorder %v9314_v55, 1933.7 }
 0x43a   :  { %vm3154_vm13 = vcmp.gt.f32.partialorder %v9317_v56, 1933.7  ;;  %vm3155_vm14 = vcmp.gt.f32.partialorder %v9320_v58, 1933.7  ;;  %vm3156_vm15 = vcmp.gt.f32.partialorder %v9323_v59, 1933.7 }
 0x43b   :  { %vm3157_vm0 = vcmp.gt.f32.partialorder %v9326_v10, 1933.7  ;;  %vm3158_vm10 = vcmp.gt.f32.partialorder %v9329_v49, 1933.7  ;;  %vm3159_vm7 = vcmp.gt.f32.partialorder %v9332_v50, 1933.7 }
 0x43c   :  { %v3160_v52 = vsel %vm3144_vm1, 0.022222223, %v3112_v37  ;;  %v3161_v53 = vsel %vm3145_vm2, 0.022222223, %v3113_v41  ;;  %v3162_v54 = vsel %vm3146_vm3, 0.022222223, %v3114_v42 }
 0x43d   :  { %v3163_v48 = vsel %vm3147_vm4, 0.022222223, %v3115_v47  ;;  %v3164_v20 = vsel %vm3148_vm5, 0.022222223, %v3116_v46  ;;  %v3165_v25 = vsel %vm3149_vm6, 0.022222223, %v3117_v45 }
 0x43e   :  { %v3166_v26 = vsel %vm3150_vm8, 0.022222223, %v3118_v44  ;;  %v3167_v27 = vsel %vm3151_vm9, 0.022222223, %v3119_v43  ;;  %v3168_v37 = vsel %vm3152_vm11, 0.022222223, %v3120_v4 }
 0x43f   :  { %v3169_v41 = vsel %vm3153_vm12, 0.022222223, %v3121_v7  ;;  %v3170_v42 = vsel %vm3154_vm13, 0.022222223, %v3122_v22  ;;  %v3171_v47 = vsel %vm3155_vm14, 0.022222223, %v3123_v23 }
 0x440   :  { %v3172_v46 = vsel %vm3156_vm15, 0.022222223, %v3124_v24  ;;  %v3173_v45 = vsel %vm3157_vm0, 0.022222223, %v3125_v60  ;;  %v3174_v44 = vsel %vm3158_vm10, 0.022222223, %v3126_v57 }
 0x441   :  { %v3175_v43 = vsel %vm3159_vm7, 0.022222223, %v3127_v18  ;;  %v3176_v4 = vsel %vm3144_vm1, 23.028889, %v3128_v8  ;;  %v3177_v7 = vsel %vm3145_vm2, 23.028889, %v3129_v35 }
 0x442   :  { %v3178_v22 = vsel %vm3146_vm3, 23.028889, %v3130_v36  ;;  %v3179_v23 = vsel %vm3147_vm4, 23.028889, %v3131_v61  ;;  %v3180_v24 = vsel %vm3148_vm5, 23.028889, %v3132_v62 }
 0x443   :  { %v3181_v60 = vsel %vm3149_vm6, 23.028889, %v3133_v63  ;;  %v3182_v57 = vsel %vm3150_vm8, 23.028889, %v3134_v3  ;;  %v3183_v18 = vsel %vm3151_vm9, 23.028889, %v3135_v5 }
 0x444   :  { %v3184_v8 = vsel %vm3152_vm11, 23.028889, %v3136_v0  ;;  %v3185_v35 = vsel %vm3153_vm12, 23.028889, %v3137_v1  ;;  %v3186_v36 = vsel %vm3154_vm13, 23.028889, %v3138_v2 }
 0x445   :  { %v3187_v61 = vsel %vm3155_vm14, 23.028889, %v3139_v11  ;;  %v3188_v62 = vsel %vm3156_vm15, 23.028889, %v3140_v12  ;;  %v3189_v63 = vsel %vm3157_vm0, 23.028889, %v3141_v14 }
 0x446   :  { %v3190_v3 = vsel %vm3158_vm10, 23.028889, %v3142_v15  ;;  %v3191_v5 = vsel %vm3159_vm7, 23.028889, %v3143_v16  ;;  %vm3192_vm1 = vcmp.gt.f32.partialorder %v9287_v29, 2023.7 }
 0x447   :  { %vm3193_vm2 = vcmp.gt.f32.partialorder %v9290_v6, 2023.7  ;;  %vm3194_vm3 = vcmp.gt.f32.partialorder %v9293_v9, 2023.7  ;;  %vm3195_vm4 = vcmp.gt.f32.partialorder %v9296_v19, 2023.7 }
 0x448   :  { %vm3196_vm5 = vcmp.gt.f32.partialorder %v9299_v40, 2023.7  ;;  %vm3197_vm6 = vcmp.gt.f32.partialorder %v9302_v51, 2023.7  ;;  %vm3198_vm8 = vcmp.gt.f32.partialorder %v9305_v30, 2023.7 }
 0x449   :  { %vm3199_vm9 = vcmp.gt.f32.partialorder %v9308_v31, 2023.7  ;;  %vm3200_vm11 = vcmp.gt.f32.partialorder %v9311_v39, 2023.7  ;;  %vm3201_vm12 = vcmp.gt.f32.partialorder %v9314_v55, 2023.7 }
 0x44a   :  { %vm3202_vm13 = vcmp.gt.f32.partialorder %v9317_v56, 2023.7  ;;  %vm3203_vm14 = vcmp.gt.f32.partialorder %v9320_v58, 2023.7  ;;  %vm3204_vm15 = vcmp.gt.f32.partialorder %v9323_v59, 2023.7 }
 0x44b   :  { %vm3205_vm0 = vcmp.gt.f32.partialorder %v9326_v10, 2023.7  ;;  %vm3206_vm10 = vcmp.gt.f32.partialorder %v9329_v49, 2023.7  ;;  %vm3207_vm7 = vcmp.gt.f32.partialorder %v9332_v50, 2023.7 }
 0x44c   :  { %v10169_v0 = vsel %vm3192_vm1, 0.021482278, %v3160_v52  ;;  %v10173_v1 = vsel %vm3193_vm2, 0.021482278, %v3161_v53  ;;  %v10177_v2 = vsel %vm3194_vm3, 0.021482278, %v3162_v54 }
 0x44d   :  { %v10181_v11 = vsel %vm3195_vm4, 0.021482278, %v3163_v48  ;;  %v10185_v12 = vsel %vm3196_vm5, 0.021482278, %v3164_v20  ;;  %v10189_v14 = vsel %vm3197_vm6, 0.021482278, %v3165_v25 }
 0x44e   :  { %v10193_v15 = vsel %vm3198_vm8, 0.021482278, %v3166_v26  ;;  %v10197_v16 = vsel %vm3199_vm9, 0.021482278, %v3167_v27  ;;  %v10201_v52 = vsel %vm3200_vm11, 0.021482278, %v3168_v37 }
 0x44f   :  { %v10205_v53 = vsel %vm3201_vm12, 0.021482278, %v3169_v41  ;;  %v10209_v54 = vsel %vm3202_vm13, 0.021482278, %v3170_v42  ;;  %v10213_v48 = vsel %vm3203_vm14, 0.021482278, %v3171_v47 }
 0x450   :  { %v10217_v20 = vsel %vm3204_vm15, 0.021482278, %v3172_v46  ;;  %v10221_v25 = vsel %vm3205_vm0, 0.021482278, %v3173_v45  ;;  %v10225_v26 = vsel %vm3206_vm10, 0.021482278, %v3174_v44 }
 0x451   :  { %v10229_v27 = vsel %vm3207_vm7, 0.021482278, %v3175_v43  ;;  %v10233_v37 = vsel %vm3192_vm1, 24.526316, %v3176_v4  ;;  %v10237_v41 = vsel %vm3193_vm2, 24.526316, %v3177_v7 }
 0x452   :  { %v10241_v42 = vsel %vm3194_vm3, 24.526316, %v3178_v22  ;;  %v10245_v47 = vsel %vm3195_vm4, 24.526316, %v3179_v23  ;;  %v10249_v46 = vsel %vm3196_vm5, 24.526316, %v3180_v24 }
 0x453   :  { %v10253_v29 = vsel %vm3197_vm6, 24.526316, %v3181_v60  ;;  %v10257_v6 = vsel %vm3198_vm8, 24.526316, %v3182_v57  ;;  %v10261_v9 = vsel %vm3199_vm9, 24.526316, %v3183_v18 }
 0x454   :  { %v10265_v19 = vsel %vm3200_vm11, 24.526316, %v3184_v8  ;;  %v10269_v40 = vsel %vm3201_vm12, 24.526316, %v3185_v35  ;;  %v10273_v51 = vsel %vm3202_vm13, 24.526316, %v3186_v36 }
 0x455   :  { %v10277_v30 = vsel %vm3203_vm14, 24.526316, %v3187_v61  ;;  %v10281_v31 = vsel %vm3204_vm15, 24.526316, %v3188_v62  ;;  %v10285_v39 = vsel %vm3205_vm0, 24.526316, %v3189_v63 }
 0x456   :  { %v10289_v55 = vsel %vm3206_vm10, 24.526316, %v3190_v3  ;;  %v10293_v56 = vsel %vm3207_vm7, 24.526316, %v3191_v5  ;;  %v10295_v45 = vld [vmem:[#allocation7] sm:$0xff]  ;;  %v10298_v58 = vld [vmem:[#allocation7 + $0x8] sm:$0xff] }
 0x457   :  { %vm3240_vm1 = vcmp.gt.f32.partialorder %v10295_v45, 2116.8  ;;  %vm3241_vm2 = vcmp.gt.f32.partialorder %v10298_v58, 2116.8  ;;  %v10301_v59 = vld [vmem:[#allocation7 + $0x10] sm:$0xff]  ;;  %v10304_v10 = vld [vmem:[#allocation7 + $0x18] sm:$0xff] }
 0x458   :  { %vm3242_vm3 = vcmp.gt.f32.partialorder %v10301_v59, 2116.8  ;;  %vm3243_vm4 = vcmp.gt.f32.partialorder %v10304_v10, 2116.8  ;;  %v10307_v49 = vld [vmem:[#allocation7 + $0x20] sm:$0xff]  ;;  %v10310_v50 = vld [vmem:[#allocation7 + $0x28] sm:$0xff] }
 0x459   :  { %vm3244_vm5 = vcmp.gt.f32.partialorder %v10307_v49, 2116.8  ;;  %vm3245_vm6 = vcmp.gt.f32.partialorder %v10310_v50, 2116.8  ;;  %v10313_v44 = vld [vmem:[#allocation7 + $0x30] sm:$0xff]  ;;  %v10316_v43 = vld [vmem:[#allocation7 + $0x38] sm:$0xff] }
 0x45a   :  { %vm3246_vm8 = vcmp.gt.f32.partialorder %v10313_v44, 2116.8  ;;  %vm3247_vm9 = vcmp.gt.f32.partialorder %v10316_v43, 2116.8  ;;  %v10319_v4 = vld [vmem:[#allocation7 + $0x40] sm:$0xff]  ;;  %v10322_v7 = vld [vmem:[#allocation7 + $0x48] sm:$0xff] }
 0x45b   :  { %vm3248_vm11 = vcmp.gt.f32.partialorder %v10319_v4, 2116.8  ;;  %vm3249_vm12 = vcmp.gt.f32.partialorder %v10322_v7, 2116.8  ;;  %v10325_v22 = vld [vmem:[#allocation7 + $0x50] sm:$0xff]  ;;  %v10328_v23 = vld [vmem:[#allocation7 + $0x58] sm:$0xff] }
 0x45c   :  { %vm3250_vm13 = vcmp.gt.f32.partialorder %v10325_v22, 2116.8  ;;  %vm3251_vm14 = vcmp.gt.f32.partialorder %v10328_v23, 2116.8  ;;  %v10331_v24 = vld [vmem:[#allocation7 + $0x60] sm:$0xff]  ;;  %v10334_v60 = vld [vmem:[#allocation7 + $0x68] sm:$0xff] }
 0x45d   :  { %vm3252_vm15 = vcmp.gt.f32.partialorder %v10331_v24, 2116.8  ;;  %vm3253_vm0 = vcmp.gt.f32.partialorder %v10334_v60, 2116.8  ;;  %v10337_v57 = vld [vmem:[#allocation7 + $0x70] sm:$0xff]  ;;  %v10340_v18 = vld [vmem:[#allocation7 + $0x78] sm:$0xff] }
 0x45e   :  { %vm3254_vm10 = vcmp.gt.f32.partialorder %v10337_v57, 2116.8  ;;  %vm3255_vm7 = vcmp.gt.f32.partialorder %v10340_v18, 2116.8  ;;  %v3256_v8 = vsel %vm3240_vm1, 0.020746889, %v10169_v0 }
 0x45f   :  { %v3257_v35 = vsel %vm3241_vm2, 0.020746889, %v10173_v1  ;;  %v3258_v36 = vsel %vm3242_vm3, 0.020746889, %v10177_v2  ;;  %v3259_v61 = vsel %vm3243_vm4, 0.020746889, %v10181_v11 }
 0x460   :  { %v3260_v62 = vsel %vm3244_vm5, 0.020746889, %v10185_v12  ;;  %v3261_v63 = vsel %vm3245_vm6, 0.020746889, %v10189_v14  ;;  %v3262_v3 = vsel %vm3246_vm8, 0.020746889, %v10193_v15 }
 0x461   :  { %v3263_v5 = vsel %vm3247_vm9, 0.020746889, %v10197_v16  ;;  %v3264_v0 = vsel %vm3248_vm11, 0.020746889, %v10201_v52  ;;  %v3265_v1 = vsel %vm3249_vm12, 0.020746889, %v10205_v53 }
 0x462   :  { %v3266_v2 = vsel %vm3250_vm13, 0.020746889, %v10209_v54  ;;  %v3267_v11 = vsel %vm3251_vm14, 0.020746889, %v10213_v48  ;;  %v3268_v12 = vsel %vm3252_vm15, 0.020746889, %v10217_v20 }
 0x463   :  { %v3269_v14 = vsel %vm3253_vm0, 0.020746889, %v10221_v25  ;;  %v3270_v15 = vsel %vm3254_vm10, 0.020746889, %v10225_v26  ;;  %v3271_v16 = vsel %vm3255_vm7, 0.020746889, %v10229_v27 }
 0x464   :  { %v3272_v52 = vsel %vm3240_vm1, 26.082987, %v10233_v37  ;;  %v3273_v53 = vsel %vm3241_vm2, 26.082987, %v10237_v41  ;;  %v3274_v54 = vsel %vm3242_vm3, 26.082987, %v10241_v42 }
 0x465   :  { %v3275_v48 = vsel %vm3243_vm4, 26.082987, %v10245_v47  ;;  %v3276_v20 = vsel %vm3244_vm5, 26.082987, %v10249_v46  ;;  %v3277_v25 = vsel %vm3245_vm6, 26.082987, %v10253_v29 }
 0x466   :  { %v3278_v26 = vsel %vm3246_vm8, 26.082987, %v10257_v6  ;;  %v3279_v27 = vsel %vm3247_vm9, 26.082987, %v10261_v9  ;;  %v3280_v37 = vsel %vm3248_vm11, 26.082987, %v10265_v19 }
 0x467   :  { %v3281_v41 = vsel %vm3249_vm12, 26.082987, %v10269_v40  ;;  %v3282_v42 = vsel %vm3250_vm13, 26.082987, %v10273_v51  ;;  %v3283_v47 = vsel %vm3251_vm14, 26.082987, %v10277_v30 }
 0x468   :  { %v3284_v46 = vsel %vm3252_vm15, 26.082987, %v10281_v31  ;;  %v3285_v29 = vsel %vm3253_vm0, 26.082987, %v10285_v39  ;;  %v3286_v6 = vsel %vm3254_vm10, 26.082987, %v10289_v55 }
 0x469   :  { %v3287_v9 = vsel %vm3255_vm7, 26.082987, %v10293_v56  ;;  %vm3288_vm1 = vcmp.gt.f32.partialorder %v10295_v45, 2213.2  ;;  %vm3289_vm2 = vcmp.gt.f32.partialorder %v10298_v58, 2213.2 }
 0x46a   :  { %vm3290_vm3 = vcmp.gt.f32.partialorder %v10301_v59, 2213.2  ;;  %vm3291_vm4 = vcmp.gt.f32.partialorder %v10304_v10, 2213.2  ;;  %vm3292_vm5 = vcmp.gt.f32.partialorder %v10307_v49, 2213.2 }
 0x46b   :  { %vm3293_vm6 = vcmp.gt.f32.partialorder %v10310_v50, 2213.2  ;;  %vm3294_vm8 = vcmp.gt.f32.partialorder %v10313_v44, 2213.2  ;;  %vm3295_vm9 = vcmp.gt.f32.partialorder %v10316_v43, 2213.2 }
 0x46c   :  { %vm3296_vm11 = vcmp.gt.f32.partialorder %v10319_v4, 2213.2  ;;  %vm3297_vm12 = vcmp.gt.f32.partialorder %v10322_v7, 2213.2  ;;  %vm3298_vm13 = vcmp.gt.f32.partialorder %v10325_v22, 2213.2 }
 0x46d   :  { %vm3299_vm14 = vcmp.gt.f32.partialorder %v10328_v23, 2213.2  ;;  %vm3300_vm15 = vcmp.gt.f32.partialorder %v10331_v24, 2213.2  ;;  %vm3301_vm0 = vcmp.gt.f32.partialorder %v10334_v60, 2213.2 }
 0x46e   :  { %vm3302_vm10 = vcmp.gt.f32.partialorder %v10337_v57, 2213.2  ;;  %vm3303_vm7 = vcmp.gt.f32.partialorder %v10340_v18, 2213.2  ;;  %v3304_v19 = vsel %vm3288_vm1, 0.02004008, %v3256_v8 }
 0x46f   :  { %v3305_v40 = vsel %vm3289_vm2, 0.02004008, %v3257_v35  ;;  %v3306_v51 = vsel %vm3290_vm3, 0.02004008, %v3258_v36  ;;  %v3307_v30 = vsel %vm3291_vm4, 0.02004008, %v3259_v61 }
 0x470   :  { %v3308_v31 = vsel %vm3292_vm5, 0.02004008, %v3260_v62  ;;  %v3309_v39 = vsel %vm3293_vm6, 0.02004008, %v3261_v63  ;;  %v3310_v55 = vsel %vm3294_vm8, 0.02004008, %v3262_v3 }
 0x471   :  { %v3311_v56 = vsel %vm3295_vm9, 0.02004008, %v3263_v5  ;;  %v3312_v8 = vsel %vm3296_vm11, 0.02004008, %v3264_v0  ;;  %v3313_v35 = vsel %vm3297_vm12, 0.02004008, %v3265_v1 }
 0x472   :  { %v3314_v36 = vsel %vm3298_vm13, 0.02004008, %v3266_v2  ;;  %v3315_v61 = vsel %vm3299_vm14, 0.02004008, %v3267_v11  ;;  %v3316_v62 = vsel %vm3300_vm15, 0.02004008, %v3268_v12 }
 0x473   :  { %v3317_v63 = vsel %vm3301_vm0, 0.02004008, %v3269_v14  ;;  %v3318_v3 = vsel %vm3302_vm10, 0.02004008, %v3270_v15  ;;  %v3319_v5 = vsel %vm3303_vm7, 0.02004008, %v3271_v16 }
 0x474   :  { %v3320_v0 = vsel %vm3288_vm1, 27.647295, %v3272_v52  ;;  %v3321_v1 = vsel %vm3289_vm2, 27.647295, %v3273_v53  ;;  %v3322_v2 = vsel %vm3290_vm3, 27.647295, %v3274_v54 }
 0x475   :  { %v3323_v11 = vsel %vm3291_vm4, 27.647295, %v3275_v48  ;;  %v3324_v12 = vsel %vm3292_vm5, 27.647295, %v3276_v20  ;;  %v3325_v14 = vsel %vm3293_vm6, 27.647295, %v3277_v25 }
 0x476   :  { %v3326_v15 = vsel %vm3294_vm8, 27.647295, %v3278_v26  ;;  %v3327_v16 = vsel %vm3295_vm9, 27.647295, %v3279_v27  ;;  %v3328_v52 = vsel %vm3296_vm11, 27.647295, %v3280_v37 }
 0x477   :  { %v3329_v53 = vsel %vm3297_vm12, 27.647295, %v3281_v41  ;;  %v3330_v54 = vsel %vm3298_vm13, 27.647295, %v3282_v42  ;;  %v3331_v48 = vsel %vm3299_vm14, 27.647295, %v3283_v47 }
 0x478   :  { %v3332_v20 = vsel %vm3300_vm15, 27.647295, %v3284_v46  ;;  %v3333_v25 = vsel %vm3301_vm0, 27.647295, %v3285_v29  ;;  %v3334_v26 = vsel %vm3302_vm10, 27.647295, %v3286_v6 }
 0x479   :  { %v3335_v27 = vsel %vm3303_vm7, 27.647295, %v3287_v9  ;;  %vm3336_vm1 = vcmp.gt.f32.partialorder %v10295_v45, 2313.0  ;;  %vm3337_vm2 = vcmp.gt.f32.partialorder %v10298_v58, 2313.0  ;;  %vm3338_vm3 = vcmp.gt.f32.partialorder %v10301_v59, 2313.0 }
 0x47a   :  { %vm3339_vm4 = vcmp.gt.f32.partialorder %v10304_v10, 2313.0  ;;  %vm3340_vm5 = vcmp.gt.f32.partialorder %v10307_v49, 2313.0  ;;  %vm3341_vm6 = vcmp.gt.f32.partialorder %v10310_v50, 2313.0  ;;  %vm3342_vm8 = vcmp.gt.f32.partialorder %v10313_v44, 2313.0 }
 0x47b   :  { %vm3343_vm9 = vcmp.gt.f32.partialorder %v10316_v43, 2313.0  ;;  %vm3344_vm11 = vcmp.gt.f32.partialorder %v10319_v4, 2313.0  ;;  %vm3345_vm12 = vcmp.gt.f32.partialorder %v10322_v7, 2313.0  ;;  %vm3346_vm13 = vcmp.gt.f32.partialorder %v10325_v22, 2313.0 }
 0x47c   :  { %vm3347_vm14 = vcmp.gt.f32.partialorder %v10328_v23, 2313.0  ;;  %vm3348_vm15 = vcmp.gt.f32.partialorder %v10331_v24, 2313.0  ;;  %vm3349_vm0 = vcmp.gt.f32.partialorder %v10334_v60, 2313.0  ;;  %vm3350_vm10 = vcmp.gt.f32.partialorder %v10337_v57, 2313.0 }
 0x47d   :  { %vm3351_vm7 = vcmp.gt.f32.partialorder %v10340_v18, 2313.0  ;;  %v3352_v37 = vsel %vm3336_vm1, 0.019398643, %v3304_v19  ;;  %v3353_v41 = vsel %vm3337_vm2, 0.019398643, %v3305_v40 }
 0x47e   :  { %v3354_v42 = vsel %vm3338_vm3, 0.019398643, %v3306_v51  ;;  %v3355_v47 = vsel %vm3339_vm4, 0.019398643, %v3307_v30  ;;  %v3356_v46 = vsel %vm3340_vm5, 0.019398643, %v3308_v31 }
 0x47f   :  { %v3357_v29 = vsel %vm3341_vm6, 0.019398643, %v3309_v39  ;;  %v3358_v6 = vsel %vm3342_vm8, 0.019398643, %v3310_v55  ;;  %v3359_v9 = vsel %vm3343_vm9, 0.019398643, %v3311_v56 }
 0x480   :  { %v3360_v19 = vsel %vm3344_vm11, 0.019398643, %v3312_v8  ;;  %v3361_v40 = vsel %vm3345_vm12, 0.019398643, %v3313_v35  ;;  %v3362_v51 = vsel %vm3346_vm13, 0.019398643, %v3314_v36 }
 0x481   :  { %v3363_v30 = vsel %vm3347_vm14, 0.019398643, %v3315_v61  ;;  %v3364_v31 = vsel %vm3348_vm15, 0.019398643, %v3316_v62  ;;  %v3365_v39 = vsel %vm3349_vm0, 0.019398643, %v3317_v63 }
 0x482   :  { %v3366_v55 = vsel %vm3350_vm10, 0.019398643, %v3318_v3  ;;  %v3367_v56 = vsel %vm3351_vm7, 0.019398643, %v3319_v5  ;;  %v3368_v8 = vsel %vm3336_vm1, 29.130941, %v3320_v0 }
 0x483   :  { %v3369_v35 = vsel %vm3337_vm2, 29.130941, %v3321_v1  ;;  %v3370_v36 = vsel %vm3338_vm3, 29.130941, %v3322_v2  ;;  %v3371_v61 = vsel %vm3339_vm4, 29.130941, %v3323_v11 }
 0x484   :  { %v3372_v62 = vsel %vm3340_vm5, 29.130941, %v3324_v12  ;;  %v3373_v63 = vsel %vm3341_vm6, 29.130941, %v3325_v14  ;;  %v3374_v3 = vsel %vm3342_vm8, 29.130941, %v3326_v15 }
 0x485   :  { %v3375_v5 = vsel %vm3343_vm9, 29.130941, %v3327_v16  ;;  %v3376_v0 = vsel %vm3344_vm11, 29.130941, %v3328_v52  ;;  %v3377_v1 = vsel %vm3345_vm12, 29.130941, %v3329_v53 }
 0x486   :  { %v3378_v2 = vsel %vm3346_vm13, 29.130941, %v3330_v54  ;;  %v3379_v11 = vsel %vm3347_vm14, 29.130941, %v3331_v48  ;;  %v3380_v12 = vsel %vm3348_vm15, 29.130941, %v3332_v20 }
 0x487   :  { %v3381_v14 = vsel %vm3349_vm0, 29.130941, %v3333_v25  ;;  %v3382_v15 = vsel %vm3350_vm10, 29.130941, %v3334_v26  ;;  %v3383_v16 = vsel %vm3351_vm7, 29.130941, %v3335_v27 }
 0x488   :  { %vm3384_vm1 = vcmp.gt.f32.partialorder %v10295_v45, 2416.1  ;;  %vm3385_vm2 = vcmp.gt.f32.partialorder %v10298_v58, 2416.1  ;;  %vm3386_vm3 = vcmp.gt.f32.partialorder %v10301_v59, 2416.1 }
 0x489   :  { %vm3387_vm4 = vcmp.gt.f32.partialorder %v10304_v10, 2416.1  ;;  %vm3388_vm5 = vcmp.gt.f32.partialorder %v10307_v49, 2416.1  ;;  %vm3389_vm6 = vcmp.gt.f32.partialorder %v10310_v50, 2416.1 }
 0x48a   :  { %vm3390_vm8 = vcmp.gt.f32.partialorder %v10313_v44, 2416.1  ;;  %vm3391_vm9 = vcmp.gt.f32.partialorder %v10316_v43, 2416.1  ;;  %vm3392_vm11 = vcmp.gt.f32.partialorder %v10319_v4, 2416.1 }
 0x48b   :  { %vm3393_vm12 = vcmp.gt.f32.partialorder %v10322_v7, 2416.1  ;;  %vm3394_vm13 = vcmp.gt.f32.partialorder %v10325_v22, 2416.1  ;;  %vm3395_vm14 = vcmp.gt.f32.partialorder %v10328_v23, 2416.1 }
 0x48c   :  { %vm3396_vm15 = vcmp.gt.f32.partialorder %v10331_v24, 2416.1  ;;  %vm3397_vm0 = vcmp.gt.f32.partialorder %v10334_v60, 2416.1  ;;  %vm3398_vm10 = vcmp.gt.f32.partialorder %v10337_v57, 2416.1 }
 0x48d   :  { %vm3399_vm7 = vcmp.gt.f32.partialorder %v10340_v18, 2416.1  ;;  %v3400_v52 = vsel %vm3384_vm1, 0.018744143, %v3352_v37  ;;  %v3401_v53 = vsel %vm3385_vm2, 0.018744143, %v3353_v41 }
 0x48e   :  { %v3402_v54 = vsel %vm3386_vm3, 0.018744143, %v3354_v42  ;;  %v3403_v48 = vsel %vm3387_vm4, 0.018744143, %v3355_v47  ;;  %v3404_v20 = vsel %vm3388_vm5, 0.018744143, %v3356_v46 }
 0x48f   :  { %v3405_v25 = vsel %vm3389_vm6, 0.018744143, %v3357_v29  ;;  %v3406_v26 = vsel %vm3390_vm8, 0.018744143, %v3358_v6  ;;  %v3407_v27 = vsel %vm3391_vm9, 0.018744143, %v3359_v9 }
 0x490   :  { %v3408_v37 = vsel %vm3392_vm11, 0.018744143, %v3360_v19  ;;  %v3409_v41 = vsel %vm3393_vm12, 0.018744143, %v3361_v40  ;;  %v3410_v42 = vsel %vm3394_vm13, 0.018744143, %v3362_v51 }
 0x491   :  { %v3411_v47 = vsel %vm3395_vm14, 0.018744143, %v3363_v30  ;;  %v3412_v46 = vsel %vm3396_vm15, 0.018744143, %v3364_v31  ;;  %v3413_v29 = vsel %vm3397_vm0, 0.018744143, %v3365_v39 }
 0x492   :  { %v3414_v6 = vsel %vm3398_vm10, 0.018744143, %v3366_v55  ;;  %v3415_v9 = vsel %vm3399_vm7, 0.018744143, %v3367_v56  ;;  %v3416_v19 = vsel %vm3384_vm1, 30.712278, %v3368_v8 }
 0x493   :  { %v3417_v40 = vsel %vm3385_vm2, 30.712278, %v3369_v35  ;;  %v3418_v51 = vsel %vm3386_vm3, 30.712278, %v3370_v36  ;;  %v3419_v30 = vsel %vm3387_vm4, 30.712278, %v3371_v61 }
 0x494   :  { %v3420_v31 = vsel %vm3388_vm5, 30.712278, %v3372_v62  ;;  %v3421_v39 = vsel %vm3389_vm6, 30.712278, %v3373_v63  ;;  %v3422_v55 = vsel %vm3390_vm8, 30.712278, %v3374_v3 }
 0x495   :  { %v3423_v56 = vsel %vm3391_vm9, 30.712278, %v3375_v5  ;;  %v3424_v8 = vsel %vm3392_vm11, 30.712278, %v3376_v0  ;;  %v3425_v35 = vsel %vm3393_vm12, 30.712278, %v3377_v1 }
 0x496   :  { %v3426_v36 = vsel %vm3394_vm13, 30.712278, %v3378_v2  ;;  %v3427_v61 = vsel %vm3395_vm14, 30.712278, %v3379_v11  ;;  %v3428_v62 = vsel %vm3396_vm15, 30.712278, %v3380_v12 }
 0x497   :  { %v3429_v63 = vsel %vm3397_vm0, 30.712278, %v3381_v14  ;;  %v3430_v3 = vsel %vm3398_vm10, 30.712278, %v3382_v15  ;;  %v3431_v5 = vsel %vm3399_vm7, 30.712278, %v3383_v16 }
 0x498   :  { %vm3432_vm1 = vcmp.gt.f32.partialorder %v10295_v45, 2522.8  ;;  %vm3433_vm2 = vcmp.gt.f32.partialorder %v10298_v58, 2522.8  ;;  %vm3434_vm3 = vcmp.gt.f32.partialorder %v10301_v59, 2522.8 }
 0x499   :  { %vm3435_vm4 = vcmp.gt.f32.partialorder %v10304_v10, 2522.8  ;;  %vm3436_vm5 = vcmp.gt.f32.partialorder %v10307_v49, 2522.8  ;;  %vm3437_vm6 = vcmp.gt.f32.partialorder %v10310_v50, 2522.8 }
 0x49a   :  { %vm3438_vm8 = vcmp.gt.f32.partialorder %v10313_v44, 2522.8  ;;  %vm3439_vm9 = vcmp.gt.f32.partialorder %v10316_v43, 2522.8  ;;  %vm3440_vm11 = vcmp.gt.f32.partialorder %v10319_v4, 2522.8 }
 0x49b   :  { %vm3441_vm12 = vcmp.gt.f32.partialorder %v10322_v7, 2522.8  ;;  %vm3442_vm13 = vcmp.gt.f32.partialorder %v10325_v22, 2522.8  ;;  %vm3443_vm14 = vcmp.gt.f32.partialorder %v10328_v23, 2522.8 }
 0x49c   :  { %vm3444_vm15 = vcmp.gt.f32.partialorder %v10331_v24, 2522.8  ;;  %vm3445_vm0 = vcmp.gt.f32.partialorder %v10334_v60, 2522.8  ;;  %vm3446_vm10 = vcmp.gt.f32.partialorder %v10337_v57, 2522.8 }
 0x49d   :  { %vm3447_vm7 = vcmp.gt.f32.partialorder %v10340_v18, 2522.8  ;;  %v3448_v0 = vsel %vm3432_vm1, 0.018115941, %v3400_v52  ;;  %v3449_v1 = vsel %vm3433_vm2, 0.018115941, %v3401_v53 }
 0x49e   :  { %v3450_v2 = vsel %vm3434_vm3, 0.018115941, %v3402_v54  ;;  %v3451_v11 = vsel %vm3435_vm4, 0.018115941, %v3403_v48  ;;  %v3452_v12 = vsel %vm3436_vm5, 0.018115941, %v3404_v20 }
 0x49f   :  { %v3453_v14 = vsel %vm3437_vm6, 0.018115941, %v3405_v25  ;;  %v3454_v15 = vsel %vm3438_vm8, 0.018115941, %v3406_v26  ;;  %v3455_v16 = vsel %vm3439_vm9, 0.018115941, %v3407_v27 }
 0x4a0   :  { %v3456_v52 = vsel %vm3440_vm11, 0.018115941, %v3408_v37  ;;  %v3457_v53 = vsel %vm3441_vm12, 0.018115941, %v3409_v41  ;;  %v3458_v54 = vsel %vm3442_vm13, 0.018115941, %v3410_v42 }
 0x4a1   :  { %v3459_v48 = vsel %vm3443_vm14, 0.018115941, %v3411_v47  ;;  %v3460_v20 = vsel %vm3444_vm15, 0.018115941, %v3412_v46  ;;  %v3461_v25 = vsel %vm3445_vm0, 0.018115941, %v3413_v29 }
 0x4a2   :  { %v3462_v26 = vsel %vm3446_vm10, 0.018115941, %v3414_v6  ;;  %v3463_v27 = vsel %vm3447_vm7, 0.018115941, %v3415_v9  ;;  %v3464_v37 = vsel %vm3432_vm1, 32.2971, %v3416_v19 }
 0x4a3   :  { %v3465_v41 = vsel %vm3433_vm2, 32.2971, %v3417_v40  ;;  %v3466_v42 = vsel %vm3434_vm3, 32.2971, %v3418_v51  ;;  %v3467_v47 = vsel %vm3435_vm4, 32.2971, %v3419_v30 }
 0x4a4   :  { %v3468_v46 = vsel %vm3436_vm5, 32.2971, %v3420_v31  ;;  %v3469_v29 = vsel %vm3437_vm6, 32.2971, %v3421_v39  ;;  %v3470_v6 = vsel %vm3438_vm8, 32.2971, %v3422_v55 }
 0x4a5   :  { %v3471_v9 = vsel %vm3439_vm9, 32.2971, %v3423_v56  ;;  %v3472_v19 = vsel %vm3440_vm11, 32.2971, %v3424_v8  ;;  %v3473_v40 = vsel %vm3441_vm12, 32.2971, %v3425_v35 }
 0x4a6   :  { %v3474_v51 = vsel %vm3442_vm13, 32.2971, %v3426_v36  ;;  %v3475_v30 = vsel %vm3443_vm14, 32.2971, %v3427_v61  ;;  %v3476_v31 = vsel %vm3444_vm15, 32.2971, %v3428_v62 }
 0x4a7   :  { %v3477_v39 = vsel %vm3445_vm0, 32.2971, %v3429_v63  ;;  %v3478_v55 = vsel %vm3446_vm10, 32.2971, %v3430_v3  ;;  %v3479_v56 = vsel %vm3447_vm7, 32.2971, %v3431_v5 }
 0x4a8   :  { %vm3480_vm1 = vcmp.gt.f32.partialorder %v10295_v45, 2633.2  ;;  %vm3481_vm2 = vcmp.gt.f32.partialorder %v10298_v58, 2633.2  ;;  %vm3482_vm3 = vcmp.gt.f32.partialorder %v10301_v59, 2633.2 }
 0x4a9   :  { %vm3483_vm4 = vcmp.gt.f32.partialorder %v10304_v10, 2633.2  ;;  %vm3484_vm5 = vcmp.gt.f32.partialorder %v10307_v49, 2633.2  ;;  %vm3485_vm6 = vcmp.gt.f32.partialorder %v10310_v50, 2633.2 }
 0x4aa   :  { %vm3486_vm8 = vcmp.gt.f32.partialorder %v10313_v44, 2633.2  ;;  %vm3487_vm9 = vcmp.gt.f32.partialorder %v10316_v43, 2633.2  ;;  %vm3488_vm11 = vcmp.gt.f32.partialorder %v10319_v4, 2633.2 }
 0x4ab   :  { %vm3489_vm12 = vcmp.gt.f32.partialorder %v10322_v7, 2633.2  ;;  %vm3490_vm13 = vcmp.gt.f32.partialorder %v10325_v22, 2633.2  ;;  %vm3491_vm14 = vcmp.gt.f32.partialorder %v10328_v23, 2633.2 }
 0x4ac   :  { %vm3492_vm15 = vcmp.gt.f32.partialorder %v10331_v24, 2633.2  ;;  %vm3493_vm0 = vcmp.gt.f32.partialorder %v10334_v60, 2633.2  ;;  %vm3494_vm10 = vcmp.gt.f32.partialorder %v10337_v57, 2633.2 }
 0x4ad   :  { %vm3495_vm7 = vcmp.gt.f32.partialorder %v10340_v18, 2633.2  ;;  %v3496_v8 = vsel %vm3480_vm1, 0.017528484, %v3448_v0  ;;  %v3497_v35 = vsel %vm3481_vm2, 0.017528484, %v3449_v1 }
 0x4ae   :  { %v3498_v36 = vsel %vm3482_vm3, 0.017528484, %v3450_v2  ;;  %v3499_v61 = vsel %vm3483_vm4, 0.017528484, %v3451_v11  ;;  %v3500_v62 = vsel %vm3484_vm5, 0.017528484, %v3452_v12 }
 0x4af   :  { %v3501_v63 = vsel %vm3485_vm6, 0.017528484, %v3453_v14  ;;  %v3502_v3 = vsel %vm3486_vm8, 0.017528484, %v3454_v15  ;;  %v3503_v5 = vsel %vm3487_vm9, 0.017528484, %v3455_v16 }
 0x4b0   :  { %v3504_v0 = vsel %vm3488_vm11, 0.017528484, %v3456_v52  ;;  %v3505_v1 = vsel %vm3489_vm12, 0.017528484, %v3457_v53  ;;  %v3506_v2 = vsel %vm3490_vm13, 0.017528484, %v3458_v54 }
 0x4b1   :  { %v3507_v11 = vsel %vm3491_vm14, 0.017528484, %v3459_v48  ;;  %v3508_v12 = vsel %vm3492_vm15, 0.017528484, %v3460_v20  ;;  %v3509_v14 = vsel %vm3493_vm0, 0.017528484, %v3461_v25 }
 0x4b2   :  { %v3510_v15 = vsel %vm3494_vm10, 0.017528484, %v3462_v26  ;;  %v3511_v16 = vsel %vm3495_vm7, 0.017528484, %v3463_v27  ;;  %v3512_v52 = vsel %vm3480_vm1, 33.843998, %v3464_v37 }
 0x4b3   :  { %v3513_v53 = vsel %vm3481_vm2, 33.843998, %v3465_v41  ;;  %v3514_v54 = vsel %vm3482_vm3, 33.843998, %v3466_v42  ;;  %v3515_v48 = vsel %vm3483_vm4, 33.843998, %v3467_v47 }
 0x4b4   :  { %v3516_v20 = vsel %vm3484_vm5, 33.843998, %v3468_v46  ;;  %v3517_v25 = vsel %vm3485_vm6, 33.843998, %v3469_v29  ;;  %v3518_v26 = vsel %vm3486_vm8, 33.843998, %v3470_v6 }
 0x4b5   :  { %v3519_v27 = vsel %vm3487_vm9, 33.843998, %v3471_v9  ;;  %v3520_v37 = vsel %vm3488_vm11, 33.843998, %v3472_v19  ;;  %v3521_v41 = vsel %vm3489_vm12, 33.843998, %v3473_v40 }
 0x4b6   :  { %v3522_v42 = vsel %vm3490_vm13, 33.843998, %v3474_v51  ;;  %v3523_v47 = vsel %vm3491_vm14, 33.843998, %v3475_v30  ;;  %v3524_v46 = vsel %vm3492_vm15, 33.843998, %v3476_v31 }
 0x4b7   :  { %v3525_v29 = vsel %vm3493_vm0, 33.843998, %v3477_v39  ;;  %v3526_v6 = vsel %vm3494_vm10, 33.843998, %v3478_v55  ;;  %v3527_v9 = vsel %vm3495_vm7, 33.843998, %v3479_v56 }
 0x4b8   :  { %vm3528_vm1 = vcmp.gt.f32.partialorder %v10295_v45, 2747.3  ;;  %vm3529_vm2 = vcmp.gt.f32.partialorder %v10298_v58, 2747.3  ;;  %vm3530_vm3 = vcmp.gt.f32.partialorder %v10301_v59, 2747.3 }
 0x4b9   :  { %vm3531_vm4 = vcmp.gt.f32.partialorder %v10304_v10, 2747.3  ;;  %vm3532_vm5 = vcmp.gt.f32.partialorder %v10307_v49, 2747.3  ;;  %vm3533_vm6 = vcmp.gt.f32.partialorder %v10310_v50, 2747.3 }
 0x4ba   :  { %vm3534_vm8 = vcmp.gt.f32.partialorder %v10313_v44, 2747.3  ;;  %vm3535_vm9 = vcmp.gt.f32.partialorder %v10316_v43, 2747.3  ;;  %vm3536_vm11 = vcmp.gt.f32.partialorder %v10319_v4, 2747.3 }
 0x4bb   :  { %vm3537_vm12 = vcmp.gt.f32.partialorder %v10322_v7, 2747.3  ;;  %vm3538_vm13 = vcmp.gt.f32.partialorder %v10325_v22, 2747.3  ;;  %vm3539_vm14 = vcmp.gt.f32.partialorder %v10328_v23, 2747.3 }
 0x4bc   :  { %vm3540_vm15 = vcmp.gt.f32.partialorder %v10331_v24, 2747.3  ;;  %vm3541_vm0 = vcmp.gt.f32.partialorder %v10334_v60, 2747.3  ;;  %vm3542_vm10 = vcmp.gt.f32.partialorder %v10337_v57, 2747.3 }
 0x4bd   :  { %vm3543_vm7 = vcmp.gt.f32.partialorder %v10340_v18, 2747.3  ;;  %v3544_v19 = vsel %vm3528_vm1, 0.016949153, %v3496_v8  ;;  %v3545_v40 = vsel %vm3529_vm2, 0.016949153, %v3497_v35 }
 0x4be   :  { %v3546_v51 = vsel %vm3530_vm3, 0.016949153, %v3498_v36  ;;  %v3547_v30 = vsel %vm3531_vm4, 0.016949153, %v3499_v61  ;;  %v3548_v31 = vsel %vm3532_vm5, 0.016949153, %v3500_v62 }
 0x4bf   :  { %v3549_v39 = vsel %vm3533_vm6, 0.016949153, %v3501_v63  ;;  %v3550_v55 = vsel %vm3534_vm8, 0.016949153, %v3502_v3  ;;  %v3551_v56 = vsel %vm3535_vm9, 0.016949153, %v3503_v5 }
 0x4c0   :  { %v3552_v8 = vsel %vm3536_vm11, 0.016949153, %v3504_v0  ;;  %v3553_v35 = vsel %vm3537_vm12, 0.016949153, %v3505_v1  ;;  %v3554_v36 = vsel %vm3538_vm13, 0.016949153, %v3506_v2 }
 0x4c1   :  { %v3555_v61 = vsel %vm3539_vm14, 0.016949153, %v3507_v11  ;;  %v3556_v62 = vsel %vm3540_vm15, 0.016949153, %v3508_v12  ;;  %v3557_v63 = vsel %vm3541_vm0, 0.016949153, %v3509_v14 }
 0x4c2   :  { %v3558_v3 = vsel %vm3542_vm10, 0.016949153, %v3510_v15  ;;  %v3559_v5 = vsel %vm3543_vm7, 0.016949153, %v3511_v16  ;;  %v3560_v0 = vsel %vm3528_vm1, 35.435593, %v3512_v52 }
 0x4c3   :  { %v3561_v1 = vsel %vm3529_vm2, 35.435593, %v3513_v53  ;;  %v3562_v2 = vsel %vm3530_vm3, 35.435593, %v3514_v54  ;;  %v3563_v11 = vsel %vm3531_vm4, 35.435593, %v3515_v48 }
 0x4c4   :  { %v3564_v12 = vsel %vm3532_vm5, 35.435593, %v3516_v20  ;;  %v3565_v14 = vsel %vm3533_vm6, 35.435593, %v3517_v25  ;;  %v3566_v15 = vsel %vm3534_vm8, 35.435593, %v3518_v26 }
 0x4c5   :  { %v3567_v16 = vsel %vm3535_vm9, 35.435593, %v3519_v27  ;;  %v3568_v52 = vsel %vm3536_vm11, 35.435593, %v3520_v37  ;;  %v3569_v53 = vsel %vm3537_vm12, 35.435593, %v3521_v41 }
 0x4c6   :  { %v3570_v54 = vsel %vm3538_vm13, 35.435593, %v3522_v42  ;;  %v3571_v48 = vsel %vm3539_vm14, 35.435593, %v3523_v47  ;;  %v3572_v20 = vsel %vm3540_vm15, 35.435593, %v3524_v46 }
 0x4c7   :  { %v3573_v25 = vsel %vm3541_vm0, 35.435593, %v3525_v29  ;;  %v3574_v26 = vsel %vm3542_vm10, 35.435593, %v3526_v6  ;;  %v3575_v27 = vsel %vm3543_vm7, 35.435593, %v3527_v9 }
 0x4c8   :  { %vm3576_vm1 = vcmp.gt.f32.partialorder %v10295_v45, 2865.3  ;;  %vm3577_vm2 = vcmp.gt.f32.partialorder %v10298_v58, 2865.3  ;;  %vm3578_vm3 = vcmp.gt.f32.partialorder %v10301_v59, 2865.3 }
 0x4c9   :  { %vm3579_vm4 = vcmp.gt.f32.partialorder %v10304_v10, 2865.3  ;;  %vm3580_vm5 = vcmp.gt.f32.partialorder %v10307_v49, 2865.3  ;;  %vm3581_vm6 = vcmp.gt.f32.partialorder %v10310_v50, 2865.3 }
 0x4ca   :  { %vm3582_vm8 = vcmp.gt.f32.partialorder %v10313_v44, 2865.3  ;;  %vm3583_vm9 = vcmp.gt.f32.partialorder %v10316_v43, 2865.3  ;;  %vm3584_vm11 = vcmp.gt.f32.partialorder %v10319_v4, 2865.3 }
 0x4cb   :  { %vm3585_vm12 = vcmp.gt.f32.partialorder %v10322_v7, 2865.3  ;;  %vm3586_vm13 = vcmp.gt.f32.partialorder %v10325_v22, 2865.3  ;;  %vm3587_vm14 = vcmp.gt.f32.partialorder %v10328_v23, 2865.3 }
 0x4cc   :  { %vm3588_vm15 = vcmp.gt.f32.partialorder %v10331_v24, 2865.3  ;;  %vm3589_vm0 = vcmp.gt.f32.partialorder %v10334_v60, 2865.3  ;;  %vm3590_vm10 = vcmp.gt.f32.partialorder %v10337_v57, 2865.3 }
 0x4cd   :  { %vm3591_vm7 = vcmp.gt.f32.partialorder %v10340_v18, 2865.3  ;;  %v3592_v37 = vsel %vm3576_vm1, 0.016380016, %v3544_v19  ;;  %v3593_v41 = vsel %vm3577_vm2, 0.016380016, %v3545_v40 }
 0x4ce   :  { %v3594_v42 = vsel %vm3578_vm3, 0.016380016, %v3546_v51  ;;  %v3595_v47 = vsel %vm3579_vm4, 0.016380016, %v3547_v30  ;;  %v3596_v46 = vsel %vm3580_vm5, 0.016380016, %v3548_v31 }
 0x4cf   :  { %v3597_v29 = vsel %vm3581_vm6, 0.016380016, %v3549_v39  ;;  %v3598_v6 = vsel %vm3582_vm8, 0.016380016, %v3550_v55  ;;  %v3599_v9 = vsel %vm3583_vm9, 0.016380016, %v3551_v56 }
 0x4d0   :  { %v3600_v19 = vsel %vm3584_vm11, 0.016380016, %v3552_v8  ;;  %v3601_v40 = vsel %vm3585_vm12, 0.016380016, %v3553_v35  ;;  %v3602_v51 = vsel %vm3586_vm13, 0.016380016, %v3554_v36 }
 0x4d1   :  { %v3603_v30 = vsel %vm3587_vm14, 0.016380016, %v3555_v61  ;;  %v3604_v31 = vsel %vm3588_vm15, 0.016380016, %v3556_v62  ;;  %v3605_v39 = vsel %vm3589_vm0, 0.016380016, %v3557_v63 }
 0x4d2   :  { %v3606_v55 = vsel %vm3590_vm10, 0.016380016, %v3558_v3  ;;  %v3607_v56 = vsel %vm3591_vm7, 0.016380016, %v3559_v5  ;;  %v3608_v8 = vsel %vm3576_vm1, 37.066338, %v3560_v0 }
 0x4d3   :  { %v3609_v35 = vsel %vm3577_vm2, 37.066338, %v3561_v1  ;;  %v3610_v36 = vsel %vm3578_vm3, 37.066338, %v3562_v2  ;;  %v3611_v61 = vsel %vm3579_vm4, 37.066338, %v3563_v11 }
 0x4d4   :  { %v3612_v62 = vsel %vm3580_vm5, 37.066338, %v3564_v12  ;;  %v3613_v63 = vsel %vm3581_vm6, 37.066338, %v3565_v14  ;;  %v3614_v3 = vsel %vm3582_vm8, 37.066338, %v3566_v15 }
 0x4d5   :  { %v3615_v5 = vsel %vm3583_vm9, 37.066338, %v3567_v16  ;;  %v3616_v0 = vsel %vm3584_vm11, 37.066338, %v3568_v52  ;;  %v3617_v1 = vsel %vm3585_vm12, 37.066338, %v3569_v53 }
 0x4d6   :  { %v3618_v2 = vsel %vm3586_vm13, 37.066338, %v3570_v54  ;;  %v3619_v11 = vsel %vm3587_vm14, 37.066338, %v3571_v48  ;;  %v3620_v12 = vsel %vm3588_vm15, 37.066338, %v3572_v20 }
 0x4d7   :  { %v3621_v14 = vsel %vm3589_vm0, 37.066338, %v3573_v25  ;;  %v3622_v15 = vsel %vm3590_vm10, 37.066338, %v3574_v26  ;;  %v3623_v16 = vsel %vm3591_vm7, 37.066338, %v3575_v27 }
 0x4d8   :  { %vm3624_vm1 = vcmp.gt.f32.partialorder %v10295_v45, 2987.4  ;;  %vm3625_vm2 = vcmp.gt.f32.partialorder %v10298_v58, 2987.4  ;;  %vm3626_vm3 = vcmp.gt.f32.partialorder %v10301_v59, 2987.4 }
 0x4d9   :  { %vm3627_vm4 = vcmp.gt.f32.partialorder %v10304_v10, 2987.4  ;;  %vm3628_vm5 = vcmp.gt.f32.partialorder %v10307_v49, 2987.4  ;;  %vm3629_vm6 = vcmp.gt.f32.partialorder %v10310_v50, 2987.4 }
 0x4da   :  { %vm3630_vm8 = vcmp.gt.f32.partialorder %v10313_v44, 2987.4  ;;  %vm3631_vm9 = vcmp.gt.f32.partialorder %v10316_v43, 2987.4  ;;  %vm3632_vm11 = vcmp.gt.f32.partialorder %v10319_v4, 2987.4 }
 0x4db   :  { %vm3633_vm12 = vcmp.gt.f32.partialorder %v10322_v7, 2987.4  ;;  %vm3634_vm13 = vcmp.gt.f32.partialorder %v10325_v22, 2987.4  ;;  %vm3635_vm14 = vcmp.gt.f32.partialorder %v10328_v23, 2987.4 }
 0x4dc   :  { %vm3636_vm15 = vcmp.gt.f32.partialorder %v10331_v24, 2987.4  ;;  %vm3637_vm0 = vcmp.gt.f32.partialorder %v10334_v60, 2987.4  ;;  %vm3638_vm10 = vcmp.gt.f32.partialorder %v10337_v57, 2987.4 }
 0x4dd   :  { %vm3639_vm7 = vcmp.gt.f32.partialorder %v10340_v18, 2987.4  ;;  %v3640_v52 = vsel %vm3624_vm1, 0.01584786, %v3592_v37  ;;  %v3641_v53 = vsel %vm3625_vm2, 0.01584786, %v3593_v41 }
 0x4de   :  { %v3642_v54 = vsel %vm3626_vm3, 0.01584786, %v3594_v42  ;;  %v3643_v48 = vsel %vm3627_vm4, 0.01584786, %v3595_v47  ;;  %v3644_v20 = vsel %vm3628_vm5, 0.01584786, %v3596_v46 }
 0x4df   :  { %v3645_v25 = vsel %vm3629_vm6, 0.01584786, %v3597_v29  ;;  %v3646_v26 = vsel %vm3630_vm8, 0.01584786, %v3598_v6  ;;  %v3647_v27 = vsel %vm3631_vm9, 0.01584786, %v3599_v9 }
 0x4e0   :  { %v3648_v37 = vsel %vm3632_vm11, 0.01584786, %v3600_v19  ;;  %v3649_v41 = vsel %vm3633_vm12, 0.01584786, %v3601_v40  ;;  %v3650_v42 = vsel %vm3634_vm13, 0.01584786, %v3602_v51 }
 0x4e1   :  { %v3651_v47 = vsel %vm3635_vm14, 0.01584786, %v3603_v30  ;;  %v3652_v46 = vsel %vm3636_vm15, 0.01584786, %v3604_v31  ;;  %v3653_v29 = vsel %vm3637_vm0, 0.01584786, %v3605_v39 }
 0x4e2   :  { %v3654_v6 = vsel %vm3638_vm10, 0.01584786, %v3606_v55  ;;  %v3655_v9 = vsel %vm3639_vm7, 0.01584786, %v3607_v56  ;;  %v3656_v19 = vsel %vm3624_vm1, 38.6561, %v3608_v8 }
 0x4e3   :  { %v3657_v40 = vsel %vm3625_vm2, 38.6561, %v3609_v35  ;;  %v3658_v51 = vsel %vm3626_vm3, 38.6561, %v3610_v36  ;;  %v3659_v30 = vsel %vm3627_vm4, 38.6561, %v3611_v61 }
 0x4e4   :  { %v3660_v31 = vsel %vm3628_vm5, 38.6561, %v3612_v62  ;;  %v3661_v39 = vsel %vm3629_vm6, 38.6561, %v3613_v63  ;;  %v3662_v55 = vsel %vm3630_vm8, 38.6561, %v3614_v3 }
 0x4e5   :  { %v3663_v56 = vsel %vm3631_vm9, 38.6561, %v3615_v5  ;;  %v3664_v8 = vsel %vm3632_vm11, 38.6561, %v3616_v0  ;;  %v3665_v35 = vsel %vm3633_vm12, 38.6561, %v3617_v1 }
 0x4e6   :  { %v3666_v36 = vsel %vm3634_vm13, 38.6561, %v3618_v2  ;;  %v3667_v61 = vsel %vm3635_vm14, 38.6561, %v3619_v11  ;;  %v3668_v62 = vsel %vm3636_vm15, 38.6561, %v3620_v12 }
 0x4e7   :  { %v3669_v63 = vsel %vm3637_vm0, 38.6561, %v3621_v14  ;;  %v3670_v3 = vsel %vm3638_vm10, 38.6561, %v3622_v15  ;;  %v3671_v5 = vsel %vm3639_vm7, 38.6561, %v3623_v16 }
 0x4e8   :  { %vm3672_vm1 = vcmp.gt.f32.partialorder %v10295_v45, 3113.6  ;;  %vm3673_vm2 = vcmp.gt.f32.partialorder %v10298_v58, 3113.6  ;;  %vm3674_vm3 = vcmp.gt.f32.partialorder %v10301_v59, 3113.6 }
 0x4e9   :  { %vm3675_vm4 = vcmp.gt.f32.partialorder %v10304_v10, 3113.6  ;;  %vm3676_vm5 = vcmp.gt.f32.partialorder %v10307_v49, 3113.6  ;;  %vm3677_vm6 = vcmp.gt.f32.partialorder %v10310_v50, 3113.6 }
 0x4ea   :  { %vm3678_vm8 = vcmp.gt.f32.partialorder %v10313_v44, 3113.6  ;;  %vm3679_vm9 = vcmp.gt.f32.partialorder %v10316_v43, 3113.6  ;;  %vm3680_vm11 = vcmp.gt.f32.partialorder %v10319_v4, 3113.6 }
 0x4eb   :  { %vm3681_vm12 = vcmp.gt.f32.partialorder %v10322_v7, 3113.6  ;;  %vm3682_vm13 = vcmp.gt.f32.partialorder %v10325_v22, 3113.6  ;;  %vm3683_vm14 = vcmp.gt.f32.partialorder %v10328_v23, 3113.6 }
 0x4ec   :  { %vm3684_vm15 = vcmp.gt.f32.partialorder %v10331_v24, 3113.6  ;;  %vm3685_vm0 = vcmp.gt.f32.partialorder %v10334_v60, 3113.6  ;;  %vm3686_vm10 = vcmp.gt.f32.partialorder %v10337_v57, 3113.6 }
 0x4ed   :  { %vm3687_vm7 = vcmp.gt.f32.partialorder %v10340_v18, 3113.6  ;;  %v3688_v0 = vsel %vm3672_vm1, 0.0153139355, %v3640_v52  ;;  %v3689_v1 = vsel %vm3673_vm2, 0.0153139355, %v3641_v53 }
 0x4ee   :  { %v3690_v2 = vsel %vm3674_vm3, 0.0153139355, %v3642_v54  ;;  %v3691_v11 = vsel %vm3675_vm4, 0.0153139355, %v3643_v48  ;;  %v3692_v12 = vsel %vm3676_vm5, 0.0153139355, %v3644_v20 }
 0x4ef   :  { %v3693_v14 = vsel %vm3677_vm6, 0.0153139355, %v3645_v25  ;;  %v3694_v15 = vsel %vm3678_vm8, 0.0153139355, %v3646_v26  ;;  %v3695_v16 = vsel %vm3679_vm9, 0.0153139355, %v3647_v27 }
 0x4f0   :  { %v3696_v52 = vsel %vm3680_vm11, 0.0153139355, %v3648_v37  ;;  %v3697_v53 = vsel %vm3681_vm12, 0.0153139355, %v3649_v41  ;;  %v3698_v54 = vsel %vm3682_vm13, 0.0153139355, %v3650_v42 }
 0x4f1   :  { %v3699_v48 = vsel %vm3683_vm14, 0.0153139355, %v3651_v47  ;;  %v3700_v20 = vsel %vm3684_vm15, 0.0153139355, %v3652_v46  ;;  %v3701_v25 = vsel %vm3685_vm0, 0.0153139355, %v3653_v29 }
 0x4f2   :  { %v3702_v26 = vsel %vm3686_vm10, 0.0153139355, %v3654_v6  ;;  %v3703_v27 = vsel %vm3687_vm7, 0.0153139355, %v3655_v9  ;;  %v3704_v37 = vsel %vm3672_vm1, 40.31853, %v3656_v19 }
 0x4f3   :  { %v3705_v41 = vsel %vm3673_vm2, 40.31853, %v3657_v40  ;;  %v3706_v42 = vsel %vm3674_vm3, 40.31853, %v3658_v51  ;;  %v3707_v47 = vsel %vm3675_vm4, 40.31853, %v3659_v30 }
 0x4f4   :  { %v3708_v46 = vsel %vm3676_vm5, 40.31853, %v3660_v31  ;;  %v3709_v29 = vsel %vm3677_vm6, 40.31853, %v3661_v39  ;;  %v3710_v6 = vsel %vm3678_vm8, 40.31853, %v3662_v55 }
 0x4f5   :  { %v3711_v9 = vsel %vm3679_vm9, 40.31853, %v3663_v56  ;;  %v3712_v19 = vsel %vm3680_vm11, 40.31853, %v3664_v8  ;;  %v3713_v40 = vsel %vm3681_vm12, 40.31853, %v3665_v35 }
 0x4f6   :  { %v3714_v51 = vsel %vm3682_vm13, 40.31853, %v3666_v36  ;;  %v3715_v30 = vsel %vm3683_vm14, 40.31853, %v3667_v61  ;;  %v3716_v31 = vsel %vm3684_vm15, 40.31853, %v3668_v62 }
 0x4f7   :  { %v3717_v39 = vsel %vm3685_vm0, 40.31853, %v3669_v63  ;;  %v3718_v55 = vsel %vm3686_vm10, 40.31853, %v3670_v3  ;;  %v3719_v56 = vsel %vm3687_vm7, 40.31853, %v3671_v5 }
 0x4f8   :  { %vm3720_vm1 = vcmp.gt.f32.partialorder %v10295_v45, 3244.2  ;;  %vm3721_vm2 = vcmp.gt.f32.partialorder %v10298_v58, 3244.2  ;;  %vm3722_vm3 = vcmp.gt.f32.partialorder %v10301_v59, 3244.2 }
 0x4f9   :  { %vm3723_vm4 = vcmp.gt.f32.partialorder %v10304_v10, 3244.2  ;;  %vm3724_vm5 = vcmp.gt.f32.partialorder %v10307_v49, 3244.2  ;;  %vm3725_vm6 = vcmp.gt.f32.partialorder %v10310_v50, 3244.2 }
 0x4fa   :  { %vm3726_vm8 = vcmp.gt.f32.partialorder %v10313_v44, 3244.2  ;;  %vm3727_vm9 = vcmp.gt.f32.partialorder %v10316_v43, 3244.2  ;;  %vm3728_vm11 = vcmp.gt.f32.partialorder %v10319_v4, 3244.2 }
 0x4fb   :  { %vm3729_vm12 = vcmp.gt.f32.partialorder %v10322_v7, 3244.2  ;;  %vm3730_vm13 = vcmp.gt.f32.partialorder %v10325_v22, 3244.2  ;;  %vm3731_vm14 = vcmp.gt.f32.partialorder %v10328_v23, 3244.2 }
 0x4fc   :  { %vm3732_vm15 = vcmp.gt.f32.partialorder %v10331_v24, 3244.2  ;;  %vm3733_vm0 = vcmp.gt.f32.partialorder %v10334_v60, 3244.2  ;;  %vm3734_vm10 = vcmp.gt.f32.partialorder %v10337_v57, 3244.2 }
 0x4fd   :  { %vm3735_vm7 = vcmp.gt.f32.partialorder %v10340_v18, 3244.2  ;;  %v11177_v8 = vsel %vm3720_vm1, 0.014803849, %v3688_v0  ;;  %v11181_v35 = vsel %vm3721_vm2, 0.014803849, %v3689_v1 }
 0x4fe   :  { %v11185_v36 = vsel %vm3722_vm3, 0.014803849, %v3690_v2  ;;  %v11189_v61 = vsel %vm3723_vm4, 0.014803849, %v3691_v11  ;;  %v11193_v62 = vsel %vm3724_vm5, 0.014803849, %v3692_v12 }
 0x4ff   :  { %v11197_v63 = vsel %vm3725_vm6, 0.014803849, %v3693_v14  ;;  %v11201_v3 = vsel %vm3726_vm8, 0.014803849, %v3694_v15  ;;  %v11205_v5 = vsel %vm3727_vm9, 0.014803849, %v3695_v16 }
 0x500   :  { %v11209_v0 = vsel %vm3728_vm11, 0.014803849, %v3696_v52  ;;  %v11213_v1 = vsel %vm3729_vm12, 0.014803849, %v3697_v53  ;;  %v11217_v2 = vsel %vm3730_vm13, 0.014803849, %v3698_v54 }
 0x501   :  { %v11221_v11 = vsel %vm3731_vm14, 0.014803849, %v3699_v48  ;;  %v11225_v12 = vsel %vm3732_vm15, 0.014803849, %v3700_v20  ;;  %v11229_v14 = vsel %vm3733_vm0, 0.014803849, %v3701_v25 }
 0x502   :  { %v11233_v15 = vsel %vm3734_vm10, 0.014803849, %v3702_v26  ;;  %v11237_v16 = vsel %vm3735_vm7, 0.014803849, %v3703_v27  ;;  %v11241_v52 = vsel %vm3720_vm1, 41.973354, %v3704_v37 }
 0x503   :  { %v11245_v53 = vsel %vm3721_vm2, 41.973354, %v3705_v41  ;;  %v11249_v54 = vsel %vm3722_vm3, 41.973354, %v3706_v42  ;;  %v11253_v48 = vsel %vm3723_vm4, 41.973354, %v3707_v47 }
 0x504   :  { %v11257_v20 = vsel %vm3724_vm5, 41.973354, %v3708_v46  ;;  %v11261_v45 = vsel %vm3725_vm6, 41.973354, %v3709_v29  ;;  %v11265_v58 = vsel %vm3726_vm8, 41.973354, %v3710_v6 }
 0x505   :  { %v11269_v59 = vsel %vm3727_vm9, 41.973354, %v3711_v9  ;;  %v11273_v10 = vsel %vm3728_vm11, 41.973354, %v3712_v19  ;;  %v11277_v49 = vsel %vm3729_vm12, 41.973354, %v3713_v40 }
 0x506   :  { %v11281_v50 = vsel %vm3730_vm13, 41.973354, %v3714_v51  ;;  %v11285_v44 = vsel %vm3731_vm14, 41.973354, %v3715_v30  ;;  %v11289_v43 = vsel %vm3732_vm15, 41.973354, %v3716_v31 }
 0x507   :  { %v11293_v4 = vsel %vm3733_vm0, 41.973354, %v3717_v39  ;;  %v11297_v7 = vsel %vm3734_vm10, 41.973354, %v3718_v55  ;;  %v11301_v22 = vsel %vm3735_vm7, 41.973354, %v3719_v56 }
 0x508   :  { %v11303_v25 = vld [vmem:[#allocation7] sm:$0xff]  ;;  %v11306_v23 = vld [vmem:[#allocation7 + $0x8] sm:$0xff]  ;;  %v11309_v24 = vld [vmem:[#allocation7 + $0x10] sm:$0xff] }
 0x509   :  { %vm3768_vm1 = vcmp.gt.f32.partialorder %v11303_v25, 3379.3  ;;  %vm3769_vm2 = vcmp.gt.f32.partialorder %v11306_v23, 3379.3  ;;  %vm3770_vm3 = vcmp.gt.f32.partialorder %v11309_v24, 3379.3 }
 0x50a   :  { %v11312_v60 = vld [vmem:[#allocation7 + $0x18] sm:$0xff]  ;;  %v11315_v57 = vld [vmem:[#allocation7 + $0x20] sm:$0xff]  ;;  %v11318_v18 = vld [vmem:[#allocation7 + $0x28] sm:$0xff]  ;;  %v3784_v19 = vsel %vm3768_vm1, 0.014285714, %v11177_v8 }
 0x50b   :  { %vm3771_vm4 = vcmp.gt.f32.partialorder %v11312_v60, 3379.3  ;;  %vm3772_vm5 = vcmp.gt.f32.partialorder %v11315_v57, 3379.3  ;;  %vm3773_vm6 = vcmp.gt.f32.partialorder %v11318_v18, 3379.3 }
 0x50c   :  { %v11321_v26 = vld [vmem:[#allocation7 + $0x30] sm:$0xff]  ;;  %v11324_v27 = vld [vmem:[#allocation7 + $0x38] sm:$0xff]  ;;  %v11327_v37 = vld [vmem:[#allocation7 + $0x40] sm:$0xff]  ;;  %v3785_v40 = vsel %vm3769_vm2, 0.014285714, %v11181_v35 }
 0x50d   :  { %vm3774_vm8 = vcmp.gt.f32.partialorder %v11321_v26, 3379.3  ;;  %vm3775_vm9 = vcmp.gt.f32.partialorder %v11324_v27, 3379.3  ;;  %vm3776_vm11 = vcmp.gt.f32.partialorder %v11327_v37, 3379.3 }
 0x50e   :  { %v11330_v41 = vld [vmem:[#allocation7 + $0x48] sm:$0xff]  ;;  %v11333_v42 = vld [vmem:[#allocation7 + $0x50] sm:$0xff]  ;;  %v11336_v47 = vld [vmem:[#allocation7 + $0x58] sm:$0xff]  ;;  %v3786_v51 = vsel %vm3770_vm3, 0.014285714, %v11185_v36 }
 0x50f   :  { %vm3777_vm12 = vcmp.gt.f32.partialorder %v11330_v41, 3379.3  ;;  %vm3778_vm13 = vcmp.gt.f32.partialorder %v11333_v42, 3379.3  ;;  %vm3779_vm14 = vcmp.gt.f32.partialorder %v11336_v47, 3379.3 }
 0x510   :  { %v11339_v46 = vld [vmem:[#allocation7 + $0x60] sm:$0xff]  ;;  %v11342_v29 = vld [vmem:[#allocation7 + $0x68] sm:$0xff]  ;;  %v11345_v6 = vld [vmem:[#allocation7 + $0x70] sm:$0xff]  ;;  %v3787_v30 = vsel %vm3771_vm4, 0.014285714, %v11189_v61 }
 0x511   :  { %vm3780_vm15 = vcmp.gt.f32.partialorder %v11339_v46, 3379.3  ;;  %vm3781_vm0 = vcmp.gt.f32.partialorder %v11342_v29, 3379.3  ;;  %vm3782_vm10 = vcmp.gt.f32.partialorder %v11345_v6, 3379.3 }
 0x512   :  { %v11348_v9 = vld [vmem:[#allocation7 + $0x78] sm:$0xff]  ;;  %v3788_v31 = vsel %vm3772_vm5, 0.014285714, %v11193_v62  ;;  %v3789_v39 = vsel %vm3773_vm6, 0.014285714, %v11197_v63 }
 0x513   :  { %vm3783_vm7 = vcmp.gt.f32.partialorder %v11348_v9, 3379.3  ;;  %v3790_v55 = vsel %vm3774_vm8, 0.014285714, %v11201_v3  ;;  %v3791_v56 = vsel %vm3775_vm9, 0.014285714, %v11205_v5 }
 0x514   :  { %v3792_v8 = vsel %vm3776_vm11, 0.014285714, %v11209_v0  ;;  %v3793_v35 = vsel %vm3777_vm12, 0.014285714, %v11213_v1  ;;  %v3794_v36 = vsel %vm3778_vm13, 0.014285714, %v11217_v2 }
 0x515   :  { %v3795_v61 = vsel %vm3779_vm14, 0.014285714, %v11221_v11  ;;  %v3796_v62 = vsel %vm3780_vm15, 0.014285714, %v11225_v12  ;;  %v3797_v63 = vsel %vm3781_vm0, 0.014285714, %v11229_v14 }
 0x516   :  { %v3798_v3 = vsel %vm3782_vm10, 0.014285714, %v11233_v15  ;;  %v3799_v5 = vsel %vm3783_vm7, 0.014285714, %v11237_v16  ;;  %v3800_v0 = vsel %vm3768_vm1, 43.724285, %v11241_v52 }
 0x517   :  { %v3801_v1 = vsel %vm3769_vm2, 43.724285, %v11245_v53  ;;  %v3802_v2 = vsel %vm3770_vm3, 43.724285, %v11249_v54  ;;  %v3803_v11 = vsel %vm3771_vm4, 43.724285, %v11253_v48 }
 0x518   :  { %v3804_v12 = vsel %vm3772_vm5, 43.724285, %v11257_v20  ;;  %v3805_v14 = vsel %vm3773_vm6, 43.724285, %v11261_v45  ;;  %v3806_v15 = vsel %vm3774_vm8, 43.724285, %v11265_v58 }
 0x519   :  { %v3807_v16 = vsel %vm3775_vm9, 43.724285, %v11269_v59  ;;  %v3808_v52 = vsel %vm3776_vm11, 43.724285, %v11273_v10  ;;  %v3809_v53 = vsel %vm3777_vm12, 43.724285, %v11277_v49 }
 0x51a   :  { %v3810_v54 = vsel %vm3778_vm13, 43.724285, %v11281_v50  ;;  %v3811_v48 = vsel %vm3779_vm14, 43.724285, %v11285_v44  ;;  %v3812_v20 = vsel %vm3780_vm15, 43.724285, %v11289_v43 }
 0x51b   :  { %v3813_v45 = vsel %vm3781_vm0, 43.724285, %v11293_v4  ;;  %v3814_v58 = vsel %vm3782_vm10, 43.724285, %v11297_v7  ;;  %v3815_v59 = vsel %vm3783_vm7, 43.724285, %v11301_v22 }
 0x51c   :  { %vm3816_vm1 = vcmp.gt.f32.partialorder %v11303_v25, 3519.3  ;;  %vm3817_vm2 = vcmp.gt.f32.partialorder %v11306_v23, 3519.3  ;;  %vm3818_vm3 = vcmp.gt.f32.partialorder %v11309_v24, 3519.3 }
 0x51d   :  { %vm3819_vm4 = vcmp.gt.f32.partialorder %v11312_v60, 3519.3  ;;  %vm3820_vm5 = vcmp.gt.f32.partialorder %v11315_v57, 3519.3  ;;  %vm3821_vm6 = vcmp.gt.f32.partialorder %v11318_v18, 3519.3 }
 0x51e   :  { %vm3822_vm8 = vcmp.gt.f32.partialorder %v11321_v26, 3519.3  ;;  %vm3823_vm9 = vcmp.gt.f32.partialorder %v11324_v27, 3519.3  ;;  %vm3824_vm11 = vcmp.gt.f32.partialorder %v11327_v37, 3519.3 }
 0x51f   :  { %vm3825_vm12 = vcmp.gt.f32.partialorder %v11330_v41, 3519.3  ;;  %vm3826_vm13 = vcmp.gt.f32.partialorder %v11333_v42, 3519.3  ;;  %vm3827_vm14 = vcmp.gt.f32.partialorder %v11336_v47, 3519.3 }
 0x520   :  { %vm3828_vm15 = vcmp.gt.f32.partialorder %v11339_v46, 3519.3  ;;  %vm3829_vm0 = vcmp.gt.f32.partialorder %v11342_v29, 3519.3  ;;  %vm3830_vm10 = vcmp.gt.f32.partialorder %v11345_v6, 3519.3 }
 0x521   :  { %vm3831_vm7 = vcmp.gt.f32.partialorder %v11348_v9, 3519.3  ;;  %v3832_v10 = vsel %vm3816_vm1, 0.013774104, %v3784_v19  ;;  %v3833_v49 = vsel %vm3817_vm2, 0.013774104, %v3785_v40 }
 0x522   :  { %v3834_v50 = vsel %vm3818_vm3, 0.013774104, %v3786_v51  ;;  %v3835_v44 = vsel %vm3819_vm4, 0.013774104, %v3787_v30  ;;  %v3836_v43 = vsel %vm3820_vm5, 0.013774104, %v3788_v31  ;;  %v3864_v40 = vmul.f32 %v11303_v25, %v3832_v10 }
 0x523   :  { %v3837_v4 = vsel %vm3821_vm6, 0.013774104, %v3789_v39  ;;  %v3838_v7 = vsel %vm3822_vm8, 0.013774104, %v3790_v55  ;;  %v3839_v22 = vsel %vm3823_vm9, 0.013774104, %v3791_v56  ;;  %v3865_v39 = vmul.f32 %v11306_v23, %v3833_v49 }
 0x524   :  { %v3840_v19 = vsel %vm3824_vm11, 0.013774104, %v3792_v8  ;;  %v3841_v51 = vsel %vm3825_vm12, 0.013774104, %v3793_v35  ;;  %v3842_v30 = vsel %vm3826_vm13, 0.013774104, %v3794_v36  ;;  %v3866_v10 = vmul.f32 %v11309_v24, %v3834_v50 }
 0x525   :  { %v3843_v31 = vsel %vm3827_vm14, 0.013774104, %v3795_v61  ;;  %v3844_v55 = vsel %vm3828_vm15, 0.013774104, %v3796_v62  ;;  %v3845_v56 = vsel %vm3829_vm0, 0.013774104, %v3797_v63  ;;  %v3867_v49 = vmul.f32 %v11312_v60, %v3835_v44 }
 0x526   :  { %v3846_v8 = vsel %vm3830_vm10, 0.013774104, %v3798_v3  ;;  %v3847_v35 = vsel %vm3831_vm7, 0.013774104, %v3799_v5  ;;  %v3848_v36 = vsel %vm3816_vm1, 45.52479, %v3800_v0  ;;  %v3868_v5 = vmul.f32 %v11315_v57, %v3836_v43 }
 0x527   :  { %v3849_v61 = vsel %vm3817_vm2, 45.52479, %v3801_v1  ;;  %v3850_v62 = vsel %vm3818_vm3, 45.52479, %v3802_v2  ;;  %v3851_v63 = vsel %vm3819_vm4, 45.52479, %v3803_v11  ;;  %v3869_v24 = vmul.f32 %v11318_v18, %v3837_v4 }
 0x528   :  { %v3852_v3 = vsel %vm3820_vm5, 45.52479, %v3804_v12  ;;  %v3853_v25 = vsel %vm3821_vm6, 45.52479, %v3805_v14  ;;  %v3854_v23 = vsel %vm3822_vm8, 45.52479, %v3806_v15  ;;  %v3870_v2 = vmul.f32 %v11321_v26, %v3838_v7 }
 0x529   :  { %v3855_v0 = vsel %vm3823_vm9, 45.52479, %v3807_v16  ;;  %v3856_v60 = vsel %vm3824_vm11, 45.52479, %v3808_v52  ;;  %v3857_v1 = vsel %vm3825_vm12, 45.52479, %v3809_v53  ;;  %v3871_v14 = vmul.f32 %v11324_v27, %v3839_v22 }
 0x52a   :  { %v3858_v57 = vsel %vm3826_vm13, 45.52479, %v3810_v54  ;;  %v3859_v11 = vsel %vm3827_vm14, 45.52479, %v3811_v48  ;;  %v3860_v12 = vsel %vm3828_vm15, 45.52479, %v3812_v20  ;;  %v3872_v26 = vmul.f32 %v11327_v37, %v3840_v19 }
 0x52b   :  { %v3861_v18 = vsel %vm3829_vm0, 45.52479, %v3813_v45  ;;  %v3862_v15 = vsel %vm3830_vm10, 45.52479, %v3814_v58  ;;  %v3863_v16 = vsel %vm3831_vm7, 45.52479, %v3815_v59  ;;  %v3873_v52 = vmul.f32 %v11330_v41, %v3841_v51 }
 0x52c   :  { %v3874_v53 = vmul.f32 %v11333_v42, %v3842_v30  ;;  %v3875_v54 = vmul.f32 %v11336_v47, %v3843_v31  ;;  %v3876_v48 = vmul.f32 %v11339_v46, %v3844_v55  ;;  %v3877_v27 = vmul.f32 %v11342_v29, %v3845_v56 }
 0x52d   :  { %v3878_v20 = vmul.f32 %v11345_v6, %v3846_v8  ;;  %v3880_v45 = vadd.f32 %v3864_v40, %v3848_v36  ;;  %v3881_v58 = vadd.f32 %v3865_v39, %v3849_v61  ;;  %v3882_v50 = vadd.f32 %v3866_v10, %v3850_v62 }
 0x52e   :  { %v3879_v59 = vmul.f32 %v11348_v9, %v3847_v35  ;;  %v3883_v44 = vadd.f32 %v3867_v49, %v3851_v63  ;;  %v3884_v37 = vadd.f32 %v3868_v5, %v3852_v3  ;;  %v3885_v43 = vadd.f32 %v3869_v24, %v3853_v25 }
 0x52f   :  { %v3886_v41 = vadd.f32 %v3870_v2, %v3854_v23  ;;  %v3887_v4 = vadd.f32 %v3871_v14, %v3855_v0  ;;  %v3888_v42 = vadd.f32 %v3872_v26, %v3856_v60  ;;  %v3889_v7 = vadd.f32 %v3873_v52, %v3857_v1  ;;  %v11632_v2 = vld [vmem:[#allocation14_spill] sm:$0xff]  ;;  %v11634_v14 = vld [vmem:[#allocation16_spill] sm:$0xff] }
 0x530   :  { %v3890_v47 = vadd.f32 %v3874_v53, %v3858_v57  ;;  %v3891_v22 = vadd.f32 %v3875_v54, %v3859_v11  ;;  %v3892_v46 = vadd.f32 %v3876_v48, %v3860_v12  ;;  %v3893_v19 = vadd.f32 %v3877_v27, %v3861_v18  ;;  %v11633_v12 = vld [vmem:[#allocation15_spill] sm:$0xff]  ;;  %v11636_v52 = vld [vmem:[#allocation18_spill] sm:$0xff]  ;;  %v11638_v27 = vld [vmem:[#allocation20_spill] sm:$0xff] }
 0x531   :  { %v3894_v29 = vadd.f32 %v3878_v20, %v3862_v15  ;;  %v3896_v51 = vadd.f32 273.15, %v3880_v45  ;;  %v3897_v6 = vadd.f32 273.15, %v3881_v58  ;;  %v3898_v40 = vadd.f32 273.15, %v3882_v50 }
 0x532   :  { %v3895_v30 = vadd.f32 %v3879_v59, %v3863_v16  ;;  %v3899_v31 = vadd.f32 273.15, %v3883_v44  ;;  %v3900_v39 = vadd.f32 273.15, %v3884_v37  ;;  %v3901_v9 = vadd.f32 273.15, %v3885_v43 }
 0x533   :  { %v3902_v55 = vadd.f32 273.15, %v3886_v41  ;;  %v3903_v56 = vadd.f32 273.15, %v3887_v4  ;;  %v3904_v8 = vadd.f32 273.15, %v3888_v42  ;;  %v3928_v10 = vstv %s71_s7 }
 0x534   :  { %v3905_v35 = vadd.f32 273.15, %v3889_v7  ;;  %v3906_v36 = vadd.f32 273.15, %v3890_v47  ;;  %v3907_v61 = vadd.f32 273.15, %v3891_v22  ;;  %v3912_v49 = vsub.f32 %v3896_v51, %v4330_v13 }
 0x535   :  { %v3908_v62 = vadd.f32 273.15, %v3892_v46  ;;  %v3909_v63 = vadd.f32 273.15, %v3893_v19  ;;  %v3910_v3 = vadd.f32 273.15, %v3894_v29  ;;  %v3913_v5 = vsub.f32 %v3897_v6, %v4333_v17 }
 0x536   :  { %v3911_v25 = vadd.f32 273.15, %v3895_v30  ;;  %v3914_v23 = vsub.f32 %v3898_v40, %v4338_v21  ;;  %v3915_v0 = vsub.f32 %v3899_v31, %v4347_v28  ;;  %v3916_v24 = vsub.f32 %v3900_v39, %v4355_v32  ;;  %v11635_v16 = vld [vmem:[#allocation17_spill] sm:$0xff]  ;;  %v11637_v54 = vld [vmem:[#allocation19_spill] sm:$0xff] }
 0x537   :  { %v3917_v60 = vsub.f32 %v3901_v9, %v4357_v33  ;;  %v3918_v1 = vsub.f32 %v3902_v55, %v4359_v34  ;;  %v3919_v57 = vsub.f32 %v3903_v56, %v4367_v38  ;;  %v3920_v11 = vsub.f32 %v3904_v8, %v11632_v2  ;;  %v11639_v50 = vld [vmem:[#allocation21_spill] sm:$0xff] }
 0x538   :  { %v3921_v18 = vsub.f32 %v3905_v35, %v11633_v12  ;;  %v3922_v15 = vsub.f32 %v3906_v36, %v11634_v14  ;;  %v3923_v26 = vsub.f32 %v3907_v61, %v11635_v16  ;;  %v3924_v53 = vsub.f32 %v3908_v62, %v11636_v52 }
 0x539   :  { %v3925_v48 = vsub.f32 %v3909_v63, %v11637_v54  ;;  %v3926_v20 = vsub.f32 %v3910_v3, %v11638_v27  ;;  %v3929_v45 = vmul.f32 %v3928_v10, %v3912_v49  ;;  %v3930_v58 = vmul.f32 %v3928_v10, %v3913_v5 }
 0x53a   :  { %v3927_v59 = vsub.f32 %v3911_v25, %v11639_v50  ;;  %v3931_v44 = vmul.f32 %v3928_v10, %v3914_v23  ;;  %v3932_v37 = vmul.f32 %v3928_v10, %v3915_v0  ;;  %v3933_v43 = vmul.f32 %v3928_v10, %v3916_v24 }
 0x53b   :  { %v3934_v41 = vmul.f32 %v3928_v10, %v3917_v60  ;;  %v3935_v4 = vmul.f32 %v3928_v10, %v3918_v1  ;;  %v3936_v42 = vmul.f32 %v3928_v10, %v3919_v57  ;;  %v3937_v7 = vmul.f32 %v3928_v10, %v3920_v11 }
 0x53c   :  { %v3938_v47 = vmul.f32 %v3928_v10, %v3921_v18  ;;  %v3939_v22 = vmul.f32 %v3928_v10, %v3922_v15  ;;  %v3940_v46 = vmul.f32 %v3928_v10, %v3923_v26  ;;  %v3941_v19 = vmul.f32 %v3928_v10, %v3924_v53 }
 0x53d   :  { %v3942_v29 = vmul.f32 %v3928_v10, %v3925_v48  ;;  %v3943_v51 = vmul.f32 %v3928_v10, %v3926_v20  ;;  %v3945_v6 = vadd.f32 %v3929_v45, %v4330_v13  ;;  %v3946_v40 = vadd.f32 %v3930_v58, %v4333_v17 }
 0x53e   :  { %v3944_v30 = vmul.f32 %v3928_v10, %v3927_v59  ;;  %v3947_v31 = vadd.f32 %v3931_v44, %v4338_v21  ;;  %v3948_v39 = vadd.f32 %v3932_v37, %v4347_v28  ;;  %v3949_v9 = vadd.f32 %v3933_v43, %v4355_v32 }
 0x53f   :  { %v3950_v55 = vadd.f32 %v3934_v41, %v4357_v33  ;;  %v3951_v56 = vadd.f32 %v3935_v4, %v4359_v34  ;;  %v3952_v8 = vadd.f32 %v3936_v42, %v4367_v38  ;;  %v3953_v35 = vadd.f32 %v3937_v7, %v11632_v2 }
 0x540   :  { %v3954_v36 = vadd.f32 %v3938_v47, %v11633_v12  ;;  %v3955_v13 = vadd.f32 %v3939_v22, %v11634_v14  ;;  %v3956_v17 = vadd.f32 %v3940_v46, %v11635_v16  ;;  %v3957_v21 = vadd.f32 %v3941_v19, %v11636_v52 }
 0x541   :  { %v3958_v28 = vadd.f32 %v3942_v29, %v11637_v54  ;;  %v3959_v32 = vadd.f32 %v3943_v51, %v11638_v27  ;;  %v4014_v10 = vadd.f32 -273.15, %v3945_v6  ;;  %v4015_v33 = vadd.f32 -273.15, %v3946_v40 }
 0x542   :  { %v3960_v34 = vadd.f32 %v3944_v30, %v11639_v50  ;;  %v4016_v38 = vadd.f32 -273.15, %v3947_v31  ;;  %v4017_v61 = vadd.f32 -273.15, %v3948_v39  ;;  %v4018_v49 = vadd.f32 -273.15, %v3949_v9 }
 0x543   :  { %v4019_v62 = vadd.f32 -273.15, %v3950_v55  ;;  %v4020_v63 = vadd.f32 -273.15, %v3951_v56  ;;  %v4021_v3 = vadd.f32 -273.15, %v3952_v8 }
 0x544   :  { %3977 = vst [vmem:[#allocation9] sm:$0xff] %v4014_v10  ;;  %3978 = vst [vmem:[#allocation9 + $0x8] sm:$0xff] %v4015_v33  ;;  %v4022_v5 = vadd.f32 -273.15, %v3953_v35  ;;  %v4023_v25 = vadd.f32 -273.15, %v3954_v36 }
 0x545   :  { %v4024_v23 = vadd.f32 -273.15, %v3955_v13  ;;  %3979 = vst [vmem:[#allocation9 + $0x10] sm:$0xff] %v4016_v38  ;;  %3980 = vst [vmem:[#allocation9 + $0x18] sm:$0xff] %v4017_v61  ;;  %v4025_v0 = vadd.f32 -273.15, %v3956_v17 }
 0x546   :  { %3981 = vst [vmem:[#allocation9 + $0x20] sm:$0xff] %v4018_v49  ;;  %v4026_v24 = vadd.f32 -273.15, %v3957_v21  ;;  %v4027_v60 = vadd.f32 -273.15, %v3958_v28  ;;  %3982 = vst [vmem:[#allocation9 + $0x28] sm:$0xff] %v4019_v62 }
 0x547   :  { %3983 = vst [vmem:[#allocation9 + $0x30] sm:$0xff] %v4020_v63  ;;  %3984 = vst [vmem:[#allocation9 + $0x38] sm:$0xff] %v4021_v3  ;;  %v4028_v1 = vadd.f32 -273.15, %v3959_v32  ;;  %v4029_v57 = vadd.f32 -273.15, %v3960_v34 }
 0x548   :  { %3985 = vst [vmem:[#allocation9 + $0x40] sm:$0xff] %v4022_v5  ;;  %3986 = vst [vmem:[#allocation9 + $0x48] sm:$0xff] %v4023_v25 }
 0x549   :  { %3987 = vst [vmem:[#allocation9 + $0x50] sm:$0xff] %v4024_v23  ;;  %3988 = vst [vmem:[#allocation9 + $0x58] sm:$0xff] %v4025_v0 }
 0x54a   :  { %3989 = vst [vmem:[#allocation9 + $0x60] sm:$0xff] %v4026_v24  ;;  %3990 = vst [vmem:[#allocation9 + $0x68] sm:$0xff] %v4027_v60 }
 0x54b   :  { %3991 = vst [vmem:[#allocation9 + $0x70] sm:$0xff] %v4028_v1  ;;  %3992 = vst [vmem:[#allocation9 + $0x78] sm:$0xff] %v4029_v57 }
 0x54c   :  { %4225 = shalt.err (!%p4222_p9)
}
 0x54d   :  { %s4226_s13 = scalar_lea.hbm %s11594_s3, 2048 }
 0x54e   :  { %p4227_p10 = scmp.ne.s32.totalorder %s11594_s3, %s4226_s13  ;;  %p4230_p11 = scmp.lt.u32.totalorder %s4226_s13, %s11594_s3 }
 0x550   :  { %p4232_p12 = pnand %p4230_p11, %p4227_p10 }
 0x552   :  { %4235 = shalt.err (!%p4232_p12)
}
 0x553   :  { %4004 = dma.vmem_to_hbm [thread:$0]  %s3999_s9, 2048, %s11594_s3, [#allocation4], %s4246_s0, %s4246_s0, %s4247_s5  }
 0x554   :  { %4242 = dma.done.wait [#allocation4], 2048  }
 0x555   :  { %4243 = vsyncadd [#allocation4], 4294965248 }
 0x556   :  { %4008 = vsyncpa [#allocation3], 1 }
 0x557   :  { %4009 = vsyncpa [#allocation8], 1 }
 0x558   :  { %4010 = vsyncpa [#allocation4], 1 }
 0x559   :  { %4011 = vsyncpa [#allocation5], 1 }

</bundles_post_ra>
